<compile_context>
chip_gen: v5e
topology: v5e:2x2
jax: 0.10.0
libtpu: 0.0.40
codegen_flags: <defaults>
</compile_context>

<pallas_src>
import functools

import jax
import jax.numpy as jnp
from jax import lax
from jax.experimental import pallas as pl
from jax.experimental.pallas import tpu as pltpu


# ---------------------------------------------------------------------------
# Kernels
# ---------------------------------------------------------------------------

def _make_conv3x3_kernel(*, stride, H, W, Cin, Cout, res_scale, has_res):
    """Fused BN->ReLU->3x3 conv (pad=1) whole-image kernel, optional residual.

    Grid = (N,); each step produces one full image (Ho*Wo, Cout).
    The BN/ReLU prologue is hoisted: it is computed once into a zero-padded
    bf16 VMEM scratch, then each of the 3 vertical taps is a single matmul
    with the 3 horizontal taps fused along K (K = 3*Cin).
    """
    Ho = (H - 1) // stride + 1
    Wo = (W - 1) // stride + 1
    Hp, Wp = H + 2, W + 2

    def kernel(*refs):
        x_ref, w_ref, s_ref, b_ref = refs[:4]
        pos = 4
        res_ref = None
        if has_res:
            res_ref = refs[pos]; pos += 1
        o_ref = refs[pos]; pos += 1
        pre_ref = refs[pos]; pos += 1
        sel_refs = refs[pos:pos + 3] if stride > 1 else None

        # ---- Prologue: BN + ReLU once per image, into zero-padded scratch.
        # The zero halo provides the conv's spatial zero padding (padding is
        # applied to the *post-activation* tensor, matching PyTorch).
        act = jnp.maximum(x_ref[...] * s_ref[...] + b_ref[...], 0.0)
        act = act.astype(jnp.bfloat16)                       # (H, W, Cin)
        pre_ref[...] = jnp.zeros((Hp, Wp, Cin), jnp.bfloat16)
        pre_ref[1:H + 1, 1:W + 1, :] = act

        if stride > 1:
            # Column (lane-window) de-interleave done ONCE per image.
            for dx in range(3):
                sel_refs[dx][...] = pre_ref[:, pl.ds(dx, Wo, stride=stride), :]

        # ---- 3 matmuls (one per vertical tap), dx fused along K = 3*Cin.
        acc = jnp.zeros((Ho * Wo, Cout), jnp.float32)
        for dy in range(3):
            taps = []
            for dx in range(3):
                if stride == 1:
                    win = pre_ref[dy:dy + Ho, dx:dx + Wo, :]          # (Ho,Wo,Cin)
                else:
                    win = sel_refs[dx][pl.ds(dy, Ho, stride=stride), :, :]
                taps.append(win)
            a = jnp.concatenate(taps, axis=-1)                        # (Ho,Wo,3Cin)
            a = a.reshape(Ho * Wo, 3 * Cin)      # merge leading dims (Wo % 8 == 0)
            acc = acc + jnp.dot(a, w_ref[dy],
                                preferred_element_type=jnp.float32)

        # ---- Epilogue: fused residual add (in f32), then store.
        if has_res:
            r = res_ref[...].astype(jnp.float32)
            if res_scale != 1.0:
                r = r * res_scale
            acc = acc + r
        o_ref[...] = acc.astype(o_ref.dtype)

    return kernel


def _make_conv1x1_kernel(*, stride, H, W, Cin, Cout):
    """Fused BN->ReLU->1x1 strided conv (the projection shortcut), one image/step."""
    Ho = (H - 1) // stride + 1
    Wo = (W - 1) // stride + 1

    def kernel(*refs):
        if stride > 1:
            x_ref, w_ref, s_ref, b_ref, o_ref, tmp_ref = refs
        else:
            x_ref, w_ref, s_ref, b_ref, o_ref = refs

        if stride == 1:
            pre = jnp.maximum(x_ref[...] * s_ref[...] + b_ref[...], 0.0)
            pre = pre.astype(jnp.bfloat16)                       # (Ho, Wo, Cin)
        else:
            # Strided row selection, BN+ReLU on the selected rows only, then
            # strided column selection via a small bf16 scratch (one strided
            # dim per access).
            rows = x_ref[pl.ds(0, Ho, stride=stride), :, :]      # (Ho, W, Cin)
            tmp_ref[...] = jnp.maximum(rows * s_ref[...] + b_ref[...],
                                       0.0).astype(jnp.bfloat16)
            pre = tmp_ref[:, pl.ds(0, Wo, stride=stride), :]     # (Ho, Wo, Cin)

        pre2 = pre.reshape(Ho * Wo, Cin)
        out = jnp.dot(pre2, w_ref[...], preferred_element_type=jnp.float32)
        o_ref[...] = out.astype(o_ref.dtype)

    return kernel


# ---------------------------------------------------------------------------
# Wrappers (pallas_call plumbing)
# ---------------------------------------------------------------------------

def preact_conv3x3(x, w_hwio, scale, bias, *, stride, residual=None,
                   res_scale=1.0, out_dtype=jnp.float32):
    """y = conv3x3(relu(scale*x+bias), stride, pad=1) [+ res_scale*residual].

    x: (N, H, W, Cin) NHWC (f32 or bf16).  w_hwio: (3, 3, Cin, Cout) bf16.
    residual (optional): (N, Ho, Wo, Cout).  Returns (N, Ho, Wo, Cout) out_dtype.
    """
    n, h, w, cin = x.shape
    cout = w_hwio.shape[-1]
    ho = (h - 1) // stride + 1
    wo = (w - 1) // stride + 1
    w3 = w_hwio.reshape(3, 3 * cin, cout)       # K axis ordered (kw, cin)

    in_specs = [
        pl.BlockSpec((None, h, w, cin), lambda ni: (ni, 0, 0, 0)),
        pl.BlockSpec((3, 3 * cin, cout), lambda ni: (0, 0, 0)),
        pl.BlockSpec((1, cin), lambda ni: (0, 0)),
        pl.BlockSpec((1, cin), lambda ni: (0, 0)),
    ]
    args = [x, w3, scale.reshape(1, -1), bias.reshape(1, -1)]
    if residual is not None:
        res = residual.reshape(n, ho * wo, cout)      # free (merges middle dims)
        in_specs.append(pl.BlockSpec((None, ho * wo, cout),
                                     lambda ni: (ni, 0, 0)))
        args.append(res)

    scratch = [pltpu.VMEM((h + 2, w + 2, cin), jnp.bfloat16)]
    if stride > 1:
        scratch += [pltpu.VMEM((h + 2, wo, cin), jnp.bfloat16) for _ in range(3)]

    kernel = _make_conv3x3_kernel(stride=stride, H=h, W=w, Cin=cin, Cout=cout,
                                  res_scale=res_scale,
                                  has_res=residual is not None)
    out = pl.pallas_call(
        kernel,
        out_shape=jax.ShapeDtypeStruct((n, ho * wo, cout), out_dtype),
        grid=(n,),
        in_specs=in_specs,
        out_specs=pl.BlockSpec((None, ho * wo, cout), lambda ni: (ni, 0, 0)),
        scratch_shapes=scratch,
        compiler_params=pltpu.CompilerParams(
            dimension_semantics=("parallel",)),
    )(*args)
    return out.reshape(n, ho, wo, cout)


def preact_conv1x1(x, w, scale, bias, *, stride, out_dtype=jnp.float32):
    """y = conv1x1(relu(scale*x+bias), stride).  x: (N,H,W,Cin), w: (Cin,Cout) bf16."""
    n, h, wdim, cin = x.shape
    cout = w.shape[-1]
    ho = (h - 1) // stride + 1
    wo = (wdim - 1) // stride + 1

    scratch = []
    if stride > 1:
        scratch = [pltpu.VMEM((ho, wdim, cin), jnp.bfloat16)]

    out = pl.pallas_call(
        _make_conv1x1_kernel(stride=stride, H=h, W=wdim, Cin=cin, Cout=cout),
        out_shape=jax.ShapeDtypeStruct((n, ho * wo, cout), out_dtype),
        grid=(n,),
        in_specs=[
            pl.BlockSpec((None, h, wdim, cin), lambda ni: (ni, 0, 0, 0)),
            pl.BlockSpec((cin, cout), lambda ni: (0, 0)),
            pl.BlockSpec((1, cin), lambda ni: (0, 0)),
            pl.BlockSpec((1, cin), lambda ni: (0, 0)),
        ],
        out_specs=pl.BlockSpec((None, ho * wo, cout), lambda ni: (ni, 0, 0)),
        scratch_shapes=scratch,
        compiler_params=pltpu.CompilerParams(
            dimension_semantics=("parallel",)),
    )(x, w, scale.reshape(1, -1), bias.reshape(1, -1))
    return out.reshape(n, ho, wo, cout)


# ---------------------------------------------------------------------------
# BasicBlockV2 forward
# ---------------------------------------------------------------------------

def bn_fold(bn, eps=1e-5):
    scale = bn["gamma"] / jnp.sqrt(bn["var"] + eps)
    bias = bn["beta"] - bn["mean"] * scale
    return scale, bias


@functools.partial(jax.jit, static_argnames=("stride", "is_normal"))
def basic_block_v2(params, x_nchw, *, stride, is_normal):
    x = jnp.transpose(x_nchw, (0, 2, 3, 1)).astype(jnp.float32)   # NCHW -> NHWC

    # out = conv1(relu(bn1(x)))                  (bf16 intermediate)
    s1, b1 = bn_fold(params["bn1"])
    out = preact_conv3x3(x, params["conv1_w"], s1, b1, stride=stride,
                         out_dtype=jnp.bfloat16)

    # shortcut(x) = x  or  conv1x1(relu(bn_sc(x)), stride)  (bf16 intermediate)
    if "sc_w" in params:
        ss, bs = bn_fold(params["bn_sc"])
        shortcut = preact_conv1x1(x, params["sc_w"], ss, bs, stride=stride,
                                  out_dtype=jnp.bfloat16)
    else:
        shortcut = x

    # out = conv2(relu(bn2(out))) + (1 or 1.5) * shortcut   (residual fused)
    s2, b2 = bn_fold(params["bn2"])
    out = preact_conv3x3(out, params["conv2_w"], s2, b2, stride=1,
                         residual=shortcut,
                         res_scale=1.0 if is_normal else 1.5,
                         out_dtype=jnp.float32)
    return jnp.transpose(out, (0, 3, 1, 2))                      # NHWC -> NCHW


# ---------------------------------------------------------------------------
# Pure-JAX reference (matching the kernel's bf16 rounding points)
# ---------------------------------------------------------------------------

def reference_block(params, x_nchw, *, stride, is_normal):
    x = jnp.transpose(x_nchw, (0, 2, 3, 1)).astype(jnp.float32)

    def pre(v, bn):
        s, b = bn_fold(bn)
        y = jnp.maximum(v * s + b, 0.0)
        return y.astype(jnp.bfloat16).astype(jnp.float32)

    def conv(v, w, s, pad):
        return lax.conv_general_dilated(
            v, w.astype(jnp.float32), (s, s), pad,
            dimension_numbers=("NHWC", "HWIO", "NHWC"),
            precision=lax.Precision.HIGHEST)

    out = conv(pre(x, params["bn1"]), params["conv1_w"], stride, ((1, 1), (1, 1)))
    out = out.astype(jnp.bfloat16).astype(jnp.float32)           # bf16 intermediate
    out = conv(pre(out, params["bn2"]), params["conv2_w"], 1, ((1, 1), (1, 1)))
    if "sc_w" in params:
        w_sc = params["sc_w"].astype(jnp.float32)[None, None]
        sc = conv(pre(x, params["bn_sc"]), w_sc, stride, ((0, 0), (0, 0)))
        sc = sc.astype(jnp.bfloat16).astype(jnp.float32)         # bf16 intermediate
    else:
        sc = x
    out = out + (1.0 if is_normal else 1.5) * sc
    return jnp.transpose(out, (0, 3, 1, 2))


# ---------------------------------------------------------------------------
# Deterministic parameter init
# ---------------------------------------------------------------------------

def init_block_params(key, in_planes, planes, stride):
    ks = jax.random.split(key, 6)

    def conv_w(k, kh, kw, cin, cout):
        fan = kh * kw * cin
        w = jax.random.normal(k, (kh, kw, cin, cout), jnp.float32) / jnp.sqrt(fan)
        return w.astype(jnp.bfloat16)

    def bn(k, c):
        k1, k2, k3, k4 = jax.random.split(k, 4)
        return dict(
            gamma=1.0 + 0.1 * jax.random.normal(k1, (c,), jnp.float32),
            beta=0.1 * jax.random.normal(k2, (c,), jnp.float32),
            mean=0.1 * jax.random.normal(k3, (c,), jnp.float32),
            var=1.0 + 0.1 * jnp.abs(jax.random.normal(k4, (c,), jnp.float32)),
        )

    p = dict(conv1_w=conv_w(ks[0], 3, 3, in_planes, planes), bn1=bn(ks[1], in_planes),
             conv2_w=conv_w(ks[2], 3, 3, planes, planes), bn2=bn(ks[3], planes))
    if stride != 1 or in_planes != planes:
        p["sc_w"] = conv_w(ks[4], 1, 1, in_planes, planes)[0, 0]   # (Cin, Cout)
        p["bn_sc"] = bn(ks[5], in_planes)
    return p


# ---------------------------------------------------------------------------

if __name__ == "__main__":
    key = jax.random.PRNGKey(0)
    kx, kp1, kp2 = jax.random.split(key, 3)
    x = jax.random.normal(kx, (2, 64, 16, 16), jnp.float32)   # NCHW like PyTorch

    configs = [
        # identity shortcut, plain residual add
        (kp1, dict(in_planes=64, planes=64, stride=1, is_normal=True)),
        # BN-ReLU-1x1 projection shortcut, 1.5x residual add
        (kp2, dict(in_planes=64, planes=128, stride=2, is_normal=False)),
    ]
    for kp, cfg in configs:
        params = init_block_params(kp, cfg["in_planes"], cfg["planes"],
                                   cfg["stride"])
        out = jax.block_until_ready(
            basic_block_v2(params, x, stride=cfg["stride"],
                           is_normal=cfg["is_normal"]))
        ref = jax.block_until_ready(
            reference_block(params, x, stride=cfg["stride"],
                            is_normal=cfg["is_normal"]))
        assert out.shape == ref.shape, (out.shape, ref.shape)
        assert bool(jnp.all(jnp.isfinite(out)))
        err = float(jnp.max(jnp.abs(out - ref)))
        assert err < 2e-2, f"max abs error vs reference: {err}"

    print("KERNEL_OK")
</pallas_src>

<mosaic_0001>
module attributes {stable_mosaic.version = 11 : i64} {
  func.func @kernel(%arg0: i32, %arg1: memref<1x16x16x64xf32, #tpu.memory_space<vmem>>, %arg2: memref<3x192x64xbf16, #tpu.memory_space<vmem>>, %arg3: memref<1x64xf32, #tpu.memory_space<vmem>>, %arg4: memref<1x64xf32, #tpu.memory_space<vmem>>, %arg5: memref<1x256x64xbf16, #tpu.memory_space<vmem>>, %arg6: memref<18x18x64xbf16, #tpu.memory_space<vmem>>) attributes {dimension_semantics = [#tpu.dimension_semantics<parallel>], iteration_bounds = array<i64: 2>, scalar_prefetch = 0 : i64, scratch_operands = 1 : i64, tpu.core_type = #tpu.core_type<tc>, window_params = [{transform_indices = @transform_0, window_bounds = array<i64: 1, 16, 16, 64>}, {pipeline_mode = #tpu.pipeline_mode<synchronous>, transform_indices = @transform_1, window_bounds = array<i64: 3, 192, 64>}, {pipeline_mode = #tpu.pipeline_mode<synchronous>, transform_indices = @transform_2, window_bounds = array<i64: 1, 64>}, {pipeline_mode = #tpu.pipeline_mode<synchronous>, transform_indices = @transform_3, window_bounds = array<i64: 1, 64>}, {transform_indices = @transform_4, window_bounds = array<i64: 1, 256, 64>}]} {
    %c0 = arith.constant 0 : index
    %c0_0 = arith.constant 0 : index
    %c0_1 = arith.constant 0 : index
    %c0_2 = arith.constant 0 : index
    %0 = vector.load %arg1[%c0, %c0_0, %c0_1, %c0_2] : memref<1x16x16x64xf32, #tpu.memory_space<vmem>>, vector<1x16x16x64xf32>
    %1 = vector.shape_cast %0 : vector<1x16x16x64xf32> to vector<16x16x64xf32>
    %c0_3 = arith.constant 0 : index
    %c0_4 = arith.constant 0 : index
    %2 = vector.load %arg3[%c0_3, %c0_4] : memref<1x64xf32, #tpu.memory_space<vmem>>, vector<1x64xf32>
    %3 = vector.shape_cast %2 : vector<1x64xf32> to vector<1x1x64xf32>
    %4 = vector.broadcast %3 : vector<1x1x64xf32> to vector<16x16x64xf32>
    %5 = arith.mulf %1, %4 : vector<16x16x64xf32>
    %c0_5 = arith.constant 0 : index
    %c0_6 = arith.constant 0 : index
    %6 = vector.load %arg4[%c0_5, %c0_6] : memref<1x64xf32, #tpu.memory_space<vmem>>, vector<1x64xf32>
    %7 = vector.shape_cast %6 : vector<1x64xf32> to vector<1x1x64xf32>
    %8 = vector.broadcast %7 : vector<1x1x64xf32> to vector<16x16x64xf32>
    %9 = arith.addf %5, %8 : vector<16x16x64xf32>
    %cst = arith.constant 0.000000e+00 : f32
    %10 = vector.broadcast %cst : f32 to vector<16x16x64xf32>
    %11 = arith.maximumf %9, %10 : vector<16x16x64xf32>
    %12 = arith.truncf %11 : vector<16x16x64xf32> to vector<16x16x64xbf16>
    %cst_7 = arith.constant 0.000000e+00 : bf16
    %13 = vector.broadcast %cst_7 : bf16 to vector<18x18x64xbf16>
    %c0_8 = arith.constant 0 : index
    %c0_9 = arith.constant 0 : index
    %c0_10 = arith.constant 0 : index
    %14 = vector.load %arg6[%c0_8, %c0_9, %c0_10] : memref<18x18x64xbf16, #tpu.memory_space<vmem>>, vector<18x18x64xbf16>
    tpu.vector_store %arg6[%c0_8, %c0_9, %c0_10], %13 {strides = array<i32>} : memref<18x18x64xbf16, #tpu.memory_space<vmem>>, vector<18x18x64xbf16>,
    %c1 = arith.constant 1 : index
    %c1_11 = arith.constant 1 : index
    %c0_12 = arith.constant 0 : index
    %15 = vector.load %arg6[%c1, %c1_11, %c0_12] : memref<18x18x64xbf16, #tpu.memory_space<vmem>>, vector<16x16x64xbf16>
    tpu.vector_store %arg6[%c1, %c1_11, %c0_12], %12 {strides = array<i32>} : memref<18x18x64xbf16, #tpu.memory_space<vmem>>, vector<16x16x64xbf16>,
    %cst_13 = arith.constant 0.000000e+00 : f32
    %16 = vector.broadcast %cst_13 : f32 to vector<256x64xf32>
    %c0_14 = arith.constant 0 : index
    %c0_15 = arith.constant 0 : index
    %c0_16 = arith.constant 0 : index
    %17 = vector.load %arg6[%c0_14, %c0_15, %c0_16] : memref<18x18x64xbf16, #tpu.memory_space<vmem>>, vector<16x16x64xbf16>
    %c0_17 = arith.constant 0 : index
    %c1_18 = arith.constant 1 : index
    %c0_19 = arith.constant 0 : index
    %18 = vector.load %arg6[%c0_17, %c1_18, %c0_19] : memref<18x18x64xbf16, #tpu.memory_space<vmem>>, vector<16x16x64xbf16>
    %c0_20 = arith.constant 0 : index
    %c2 = arith.constant 2 : index
    %c0_21 = arith.constant 0 : index
    %19 = vector.load %arg6[%c0_20, %c2, %c0_21] : memref<18x18x64xbf16, #tpu.memory_space<vmem>>, vector<16x16x64xbf16>
    %20 = tpu.concatenate %17, %18, %19 in 2 : vector<16x16x64xbf16>, vector<16x16x64xbf16>, vector<16x16x64xbf16> -> vector<16x16x192xbf16>
    %21 = vector.shape_cast %20 : vector<16x16x192xbf16> to vector<256x192xbf16>
    %c0_22 = arith.constant 0 : index
    %c0_23 = arith.constant 0 : index
    %c0_24 = arith.constant 0 : index
    %22 = vector.load %arg2[%c0_22, %c0_23, %c0_24] : memref<3x192x64xbf16, #tpu.memory_space<vmem>>, vector<1x192x64xbf16>
    %23 = vector.shape_cast %22 : vector<1x192x64xbf16> to vector<192x64xbf16>
    %cst_25 = arith.constant dense<0.000000e+00> : vector<256x64xf32>
    %24 = tpu.matmul %21, %23, %cst_25 {dimension_numbers = #tpu.dot_dimension_numbers<[1], [0], [0], [1], [0, 0, 1, 1], [], []>} : vector<256x192xbf16>, vector<192x64xbf16>, vector<256x64xf32> -> vector<256x64xf32>
    %25 = arith.addf %16, %24 : vector<256x64xf32>
    %c1_26 = arith.constant 1 : index
    %c0_27 = arith.constant 0 : index
    %c0_28 = arith.constant 0 : index
    %26 = vector.load %arg6[%c1_26, %c0_27, %c0_28] : memref<18x18x64xbf16, #tpu.memory_space<vmem>>, vector<16x16x64xbf16>
    %c1_29 = arith.constant 1 : index
    %c1_30 = arith.constant 1 : index
    %c0_31 = arith.constant 0 : index
    %27 = vector.load %arg6[%c1_29, %c1_30, %c0_31] : memref<18x18x64xbf16, #tpu.memory_space<vmem>>, vector<16x16x64xbf16>
    %c1_32 = arith.constant 1 : index
    %c2_33 = arith.constant 2 : index
    %c0_34 = arith.constant 0 : index
    %28 = vector.load %arg6[%c1_32, %c2_33, %c0_34] : memref<18x18x64xbf16, #tpu.memory_space<vmem>>, vector<16x16x64xbf16>
    %29 = tpu.concatenate %26, %27, %28 in 2 : vector<16x16x64xbf16>, vector<16x16x64xbf16>, vector<16x16x64xbf16> -> vector<16x16x192xbf16>
    %30 = vector.shape_cast %29 : vector<16x16x192xbf16> to vector<256x192xbf16>
    %c1_35 = arith.constant 1 : index
    %c0_36 = arith.constant 0 : index
    %c0_37 = arith.constant 0 : index
    %31 = vector.load %arg2[%c1_35, %c0_36, %c0_37] : memref<3x192x64xbf16, #tpu.memory_space<vmem>>, vector<1x192x64xbf16>
    %32 = vector.shape_cast %31 : vector<1x192x64xbf16> to vector<192x64xbf16>
    %cst_38 = arith.constant dense<0.000000e+00> : vector<256x64xf32>
    %33 = tpu.matmul %30, %32, %cst_38 {dimension_numbers = #tpu.dot_dimension_numbers<[1], [0], [0], [1], [0, 0, 1, 1], [], []>} : vector<256x192xbf16>, vector<192x64xbf16>, vector<256x64xf32> -> vector<256x64xf32>
    %34 = arith.addf %25, %33 : vector<256x64xf32>
    %c2_39 = arith.constant 2 : index
    %c0_40 = arith.constant 0 : index
    %c0_41 = arith.constant 0 : index
    %35 = vector.load %arg6[%c2_39, %c0_40, %c0_41] : memref<18x18x64xbf16, #tpu.memory_space<vmem>>, vector<16x16x64xbf16>
    %c2_42 = arith.constant 2 : index
    %c1_43 = arith.constant 1 : index
    %c0_44 = arith.constant 0 : index
    %36 = vector.load %arg6[%c2_42, %c1_43, %c0_44] : memref<18x18x64xbf16, #tpu.memory_space<vmem>>, vector<16x16x64xbf16>
    %c2_45 = arith.constant 2 : index
    %c2_46 = arith.constant 2 : index
    %c0_47 = arith.constant 0 : index
    %37 = vector.load %arg6[%c2_45, %c2_46, %c0_47] : memref<18x18x64xbf16, #tpu.memory_space<vmem>>, vector<16x16x64xbf16>
    %38 = tpu.concatenate %35, %36, %37 in 2 : vector<16x16x64xbf16>, vector<16x16x64xbf16>, vector<16x16x64xbf16> -> vector<16x16x192xbf16>
    %39 = vector.shape_cast %38 : vector<16x16x192xbf16> to vector<256x192xbf16>
    %c2_48 = arith.constant 2 : index
    %c0_49 = arith.constant 0 : index
    %c0_50 = arith.constant 0 : index
    %40 = vector.load %arg2[%c2_48, %c0_49, %c0_50] : memref<3x192x64xbf16, #tpu.memory_space<vmem>>, vector<1x192x64xbf16>
    %41 = vector.shape_cast %40 : vector<1x192x64xbf16> to vector<192x64xbf16>
    %cst_51 = arith.constant dense<0.000000e+00> : vector<256x64xf32>
    %42 = tpu.matmul %39, %41, %cst_51 {dimension_numbers = #tpu.dot_dimension_numbers<[1], [0], [0], [1], [0, 0, 1, 1], [], []>} : vector<256x192xbf16>, vector<192x64xbf16>, vector<256x64xf32> -> vector<256x64xf32>
    %43 = arith.addf %34, %42 : vector<256x64xf32>
    %44 = arith.truncf %43 : vector<256x64xf32> to vector<256x64xbf16>
    %c0_52 = arith.constant 0 : index
    %c0_53 = arith.constant 0 : index
    %c0_54 = arith.constant 0 : index
    %45 = vector.load %arg5[%c0_52, %c0_53, %c0_54] : memref<1x256x64xbf16, #tpu.memory_space<vmem>>, vector<1x256x64xbf16>
    %46 = vector.shape_cast %45 : vector<1x256x64xbf16> to vector<256x64xbf16>
    %47 = vector.shape_cast %44 : vector<256x64xbf16> to vector<1x256x64xbf16>
    tpu.vector_store %arg5[%c0_52, %c0_53, %c0_54], %47 {strides = array<i32>} : memref<1x256x64xbf16, #tpu.memory_space<vmem>>, vector<1x256x64xbf16>,
    return
  }
  func.func @transform_0(%arg0: i32) -> (i32, i32, i32, i32) {
    %c0_i32 = arith.constant 0 : i32
    %c0_i32_0 = arith.constant 0 : i32
    %c0_i32_1 = arith.constant 0 : i32
    %c0_i32_2 = arith.constant 0 : i32
    return %arg0, %c0_i32, %c0_i32_0, %c0_i32_1 : i32, i32, i32, i32
  }
  func.func @transform_1(%arg0: i32) -> (i32, i32, i32) {
    %c0_i32 = arith.constant 0 : i32
    %c0_i32_0 = arith.constant 0 : i32
    %c0_i32_1 = arith.constant 0 : i32
    %c0_i32_2 = arith.constant 0 : i32
    return %c0_i32, %c0_i32_0, %c0_i32_1 : i32, i32, i32
  }
  func.func @transform_2(%arg0: i32) -> (i32, i32) {
    %c0_i32 = arith.constant 0 : i32
    %c0_i32_0 = arith.constant 0 : i32
    %c0_i32_1 = arith.constant 0 : i32
    return %c0_i32, %c0_i32_0 : i32, i32
  }
  func.func @transform_3(%arg0: i32) -> (i32, i32) {
    %c0_i32 = arith.constant 0 : i32
    %c0_i32_0 = arith.constant 0 : i32
    %c0_i32_1 = arith.constant 0 : i32
    return %c0_i32, %c0_i32_0 : i32, i32
  }
  func.func @transform_4(%arg0: i32) -> (i32, i32, i32) {
    %c0_i32 = arith.constant 0 : i32
    %c0_i32_0 = arith.constant 0 : i32
    %c0_i32_1 = arith.constant 0 : i32
    return %arg0, %c0_i32, %c0_i32_0 : i32, i32, i32
  }
}

module attributes {stable_mosaic.version = 11 : i64} {
  func.func @kernel(%arg0: i32, %arg1: memref<1x16x16x64xbf16, #tpu.memory_space<vmem>>, %arg2: memref<3x192x64xbf16, #tpu.memory_space<vmem>>, %arg3: memref<1x64xf32, #tpu.memory_space<vmem>>, %arg4: memref<1x64xf32, #tpu.memory_space<vmem>>, %arg5: memref<1x256x64xf32, #tpu.memory_space<vmem>>, %arg6: memref<1x256x64xf32, #tpu.memory_space<vmem>>, %arg7: memref<18x18x64xbf16, #tpu.memory_space<vmem>>) attributes {dimension_semantics = [#tpu.dimension_semantics<parallel>], iteration_bounds = array<i64: 2>, scalar_prefetch = 0 : i64, scratch_operands = 1 : i64, tpu.core_type = #tpu.core_type<tc>, window_params = [{transform_indices = @transform_0, window_bounds = array<i64: 1, 16, 16, 64>}, {pipeline_mode = #tpu.pipeline_mode<synchronous>, transform_indices = @transform_1, window_bounds = array<i64: 3, 192, 64>}, {pipeline_mode = #tpu.pipeline_mode<synchronous>, transform_indices = @transform_2, window_bounds = array<i64: 1, 64>}, {pipeline_mode = #tpu.pipeline_mode<synchronous>, transform_indices = @transform_3, window_bounds = array<i64: 1, 64>}, {transform_indices = @transform_4, window_bounds = array<i64: 1, 256, 64>}, {transform_indices = @transform_5, window_bounds = array<i64: 1, 256, 64>}]} {
    %c0 = arith.constant 0 : index
    %c0_0 = arith.constant 0 : index
    %c0_1 = arith.constant 0 : index
    %c0_2 = arith.constant 0 : index
    %0 = vector.load %arg1[%c0, %c0_0, %c0_1, %c0_2] : memref<1x16x16x64xbf16, #tpu.memory_space<vmem>>, vector<1x16x16x64xbf16>
    %1 = vector.shape_cast %0 : vector<1x16x16x64xbf16> to vector<16x16x64xbf16>
    %c0_3 = arith.constant 0 : index
    %c0_4 = arith.constant 0 : index
    %2 = vector.load %arg3[%c0_3, %c0_4] : memref<1x64xf32, #tpu.memory_space<vmem>>, vector<1x64xf32>
    %3 = arith.extf %1 : vector<16x16x64xbf16> to vector<16x16x64xf32>
    %4 = vector.shape_cast %2 : vector<1x64xf32> to vector<1x1x64xf32>
    %5 = vector.broadcast %4 : vector<1x1x64xf32> to vector<16x16x64xf32>
    %6 = arith.mulf %3, %5 : vector<16x16x64xf32>
    %c0_5 = arith.constant 0 : index
    %c0_6 = arith.constant 0 : index
    %7 = vector.load %arg4[%c0_5, %c0_6] : memref<1x64xf32, #tpu.memory_space<vmem>>, vector<1x64xf32>
    %8 = vector.shape_cast %7 : vector<1x64xf32> to vector<1x1x64xf32>
    %9 = vector.broadcast %8 : vector<1x1x64xf32> to vector<16x16x64xf32>
    %10 = arith.addf %6, %9 : vector<16x16x64xf32>
    %cst = arith.constant 0.000000e+00 : f32
    %11 = vector.broadcast %cst : f32 to vector<16x16x64xf32>
    %12 = arith.maximumf %10, %11 : vector<16x16x64xf32>
    %13 = arith.truncf %12 : vector<16x16x64xf32> to vector<16x16x64xbf16>
    %cst_7 = arith.constant 0.000000e+00 : bf16
    %14 = vector.broadcast %cst_7 : bf16 to vector<18x18x64xbf16>
    %c0_8 = arith.constant 0 : index
    %c0_9 = arith.constant 0 : index
    %c0_10 = arith.constant 0 : index
    %15 = vector.load %arg7[%c0_8, %c0_9, %c0_10] : memref<18x18x64xbf16, #tpu.memory_space<vmem>>, vector<18x18x64xbf16>
    tpu.vector_store %arg7[%c0_8, %c0_9, %c0_10], %14 {strides = array<i32>} : memref<18x18x64xbf16, #tpu.memory_space<vmem>>, vector<18x18x64xbf16>,
    %c1 = arith.constant 1 : index
    %c1_11 = arith.constant 1 : index
    %c0_12 = arith.constant 0 : index
    %16 = vector.load %arg7[%c1, %c1_11, %c0_12] : memref<18x18x64xbf16, #tpu.memory_space<vmem>>, vector<16x16x64xbf16>
    tpu.vector_store %arg7[%c1, %c1_11, %c0_12], %13 {strides = array<i32>} : memref<18x18x64xbf16, #tpu.memory_space<vmem>>, vector<16x16x64xbf16>,
    %cst_13 = arith.constant 0.000000e+00 : f32
    %17 = vector.broadcast %cst_13 : f32 to vector<256x64xf32>
    %c0_14 = arith.constant 0 : index
    %c0_15 = arith.constant 0 : index
    %c0_16 = arith.constant 0 : index
    %18 = vector.load %arg7[%c0_14, %c0_15, %c0_16] : memref<18x18x64xbf16, #tpu.memory_space<vmem>>, vector<16x16x64xbf16>
    %c0_17 = arith.constant 0 : index
    %c1_18 = arith.constant 1 : index
    %c0_19 = arith.constant 0 : index
    %19 = vector.load %arg7[%c0_17, %c1_18, %c0_19] : memref<18x18x64xbf16, #tpu.memory_space<vmem>>, vector<16x16x64xbf16>
    %c0_20 = arith.constant 0 : index
    %c2 = arith.constant 2 : index
    %c0_21 = arith.constant 0 : index
    %20 = vector.load %arg7[%c0_20, %c2, %c0_21] : memref<18x18x64xbf16, #tpu.memory_space<vmem>>, vector<16x16x64xbf16>
    %21 = tpu.concatenate %18, %19, %20 in 2 : vector<16x16x64xbf16>, vector<16x16x64xbf16>, vector<16x16x64xbf16> -> vector<16x16x192xbf16>
    %22 = vector.shape_cast %21 : vector<16x16x192xbf16> to vector<256x192xbf16>
    %c0_22 = arith.constant 0 : index
    %c0_23 = arith.constant 0 : index
    %c0_24 = arith.constant 0 : index
    %23 = vector.load %arg2[%c0_22, %c0_23, %c0_24] : memref<3x192x64xbf16, #tpu.memory_space<vmem>>, vector<1x192x64xbf16>
    %24 = vector.shape_cast %23 : vector<1x192x64xbf16> to vector<192x64xbf16>
    %cst_25 = arith.constant dense<0.000000e+00> : vector<256x64xf32>
    %25 = tpu.matmul %22, %24, %cst_25 {dimension_numbers = #tpu.dot_dimension_numbers<[1], [0], [0], [1], [0, 0, 1, 1], [], []>} : vector<256x192xbf16>, vector<192x64xbf16>, vector<256x64xf32> -> vector<256x64xf32>
    %26 = arith.addf %17, %25 : vector<256x64xf32>
    %c1_26 = arith.constant 1 : index
    %c0_27 = arith.constant 0 : index
    %c0_28 = arith.constant 0 : index
    %27 = vector.load %arg7[%c1_26, %c0_27, %c0_28] : memref<18x18x64xbf16, #tpu.memory_space<vmem>>, vector<16x16x64xbf16>
    %c1_29 = arith.constant 1 : index
    %c1_30 = arith.constant 1 : index
    %c0_31 = arith.constant 0 : index
    %28 = vector.load %arg7[%c1_29, %c1_30, %c0_31] : memref<18x18x64xbf16, #tpu.memory_space<vmem>>, vector<16x16x64xbf16>
    %c1_32 = arith.constant 1 : index
    %c2_33 = arith.constant 2 : index
    %c0_34 = arith.constant 0 : index
    %29 = vector.load %arg7[%c1_32, %c2_33, %c0_34] : memref<18x18x64xbf16, #tpu.memory_space<vmem>>, vector<16x16x64xbf16>
    %30 = tpu.concatenate %27, %28, %29 in 2 : vector<16x16x64xbf16>, vector<16x16x64xbf16>, vector<16x16x64xbf16> -> vector<16x16x192xbf16>
    %31 = vector.shape_cast %30 : vector<16x16x192xbf16> to vector<256x192xbf16>
    %c1_35 = arith.constant 1 : index
    %c0_36 = arith.constant 0 : index
    %c0_37 = arith.constant 0 : index
    %32 = vector.load %arg2[%c1_35, %c0_36, %c0_37] : memref<3x192x64xbf16, #tpu.memory_space<vmem>>, vector<1x192x64xbf16>
    %33 = vector.shape_cast %32 : vector<1x192x64xbf16> to vector<192x64xbf16>
    %cst_38 = arith.constant dense<0.000000e+00> : vector<256x64xf32>
    %34 = tpu.matmul %31, %33, %cst_38 {dimension_numbers = #tpu.dot_dimension_numbers<[1], [0], [0], [1], [0, 0, 1, 1], [], []>} : vector<256x192xbf16>, vector<192x64xbf16>, vector<256x64xf32> -> vector<256x64xf32>
    %35 = arith.addf %26, %34 : vector<256x64xf32>
    %c2_39 = arith.constant 2 : index
    %c0_40 = arith.constant 0 : index
    %c0_41 = arith.constant 0 : index
    %36 = vector.load %arg7[%c2_39, %c0_40, %c0_41] : memref<18x18x64xbf16, #tpu.memory_space<vmem>>, vector<16x16x64xbf16>
    %c2_42 = arith.constant 2 : index
    %c1_43 = arith.constant 1 : index
    %c0_44 = arith.constant 0 : index
    %37 = vector.load %arg7[%c2_42, %c1_43, %c0_44] : memref<18x18x64xbf16, #tpu.memory_space<vmem>>, vector<16x16x64xbf16>
    %c2_45 = arith.constant 2 : index
    %c2_46 = arith.constant 2 : index
    %c0_47 = arith.constant 0 : index
    %38 = vector.load %arg7[%c2_45, %c2_46, %c0_47] : memref<18x18x64xbf16, #tpu.memory_space<vmem>>, vector<16x16x64xbf16>
    %39 = tpu.concatenate %36, %37, %38 in 2 : vector<16x16x64xbf16>, vector<16x16x64xbf16>, vector<16x16x64xbf16> -> vector<16x16x192xbf16>
    %40 = vector.shape_cast %39 : vector<16x16x192xbf16> to vector<256x192xbf16>
    %c2_48 = arith.constant 2 : index
    %c0_49 = arith.constant 0 : index
    %c0_50 = arith.constant 0 : index
    %41 = vector.load %arg2[%c2_48, %c0_49, %c0_50] : memref<3x192x64xbf16, #tpu.memory_space<vmem>>, vector<1x192x64xbf16>
    %42 = vector.shape_cast %41 : vector<1x192x64xbf16> to vector<192x64xbf16>
    %cst_51 = arith.constant dense<0.000000e+00> : vector<256x64xf32>
    %43 = tpu.matmul %40, %42, %cst_51 {dimension_numbers = #tpu.dot_dimension_numbers<[1], [0], [0], [1], [0, 0, 1, 1], [], []>} : vector<256x192xbf16>, vector<192x64xbf16>, vector<256x64xf32> -> vector<256x64xf32>
    %44 = arith.addf %35, %43 : vector<256x64xf32>
    %c0_52 = arith.constant 0 : index
    %c0_53 = arith.constant 0 : index
    %c0_54 = arith.constant 0 : index
    %45 = vector.load %arg5[%c0_52, %c0_53, %c0_54] : memref<1x256x64xf32, #tpu.memory_space<vmem>>, vector<1x256x64xf32>
    %46 = vector.shape_cast %45 : vector<1x256x64xf32> to vector<256x64xf32>
    %47 = arith.addf %44, %46 : vector<256x64xf32>
    %c0_55 = arith.constant 0 : index
    %c0_56 = arith.constant 0 : index
    %c0_57 = arith.constant 0 : index
    %48 = vector.load %arg6[%c0_55, %c0_56, %c0_57] : memref<1x256x64xf32, #tpu.memory_space<vmem>>, vector<1x256x64xf32>
    %49 = vector.shape_cast %48 : vector<1x256x64xf32> to vector<256x64xf32>
    %50 = vector.shape_cast %47 : vector<256x64xf32> to vector<1x256x64xf32>
    tpu.vector_store %arg6[%c0_55, %c0_56, %c0_57], %50 {strides = array<i32>} : memref<1x256x64xf32, #tpu.memory_space<vmem>>, vector<1x256x64xf32>,
    return
  }
  func.func @transform_0(%arg0: i32) -> (i32, i32, i32, i32) {
    %c0_i32 = arith.constant 0 : i32
    %c0_i32_0 = arith.constant 0 : i32
    %c0_i32_1 = arith.constant 0 : i32
    %c0_i32_2 = arith.constant 0 : i32
    return %arg0, %c0_i32, %c0_i32_0, %c0_i32_1 : i32, i32, i32, i32
  }
  func.func @transform_1(%arg0: i32) -> (i32, i32, i32) {
    %c0_i32 = arith.constant 0 : i32
    %c0_i32_0 = arith.constant 0 : i32
    %c0_i32_1 = arith.constant 0 : i32
    %c0_i32_2 = arith.constant 0 : i32
    return %c0_i32, %c0_i32_0, %c0_i32_1 : i32, i32, i32
  }
  func.func @transform_2(%arg0: i32) -> (i32, i32) {
    %c0_i32 = arith.constant 0 : i32
    %c0_i32_0 = arith.constant 0 : i32
    %c0_i32_1 = arith.constant 0 : i32
    return %c0_i32, %c0_i32_0 : i32, i32
  }
  func.func @transform_3(%arg0: i32) -> (i32, i32) {
    %c0_i32 = arith.constant 0 : i32
    %c0_i32_0 = arith.constant 0 : i32
    %c0_i32_1 = arith.constant 0 : i32
    return %c0_i32, %c0_i32_0 : i32, i32
  }
  func.func @transform_4(%arg0: i32) -> (i32, i32, i32) {
    %c0_i32 = arith.constant 0 : i32
    %c0_i32_0 = arith.constant 0 : i32
    %c0_i32_1 = arith.constant 0 : i32
    return %arg0, %c0_i32, %c0_i32_0 : i32, i32, i32
  }
  func.func @transform_5(%arg0: i32) -> (i32, i32, i32) {
    %c0_i32 = arith.constant 0 : i32
    %c0_i32_0 = arith.constant 0 : i32
    %c0_i32_1 = arith.constant 0 : i32
    return %arg0, %c0_i32, %c0_i32_0 : i32, i32, i32
  }
}

</mosaic_0001>

<bundles_post_ra>
// kernel: basic_block_v2.2
= control target key start
LH: loop header
LB: loop body
LE: loop exit
PB: predicated region body
PF: predicated region fallthrough
CT: control target
= control target key end

     0   :  { %9 = vsyncpa [#allocation4], 0  ;;  %s6197_s0 = inlined_call_operand.hbm [shape: f32[2,16,16,64], index: 0, kind: input, shape index: {}]   ;;  %s6198_s1 = inlined_call_operand.hbm [shape: bf16[3,192,64], index: 1, kind: input, shape index: {}]   ;;  %s6199_s2 = inlined_call_operand.vmem [shape: f32[1,64], index: 2, kind: input, shape index: {}]   ;;  %s6200_s3 = inlined_call_operand.vmem [shape: f32[1,64], index: 3, kind: input, shape index: {}]   ;;  %s6201_s4 = inlined_call_operand.vmem [shape: bf16[2,256,64], index: 4, kind: output, shape index: {}]  }
   0x1   :  { %11 = vsyncpa [#allocation4 + $0x1], 0 }
   0x2   :  { %12 = vsyncpa [#allocation6], 0  ;;  %s4448_s15 = smov 0   ;;  %s4450_s16 = smov 0  }
   0x3   :  { %s4452_s17 = smov 0   ;;  %s4454_s18 = smov 0  }
   0x4 LB: > { %s4467_s19 = sadd.s32 4294967295, %s4414_s18   ;;  %p38_p0 = scmp.ne.s32.totalorder %s4406_s16, %s4402_s15  ;;  %s4414_s18 = sphi %s4454_s18, %s6393_s18   ;;  %s4410_s17 = sphi %s4452_s17, %s6392_s17   ;;  %s4406_s16 = sphi %s4450_s16, %s6391_s16   ;;  %s4402_s15 = sphi %s4448_s15, %s6390_s15  }
   0x5   : > { %p39_p1 = scmp.eq.s32.totalorder %s4467_s19, 0  ;;  %p3729_p2 = scmp.ge.s32.totalorder %s4414_s18, 1 }
   0x6   : > { %p138_p3 = scmp.lt.s32.totalorder %s4414_s18, 3  ;;  %s149_s23 = sshll.u32 %s6198_s1, 4  ;;  %s150_s23 = int_to_ptr.hbm [resolvable:$true] %s149_s23 }
   0x7   : > { %p4475_p4 = por %p39_p1, %p38_p0  ;;  %s4416_s25 = smov [#allocation5]  }
   0x8   : > { %p4482_p5 = pnand %p3729_p2, %p138_p3  ;;  %s151_s26 = sshll.u32 %s4416_s25, 4  ;;  %s152_s26 = int_to_ptr.vmem [resolvable:$true] %s151_s26 }
   0x9   : > { %s4491_s27 = sadd.s32 1, %s4414_s18   ;;  %s4417_s28 = smov 64  }
   0xa   : > { %p4176_p6 = pneg %p4482_p5  ;;  %s4418_s29 = smov 4  }
   0xb   : > { %s22_s30 = ssub.s32 %s4414_s18, %s4491_s27  ;;  %s25_s5 = sadd.s32 1, %s4410_s17 }
   0xc   : > { %p4177_p7 = pnand %p4176_p6, %p39_p1  ;;  %p23_p8 = scmp.eq.s32.totalorder %s22_s30, 0 }
   0xd   : > { %p32_p9 = scmp.ne.s32.totalorder %s4410_s17, %s4406_s16  ;;  %p33_p10 = scmp.eq.s32.totalorder %s4414_s18, 0 }
   0xe   : > { %4179 = dma.hbm_to_vmem [thread:$0]  (!%p4177_p7), %s150_s23, 4608, %s152_s26, [#allocation6], %s4417_s28, %s4417_s28, %s4418_s29  }
   0xf   : > { %p4185_p11 = scmp.lt.s32.totalorder %s4414_s18, 2  ;;  %p34_p12 = por %p33_p10, %p32_p9 }
  0x10   : > { %s4501_s6 = scalar_select %p23_p8, %s4410_s17, %s25_s5  }
  0x11   : > { %s171_s7 = sand.u32 1, %s4410_s17   ;;  %s3934_s9 = sshll.u32 %s4414_s18, 8 }
  0x12   : > { %s3732_s8 = sshll.u32 %s171_s7, 8  ;;  %s180_s12 = scalar_lea.hbm %s6197_s0, %s3934_s9 }
  0x13   : > { %s175_s13 = scalar_lea.vmem [#allocation3], %s3732_s8  ;;  %s181_s15 = sshll.u32 %s180_s12, 4  ;;  %s182_s15 = int_to_ptr.hbm [resolvable:$true] %s181_s15 }
  0x14   : > { %s183_s14 = sshll.u32 %s175_s13, 4  ;;  %p4508_p13 = pnand %p4185_p11, %p34_p12  ;;  %s184_s14 = int_to_ptr.vmem [resolvable:$true] %s183_s14 }
  0x15   : > { %s172_s22 = scalar_lea.sflag [#allocation4], %s171_s7  ;;  %s4334_s23 = sshra.s32 %s182_s15, 4  ;;  %s4335_s23 = int_to_ptr.hbm [resolvable:$true] %s4334_s23 }
  0x16   : > { %s4336_s25 = scalar_lea.hbm %s4335_s23, 256  ;;  %p4338_p2 = pneg %p4508_p13 }
  0x17   : > { %p4337_p0 = scmp.ne.s32.totalorder %s4335_s23, %s4336_s25  ;;  %s4341_s28 = scalar_lea.hbm %s6197_s0, 512 }
  0x18   : > { %p4342_p7 = scmp.lt.s32.totalorder %s4335_s23, %s6197_s0  ;;  %p4343_p8 = scmp.lt.s32.totalorder %s4341_s28, %s4336_s25 }
  0x19   : > { %p4339_p3 = pnand %p4338_p2, %p4337_p0 }
  0x1a   : > { %p4344_p9 = por %p4343_p8, %p4342_p7 }
  0x1b   : > { %p4340_p6 = pneg %p4339_p3 }
  0x1d   : > { %p4345_p10 = pnand %p4344_p9, %p4340_p6 }
  0x1f   : > { %4348 = shalt.err (!%p4345_p10)
}
  0x20   : > { %s4419_s5 = smov 128   ;;  %s4420_s7 = smov 8  }
  0x21   : > { %4183 = dma.hbm_to_vmem [thread:$0]  (!%p4508_p13), %s182_s15, 4096, %s184_s14, %s172_s22, %s4419_s5, %s4419_s5, %s4420_s7  }
  0x22   : > { %195 = sbr.rel (%p4482_p5) target bundleno = 734 (0x2de), region = 36 }
  0x27   : > { %s197_s8 = sand.u32 1, %s4406_s16  }
  0x28   : > { %s3736_s9 = sshll.u32 %s197_s8, 8  ;;  %s198_s10 = scalar_lea.sflag [#allocation4], %s197_s8 }
  0x29   : > { %s4525_s11 = scalar_lea.vmem [#allocation3], %s3736_s9 }
  0x2a   : > { %4381 = dma.done.wait (%p4475_p4), %s198_s10, 4096  }
  0x2b   : > { %4383 = vsyncadd (%p4475_p4), %s198_s10, 4294963200 }
  0x2c   : > { %4385 = dma.done.wait (%p39_p1), [#allocation6], 4608  }
  0x2d   : > { %4387 = vsyncadd (%p39_p1), [#allocation6], 4294962688  ;;  %vm406_vm0 = vcmask 519168   ;;  %vm409_vm1 = vcmask 516096   ;;  %v4421_v0 = vmov 0   ;;  %v3947_v1 = vld [vmem:[#allocation5 + $0x58] sm:$0xff] }
  0x2e   : > { %407 = vst.msk [vmem:[#allocation2] sm:$0xf] %vm406_vm0, %v4421_v0  ;;  %v3959_v2 = vld [vmem:[#allocation5 + $0xb8] sm:$0xff]  ;;  %v3946_v3 = vld [vmem:[#allocation5 + $0x50] sm:$0xff]  ;;  %v238_v4 = vld [vmem:[%s4525_s11] sm:$0xff]  ;;  %4166 = vmatpush.bf16.msra.mxu3 %v3947_v1  ;;  %s4422_s14 = smov 64  }
  0x2f   : > { %408 = vst.msk [vmem:[#allocation2 + $0x4] sm:$0xf] %vm406_vm0, %v4421_v0  ;;  %4162 = vmatpush.bf16.msra.mxu1 %v3959_v2  ;;  %v239_v6 = vld [vmem:[%s4525_s11 + $0x8] sm:$0xff]  ;;  %vm1095_vm2 = vsmask.f32 7424  ;;  %v250_v25 = vld [vmem:[%s4525_s11 + $0x60] sm:$0xff] }
  0x30   : > { %410 = vst.msk [vmem:[#allocation2 + $0x8] sm:$0x1] %vm409_vm1, %v4421_v0  ;;  %v4562_v11 = vld [vmem:[%s6199_s2] ss:$0 sm:$0xff]  ;;  %v241_v27 = vld [vmem:[%s4525_s11 + $0x18] sm:$0xff]  ;;  %v240_v33 = vld [vmem:[%s4525_s11 + $0x10] sm:$0xff] }
  0x31   : > { %411 = vst.msk [vmem:[#allocation2 + $0xc] sm:$0xf] %vm406_vm0, %v4421_v0  ;;  %v4569_v13 = vld [vmem:[%s6200_s3] ss:$0 sm:$0xff]  ;;  %v274_v16 = vmul.f32 %v4562_v11, %v238_v4  ;;  %v275_v17 = vmul.f32 %v4562_v11, %v239_v6  ;;  %v286_v31 = vmul.f32 %v4562_v11, %v250_v25  ;;  %v277_v34 = vmul.f32 %v4562_v11, %v241_v27  ;;  %v252_v51 = vld [vmem:[%s4525_s11 + $0x70] sm:$0xff]  ;;  %v253_v52 = vld [vmem:[%s4525_s11 + $0x78] sm:$0xff] }
  0x32   : > { %412 = vst.msk [vmem:[#allocation2 + $0x10] sm:$0xf] %vm406_vm0, %v4421_v0  ;;  %4167 = vmatpush.bf16.msra.mxu3 %v3946_v3  ;;  %v3945_v15 = vld [vmem:[#allocation5 + $0x48] sm:$0xff]  ;;  %v276_v39 = vmul.f32 %v4562_v11, %v240_v33  ;;  %vm462_vm3 = vsmask.f32 256  ;;  %v288_v54 = vmul.f32 %v4562_v11, %v252_v51  ;;  %v289_v59 = vmul.f32 %v4562_v11, %v253_v52  ;;  %v244_v1 = vld [vmem:[%s4525_s11 + $0x30] sm:$0xff] }
  0x33   : > { %413 = vst.msk [vmem:[#allocation2 + $0x14] sm:$0x1] %vm409_vm1, %v4421_v0  ;;  %v310_v20 = vadd.f32 %v4569_v13, %v274_v16  ;;  %v311_v21 = vadd.f32 %v4569_v13, %v275_v17  ;;  %v251_v26 = vld [vmem:[%s4525_s11 + $0x68] sm:$0xff]  ;;  %v322_v37 = vadd.f32 %v4569_v13, %v286_v31  ;;  %v313_v40 = vadd.f32 %v4569_v13, %v277_v34  ;;  %v245_v6 = vld [vmem:[%s4525_s11 + $0x38] sm:$0xff]  ;;  %vm4704_vm8 = vmand %vm409_vm1, %vm462_vm3  ;;  %p232_p1 = scmp.lt.s32.totalorder %s4467_s19, 1 }
  0x34   : > { %414 = vst.msk [vmem:[#allocation2 + $0x18] sm:$0xf] %vm406_vm0, %v4421_v0  ;;  %v287_v32 = vmul.f32 %v4562_v11, %v251_v26  ;;  %v312_v43 = vadd.f32 %v4569_v13, %v276_v39  ;;  %vm463_vm4 = vsmask.f32 4368  ;;  %vm787_vm5 = vsmask.f32 7938 }
  0x35   : > { %415 = vst.msk [vmem:[#allocation2 + $0x1c] sm:$0xf] %vm406_vm0, %v4421_v0  ;;  %v342_v23 = vmax.f32 %v310_v20, 0.0  ;;  %v343_v24 = vmax.f32 %v311_v21, 0.0  ;;  %v354_v41 = vmax.f32 %v322_v37, 0.0  ;;  %v345_v50 = vmax.f32 %v313_v40, 0.0  ;;  %vm4645_vm6 = vmor %vm462_vm3, %vm463_vm4 }
  0x36   : > { %v3973_v5 = vld [vmem:[#allocation2] sm:$0xff]   ;;  %416 = vst.msk [vmem:[#allocation2 + $0x20] sm:$0x1] %vm409_vm1, %v4421_v0  ;;  %4168 = vmatpush.bf16.msra.mxu3 %v3945_v15  ;;  %v323_v38 = vadd.f32 %v4569_v13, %v287_v32  ;;  %v344_v49 = vmax.f32 %v312_v43, 0.0  ;;  %v324_v60 = vadd.f32 %v4569_v13, %v288_v54  ;;  %vm4657_vm7 = vmand %vm406_vm0, %vm787_vm5  ;;  %v281_v21 = vmul.f32 %v4562_v11, %v245_v6  ;;  %v246_v26 = vld [vmem:[%s4525_s11 + $0x40] sm:$0xff]  ;;  %s6395_s19 = smov (!%p232_p1, %s4467_s19), 1 }
  0x37   : > { %v935_v7 = vld [vmem:[#allocation2 + $0x8] sm:$0x1]  ;;  %v1097_v8 = vshrl.u32 %v3973_v5, 16  ;;  %v1099_v9 = vshll.u32 %v3973_v5, 16  ;;  %417 = vst.msk [vmem:[#allocation2 + $0x24] sm:$0xf] %vm406_vm0, %v4421_v0  ;;  %v374_v29 = vpack.c.bf16 %v342_v23, %v342_v23  ;;  %v375_v30 = vpack.c.bf16 %v343_v24, %v343_v24 }
  0x38   : > { %v1063_v10 = vunpack.c.l.b16 %v935_v7  ;;  %418 = vst.msk [vmem:[#allocation2 + $0x28] sm:$0xf] %vm406_vm0, %v4421_v0  ;;  %v355_v42 = vmax.f32 %v323_v38, 0.0  ;;  %v386_v47 = vpack.c.bf16 %v354_v41, %v354_v41  ;;  %v4629_v56 = vpack.c.bf16 %v344_v49, %v344_v49  ;;  %v4638_v63 = vld [vmem:[#allocation2 + $0xc] sm:$0xf]  ;;  %v247_v31 = vld [vmem:[%s4525_s11 + $0x48] sm:$0xff] }
  0x39   : > { %v1101_v12 = vrot.slane %v1099_v9, 1  ;;  %419 = vst.msk [vmem:[#allocation2 + $0x2c] sm:$0x1] %vm409_vm1, %v4421_v0  ;;  %v466_v35 = vshrl.u32 %v374_v29, 16  ;;  %v474_v36 = vshrl.u32 %v375_v30, 16  ;;  %v477_v46 = vshll.u32 %v375_v30, 16 }
  0x3a   : > { %v4571_v14 = vpack.c.b16 %v1063_v10, %v1063_v10  ;;  %420 = vst.msk [vmem:[#allocation2 + $0x30] sm:$0xf] %vm406_vm0, %v4421_v0  ;;  %v387_v48 = vpack.c.bf16 %v355_v42, %v355_v42  ;;  %v469_v53 = vshll.u32 %v374_v29, 16  ;;  %v568_v55 = vshrl.u32 %v386_v47, 16  ;;  %v795_v32 = vld [vmem:[#allocation2 + $0x14] sm:$0x1] }
  0x3b   : > { %421 = vst.msk [vmem:[#allocation2 + $0x34] sm:$0xf] %vm406_vm0, %v4421_v0  ;;  %v1102_v18 = vor.u32 %v1101_v12, %v1097_v8  ;;  %v468_v44 = vrot.slane %v466_v35, 7  ;;  %v4618_v45 = vrot.slane %v474_v36, 7  ;;  %v377_v58 = vpack.c.bf16 %v345_v50, %v345_v50  ;;  %v254_v52 = vld [vmem:[%s4525_s11 + $0x80] sm:$0xff]  ;;  %s3935_s25 = sshll.u32 %s6395_s19, 7 }
  0x3c   : > { %6230 = vst [vmem:[#allocation9_spill] sm:$0xff] %v4571_v14  ;;  %v1104_v19 = vshll.u32 %v4571_v14, 16  ;;  %v576_v57 = vshrl.u32 %v387_v48, 16  ;;  %v483_v4 = vshrl.u32 %v4629_v56, 16  ;;  %v356_v5 = vmax.f32 %v324_v60, 0.0  ;;  %s5953_s28 = scalar_lea.vmem %s6201_s4, %s3935_s25 }
  0x3d   : > { %422 = vst.msk [vmem:[#allocation2 + $0x38] sm:$0x1] %vm409_vm1, %v4421_v0  ;;  %v472_v61 = vrot.slane %v468_v44, 4  ;;  %v479_v62 = vor.u32 %v477_v46, %v4618_v45  ;;  %v4649_v3 = vor.u32 %v469_v53, %v468_v44  ;;  %v570_v8 = vrot.slane %v568_v55, 7  ;;  %v4720_v53 = vld [vmem:[#allocation2 + $0x18] sm:$0xf] }
  0x3e   : > { %423 = vst.msk [vmem:[#allocation2 + $0x3c] sm:$0xf] %vm406_vm0, %v4421_v0  ;;  %v1106_v22 = vrot.slane %v1104_v19, 1  ;;  %v571_v9 = vshll.u32 %v386_v47, 16  ;;  %v579_v10 = vshll.u32 %v387_v48, 16  ;;  %v325_v12 = vadd.f32 %v4569_v13, %v289_v59  ;;  %v3958_v59 = vld [vmem:[#allocation5 + $0xb0] sm:$0xff] }
  0x3f   : > { %424 = vst.msk [vmem:[#allocation2 + $0x40] sm:$0xf] %vm406_vm0, %v4421_v0  ;;  %v578_v15 = vrot.slane %v576_v57, 7  ;;  %v491_v16 = vshrl.u32 %v377_v58, 16  ;;  %v4664_v17 = vpack.c.bf16 %v356_v5, %v356_v5  ;;  %v4671_v19 = vsel %vm4645_vm6, %v472_v61, %v479_v62  ;;  %4163 = vmatpush.bf16.msra.mxu1 %v3958_v59 }
  0x40   : > { %425 = vst.msk [vmem:[#allocation2 + $0x44] sm:$0x1] %vm409_vm1, %v4421_v0  ;;  %v1107_v28 = vsel %vm1095_vm2, %v1102_v18, %v1106_v22  ;;  %v280_v18 = vmul.f32 %v4562_v11, %v244_v1  ;;  %v481_v20 = vrot.slane %v4618_v45, 4  ;;  %v790_v22 = vsel %vm4657_vm7, %v4649_v3, %v4638_v63  ;;  %v3944_v1 = vld [vmem:[#allocation5 + $0x40] sm:$0xff] }
  0x41   : > { %426 = vst.msk [vmem:[#allocation2 + $0x48] sm:$0xf] %vm406_vm0, %v4421_v0  ;;  %1288 = vrot.lane.b32.xlu0 %v1107_v28, %s4422_s14  ;;  %v485_v23 = vrot.slane %v483_v4, 7  ;;  %v486_v24 = vshll.u32 %v4629_v56, 16  ;;  %v494_v25 = vshll.u32 %v377_v58, 16  ;;  %v357_v27 = vmax.f32 %v325_v12, 0.0  ;;  %4169 = vmatpush.bf16.msra.mxu3 %v3944_v1 }
  0x42   : > { %427 = vst.msk [vmem:[#allocation2 + $0x4c] sm:$0xf] %vm406_vm0, %v4421_v0  ;;  %v585_v28 = vshrl.u32 %v4664_v17, 16  ;;  %v316_v29 = vadd.f32 %v4569_v13, %v280_v18  ;;  %v317_v30 = vadd.f32 %v4569_v13, %v281_v21  ;;  %v4691_v33 = vor.u32 %v571_v9, %v570_v8 }
  0x43   : > { %428 = vst.msk [vmem:[#allocation2 + $0x50] sm:$0x1] %vm409_vm1, %v4421_v0  ;;  %v574_v34 = vrot.slane %v570_v8, 4  ;;  %v581_v35 = vor.u32 %v579_v10, %v578_v15  ;;  %v4693_v36 = vrot.slane %v491_v16, 7  ;;  %v583_v37 = vrot.slane %v578_v15, 4  ;;  %v3957_v10 = vld [vmem:[#allocation5 + $0xa8] sm:$0xff] }
  0x44   : > { %429 = vst.msk [vmem:[#allocation2 + $0x54] sm:$0xf] %vm406_vm0, %v4421_v0  ;;  %v389_v39 = vpack.c.bf16 %v357_v27, %v357_v27  ;;  %v348_v40 = vmax.f32 %v316_v29, 0.0  ;;  %v282_v41 = vmul.f32 %v4562_v11, %v246_v26  ;;  %v489_v44 = vrot.slane %v485_v23, 4  ;;  %v802_v8 = vld [vmem:[#allocation2 + $0x20] sm:$0x1]  ;;  %4164 = vmatpush.bf16.msra.mxu1 %v3957_v10 }
  0x45   : > { %430 = vst.msk [vmem:[#allocation2 + $0x58] sm:$0xf] %vm406_vm0, %v4421_v0  ;;  %v496_v45 = vor.u32 %v494_v25, %v4693_v36  ;;  %v349_v46 = vmax.f32 %v317_v30, 0.0  ;;  %v283_v47 = vmul.f32 %v4562_v11, %v247_v31  ;;  %v4712_v48 = vor.u32 %v486_v24, %v485_v23  ;;  %v242_v30 = vld [vmem:[%s4525_s11 + $0x20] sm:$0xff] }
  0x46   : > { %431 = vst.msk [vmem:[#allocation2 + $0x5c] sm:$0x1] %vm409_vm1, %v4421_v0  ;;  %v4714_v49 = vrot.slane %v585_v28, 7  ;;  %v588_v50 = vshll.u32 %v4664_v17, 16  ;;  %v593_v51 = vshrl.u32 %v389_v39, 16  ;;  %v380_v54 = vpack.c.bf16 %v348_v40, %v348_v40 }
  0x47   : > { %432 = vst.msk [vmem:[#allocation2 + $0x60] sm:$0xf] %vm406_vm0, %v4421_v0  ;;  %v4722_v55 = vpack.c.bf16 %v349_v46, %v349_v46  ;;  %v318_v56 = vadd.f32 %v4569_v13, %v282_v41  ;;  %v319_v57 = vadd.f32 %v4569_v13, %v283_v47  ;;  %v4730_v58 = vsel %vm4704_vm8, %v481_v20, %v795_v32  ;;  %v255_v20 = vld [vmem:[%s4525_s11 + $0x88] sm:$0xff] }
  0x48   : > { %433 = vst.msk [vmem:[#allocation2 + $0x64] sm:$0xf] %vm406_vm0, %v4421_v0  ;;  %v4734_v60 = vsel %vm4645_vm6, %v574_v34, %v581_v35  ;;  %v596_v62 = vshll.u32 %v389_v39, 16  ;;  %v4748_v5 = vsel %vm4645_vm6, %v489_v44, %v496_v45  ;;  %v498_v6 = vrot.slane %v4693_v36, 4  ;;  %v4792_v45 = vld [vmem:[#allocation2 + $0x30] sm:$0xf] }
  0x49   : > { %434 = vst.msk [vmem:[#allocation2 + $0x68] sm:$0x1] %vm409_vm1, %v4421_v0  ;;  %v290_v9 = vmul.f32 %v4562_v11, %v254_v52  ;;  %v799_v12 = vsel %vm4657_vm7, %v4712_v48, %v4720_v53  ;;  %v4759_v15 = vor.u32 %v588_v50, %v4714_v49  ;;  %v595_v16 = vrot.slane %v593_v51, 7  ;;  %v243_v47 = vld [vmem:[%s4525_s11 + $0x28] sm:$0xff] }
  0x4a   : > { %435 = vst.msk [vmem:[#allocation2 + $0x6c] sm:$0xf] %vm406_vm0, %v4421_v0  ;;  %v517_v18 = vshrl.u32 %v380_v54, 16  ;;  %v591_v21 = vrot.slane %v4714_v49, 4  ;;  %v525_v23 = vshrl.u32 %v4722_v55, 16  ;;  %v350_v24 = vmax.f32 %v318_v56, 0.0 }
  0x4b   : > { %436 = vst.msk [vmem:[#allocation2 + $0x70] sm:$0xf] %vm406_vm0, %v4421_v0  ;;  %v4697_v38 = vld [vmem:[#allocation2 + $0x54] sm:$0xf]  ;;  %v351_v25 = vmax.f32 %v319_v57, 0.0  ;;  %v598_v26 = vor.u32 %v596_v62, %v595_v16  ;;  %v520_v28 = vshll.u32 %v380_v54, 16  ;;  %v291_v29 = vmul.f32 %v4562_v11, %v255_v20 }
  0x4c   : > { %437 = vst.msk [vmem:[#allocation2 + $0x74] sm:$0x1] %vm409_vm1, %v4421_v0  ;;  %v834_v61 = vsel %vm4657_vm7, %v4691_v33, %v4697_v38  ;;  %v519_v27 = vrot.slane %v517_v18, 7  ;;  %v528_v31 = vshll.u32 %v4722_v55, 16  ;;  %v382_v32 = vpack.c.bf16 %v350_v24, %v350_v24  ;;  %v3956_v49 = vld [vmem:[#allocation5 + $0xa0] sm:$0xff] }
  0x4d   : > { %438 = vst.msk [vmem:[#allocation2 + $0x78] sm:$0xf] %vm406_vm0, %v4421_v0  ;;  %v837_v43 = vld [vmem:[#allocation2 + $0x5c] sm:$0x1]  ;;  %v383_v34 = vpack.c.bf16 %v351_v25, %v351_v25  ;;  %v326_v35 = vadd.f32 %v4569_v13, %v290_v9  ;;  %v4780_v36 = vsel %vm4704_vm8, %v498_v6, %v802_v8  ;;  %v327_v39 = vadd.f32 %v4569_v13, %v291_v29 }
  0x4e   : > { %439 = vst.msk [vmem:[#allocation2 + $0x7c] sm:$0xf] %vm406_vm0, %v4421_v0  ;;  %v4744_v4 = vsel %vm4704_vm8, %v583_v37, %v837_v43  ;;  %v4761_v17 = vld [vmem:[#allocation2 + $0x60] sm:$0xf]  ;;  %v278_v40 = vmul.f32 %v4562_v11, %v242_v30  ;;  %v600_v41 = vrot.slane %v595_v16, 4  ;;  %v4790_v44 = vrot.slane %v525_v23, 7  ;;  %4165 = vmatpush.bf16.msra.mxu1 %v3956_v49 }
  0x4f   : > { %440 = vst.msk [vmem:[#allocation2 + $0x80] sm:$0x1] %vm409_vm1, %v4421_v0  ;;  %v841_v43 = vsel %vm4657_vm7, %v4759_v15, %v4761_v17  ;;  %v534_v46 = vshrl.u32 %v382_v32, 16  ;;  %v4799_v50 = vsel %vm4645_vm6, %v591_v21, %v598_v26  ;;  %v4801_v51 = vor.u32 %v520_v28, %v519_v27  ;;  %v4832_v26 = vld [vmem:[#allocation2 + $0x3c] sm:$0xf] }
  0x50   : > { %441 = vst.msk [vmem:[#allocation2 + $0x84] sm:$0xf] %vm406_vm0, %v4421_v0  ;;  %v844_v37 = vld [vmem:[#allocation2 + $0x68] sm:$0x1]  ;;  %v542_v52 = vshrl.u32 %v383_v34, 16  ;;  %v358_v54 = vmax.f32 %v326_v35, 0.0  ;;  %v530_v56 = vor.u32 %v528_v31, %v4790_v44  ;;  %v279_v6 = vmul.f32 %v4562_v11, %v243_v47 }
  0x51   : > { %442 = vst.msk [vmem:[#allocation2 + $0x88] sm:$0xf] %vm406_vm0, %v4421_v0  ;;  %v523_v55 = vrot.slane %v519_v27, 4  ;;  %v537_v57 = vshll.u32 %v382_v32, 16  ;;  %v359_v59 = vmax.f32 %v327_v39, 0.0  ;;  %v536_v62 = vrot.slane %v534_v46, 7 }
  0x52   : > { %443 = vst.msk [vmem:[#allocation2 + $0x8c] sm:$0x1] %vm409_vm1, %v4421_v0  ;;  %v390_v1 = vpack.c.bf16 %v358_v54, %v358_v54  ;;  %v314_v8 = vadd.f32 %v4569_v13, %v278_v40  ;;  %v4814_v9 = vsel %vm4704_vm8, %v600_v41, %v844_v37  ;;  %v544_v10 = vrot.slane %v542_v52, 7  ;;  %v257_v37 = vld [vmem:[%s4525_s11 + $0x98] sm:$0xff]  ;;  %v4852_v49 = vld [vmem:[#allocation2 + $0x6c] sm:$0xf] }
  0x53   : > { %444 = vst.msk [vmem:[#allocation2 + $0x90] sm:$0xf] %vm406_vm0, %v4421_v0  ;;  %v545_v16 = vshll.u32 %v383_v34, 16  ;;  %v391_v18 = vpack.c.bf16 %v359_v59, %v359_v59  ;;  %v532_v20 = vrot.slane %v4790_v44, 4  ;;  %v813_v21 = vsel %vm4657_vm7, %v4801_v51, %v4792_v45  ;;  %v256_v44 = vld [vmem:[%s4525_s11 + $0x90] sm:$0xff] }
  0x54   : > { %445 = vst.msk [vmem:[#allocation2 + $0x94] sm:$0xf] %vm406_vm0, %v4421_v0  ;;  %v602_v23 = vshrl.u32 %v390_v1, 16  ;;  %v605_v24 = vshll.u32 %v390_v1, 16  ;;  %v4830_v25 = vsel %vm4645_vm6, %v523_v55, %v530_v56  ;;  %v315_v29 = vadd.f32 %v4569_v13, %v279_v6 }
  0x55   : > { %446 = vst.msk [vmem:[#allocation2 + $0x98] sm:$0x1] %vm409_vm1, %v4421_v0  ;;  %v610_v27 = vshrl.u32 %v391_v18, 16  ;;  %v613_v28 = vshll.u32 %v391_v18, 16  ;;  %v4837_v30 = vor.u32 %v537_v57, %v536_v62  ;;  %v540_v63 = vrot.slane %v536_v62, 4 }
  0x56   : > { %447 = vst.msk [vmem:[#allocation2 + $0x9c] sm:$0xf] %vm406_vm0, %v4421_v0  ;;  %v604_v3 = vrot.slane %v602_v23, 7  ;;  %v547_v31 = vor.u32 %v545_v16, %v544_v10  ;;  %v549_v32 = vrot.slane %v544_v10, 4  ;;  %v347_v35 = vmax.f32 %v315_v29, 0.0 }
  0x57   : > { %448 = vst.msk [vmem:[#allocation2 + $0xa0] sm:$0xf] %vm406_vm0, %v4421_v0  ;;  %v612_v34 = vrot.slane %v610_v27, 7  ;;  %v293_v46 = vmul.f32 %v4562_v11, %v257_v37  ;;  %v292_v54 = vmul.f32 %v4562_v11, %v256_v44  ;;  %v820_v38 = vsel %vm4657_vm7, %v4837_v30, %v4832_v26 }
  0x58   : > { %449 = vst.msk [vmem:[#allocation2 + $0xa4] sm:$0x1] %vm409_vm1, %v4421_v0  ;;  %v4846_v39 = vor.u32 %v605_v24, %v604_v3  ;;  %v608_v40 = vrot.slane %v604_v3, 4  ;;  %v379_v52 = vpack.c.bf16 %v347_v35, %v347_v35  ;;  %vm1368_vm9 = vcmask 1046528  }
  0x59   : > { %450 = vst.msk [vmem:[#allocation2 + $0xa8] sm:$0xf] %vm406_vm0, %v4421_v0  ;;  %v617_v47 = vrot.slane %v612_v34, 4  ;;  %v4906_v18 = vadd.f32 %v4569_v13, %v292_v54  ;;  %vm1417_vm10 = vcmask 523264  }
  0x5a   : > { %451 = vst.msk [vmem:[#allocation2 + $0xac] sm:$0xf] %vm406_vm0, %v4421_v0  ;;  %v508_v59 = vshrl.u32 %v379_v52, 16  ;;  %v848_v48 = vsel %vm4657_vm7, %v4846_v39, %v4852_v49 }
  0x5b   : > { %452 = vst.msk [vmem:[#allocation2 + $0xb0] sm:$0x1] %vm409_vm1, %v4421_v0 }
  0x5c   : > { %453 = vst.msk [vmem:[#allocation2 + $0xb4] sm:$0xf] %vm406_vm0, %v4421_v0  ;;  %v4903_v16 = vrot.slane %v508_v59, 7 }
  0x5d   : > { %454 = vst.msk [vmem:[#allocation2 + $0xb8] sm:$0xf] %vm406_vm0, %v4421_v0 }
  0x5e   : > { %455 = vst.msk [vmem:[#allocation2 + $0xbc] sm:$0x1] %vm409_vm1, %v4421_v0 }
  0x5f   : > { %456 = vst.msk [vmem:[#allocation2 + $0xc0] sm:$0xf] %vm406_vm0, %v4421_v0 }
  0x60   : > { %457 = vst.msk [vmem:[#allocation2 + $0xc4] sm:$0xf] %vm406_vm0, %v4421_v0 }
  0x61   : > { %458 = vst.msk [vmem:[#allocation2 + $0xc8] sm:$0x1] %vm409_vm1, %v4421_v0 }
  0x62   : > { %459 = vst.msk [vmem:[#allocation2 + $0xcc] sm:$0xf] %vm406_vm0, %v4421_v0 }
  0x63   : > { %460 = vst.msk [vmem:[#allocation2 + $0xd0] sm:$0xf] %vm406_vm0, %v4421_v0 }
  0x64   : > { %461 = vst.msk [vmem:[#allocation2 + $0xd4] sm:$0x1] %vm409_vm1, %v4421_v0  ;;  %v816_v0 = vld [vmem:[#allocation2 + $0x38] sm:$0x1] }
  0x65   : > { %791 = vst [vmem:[#allocation2 + $0xc] sm:$0xf] %v790_v22  ;;  %v346_v22 = vmax.f32 %v314_v8, 0.0  ;;  %v817_v33 = vsel %vm4704_vm8, %v532_v20, %v816_v0 }
  0x66   : > { %792 = vst.msk [vmem:[#allocation2 + $0x10] sm:$0xf] %vm406_vm0, %v4671_v19  ;;  %v823_v19 = vld [vmem:[#allocation2 + $0x44] sm:$0x1] }
  0x67   : > { %797 = vst [vmem:[#allocation2 + $0x14] sm:$0x1] %v4730_v58  ;;  %v378_v41 = vpack.c.bf16 %v346_v22, %v346_v22  ;;  %v615_v58 = vor.u32 %v613_v28, %v612_v34  ;;  %v4876_v56 = vsel %vm4704_vm8, %v549_v32, %v823_v19 }
  0x68   : > { %835 = vst [vmem:[#allocation2 + $0x54] sm:$0xf] %v834_v61  ;;  %v851_v61 = vld [vmem:[#allocation2 + $0x74] sm:$0x1] }
  0x69   : > { %836 = vst.msk [vmem:[#allocation2 + $0x58] sm:$0xf] %vm406_vm0, %v4734_v60  ;;  %v500_v55 = vshrl.u32 %v378_v41, 16  ;;  %v4863_v60 = vadd.f32 %v4569_v13, %v293_v46  ;;  %v503_v57 = vshll.u32 %v378_v41, 16  ;;  %v4882_v62 = vsel %vm4645_vm6, %v608_v40, %v615_v58 }
  0x6a   : > { %839 = vst [vmem:[#allocation2 + $0x5c] sm:$0x1] %v4744_v4  ;;  %v4872_v4 = vsel %vm4645_vm6, %v540_v63, %v547_v31 }
  0x6b   : > { %800 = vst [vmem:[#allocation2 + $0x18] sm:$0xf] %v799_v12  ;;  %v4888_v53 = vrot.slane %v500_v55, 7  ;;  %v511_v12 = vshll.u32 %v379_v52, 16  ;;  %v361_v20 = vmax.f32 %v4863_v60, 0.0 }
  0x6c   : > { %801 = vst.msk [vmem:[#allocation2 + $0x1c] sm:$0xf] %vm406_vm0, %v4748_v5  ;;  %v4901_v5 = vsel %vm4704_vm8, %v617_v47, %v851_v61 }
  0x6d   : > { %v4890_v1 = vld [vmem:[#allocation2 + $0xc] sm:$0xff]   ;;  %804 = vst [vmem:[#allocation2 + $0x20] sm:$0x1] %v4780_v36  ;;  %v4917_v13 = vor.u32 %v503_v57, %v4888_v53  ;;  %v506_v28 = vrot.slane %v4888_v53, 4  ;;  %v4924_v15 = vor.u32 %v511_v12, %v4903_v16 }
  0x6e   : > { %v4892_v6 = vld [vmem:[#allocation2 + $0xc] sm:$0xf0]  ;;  %v1522_v23 = vld [vmem:[#allocation2 + $0x14] sm:$0x1]  ;;  %842 = vst [vmem:[#allocation2 + $0x60] sm:$0xf] %v841_v43 }
  0x6f   : > { %6237 = vst [vmem:[#allocation10_spill] sm:$0xff] %v4892_v6  ;;  %v4894_v8 = vld [vmem:[#allocation2 + $0xc] sm:$0xff]   ;;  %v936_v24 = vld [vmem:[#allocation2 + $0x14] sm:$0x1]  ;;  %v1650_v36 = vunpack.c.l.b16 %v1522_v23  ;;  %v4245_v27 = vld [vmem:[#allocation2 + $0x54] sm:$0xe] }
  0x70   : > { %v4896_v10 = vld [vmem:[#allocation2 + $0xc] sm:$0xf0]  ;;  %v1064_v0 = vunpack.c.l.b16 %v936_v24  ;;  %843 = vst.msk [vmem:[#allocation2 + $0x64] sm:$0xf] %vm406_vm0, %v4799_v50  ;;  %v4920_v29 = vld [vmem:[#allocation2 + $0x54] sm:$0xff]   ;;  %v1683_v50 = vshrl.u32 %v4890_v1, 16 }
  0x71   : > { %6238 = vst [vmem:[#allocation11_spill] sm:$0xff] %v4896_v10  ;;  %v4244_v63 = vld [vmem:[#allocation2 + $0x54] sm:$0xf0]  ;;  %v4926_v17 = vpack.c.b16 %v1650_v36, %v1650_v36  ;;  %v942_v3 = vld [vmem:[#allocation2 + $0x5c] sm:$0x1]  ;;  %v1685_v22 = vshll.u32 %v4890_v1, 16 }
  0x72   : > { %846 = vst [vmem:[#allocation2 + $0x68] sm:$0x1] %v4814_v9  ;;  %v4928_v43 = vpack.c.b16 %v1064_v0, %v1064_v0  ;;  %v1109_v9 = vshrl.u32 %v4894_v8, 16  ;;  %v1111_v31 = vshll.u32 %v4894_v8, 16  ;;  %v1070_v35 = vunpack.c.l.b16 %v942_v3  ;;  %v868_v10 = vld [vmem:[#allocation2 + $0x90] sm:$0xf] }
  0x73   : > { %6239 = vst [vmem:[#allocation12_spill] sm:$0xff] %v4926_v17  ;;  %v1690_v32 = vshll.u32 %v4926_v17, 16  ;;  %v4099_v37 = vld [vmem:[#allocation2 + $0x18] sm:$0xff]   ;;  %v1687_v45 = vrot.slane %v1685_v22, 1 }
  0x74   : > { %6240 = vst [vmem:[#allocation13_spill] sm:$0xff] %v4928_v43  ;;  %v1116_v34 = vshll.u32 %v4928_v43, 16  ;;  %v1113_v51 = vrot.slane %v1111_v31, 1  ;;  %v1523_v19 = vld [vmem:[#allocation2 + $0x20] sm:$0x1]  ;;  %v1695_v40 = vshrl.u32 %v4099_v37, 16  ;;  %v4943_v46 = vpack.c.b16 %v1070_v35, %v1070_v35 }
  0x75   : > { %814 = vst [vmem:[#allocation2 + $0x30] sm:$0xf] %v813_v21  ;;  %v4246_v21 = vor.u32 %v4245_v27, %v4244_v63  ;;  %v1692_v41 = vrot.slane %v1690_v32, 1  ;;  %v1651_v58 = vunpack.c.l.b16 %v1523_v19  ;;  %v4117_v47 = vld [vmem:[#allocation2 + $0x60] sm:$0xe]  ;;  %v1697_v55 = vshll.u32 %v4099_v37, 16 }
  0x76   : > { %815 = vst.msk [vmem:[#allocation2 + $0x34] sm:$0xf] %vm406_vm0, %v4830_v25  ;;  %v1118_v44 = vrot.slane %v1116_v34, 1  ;;  %v4088_v52 = vld [vmem:[#allocation2 + $0x60] sm:$0xe]  ;;  %v1688_v25 = vor.u32 %v1687_v45, %v1683_v50  ;;  %v1114_v54 = vor.u32 %v1113_v51, %v1109_v9  ;;  %v4961_v37 = vld [vmem:[#allocation2 + $0x54] sm:$0xff]  }
  0x77   : > { %818 = vst [vmem:[#allocation2 + $0x38] sm:$0x1] %v817_v33  ;;  %v1390_v61 = vrot.slane %v4246_v21, 1  ;;  %v4116_v57 = vld [vmem:[#allocation2 + $0x60] sm:$0xf0]  ;;  %v1391_v33 = vrot.slane %v4943_v46, 1  ;;  %v4946_v12 = vpack.c.b16 %v1651_v58, %v1651_v58 }
  0x78   : > { %v4087_v59 = vld [vmem:[#allocation2 + $0x60] sm:$0xf0]  ;;  %v4118_v24 = vor.u32 %v4117_v47, %v4116_v57  ;;  %v1693_v27 = vsel %vm1095_vm2, %v1688_v25, %v1692_v41  ;;  %v1119_v63 = vsel %vm1095_vm2, %v1114_v54, %v1118_v44  ;;  %v1699_v3 = vrot.slane %v1697_v55, 1  ;;  %821 = vst [vmem:[#allocation2 + $0x3c] sm:$0xf] %v820_v38 }
  0x79   : > { %6241 = vst [vmem:[#allocation14_spill] sm:$0xff] %v4946_v12  ;;  %v1529_v23 = vld [vmem:[#allocation2 + $0x68] sm:$0x1]  ;;  %v4089_v0 = vor.u32 %v4088_v52, %v4087_v59  ;;  %v1528_v50 = vld [vmem:[#allocation2 + $0x5c] sm:$0x1]  ;;  %1874 = vrot.lane.b32.xlu0 %v1693_v27, %s4422_s14  ;;  %1290 = vrot.lane.b32.xlu1 %v1119_v63, %s4422_s14  ;;  %v1392_v9 = vsel %vm1368_vm9, %v1390_v61, %v1391_v33  ;;  %v1702_v31 = vshll.u32 %v4946_v12, 16 }
  0x7a   : > { %v943_v36 = vld [vmem:[#allocation2 + $0x68] sm:$0x1]  ;;  %v1657_v22 = vunpack.c.l.b16 %v1529_v23  ;;  %v1975_v32 = vrot.slane %v4118_v24, 1  ;;  %822 = vst.msk [vmem:[#allocation2 + $0x40] sm:$0xf] %vm406_vm0, %v4872_v4  ;;  %3859 = vmatmul.msk.bf16.vlgmr.msra.gmra.mxu3 %vm1417_vm10, %v1392_v9  ;;  %v4966_v26 = vor.u32 %v1699_v3, %v1695_v40  ;;  %v1656_v54 = vunpack.c.l.b16 %v1528_v50  ;;  %v249_v12 = vld [vmem:[%s4525_s11 + $0x58] sm:$0xff] }
  0x7b   : > { %v1071_v35 = vunpack.c.l.b16 %v943_v36  ;;  %6242 = vst [vmem:[#allocation15_spill] sm:$0xff] %v4961_v37  ;;  %v4963_v45 = vld [vmem:[#allocation2 + $0x54] sm:$0xf0]  ;;  %v1704_v19 = vrot.slane %v1702_v31, 1  ;;  %v1393_v4 = vrot.slane %v4089_v0, 1  ;;  %v1755_v53 = vshrl.u32 %v4961_v37, 16 }
  0x7c   : > { %6243 = vst [vmem:[#allocation16_spill] sm:$0xff] %v4963_v45  ;;  %v4968_v30 = vpack.c.b16 %v1657_v22, %v1657_v22  ;;  %v805_v47 = vld [vmem:[#allocation2 + $0x24] sm:$0xf]  ;;  %v937_v61 = vld [vmem:[#allocation2 + $0x20] sm:$0x1]  ;;  %v4998_v57 = vpack.c.b16 %v1656_v54, %v1656_v54 }
  0x7d   : > { %v4100_v34 = vld [vmem:[#allocation2 + $0x30] sm:$0xff]   ;;  %825 = vst [vmem:[#allocation2 + $0x44] sm:$0x1] %v4876_v56  ;;  %v4971_v44 = vpack.c.b16 %v1071_v35, %v1071_v35  ;;  %v1705_v56 = vsel %vm1095_vm2, %v4966_v26, %v1704_v19  ;;  %v809_v59 = vld [vmem:[#allocation2 + $0x2c] sm:$0x1]  ;;  %v1065_v24 = vunpack.c.l.b16 %v937_v61 }
  0x7e   : > { %v1525_v38 = vld [vmem:[#allocation2 + $0x38] sm:$0x1]  ;;  %v1719_v51 = vshrl.u32 %v4100_v34, 16  ;;  %v1721_v21 = vshll.u32 %v4100_v34, 16  ;;  %849 = vst [vmem:[#allocation2 + $0x6c] sm:$0xf] %v848_v48 }
  0x7f   : > { %v1653_v41 = vunpack.c.l.b16 %v1525_v38  ;;  %v1976_v40 = vrot.slane %v4968_v30, 1  ;;  %850 = vst.msk [vmem:[#allocation2 + $0x70] sm:$0xf] %vm406_vm0, %v4882_v62  ;;  %v1394_v25 = vrot.slane %v4971_v44, 1  ;;  %v514_v62 = vsel %vm4645_vm6, %v506_v28, %v4924_v15 }
  0x80   : > { %v1723_v58 = vrot.slane %v1721_v21, 1  ;;  %853 = vst [vmem:[#allocation2 + $0x74] sm:$0x1] %v4901_v5  ;;  %v515_v5 = vrot.slane %v4903_v16, 4  ;;  %v1757_v28 = vshll.u32 %v4961_v37, 16  ;;  %v806_v15 = vsel %vm4657_vm7, %v4917_v13, %v805_v47 }
  0x81   : > { %v4983_v52 = vpack.c.b16 %v1653_v41, %v1653_v41  ;;  %v1977_v39 = vsel %vm1368_vm9, %v1975_v32, %v1976_v40  ;;  %v1395_v55 = vsel %vm1368_vm9, %v1393_v4, %v1394_v25  ;;  %6245 = vst [vmem:[#allocation18_spill] sm:$0xff] %v4998_v57  ;;  %v5002_v33 = vld [vmem:[#allocation2 + $0x3c] sm:$0xff]   ;;  %1876 = vrot.lane.b32.xlu1 %v1705_v56, %s4422_s14  ;;  %v1762_v0 = vshll.u32 %v4998_v57, 16  ;;  %v872_v37 = vld [vmem:[#allocation2 + $0x98] sm:$0x1] }
  0x82   : > { %v4988_v49 = vor.u32 %v1723_v58, %v1719_v51  ;;  %3795 = vmatmul.msk.bf16.vlgmr.msra.gmra.mxu1 %vm1417_vm10, %v1977_v39  ;;  %808 = vst.msk [vmem:[#allocation2 + $0x28] sm:$0xf] %vm406_vm0, %v514_v62  ;;  %v5004_v23 = vld [vmem:[#allocation2 + $0x3c] sm:$0xf0]  ;;  %v1759_v3 = vrot.slane %v1757_v28, 1  ;;  %v810_v22 = vsel %vm4704_vm8, %v515_v5, %v809_v59  ;;  %v5015_v50 = vpack.c.b16 %v1065_v24, %v1065_v24 }
  0x83   : > { %6244 = vst [vmem:[#allocation17_spill] sm:$0xff] %v4983_v52  ;;  %v1726_v48 = vshll.u32 %v4983_v52, 16  ;;  %v1764_v32 = vrot.slane %v1762_v0, 1  ;;  %v1157_v41 = vshrl.u32 %v5002_v33, 16  ;;  %v1159_v4 = vshll.u32 %v5002_v33, 16 }
  0x84   : > { %6246 = vst [vmem:[#allocation19_spill] sm:$0xff] %v5002_v33  ;;  %v940_v16 = vld [vmem:[#allocation2 + $0x44] sm:$0x1]  ;;  %v1760_v38 = vor.u32 %v1759_v3, %v1755_v53  ;;  %v1128_v53 = vshll.u32 %v5015_v50, 16  ;;  %v882_v33 = vld [vmem:[#allocation2 + $0xa8] sm:$0xf] }
  0x85   : > { %6247 = vst [vmem:[#allocation20_spill] sm:$0xff] %v5004_v23  ;;  %v1728_v36 = vrot.slane %v1726_v48, 1  ;;  %v1068_v27 = vunpack.c.l.b16 %v940_v16  ;;  %v4248_v63 = vld [vmem:[#allocation2 + $0x6c] sm:$0xe]  ;;  %v1161_v54 = vrot.slane %v1159_v4, 1 }
  0x86   : > { %807 = vst [vmem:[#allocation2 + $0x24] sm:$0xf] %v806_v15  ;;  %v5019_v13 = vld [vmem:[#allocation2 + $0x6c] sm:$0xff]   ;;  %v5029_v25 = vsel %vm1095_vm2, %v1760_v38, %v1764_v32 }
  0x87   : > { %6248 = vst [vmem:[#allocation21_spill] sm:$0xff] %v5015_v50  ;;  %v1729_v9 = vsel %vm1095_vm2, %v4988_v49, %v1728_v36  ;;  %v4247_v31 = vld [vmem:[#allocation2 + $0x6c] sm:$0xf0]  ;;  %v5021_v34 = vpack.c.b16 %v1068_v27, %v1068_v27  ;;  %v1530_v35 = vld [vmem:[#allocation2 + $0x74] sm:$0x1]  ;;  %v1162_v28 = vor.u32 %v1161_v54, %v1157_v41  ;;  %v1130_v27 = vrot.slane %v1128_v53, 1 }
  0x88   : > { %811 = vst [vmem:[#allocation2 + $0x2c] sm:$0x1] %v810_v22  ;;  %v5023_v51 = vld [vmem:[#allocation2 + $0x6c] sm:$0xff]   ;;  %v944_v19 = vld [vmem:[#allocation2 + $0x74] sm:$0x1]  ;;  %v1658_v40 = vunpack.c.l.b16 %v1530_v35  ;;  %v4249_v56 = vor.u32 %v4248_v63, %v4247_v31  ;;  %v393_v41 = vpack.c.bf16 %v361_v20, %v361_v20 }
  0x89   : > { %6249 = vst [vmem:[#allocation22_spill] sm:$0xff] %v5021_v34  ;;  %v4250_v21 = vld [vmem:[#allocation2 + $0x6c] sm:$0xf0]  ;;  %v4251_v58 = vld [vmem:[#allocation2 + $0x6c] sm:$0xe]  ;;  %v1164_v47 = vshll.u32 %v5021_v34, 16  ;;  %v1072_v39 = vunpack.c.l.b16 %v944_v19  ;;  %1880 = vrot.lane.b32.xlu1 %v1729_v9, %s4422_s14  ;;  %v1131_v38 = vsel %vm1095_vm2, %v4966_v26, %v1130_v27 }
  0x8a   : > { %v5031_v61 = vpack.c.b16 %v1658_v40, %v1658_v40  ;;  %v1978_v48 = vrot.slane %v4249_v56, 1  ;;  %v5035_v59 = vld [vmem:[#allocation2 + $0x24] sm:$0xf0]  ;;  %v2704_v36 = vld [vmem:[#allocation2 + $0x20] sm:$0x1]  ;;  %3860 = vmatmul.msk.bf16.gmra.mxu3 %vm1417_vm10, %v1395_v55  ;;  %v4252_v16 = vor.u32 %v4251_v58, %v4250_v21  ;;  %1292 = vrot.lane.b32.xlu2 %v1131_v38, %s4422_s14  ;;  %v360_v21 = vmax.f32 %v4906_v18, 0.0 }
  0x8b   : > { %v1166_v62 = vrot.slane %v1164_v47, 1  ;;  %6250 = vst [vmem:[#allocation23_spill] sm:$0xff] %v5035_v59  ;;  %v5040_v24 = vpack.c.b16 %v1072_v39, %v1072_v39  ;;  %v5045_v3 = vld [vmem:[#allocation2 + $0x24] sm:$0xf0]  ;;  %v2832_v19 = vunpack.c.l.b16 %v2704_v36  ;;  %v627_v18 = vshrl.u32 %v393_v41, 16  ;;  %v5395_v7 = vld [vmem:[#allocation2 + $0x6c] sm:$0xff]  }
  0x8c   : > { %v1979_v15 = vrot.slane %v5031_v61, 1  ;;  %6251 = vst [vmem:[#allocation24_spill] sm:$0xff] %v5045_v3  ;;  %v1396_v35 = vrot.slane %v4252_v16, 1  ;;  %v392_v39 = vpack.c.bf16 %v360_v21, %v360_v21  ;;  %v865_v59 = vld [vmem:[#allocation2 + $0x8c] sm:$0x1]  ;;  %v1207_v42 = vshll.u32 %v5023_v51, 16 }
  0x8d   : > { %v5033_v5 = vld [vmem:[#allocation2 + $0x24] sm:$0xff]   ;;  %v1167_v22 = vsel %vm1095_vm2, %v1162_v28, %v1166_v62  ;;  %v1397_v9 = vrot.slane %v5040_v24, 1  ;;  %v5064_v56 = vpack.c.b16 %v2832_v19, %v2832_v19  ;;  %v630_v62 = vshll.u32 %v393_v41, 16  ;;  %v258_v41 = vld [vmem:[%s4525_s11 + $0xa0] sm:$0xff] }
  0x8e   : > { %v5043_v63 = vld [vmem:[#allocation2 + $0x24] sm:$0xff]   ;;  %v1980_v31 = vsel %vm1368_vm9, %v1978_v48, %v1979_v15  ;;  %v1133_v58 = vshrl.u32 %v5033_v5, 16  ;;  %v1135_v47 = vshll.u32 %v5033_v5, 16  ;;  %v619_v36 = vshrl.u32 %v392_v39, 16 }
  0x8f   : > { %v938_v0 = vld [vmem:[#allocation2 + $0x2c] sm:$0x1]  ;;  %v5060_v40 = vsel %vm1368_vm9, %v1396_v35, %v1397_v9  ;;  %v2872_v20 = vshll.u32 %v5064_v56, 16  ;;  %v5069_v53 = vld [vmem:[#allocation2 + $0x24] sm:$0xff]   ;;  %v622_v16 = vshll.u32 %v392_v39, 16 }
  0x90   : > { %v1066_v32 = vunpack.c.l.b16 %v938_v0  ;;  %v1524_v4 = vld [vmem:[#allocation2 + $0x2c] sm:$0x1]  ;;  %v1137_v60 = vrot.slane %v1135_v47, 1  ;;  %6253 = vst [vmem:[#allocation26_spill] sm:$0xff] %v5069_v53  ;;  %v5071_v28 = vld [vmem:[#allocation2 + $0x24] sm:$0xf0] }
  0x91   : > { %v1652_v48 = vunpack.c.l.b16 %v1524_v4  ;;  %1298 = vrot.lane.b32.xlu1 %v1167_v22, %s4422_s14  ;;  %v629_v0 = vrot.slane %v627_v18, 7  ;;  %v858_v9 = vld [vmem:[#allocation2 + $0x80] sm:$0x1]  ;;  %v621_v35 = vrot.slane %v619_v36, 7  ;;  %v2705_v21 = vld [vmem:[#allocation2 + $0x2c] sm:$0x1] }
  0x92   : > { %v5052_v55 = vpack.c.b16 %v1066_v32, %v1066_v32  ;;  %3796 = vmatmul.msk.bf16.gmra.mxu1 %vm1417_vm10, %v1980_v31  ;;  %v1138_v27 = vor.u32 %v1137_v60, %v1133_v58  ;;  %v2874_v31 = vrot.slane %v2872_v20, 1  ;;  %v854_v47 = vld [vmem:[#allocation2 + $0x78] sm:$0xf]  ;;  %v1709_v58 = vshll.u32 %v5043_v63, 16  ;;  %v259_v39 = vld [vmem:[%s4525_s11 + $0xa8] sm:$0xff] }
  0x93   : > { %v5074_v32 = vpack.c.b16 %v1652_v48, %v1652_v48  ;;  %v632_v38 = vor.u32 %v630_v62, %v629_v0  ;;  %v634_v19 = vrot.slane %v629_v0, 4  ;;  %v624_v18 = vor.u32 %v622_v16, %v621_v35  ;;  %v5090_v36 = vld [vmem:[#allocation2 + $0x3c] sm:$0xff]  }
  0x94   : > { %6252 = vst [vmem:[#allocation25_spill] sm:$0xff] %v5052_v55  ;;  %v1140_v54 = vshll.u32 %v5052_v55, 16  ;;  %v5080_v22 = vsel %vm1095_vm2, %v4966_v26, %v2874_v31  ;;  %v625_v60 = vrot.slane %v621_v35, 4  ;;  %v1711_v48 = vrot.slane %v1709_v58, 1  ;;  %v5092_v0 = vld [vmem:[#allocation2 + $0x3c] sm:$0xf0] }
  0x95   : > { %6254 = vst [vmem:[#allocation27_spill] sm:$0xff] %v5074_v32  ;;  %v859_v62 = vsel %vm4704_vm8, %v634_v19, %v858_v9  ;;  %v1714_v20 = vshll.u32 %v5074_v32, 16  ;;  %v294_v26 = vmul.f32 %v4562_v11, %v258_v41  ;;  %v855_v16 = vsel %vm4657_vm7, %v624_v18, %v854_v47  ;;  %v5101_v35 = vld [vmem:[%s6199_s2] ss:$0 sm:$0xff]  ;;  %v3943_v19 = vld [vmem:[#allocation5 + $0x38] sm:$0xff] }
  0x96   : > { %v1142_v15 = vrot.slane %v1140_v54, 1  ;;  %v1707_v54 = vshrl.u32 %v5043_v63, 16  ;;  %860 = vst [vmem:[#allocation2 + $0x80] sm:$0x1] %v859_v62  ;;  %v633_v31 = vsel %vm4645_vm6, %v625_v60, %v632_v38  ;;  %v295_v11 = vmul.f32 %v5101_v35, %v259_v39  ;;  %v5109_v38 = vld [vmem:[%s6200_s3] ss:$0 sm:$0xff]  ;;  %2493 = vmatpush.bf16.msra.mxu2 %v3943_v19 }
  0x97   : > { %6255 = vst [vmem:[#allocation28_spill] sm:$0xff] %v5090_v36  ;;  %v1716_v9 = vrot.slane %v1714_v20, 1  ;;  %v260_v39 = vld [vmem:[%s4525_s11 + $0xb0] sm:$0xff]  ;;  %v2877_v60 = vshrl.u32 %v5069_v53, 16  ;;  %v2879_v62 = vshll.u32 %v5069_v53, 16  ;;  %v1731_v45 = vshrl.u32 %v5090_v36, 16 }
  0x98   : > { %v1143_v4 = vsel %vm1095_vm2, %v1138_v27, %v1142_v15  ;;  %v2833_v15 = vunpack.c.l.b16 %v2705_v21  ;;  %6256 = vst [vmem:[#allocation29_spill] sm:$0xff] %v5092_v0  ;;  %v1526_v27 = vld [vmem:[#allocation2 + $0x44] sm:$0x1]  ;;  %v1712_v21 = vor.u32 %v1711_v48, %v1707_v54  ;;  %v331_v47 = vadd.f32 %v5109_v38, %v295_v11  ;;  %v2706_v54 = vld [vmem:[#allocation2 + $0x38] sm:$0x1]  ;;  %v3942_v20 = vld [vmem:[#allocation5 + $0x30] sm:$0xff] }
  0x99   : > { %1294 = vrot.lane.b32.xlu0 %v1143_v4, %s4422_s14  ;;  %856 = vst [vmem:[#allocation2 + $0x78] sm:$0xf] %v855_v16  ;;  %v330_v4 = vadd.f32 %v5109_v38, %v294_v26  ;;  %1886 = vrot.lane.b32.xlu1 %v5029_v25, %s4422_s14  ;;  %v1654_v58 = vunpack.c.l.b16 %v1526_v27  ;;  %v2881_v27 = vrot.slane %v2879_v62, 1  ;;  %v2834_v16 = vunpack.c.l.b16 %v2706_v54  ;;  %v261_v11 = vld [vmem:[%s4525_s11 + $0xb8] sm:$0xff] }
  0x9a   : > { %v5104_v41 = vpack.c.b16 %v2833_v15, %v2833_v15  ;;  %857 = vst.msk [vmem:[#allocation2 + $0x7c] sm:$0xf] %vm406_vm0, %v633_v31  ;;  %3861 = vmatmul.msk.bf16.gmra.mxu3 %vm1417_vm10, %v5060_v40  ;;  %v1717_v18 = vsel %vm1095_vm2, %v1712_v21, %v1716_v9  ;;  %v363_v15 = vmax.f32 %v331_v47, 0.0  ;;  %v296_v40 = vmul.f32 %v5101_v35, %v260_v39  ;;  %v889_v53 = vld [vmem:[#allocation2 + $0xb4] sm:$0xf] }
  0x9b   : > { %1878 = vrot.lane.b32.xlu2 %v1717_v18, %s4422_s14  ;;  %v362_v48 = vmax.f32 %v330_v4, 0.0  ;;  %v5124_v26 = vpack.c.b16 %v1654_v58, %v1654_v58  ;;  %v1733_v34 = vshll.u32 %v5090_v36, 16  ;;  %2494 = vmatpush.bf16.msra.mxu2 %v3942_v20  ;;  %v2882_v47 = vor.u32 %v2881_v27, %v2877_v60  ;;  %v886_v36 = vld [vmem:[#allocation2 + $0xb0] sm:$0x1] }
  0x9c   : > { %6257 = vst [vmem:[#allocation30_spill] sm:$0xff] %v5104_v41  ;;  %v2884_v25 = vshll.u32 %v5104_v41, 16  ;;  %v395_v57 = vpack.c.bf16 %v363_v15, %v363_v15  ;;  %v5131_v0 = vpack.c.b16 %v2834_v16, %v2834_v16  ;;  %v297_v39 = vmul.f32 %v5101_v35, %v261_v11  ;;  %v861_v16 = vld [vmem:[#allocation2 + $0x84] sm:$0xf] }
  0x9d   : > { %6258 = vst [vmem:[#allocation31_spill] sm:$0xff] %v5124_v26  ;;  %v1531_v9 = vld [vmem:[#allocation2 + $0x80] sm:$0x1]  ;;  %v394_v21 = vpack.c.bf16 %v362_v48, %v362_v48  ;;  %v1738_v58 = vshll.u32 %v5124_v26, 16 }
  0x9e   : > { %v2886_v31 = vrot.slane %v2884_v25, 1  ;;  %v945_v19 = vld [vmem:[#allocation2 + $0x80] sm:$0x1]  ;;  %v1659_v18 = vunpack.c.l.b16 %v1531_v9  ;;  %6259 = vst [vmem:[#allocation32_spill] sm:$0xff] %v5131_v0  ;;  %v644_v9 = vshrl.u32 %v395_v57, 16 }
  0x9f   : > { %v1073_v4 = vunpack.c.l.b16 %v945_v19  ;;  %v636_v54 = vshrl.u32 %v394_v21, 16  ;;  %v639_v23 = vshll.u32 %v394_v21, 16  ;;  %v647_v21 = vshll.u32 %v395_v57, 16 }
  0xa0   : > { %v4120_v62 = vld [vmem:[#allocation2 + $0x78] sm:$0xe]  ;;  %v5134_v15 = vpack.c.b16 %v1659_v18, %v1659_v18  ;;  %v2887_v20 = vsel %vm1095_vm2, %v2882_v47, %v2886_v31  ;;  %v646_v26 = vrot.slane %v644_v9, 7  ;;  %v1740_v57 = vrot.slane %v1738_v58, 1  ;;  %v3941_v58 = vld [vmem:[#allocation5 + $0x28] sm:$0xff] }
  0xa1   : > { %v4091_v25 = vld [vmem:[#allocation2 + $0x78] sm:$0xe]  ;;  %v4119_v48 = vld [vmem:[#allocation2 + $0x78] sm:$0xf0]  ;;  %v5136_v55 = vpack.c.b16 %v1073_v4, %v1073_v4  ;;  %3056 = vrot.lane.b32.xlu1 %v5080_v22, %s4422_s14  ;;  %v638_v19 = vrot.slane %v636_v54, 7  ;;  %v1735_v4 = vrot.slane %v1733_v34, 1  ;;  %2495 = vmatpush.bf16.msra.mxu2 %v3941_v58 }
  0xa2   : > { %v4090_v52 = vld [vmem:[#allocation2 + $0x78] sm:$0xf0]  ;;  %v4121_v60 = vor.u32 %v4120_v62, %v4119_v48  ;;  %v1982_v11 = vrot.slane %v5134_v15, 1  ;;  %v939_v22 = vld [vmem:[#allocation2 + $0x38] sm:$0x1]  ;;  %v649_v62 = vor.u32 %v647_v21, %v646_v26  ;;  %v248_v54 = vld [vmem:[%s4525_s11 + $0x50] sm:$0xff]  ;;  %v333_v21 = vadd.f32 %v5109_v38, %v297_v39 }
  0xa3   : > { %v4092_v27 = vor.u32 %v4091_v25, %v4090_v52  ;;  %v1400_v18 = vrot.slane %v5136_v55, 1  ;;  %v641_v32 = vor.u32 %v639_v23, %v638_v19  ;;  %v642_v3 = vrot.slane %v638_v19, 4 }
  0xa4   : > { %v1981_v31 = vrot.slane %v4121_v60, 1  ;;  %v651_v52 = vrot.slane %v646_v26, 4  ;;  %v1736_v25 = vor.u32 %v1735_v4, %v1731_v45  ;;  %v2896_v34 = vshll.u32 %v5131_v0, 16  ;;  %v262_v60 = vld [vmem:[%s4525_s11 + $0xc0] sm:$0xff] }
  0xa5   : > { %v1399_v47 = vrot.slane %v4092_v27, 1  ;;  %v862_v9 = vsel %vm4657_vm7, %v641_v32, %v861_v16  ;;  %v650_v23 = vsel %vm4645_vm6, %v642_v3, %v649_v62  ;;  %v1067_v27 = vunpack.c.l.b16 %v939_v22  ;;  %v3971_v16 = vld [vmem:[#allocation5 + $0x118] sm:$0xff]  ;;  %v3964_v0 = vld [vmem:[#allocation5 + $0xe0] sm:$0xff] }
  0xa6   : > { %v1983_v48 = vsel %vm1368_vm9, %v1981_v31, %v1982_v11  ;;  %863 = vst [vmem:[#allocation2 + $0x84] sm:$0xf] %v862_v9  ;;  %v866_v45 = vsel %vm4704_vm8, %v651_v52, %v865_v59  ;;  %v1741_v26 = vsel %vm1095_vm2, %v1736_v25, %v1740_v57  ;;  %v2898_v32 = vrot.slane %v2896_v34, 1  ;;  %v3955_v11 = vld [vmem:[#allocation5 + $0x98] sm:$0xff]  ;;  %v5165_v31 = vld [vmem:[#allocation2 + $0x3c] sm:$0xff]   ;;  %3470 = vmatpush.bf16.msrb.mxu3 %v3971_v16 }
  0xa7   : > { %v1401_v50 = vsel %vm1368_vm9, %v1399_v47, %v1400_v18  ;;  %3797 = vmatmul.msk.bf16.gmra.mxu1 %vm1417_vm10, %v1983_v48  ;;  %864 = vst.msk [vmem:[#allocation2 + $0x88] sm:$0xf] %vm406_vm0, %v650_v23  ;;  %1882 = vrot.lane.b32.xlu0 %v1741_v26, %s4422_s14  ;;  %v332_v19 = vadd.f32 %v5109_v38, %v296_v40  ;;  %v3940_v18 = vld [vmem:[#allocation5 + $0x20] sm:$0xff]  ;;  %v5167_v47 = vld [vmem:[#allocation2 + $0x3c] sm:$0xf0]  ;;  %v365_v62 = vmax.f32 %v333_v21, 0.0 }
  0xa8   : > { %v284_v3 = vmul.f32 %v5101_v35, %v248_v54  ;;  %867 = vst [vmem:[#allocation2 + $0x8c] sm:$0x1] %v866_v45  ;;  %v5162_v59 = vpack.c.b16 %v1067_v27, %v1067_v27  ;;  %v285_v4 = vmul.f32 %v5101_v35, %v249_v12  ;;  %v5170_v40 = vmul.f32 %v5101_v35, %v262_v60  ;;  %v2707_v25 = vld [vmem:[#allocation2 + $0x44] sm:$0x1]  ;;  %v3939_v23 = vld [vmem:[#allocation5 + $0x18] sm:$0xff] }
  0xa9   : > { %6261 = vst [vmem:[#allocation34_spill] sm:$0xff] %v5165_v31  ;;  %3058 = vrot.lane.b32.xlu1 %v2887_v20, %s4422_s14  ;;  %v2899_v39 = vsel %vm1095_vm2, %v4988_v49, %v2898_v32  ;;  %v364_v22 = vmax.f32 %v332_v19, 0.0  ;;  %v263_v57 = vld [vmem:[%s4525_s11 + $0xc8] sm:$0xff]  ;;  %2195 = vmatpush.bf16.msra.mxu0 %v3955_v11  ;;  %v397_v9 = vpack.c.bf16 %v365_v62, %v365_v62  ;;  %v2835_v34 = vunpack.c.l.b16 %v2707_v25 }
  0xaa   : > { %6260 = vst [vmem:[#allocation33_spill] sm:$0xff] %v5162_v59  ;;  %v320_v52 = vadd.f32 %v5109_v38, %v284_v3  ;;  %3862 = vmatmul.msk.bf16.gmra.mxu3 %vm1417_vm10, %v1401_v50  ;;  %v1152_v12 = vshll.u32 %v5162_v59, 16  ;;  %v321_v54 = vadd.f32 %v5109_v38, %v285_v4  ;;  %2496 = vmatpush.bf16.msra.mxu2 %v3940_v18  ;;  %v3938_v59 = vld [vmem:[#allocation5 + $0x10] sm:$0xff] }
  0xab   : > { %6262 = vst [vmem:[#allocation35_spill] sm:$0xff] %v5167_v47  ;;  %v396_v48 = vpack.c.bf16 %v364_v22, %v364_v22  ;;  %v5181_v26 = vmul.f32 %v5101_v35, %v263_v57  ;;  %v5185_v21 = vpack.c.b16 %v2835_v34, %v2835_v34  ;;  %v661_v18 = vshrl.u32 %v397_v9, 16 }
  0xac   : > { %v352_v20 = vmax.f32 %v320_v52, 0.0  ;;  %v1154_v60 = vrot.slane %v1152_v12, 1  ;;  %v353_v45 = vmax.f32 %v321_v54, 0.0  ;;  %v664_v22 = vshll.u32 %v397_v9, 16 }
  0xad   : > { %v4254_v58 = vld [vmem:[#allocation2 + $0x84] sm:$0xe]  ;;  %v653_v32 = vshrl.u32 %v396_v48, 16  ;;  %v656_v50 = vshll.u32 %v396_v48, 16  ;;  %6263 = vst [vmem:[#allocation36_spill] sm:$0xff] %v5185_v21  ;;  %v663_v54 = vrot.slane %v661_v18, 7 }
  0xae   : > { %v4257_v27 = vld [vmem:[#allocation2 + $0x84] sm:$0xe]  ;;  %v5183_v19 = vpack.c.bf16 %v352_v20, %v352_v20  ;;  %v4253_v11 = vld [vmem:[#allocation2 + $0x84] sm:$0xf0]  ;;  %2497 = vmatpush.bf16.msra.mxu2 %v3939_v23  ;;  %v3967_v48 = vld [vmem:[#allocation5 + $0xf8] sm:$0xff] }
  0xaf   : > { %v5187_v16 = vld [vmem:[#allocation2 + $0x84] sm:$0xff]   ;;  %v1532_v62 = vld [vmem:[#allocation2 + $0x8c] sm:$0x1]  ;;  %v655_v12 = vrot.slane %v653_v32, 7  ;;  %v4255_v34 = vor.u32 %v4254_v58, %v4253_v11  ;;  %3377 = vmatpush.bf16.msrb.mxu1 %v3967_v48  ;;  %v666_v18 = vor.u32 %v664_v22, %v663_v54  ;;  %v1155_v11 = vsel %vm1095_vm2, %v4988_v49, %v1154_v60 }
  0xb0   : > { %v5189_v3 = vld [vmem:[#allocation2 + $0x84] sm:$0xff]   ;;  %v946_v52 = vld [vmem:[#allocation2 + $0x8c] sm:$0x1]  ;;  %v1660_v25 = vunpack.c.l.b16 %v1532_v62  ;;  %v668_v62 = vrot.slane %v663_v54, 4  ;;  %1296 = vrot.lane.b32.xlu2 %v1155_v11, %s4422_s14  ;;  %v551_v22 = vshrl.u32 %v5183_v19, 16  ;;  %v554_v49 = vshll.u32 %v5183_v19, 16 }
  0xb1   : > { %v4256_v4 = vld [vmem:[#allocation2 + $0x84] sm:$0xf0]  ;;  %v1074_v57 = vunpack.c.l.b16 %v946_v52  ;;  %3060 = vrot.lane.b32.xlu1 %v2899_v39, %s4422_s14  ;;  %v658_v9 = vor.u32 %v656_v50, %v655_v12  ;;  %v659_v14 = vrot.slane %v655_v12, 4  ;;  %v1984_v32 = vrot.slane %v4255_v34, 1  ;;  %v3937_v60 = vld [vmem:[#allocation5 + $0x8] sm:$0xff]  ;;  %v265_v11 = vld [vmem:[%s4525_s11 + $0xd8] sm:$0xff] }
  0xb2   : > { %v3954_v20 = vld [vmem:[#allocation5 + $0x90] sm:$0xff]  ;;  %v4258_v43 = vor.u32 %v4257_v27, %v4256_v4  ;;  %v5192_v17 = vpack.c.b16 %v1660_v25, %v1660_v25  ;;  %2498 = vmatpush.bf16.msra.mxu2 %v3938_v59  ;;  %v385_v4 = vpack.c.bf16 %v353_v45, %v353_v45  ;;  %v3953_v59 = vld [vmem:[#allocation5 + $0x88] sm:$0xff]  ;;  %v2903_v12 = vshll.u32 %v5165_v31, 16 }
  0xb3   : > { %v5194_v6 = vpack.c.b16 %v1074_v57, %v1074_v57  ;;  %2196 = vmatpush.bf16.msra.mxu0 %v3954_v20  ;;  %v869_v39 = vsel %vm4657_vm7, %v658_v9, %v868_v10  ;;  %v667_v50 = vsel %vm4645_vm6, %v659_v14, %v666_v18  ;;  %v264_v52 = vld [vmem:[%s4525_s11 + $0xd0] sm:$0xff]  ;;  %v2901_v14 = vshrl.u32 %v5165_v31, 16  ;;  %v1289_v54 = vpop.permute.xlu0 %1288  ;;  %v3952_v9 = vld [vmem:[#allocation5 + $0x80] sm:$0xff] }
  0xb4   : > { %v1402_v23 = vrot.slane %v4258_v43, 1  ;;  %v1985_v58 = vrot.slane %v5192_v17, 1  ;;  %870 = vst [vmem:[#allocation2 + $0x90] sm:$0xf] %v869_v39  ;;  %v873_v43 = vsel %vm4704_vm8, %v668_v62, %v872_v37  ;;  %v553_v37 = vrot.slane %v551_v22, 7  ;;  %v3966_v22 = vld [vmem:[#allocation5 + $0xf0] sm:$0xff] }
  0xb5   : > { %v1403_v27 = vrot.slane %v5194_v6, 1  ;;  %871 = vst.msk [vmem:[#allocation2 + $0x94] sm:$0xf] %vm406_vm0, %v667_v50  ;;  %v559_v45 = vshrl.u32 %v385_v4, 16  ;;  %v562_v57 = vshll.u32 %v385_v4, 16  ;;  %v2908_v20 = vshll.u32 %v5185_v21, 16  ;;  %3378 = vmatpush.bf16.msrb.mxu1 %v3966_v22 }
  0xb6   : > { %v1986_v25 = vsel %vm1368_vm9, %v1984_v32, %v1985_v58  ;;  %874 = vst [vmem:[#allocation2 + $0x98] sm:$0x1] %v873_v43  ;;  %v826_v48 = vld [vmem:[#allocation2 + $0x48] sm:$0xf]  ;;  %v334_v19 = vadd.f32 %v5109_v38, %v5170_v40  ;;  %v335_v34 = vadd.f32 %v5109_v38, %v5181_v26  ;;  %2499 = vmatpush.bf16.msra.mxu2 %v3937_v60  ;;  %v3936_v32 = vld [vmem:[#allocation5] sm:$0xff]  ;;  %v557_v58 = vrot.slane %v553_v37, 4 }
  0xb7   : > { %v1404_v10 = vsel %vm1368_vm9, %v1402_v23, %v1403_v27  ;;  %3798 = vmatmul.msk.bf16.gmra.mxu1 %vm1417_vm10, %v1986_v25  ;;  %2197 = vmatpush.bf16.msra.mxu0 %v3953_v59  ;;  %v4230_v23 = vld [vmem:[#allocation2] sm:$0xff]   ;;  %v556_v62 = vor.u32 %v554_v49, %v553_v37  ;;  %v561_v27 = vrot.slane %v559_v45, 7  ;;  %v2905_v39 = vrot.slane %v2903_v12, 1  ;;  %v830_v50 = vld [vmem:[#allocation2 + $0x50] sm:$0x1] }
  0xb8   : > { %v1419_v18 = vsel %vm1417_vm10, %v4230_v23, %v1289_v54  ;;  %v2910_v43 = vrot.slane %v2908_v20, 1  ;;  %v366_v40 = vmax.f32 %v334_v19, 0.0  ;;  %v367_v4 = vmax.f32 %v335_v34, 0.0  ;;  %v3951_v49 = vld [vmem:[#allocation5 + $0x78] sm:$0xff] }
  0xb9   : > { %v300_v26 = vmul.f32 %v5101_v35, %v264_v52  ;;  %v564_v25 = vor.u32 %v562_v57, %v561_v27  ;;  %v566_v59 = vrot.slane %v561_v27, 4  ;;  %v827_v60 = vsel %vm4657_vm7, %v556_v62, %v826_v48  ;;  %v4235_v21 = vld [vmem:[#allocation5 + $0xb8] sm:$0xff] }
  0xba   : > { %3863 = vmatmul.msk.bf16.gmra.mxu3 %vm1417_vm10, %v1404_v10  ;;  %v2906_v54 = vor.u32 %v2905_v39, %v2901_v14  ;;  %828 = vst [vmem:[#allocation2 + $0x48] sm:$0xf] %v827_v60  ;;  %v398_v12 = vpack.c.bf16 %v366_v40, %v366_v40  ;;  %v399_v23 = vpack.c.bf16 %v367_v4, %v367_v4  ;;  %v4231_v39 = vld [vmem:[#allocation5 + $0x58] sm:$0xff]  ;;  %v1810_v2 = vshll.u32 %v5192_v17, 16 }
  0xbb   : > { %v4123_v37 = vld [vmem:[#allocation2 + $0x90] sm:$0xe]  ;;  %2198 = vmatpush.bf16.msra.mxu0 %v3952_v9  ;;  %2500 = vmatpush.bf16.msra.mxu2 %v3936_v32  ;;  %v301_v10 = vmul.f32 %v5101_v35, %v265_v11  ;;  %v565_v52 = vsel %vm4645_vm6, %v557_v58, %v564_v25  ;;  %v831_v57 = vsel %vm4704_vm8, %v566_v59, %v830_v50  ;;  %v1224_v17 = vshll.u32 %v5136_v55, 16 }
  0xbc   : > { %v4094_v45 = vld [vmem:[#allocation2 + $0x90] sm:$0xe]  ;;  %v4122_v20 = vld [vmem:[#allocation2 + $0x90] sm:$0xf0]  ;;  %v2911_v14 = vsel %vm1095_vm2, %v2906_v54, %v2910_v43  ;;  %v336_v48 = vadd.f32 %v5109_v38, %v300_v26  ;;  %829 = vst.msk [vmem:[#allocation2 + $0x4c] sm:$0xf] %vm406_vm0, %v565_v52 }
  0xbd   : > { %v4093_v19 = vld [vmem:[#allocation2 + $0x90] sm:$0xf0]  ;;  %v1533_v34 = vld [vmem:[#allocation2 + $0x98] sm:$0x1]  ;;  %v4124_v62 = vor.u32 %v4123_v37, %v4122_v20  ;;  %3062 = vrot.lane.b32.xlu1 %v2911_v14, %s4422_s14  ;;  %v337_v32 = vadd.f32 %v5109_v38, %v301_v10  ;;  %832 = vst [vmem:[#allocation2 + $0x50] sm:$0x1] %v831_v57 }
  0xbe   : > { %v947_v27 = vld [vmem:[#allocation2 + $0x98] sm:$0x1]  ;;  %v4095_v9 = vor.u32 %v4094_v45, %v4093_v19  ;;  %v1661_v58 = vunpack.c.l.b16 %v1533_v34  ;;  %v670_v50 = vshrl.u32 %v398_v12, 16  ;;  %v673_v43 = vshll.u32 %v398_v12, 16  ;;  %2501 = vmatmul.bf16.vlgmr.msra.gmra.mxu2 %v1419_v18  ;;  %v3950_v26 = vld [vmem:[#allocation5 + $0x70] sm:$0xff]  ;;  %v5243_v57 = vld [vmem:[#allocation2 + $0x60] sm:$0xff]  }
  0xbf   : > { %2586 = vmatpush.bf16.msrb.mxu2 %v4231_v39  ;;  %v1075_v11 = vunpack.c.l.b16 %v947_v27  ;;  %v1987_v40 = vrot.slane %v4124_v62, 1  ;;  %v678_v4 = vshrl.u32 %v399_v23, 16  ;;  %v681_v22 = vshll.u32 %v399_v23, 16  ;;  %2199 = vmatpush.bf16.msra.mxu0 %v3951_v49  ;;  %v875_v10 = vld [vmem:[#allocation2 + $0x9c] sm:$0xf]  ;;  %v4232_v19 = vld [vmem:[#allocation5 + $0x50] sm:$0xff] }
  0xc0   : > { %v5237_v25 = vpack.c.b16 %v1661_v58, %v1661_v58  ;;  %v672_v60 = vrot.slane %v670_v50, 7  ;;  %v368_v54 = vmax.f32 %v336_v48, 0.0  ;;  %v1405_v37 = vrot.slane %v4095_v9, 1  ;;  %v879_v52 = vld [vmem:[#allocation2 + $0xa4] sm:$0x1]  ;;  %v266_v58 = vld [vmem:[%s4525_s11 + $0xe0] sm:$0xff] }
  0xc1   : > { %v5239_v59 = vpack.c.b16 %v1075_v11, %v1075_v11  ;;  %v680_v45 = vrot.slane %v678_v4, 7  ;;  %v369_v20 = vmax.f32 %v337_v32, 0.0  ;;  %v1769_v39 = vshll.u32 %v5243_v57, 16  ;;  %v267_v11 = vld [vmem:[%s4525_s11 + $0xe8] sm:$0xff] }
  0xc2   : > { %v1988_v18 = vrot.slane %v5237_v25, 1  ;;  %v675_v49 = vor.u32 %v673_v43, %v672_v60  ;;  %v676_v23 = vrot.slane %v672_v60, 4  ;;  %v5245_v48 = vpack.c.bf16 %v368_v54, %v368_v54 }
  0xc3   : > { %2587 = vmatpush.bf16.msrb.mxu2 %v4232_v19  ;;  %v1406_v12 = vrot.slane %v5239_v59, 1  ;;  %v683_v14 = vor.u32 %v681_v22, %v680_v45  ;;  %v685_v34 = vrot.slane %v680_v45, 4  ;;  %2200 = vmatpush.bf16.msra.mxu0 %v3950_v26  ;;  %v4070_v27 = vld [vmem:[#allocation2 + $0x48] sm:$0xff]   ;;  %v401_v32 = vpack.c.bf16 %v369_v20, %v369_v20 }
  0xc4   : > { %v1989_v62 = vsel %vm1368_vm9, %v1987_v40, %v1988_v18  ;;  %v876_v9 = vsel %vm4657_vm7, %v675_v49, %v875_v10  ;;  %v941_v50 = vld [vmem:[#allocation2 + $0x50] sm:$0x1]  ;;  %v1169_v43 = vshrl.u32 %v4070_v27, 16  ;;  %v1171_v4 = vshll.u32 %v4070_v27, 16  ;;  %v4233_v40 = vld [vmem:[#allocation5 + $0x48] sm:$0xff] }
  0xc5   : > { %v684_v22 = vsel %vm4645_vm6, %v676_v23, %v683_v14  ;;  %877 = vst [vmem:[#allocation2 + $0x9c] sm:$0xf] %v876_v9  ;;  %v880_v26 = vsel %vm4704_vm8, %v685_v34, %v879_v52  ;;  %v1407_v60 = vsel %vm1368_vm9, %v1405_v37, %v1406_v12  ;;  %v1069_v54 = vunpack.c.l.b16 %v941_v50  ;;  %v1527_v45 = vld [vmem:[#allocation2 + $0x50] sm:$0x1]  ;;  %v3949_v23 = vld [vmem:[#allocation5 + $0x68] sm:$0xff]  ;;  %v3948_v9 = vld [vmem:[#allocation5 + $0x60] sm:$0xff] }
  0xc6   : > { %878 = vst.msk [vmem:[#allocation2 + $0xa0] sm:$0xf] %vm406_vm0, %v684_v22  ;;  %v2708_v10 = vld [vmem:[#allocation2 + $0x50] sm:$0x1]  ;;  %v1173_v20 = vrot.slane %v1171_v4, 1  ;;  %v1655_v19 = vunpack.c.l.b16 %v1527_v45  ;;  %v687_v49 = vshrl.u32 %v5245_v48, 16  ;;  %v303_v50 = vmul.f32 %v5101_v35, %v267_v11 }
  0xc7   : > { %2588 = vmatpush.bf16.msrb.mxu2 %v4233_v40  ;;  %3799 = vmatmul.msk.bf16.gmra.mxu1 %vm1417_vm10, %v1989_v62  ;;  %881 = vst [vmem:[#allocation2 + $0xa4] sm:$0x1] %v880_v26  ;;  %v2836_v18 = vunpack.c.l.b16 %v2708_v10  ;;  %v5261_v14 = vpack.c.b16 %v1069_v54, %v1069_v54  ;;  %v695_v52 = vshrl.u32 %v401_v32, 16  ;;  %v698_v34 = vshll.u32 %v401_v32, 16  ;;  %v4234_v32 = vld [vmem:[#allocation5 + $0x40] sm:$0xff] }
  0xc8   : > { %v302_v62 = vmul.f32 %v5101_v35, %v266_v58  ;;  %v5265_v37 = vpack.c.b16 %v1655_v19, %v1655_v19  ;;  %v689_v27 = vrot.slane %v687_v49, 7  ;;  %2201 = vmatpush.bf16.msra.mxu0 %v3949_v23  ;;  %v1174_v4 = vor.u32 %v1173_v20, %v1169_v43 }
  0xc9   : > { %6264 = vst [vmem:[#allocation37_spill] sm:$0xff] %v5261_v14  ;;  %v5267_v12 = vpack.c.b16 %v2836_v18, %v2836_v18  ;;  %v1176_v22 = vshll.u32 %v5261_v14, 16  ;;  %v690_v26 = vshll.u32 %v5245_v48, 16  ;;  %v697_v40 = vrot.slane %v695_v52, 7 }
  0xca   : > { %3864 = vmatmul.msk.bf16.gmra.mxu3 %vm1417_vm10, %v1407_v60  ;;  %6265 = vst [vmem:[#allocation38_spill] sm:$0xff] %v5265_v37  ;;  %v1750_v58 = vshll.u32 %v5265_v37, 16  ;;  %v1767_v54 = vshrl.u32 %v5243_v57, 16  ;;  %v1771_v45 = vrot.slane %v1769_v39, 1  ;;  %v693_v49 = vrot.slane %v689_v27, 4  ;;  %v3970_v37 = vld [vmem:[#allocation5 + $0x110] sm:$0xff] }
  0xcb   : > { %6266 = vst [vmem:[#allocation39_spill] sm:$0xff] %v5267_v12  ;;  %2589 = vmatpush.bf16.msrb.mxu2 %v4234_v32  ;;  %v2920_v60 = vshll.u32 %v5267_v12, 16  ;;  %v1178_v10 = vrot.slane %v1176_v22, 1  ;;  %v700_v11 = vor.u32 %v698_v34, %v697_v40  ;;  %v338_v43 = vadd.f32 %v5109_v38, %v302_v62  ;;  %3471 = vmatpush.bf16.msrb.mxu3 %v3970_v37 }
  0xcc   : > { %v4389_v19 = vld [vmem:[#allocation2 + $0x9c] sm:$0xe]  ;;  %v1752_v32 = vrot.slane %v1750_v58, 1  ;;  %2202 = vmatpush.bf16.msra.mxu0 %v3948_v9  ;;  %v692_v31 = vor.u32 %v690_v26, %v689_v27  ;;  %v702_v12 = vrot.slane %v697_v40, 4  ;;  %v5287_v26 = vld [vmem:[#allocation2 + $0x54] sm:$0xff]   ;;  %v339_v40 = vadd.f32 %v5109_v38, %v303_v50 }
  0xcd   : > { %v4392_v18 = vld [vmem:[#allocation2 + $0x9c] sm:$0xe]  ;;  %v4388_v48 = vld [vmem:[#allocation2 + $0x9c] sm:$0xf0]  ;;  %v2922_v14 = vrot.slane %v2920_v60, 1  ;;  %v1179_v57 = vsel %vm1095_vm2, %v1174_v4, %v1178_v10  ;;  %v701_v27 = vsel %vm4645_vm6, %v693_v49, %v700_v11  ;;  %6267 = vst [vmem:[#allocation40_spill] sm:$0xff] %v5287_v26  ;;  %v5297_v37 = vor.u32 %v1771_v45, %v1767_v54 }
  0xce   : > { %v5276_v20 = vld [vmem:[#allocation2 + $0x9c] sm:$0xff]   ;;  %v1534_v39 = vld [vmem:[#allocation2 + $0xa4] sm:$0x1]  ;;  %1300 = vrot.lane.b32.xlu0 %v1179_v57, %s4422_s14  ;;  %v1753_v47 = vsel %vm1095_vm2, %v1174_v4, %v1752_v32  ;;  %v4390_v58 = vor.u32 %v4389_v19, %v4388_v48  ;;  %885 = vst.msk [vmem:[#allocation2 + $0xac] sm:$0xf] %vm406_vm0, %v701_v27  ;;  %v887_v19 = vsel %vm4704_vm8, %v702_v12, %v886_v36  ;;  %v1774_v50 = vshll.u32 %v4968_v30, 16 }
  0xcf   : > { %v5278_v23 = vld [vmem:[#allocation2 + $0x9c] sm:$0xff]   ;;  %v948_v22 = vld [vmem:[#allocation2 + $0xa4] sm:$0x1]  ;;  %v1662_v34 = vunpack.c.l.b16 %v1534_v39  ;;  %1884 = vrot.lane.b32.xlu2 %v1753_v47, %s4422_s14  ;;  %v2923_v9 = vsel %vm1095_vm2, %v1174_v4, %v2922_v14  ;;  %v883_v4 = vsel %vm4657_vm7, %v692_v31, %v882_v33  ;;  %v4236_v49 = vld [vmem:[#allocation5 + $0xb0] sm:$0xff]  ;;  %888 = vst [vmem:[#allocation2 + $0xb0] sm:$0x1] %v887_v19 }
  0xd0   : > { %v4391_v52 = vld [vmem:[#allocation2 + $0x9c] sm:$0xf0]  ;;  %2288 = vmatpush.bf16.msrb.mxu0 %v4235_v21  ;;  %v1076_v62 = vunpack.c.l.b16 %v948_v22  ;;  %v5289_v21 = vld [vmem:[#allocation2 + $0x54] sm:$0xf0]  ;;  %3064 = vrot.lane.b32.xlu1 %v2923_v9, %s4422_s14  ;;  %v2709_v47 = vld [vmem:[#allocation2 + $0x5c] sm:$0x1] }
  0xd1   : > { %6268 = vst [vmem:[#allocation41_spill] sm:$0xff] %v5289_v21  ;;  %v5292_v60 = vpack.c.b16 %v1662_v34, %v1662_v34  ;;  %v4393_v32 = vor.u32 %v4392_v18, %v4391_v52  ;;  %v1990_v14 = vrot.slane %v4390_v58, 1  ;;  %v1776_v45 = vrot.slane %v1774_v50, 1  ;;  %v3965_v22 = vld [vmem:[#allocation5 + $0xe8] sm:$0xff]  ;;  %v268_v9 = vld [vmem:[%s4525_s11 + $0xf0] sm:$0xff]  ;;  %v269_v19 = vld [vmem:[%s4525_s11 + $0xf8] sm:$0xff] }
  0xd2   : > { %v5294_v10 = vpack.c.b16 %v1076_v62, %v1076_v62  ;;  %884 = vst [vmem:[#allocation2 + $0xa8] sm:$0xf] %v883_v4  ;;  %v2837_v48 = vunpack.c.l.b16 %v2709_v47  ;;  %v370_v33 = vmax.f32 %v338_v43, 0.0  ;;  %v371_v36 = vmax.f32 %v339_v40, 0.0  ;;  %v4237_v27 = vld [vmem:[#allocation5 + $0xa8] sm:$0xff]  ;;  %3379 = vmatpush.bf16.msrb.mxu1 %v3965_v22 }
  0xd3   : > { %v1991_v18 = vrot.slane %v5292_v60, 1  ;;  %v1408_v11 = vrot.slane %v4393_v32, 1  ;;  %v1777_v12 = vsel %vm1095_vm2, %v5297_v37, %v1776_v45  ;;  %v1183_v34 = vshll.u32 %v4920_v29, 16  ;;  %v2710_v4 = vld [vmem:[#allocation2 + $0x68] sm:$0x1] }
  0xd4   : > { %2289 = vmatpush.bf16.msrb.mxu0 %v4236_v49  ;;  %v1409_v54 = vrot.slane %v5294_v10, 1  ;;  %v5313_v57 = vpack.c.b16 %v2837_v48, %v2837_v48  ;;  %v402_v39 = vpack.c.bf16 %v370_v33, %v370_v33  ;;  %v403_v43 = vpack.c.bf16 %v371_v36, %v371_v36 }
  0xd5   : > { %v1992_v31 = vsel %vm1368_vm9, %v1990_v14, %v1991_v18  ;;  %v1188_v62 = vshll.u32 %v4943_v46, 16  ;;  %v2925_v40 = vshrl.u32 %v5287_v26, 16  ;;  %v2927_v32 = vshll.u32 %v5287_v26, 16  ;;  %v4125_v50 = vld [vmem:[#allocation2 + $0xa8] sm:$0xf0]  ;;  %v4238_v26 = vld [vmem:[#allocation5 + $0xa0] sm:$0xff] }
  0xd6   : > { %v1410_v52 = vsel %vm1368_vm9, %v1408_v11, %v1409_v54  ;;  %6269 = vst [vmem:[#allocation42_spill] sm:$0xff] %v5313_v57  ;;  %1888 = vrot.lane.b32.xlu0 %v1777_v12, %s4422_s14  ;;  %v2932_v47 = vshll.u32 %v5313_v57, 16  ;;  %v704_v14 = vshrl.u32 %v402_v39, 16  ;;  %v4096_v49 = vld [vmem:[#allocation2 + $0xa8] sm:$0xf0]  ;;  %v707_v46 = vshll.u32 %v402_v39, 16  ;;  %3380 = vmatpush.bf16.msrb.mxu1 %v3964_v0 }
  0xd7   : > { %3800 = vmatmul.msk.bf16.gmra.mxu1 %vm1417_vm10, %v1992_v31  ;;  %v712_v18 = vshrl.u32 %v403_v43, 16  ;;  %v2929_v45 = vrot.slane %v2927_v32, 1  ;;  %v2838_v33 = vunpack.c.l.b16 %v2710_v4  ;;  %v304_v31 = vmul.f32 %v5101_v35, %v268_v9  ;;  %v1535_v36 = vld [vmem:[#allocation2 + $0xb0] sm:$0x1] }
  0xd8   : > { %2290 = vmatpush.bf16.msrb.mxu0 %v4237_v27  ;;  %v2934_v48 = vrot.slane %v2932_v47, 1  ;;  %v949_v27 = vld [vmem:[#allocation2 + $0xb0] sm:$0x1]  ;;  %v706_v22 = vrot.slane %v704_v14, 7  ;;  %v715_v39 = vshll.u32 %v403_v43, 16  ;;  %v305_v4 = vmul.f32 %v5101_v35, %v269_v19 }
  0xd9   : > { %v4126_v11 = vld [vmem:[#allocation2 + $0xa8] sm:$0xe]  ;;  %v714_v30 = vrot.slane %v712_v18, 7  ;;  %v1077_v57 = vunpack.c.l.b16 %v949_v27  ;;  %v2930_v21 = vor.u32 %v2929_v45, %v2925_v40  ;;  %v893_v18 = vld [vmem:[#allocation2 + $0xbc] sm:$0x1]  ;;  %v1185_v40 = vrot.slane %v1183_v34, 1 }
  0xda   : > { %3865 = vmatmul.msk.bf16.gmra.mxu3 %vm1417_vm10, %v1410_v52  ;;  %v4097_v54 = vld [vmem:[#allocation2 + $0xa8] sm:$0xe]  ;;  %v4127_v12 = vor.u32 %v4126_v11, %v4125_v50  ;;  %v1663_v52 = vunpack.c.l.b16 %v1535_v36  ;;  %v709_v32 = vor.u32 %v707_v46, %v706_v22  ;;  %v710_v47 = vrot.slane %v706_v22, 4  ;;  %v5353_v22 = vld [vmem:[#allocation2 + $0x78] sm:$0xff]  }
  0xdb   : > { %v4098_v58 = vor.u32 %v4097_v54, %v4096_v49  ;;  %v5329_v50 = vpack.c.b16 %v1077_v57, %v1077_v57  ;;  %v2935_v14 = vsel %vm1095_vm2, %v2930_v21, %v2934_v48  ;;  %v717_v49 = vor.u32 %v715_v39, %v714_v30 }
  0xdc   : > { %2291 = vmatpush.bf16.msrb.mxu0 %v4238_v26  ;;  %v1993_v41 = vrot.slane %v4127_v12, 1  ;;  %v5327_v9 = vpack.c.b16 %v1663_v52, %v1663_v52  ;;  %3066 = vrot.lane.b32.xlu1 %v2935_v14, %s4422_s14  ;;  %v719_v26 = vrot.slane %v714_v30, 4  ;;  %v890_v43 = vsel %vm4657_vm7, %v709_v32, %v889_v53 }
  0xdd   : > { %v1190_v46 = vrot.slane %v1188_v62, 1  ;;  %v1411_v35 = vrot.slane %v4098_v58, 1  ;;  %v718_v57 = vsel %vm4645_vm6, %v710_v47, %v717_v49  ;;  %891 = vst [vmem:[#allocation2 + $0xb4] sm:$0xf] %v890_v43  ;;  %v1781_v21 = vshll.u32 %v5019_v13, 16 }
  0xde   : > { %v1994_v11 = vrot.slane %v5327_v9, 1  ;;  %892 = vst.msk [vmem:[#allocation2 + $0xb8] sm:$0xf] %vm406_vm0, %v718_v57  ;;  %v894_v0 = vsel %vm4704_vm8, %v719_v26, %v893_v18  ;;  %v6270_v30 = vshrl.u32 %v4920_v29, 16  ;;  %v1786_v53 = vshll.u32 %v5031_v61, 16 }
  0xdf   : > { %v5345_v34 = vpack.c.b16 %v2838_v33, %v2838_v33  ;;  %v1412_v58 = vrot.slane %v5329_v50, 1  ;;  %895 = vst [vmem:[#allocation2 + $0xbc] sm:$0x1] %v894_v0  ;;  %v1783_v54 = vrot.slane %v1781_v21, 1  ;;  %v340_v45 = vadd.f32 %v5109_v38, %v304_v31  ;;  %v3963_v31 = vld [vmem:[#allocation5 + $0xd8] sm:$0xff] }
  0xe0   : > { %v1186_v19 = vor.u32 %v1185_v40, %v6270_v30  ;;  %v1995_v62 = vsel %vm1368_vm9, %v1993_v41, %v1994_v11  ;;  %v1788_v36 = vrot.slane %v1786_v53, 1  ;;  %v341_v27 = vadd.f32 %v5109_v38, %v305_v4  ;;  %v3969_v4 = vld [vmem:[#allocation5 + $0x108] sm:$0xff]  ;;  %3381 = vmatpush.bf16.msrb.mxu1 %v3963_v31 }
  0xe1   : > { %v2944_v12 = vshll.u32 %v5345_v34, 16  ;;  %v6271_v61 = vshrl.u32 %v5019_v13, 16  ;;  %v372_v33 = vmax.f32 %v340_v45, 0.0  ;;  %v1200_v52 = vshll.u32 %v4971_v44, 16  ;;  %3472 = vmatpush.bf16.msrb.mxu3 %v3969_v4 }
  0xe2   : > { %v1191_v48 = vsel %vm1095_vm2, %v1186_v19, %v1190_v46  ;;  %v373_v32 = vmax.f32 %v341_v27, 0.0  ;;  %v1413_v47 = vsel %vm1368_vm9, %v1411_v35, %v1412_v58  ;;  %v1793_v49 = vshll.u32 %v5353_v22, 16  ;;  %v3962_v46 = vld [vmem:[#allocation5 + $0xd0] sm:$0xff] }
  0xe3   : > { %1302 = vrot.lane.b32.xlu2 %v1191_v48, %s4422_s14  ;;  %v1784_v41 = vor.u32 %v1783_v54, %v6271_v61  ;;  %v2946_v39 = vrot.slane %v2944_v12, 1  ;;  %v404_v38 = vpack.c.bf16 %v372_v33, %v372_v33  ;;  %v1791_v40 = vshrl.u32 %v5353_v22, 16  ;;  %v3968_v61 = vld [vmem:[#allocation5 + $0x100] sm:$0xff] }
  0xe4   : > { %v4395_v18 = vld [vmem:[#allocation2 + $0xb4] sm:$0xe]  ;;  %v405_v43 = vpack.c.bf16 %v373_v32, %v373_v32  ;;  %v1202_v30 = vrot.slane %v1200_v52, 1  ;;  %v1798_v19 = vshll.u32 %v5134_v15, 16  ;;  %v1795_v15 = vrot.slane %v1793_v49, 1  ;;  %3382 = vmatpush.bf16.msrb.mxu1 %v3962_v46 }
  0xe5   : > { %v1789_v14 = vsel %vm1095_vm2, %v1784_v41, %v1788_v36  ;;  %v4398_v26 = vld [vmem:[#allocation2 + $0xb4] sm:$0xe]  ;;  %v2947_v44 = vsel %vm1095_vm2, %v5297_v37, %v2946_v39  ;;  %v4394_v35 = vld [vmem:[#allocation2 + $0xb4] sm:$0xf0]  ;;  %v721_v0 = vshrl.u32 %v404_v38, 16  ;;  %v724_v58 = vshll.u32 %v404_v38, 16  ;;  %3473 = vmatpush.bf16.msrb.mxu3 %v3968_v61 }
  0xe6   : > { %1890 = vrot.lane.b32.xlu0 %v1789_v14, %s4422_s14  ;;  %v5367_v11 = vld [vmem:[#allocation2 + $0xb4] sm:$0xff]   ;;  %3068 = vrot.lane.b32.xlu1 %v2947_v44, %s4422_s14  ;;  %v1536_v53 = vld [vmem:[#allocation2 + $0xbc] sm:$0x1]  ;;  %v729_v27 = vshrl.u32 %v405_v43, 16  ;;  %v4396_v52 = vor.u32 %v4395_v18, %v4394_v35  ;;  %v896_v32 = vld [vmem:[#allocation2 + $0xc0] sm:$0xf]  ;;  %v1203_v49 = vsel %vm1095_vm2, %v5297_v37, %v1202_v30 }
  0xe7   : > { %3801 = vmatmul.msk.bf16.gmra.mxu1 %vm1417_vm10, %v1995_v62  ;;  %v5369_v57 = vld [vmem:[#allocation2 + $0xb4] sm:$0xff]   ;;  %v950_v62 = vld [vmem:[#allocation2 + $0xbc] sm:$0x1]  ;;  %v1664_v48 = vunpack.c.l.b16 %v1536_v53  ;;  %v723_v12 = vrot.slane %v721_v0, 7  ;;  %v1800_v31 = vrot.slane %v1798_v19, 1  ;;  %v732_v53 = vshll.u32 %v405_v43, 16 }
  0xe8   : > { %v4397_v21 = vld [vmem:[#allocation2 + $0xb4] sm:$0xf0]  ;;  %v1078_v36 = vunpack.c.l.b16 %v950_v62  ;;  %v731_v44 = vrot.slane %v729_v27, 7  ;;  %v5388_v19 = vor.u32 %v1795_v15, %v1791_v40  ;;  %v1293_v62 = vpop.permute.xlu2 %1292  ;;  %v2711_v40 = vld [vmem:[#allocation2 + $0x74] sm:$0x1]  ;;  %v1803_v61 = vshrl.u32 %v5187_v16, 16 }
  0xe9   : > { %v5378_v39 = vpack.c.b16 %v1664_v48, %v1664_v48  ;;  %v4399_v38 = vor.u32 %v4398_v26, %v4397_v21  ;;  %v726_v4 = vor.u32 %v724_v58, %v723_v12  ;;  %v727_v0 = vrot.slane %v723_v12, 4  ;;  %v3960_v26 = vld [vmem:[#allocation5 + $0xc0] sm:$0xff] }
  0xea   : > { %3866 = vmatmul.msk.bf16.gmra.mxu3 %vm1417_vm10, %v1413_v47  ;;  %v3961_v47 = vld [vmem:[#allocation5 + $0xc8] sm:$0xff]  ;;  %v5380_v14 = vpack.c.b16 %v1078_v36, %v1078_v36  ;;  %v736_v46 = vrot.slane %v731_v44, 4  ;;  %v734_v21 = vor.u32 %v732_v53, %v731_v44  ;;  %v1801_v30 = vsel %vm1095_vm2, %v5388_v19, %v1800_v31  ;;  %v5414_v31 = vld [vmem:[#allocation2 + $0x90] sm:$0xff]  }
  0xeb   : > { %v1875_v54 = vpop.permute.xlu0 %1874  ;;  %v1291_v45 = vpop.permute.xlu1 %1290  ;;  %v1997_v18 = vrot.slane %v5378_v39, 1  ;;  %v897_v35 = vsel %vm4657_vm7, %v726_v4, %v896_v32  ;;  %1304 = vrot.lane.b32.xlu2 %v1203_v49, %s4422_s14  ;;  %3383 = vmatpush.bf16.msrb.mxu1 %v3961_v47  ;;  %v1414_v43 = vrot.slane %v4399_v38, 1  ;;  %v1205_v36 = vshrl.u32 %v5023_v51, 16 }
  0xec   : > { %v2003_v41 = vsel %vm1417_vm10, %v4890_v1, %v1875_v54  ;;  %v1422_v33 = vsel %vm1417_vm10, %v4894_v8, %v1291_v45  ;;  %v1996_v1 = vrot.slane %v4396_v52, 1  ;;  %v900_v8 = vld [vmem:[#allocation2 + $0xc8] sm:$0x1]  ;;  %898 = vst [vmem:[#allocation2 + $0xc0] sm:$0xf] %v897_v35  ;;  %v1415_v58 = vrot.slane %v5380_v14, 1 }
  0xed   : > { %2203 = vmatmul.bf16.vlgmr.msra.gmra.mxu0 %v2003_v41  ;;  %2506 = vmatmul.bf16.gmra.mxu2 %v1422_v33  ;;  %v901_v37 = vsel %vm4704_vm8, %v736_v46, %v900_v8  ;;  %v5397_v54 = vld [vmem:[#allocation2 + $0x6c] sm:$0xf0]  ;;  %v735_v48 = vsel %vm4645_vm6, %v727_v0, %v734_v21  ;;  %v1212_v12 = vshll.u32 %v5040_v24, 16  ;;  %v1805_v41 = vshll.u32 %v5187_v16, 16  ;;  %v5410_v33 = vld [vmem:[#allocation2 + $0x18] sm:$0xff]  }
  0xee   : > { %902 = vst [vmem:[#allocation2 + $0xc8] sm:$0x1] %v901_v37  ;;  %1892 = vrot.lane.b32.xlu0 %v1801_v30, %s4422_s14  ;;  %v1998_v27 = vsel %vm1368_vm9, %v1996_v1, %v1997_v18  ;;  %v1425_v52 = vsel %vm1417_vm10, %v5410_v33, %v1293_v62  ;;  %v1209_v15 = vrot.slane %v1207_v42, 1  ;;  %v1416_v24 = vsel %vm1368_vm9, %v1414_v43, %v1415_v58  ;;  %v4138_v0 = vld [vmem:[#allocation2 + $0x18] sm:$0xf0] }
  0xef   : > { %899 = vst.msk [vmem:[#allocation2 + $0xc4] sm:$0xf] %vm406_vm0, %v735_v48  ;;  %3384 = vmatpush.bf16.msrb.mxu1 %v3960_v26  ;;  %v1214_v32 = vrot.slane %v1212_v12, 1  ;;  %v1807_v47 = vrot.slane %v1805_v41, 1  ;;  %v1812_v38 = vrot.slane %v1810_v2, 1  ;;  %v2839_v44 = vunpack.c.l.b16 %v2711_v40 }
  0xf0   : > { %v1210_v4 = vor.u32 %v1209_v15, %v1205_v36  ;;  %v1815_v1 = vshrl.u32 %v5414_v31, 16  ;;  %v1817_v8 = vshll.u32 %v5414_v31, 16  ;;  %v1822_v49 = vshll.u32 %v5237_v25, 16  ;;  %v4139_v35 = vld [vmem:[#allocation2 + $0x18] sm:$0xe] }
  0xf1   : > { %v1808_v53 = vor.u32 %v1807_v47, %v1803_v61  ;;  %v5425_v21 = vpack.c.b16 %v2839_v44, %v2839_v44  ;;  %v1226_v62 = vrot.slane %v1224_v17, 1  ;;  %v2949_v58 = vshrl.u32 %v5395_v7, 16 }
  0xf2   : > { %v1215_v26 = vsel %vm1095_vm2, %v1210_v4, %v1214_v32  ;;  %v2951_v25 = vshll.u32 %v5395_v7, 16  ;;  %v1819_v37 = vrot.slane %v1817_v8, 1  ;;  %v1824_v36 = vrot.slane %v1822_v49, 1 }
  0xf3   : > { %v1877_v45 = vpop.permute.xlu1 %1876  ;;  %v4129_v46 = vld [vmem:[#allocation2 + $0xc0] sm:$0xe]  ;;  %1306 = vrot.lane.b32.xlu2 %v1215_v26, %s4422_s14  ;;  %v1813_v43 = vsel %vm1095_vm2, %v1808_v53, %v1812_v38  ;;  %v2956_v48 = vshll.u32 %v5425_v21, 16  ;;  %v4140_v15 = vor.u32 %v4139_v35, %v4138_v0  ;;  %v1227_v38 = vsel %vm1095_vm2, %v5388_v19, %v1226_v62  ;;  %v2712_v53 = vld [vmem:[#allocation2 + $0x80] sm:$0x1] }
  0xf4   : > { %v2006_v18 = vsel %vm1417_vm10, %v5410_v33, %v1877_v45  ;;  %v5438_v61 = vor.u32 %v1819_v37, %v1815_v1  ;;  %v1229_v17 = vshrl.u32 %v5189_v3, 16  ;;  %v1236_v1 = vshll.u32 %v5194_v6, 16  ;;  %v5462_v37 = vld [vmem:[#allocation2 + $0xa8] sm:$0xff]  }
  0xf5   : > { %v1537_v55 = vld [vmem:[#allocation2 + $0xc8] sm:$0x1]  ;;  %v2958_v32 = vrot.slane %v2956_v48, 1  ;;  %v1827_v8 = vshrl.u32 %v5276_v20, 16  ;;  %v1829_v49 = vshll.u32 %v5276_v20, 16  ;;  %v3137_v35 = vrot.slane %v5064_v56, 1 }
  0xf6   : > { %v4128_v40 = vld [vmem:[#allocation2 + $0xc0] sm:$0xf0]  ;;  %v1665_v45 = vunpack.c.l.b16 %v1537_v55  ;;  %1894 = vrot.lane.b32.xlu0 %v1813_v43, %s4422_s14  ;;  %v1825_v4 = vsel %vm1095_vm2, %v5438_v61, %v1824_v36  ;;  %v2840_v62 = vunpack.c.l.b16 %v2712_v53  ;;  %v3136_v6 = vrot.slane %v4140_v15, 1 }
  0xf7   : > { %3802 = vmatmul.msk.bf16.gmra.mxu1 %vm1417_vm10, %v1998_v27  ;;  %v4130_v12 = vor.u32 %v4129_v46, %v4128_v40  ;;  %v2953_v27 = vrot.slane %v2951_v25, 1  ;;  %v1831_v26 = vrot.slane %v1829_v49, 1  ;;  %v1841_v56 = vshll.u32 %v5462_v37, 16 }
  0xf8   : > { %v5442_v2 = vpack.c.b16 %v1665_v45, %v1665_v45  ;;  %v5465_v45 = vpack.c.b16 %v2840_v62, %v2840_v62  ;;  %v3138_v15 = vsel %vm1368_vm9, %v3136_v6, %v3137_v35  ;;  %v1253_v62 = vshrl.u32 %v5278_v23, 16 }
  0xf9   : > { %v2954_v47 = vor.u32 %v2953_v27, %v2949_v58  ;;  %v1238_v58 = vrot.slane %v1236_v1, 1  ;;  %v1832_v40 = vor.u32 %v1831_v26, %v1827_v8  ;;  %v1879_v27 = vpop.permute.xlu2 %1878  ;;  %v1846_v1 = vshll.u32 %v5327_v9, 16 }
  0xfa   : > { %3867 = vmatmul.msk.bf16.gmra.mxu3 %vm1417_vm10, %v1416_v24  ;;  %v1999_v24 = vrot.slane %v4130_v12, 1  ;;  %v2000_v44 = vrot.slane %v5442_v2, 1  ;;  %v2968_v12 = vshll.u32 %v5465_v45, 16  ;;  %v2009_v53 = vsel %vm1417_vm10, %v5043_v63, %v1879_v27 }
  0xfb   : > { %v5432_v30 = vpop.permute.xlu1 %1880  ;;  %v2959_v0 = vsel %vm1095_vm2, %v2954_v47, %v2958_v32  ;;  %1308 = vrot.lane.b32.xlu2 %v1227_v38, %s4422_s14  ;;  %v4260_v47 = vld [vmem:[#allocation2 + $0x24] sm:$0xe]  ;;  %v1848_v63 = vrot.slane %v1846_v1, 1  ;;  %v1272_v1 = vshll.u32 %v5329_v50, 16 }
  0xfc   : > { %3070 = vrot.lane.b32.xlu1 %v2959_v0, %s4422_s14 }
  0xfd   : > { %2208 = vmatmul.bf16.gmra.mxu0 %v2006_v18  ;;  %2511 = vmatmul.bf16.gmra.mxu2 %v1425_v52  ;;  %v5440_v41 = vpop.f32.mrf.mxu3  ;;  %v1231_v52 = vshll.u32 %v5189_v3, 16  ;;  %v1834_v18 = vshll.u32 %v5292_v60, 16  ;;  %v2001_v60 = vsel %vm1368_vm9, %v1999_v24, %v2000_v44  ;;  %v2970_v44 = vrot.slane %v2968_v12, 1  ;;  %v6272_v12 = vld [vmem:[#allocation30_spill] sm:$0xff] }
  0xfe   : > { %1896 = vrot.lane.b32.xlu0 %v1825_v4, %s4422_s14  ;;  %v1248_v4 = vshll.u32 %v5239_v59, 16  ;;  %v3140_v27 = vrot.slane %v6272_v12, 1  ;;  %v1284_v12 = vshll.u32 %v5380_v14, 16 }
  0xff   : > { %v5436_v42 = vpop.f32.mrf.mxu1  ;;  %v1233_v46 = vrot.slane %v1231_v52, 1  ;;  %v1836_v25 = vrot.slane %v1834_v18, 1  ;;  %v1843_v52 = vrot.slane %v1841_v56, 1  ;;  %v2971_v8 = vsel %vm1095_vm2, %v5388_v19, %v2970_v44 }
 0x100   : > { %v1250_v9 = vrot.slane %v1248_v4, 1  ;;  %v1255_v18 = vshll.u32 %v5278_v23, 16  ;;  %v4261_v19 = vor.u32 %v4260_v47, %v5071_v28  ;;  %v5512_v47 = vld [vmem:[#allocation2 + $0xc0] sm:$0xff]  }
 0x101   : > { %v1234_v43 = vor.u32 %v1233_v46, %v1229_v17  ;;  %v1837_v38 = vsel %vm1095_vm2, %v1832_v40, %v1836_v25  ;;  %v1839_v17 = vshrl.u32 %v5462_v37, 16  ;;  %v1853_v46 = vshll.u32 %v5367_v11, 16 }
 0x102   : > { %v1251_v26 = vsel %vm1095_vm2, %v5438_v61, %v1250_v9  ;;  %v1257_v6 = vrot.slane %v1255_v18, 1  ;;  %v1851_v25 = vshrl.u32 %v5367_v11, 16  ;;  %v1858_v40 = vshll.u32 %v5378_v39, 16  ;;  %v5527_v18 = vld [vmem:[#allocation2 + $0x30] sm:$0xff]  }
 0x103   : > { %v5459_v55 = vpop.permute.xlu1 %1298  ;;  %v1239_v24 = vsel %vm1095_vm2, %v1234_v43, %v1238_v58  ;;  %v5492_v49 = vor.u32 %v1843_v52, %v1839_v17  ;;  %v1260_v43 = vshll.u32 %v5294_v10, 16  ;;  %v3139_v56 = vrot.slane %v4261_v19, 1  ;;  %v4141_v19 = vld [vmem:[#allocation2 + $0x30] sm:$0xf0] }
 0x104   : > { %1310 = vrot.lane.b32.xlu2 %v1239_v24, %s4422_s14  ;;  %3072 = vrot.lane.b32.xlu1 %v2971_v8, %s4422_s14  ;;  %v1865_v4 = vshll.u32 %v5512_v47, 16 }
 0x105   : > { %v5470_v36 = vpop.f32.mrf.mxu3  ;;  %v1849_v58 = vsel %vm1095_vm2, %v5492_v49, %v1848_v63  ;;  %v3141_v44 = vsel %vm1368_vm9, %v3139_v56, %v3140_v27  ;;  %v2714_v63 = vld [vmem:[#allocation2 + $0x98] sm:$0x1]  ;;  %v5548_v27 = vld [vmem:[#allocation2 + $0x84] sm:$0xff]  }
 0x106   : > { %1898 = vrot.lane.b32.xlu0 %v1837_v38, %s4422_s14  ;;  %v1860_v38 = vrot.slane %v1858_v40, 1  ;;  %v1867_v8 = vrot.slane %v1865_v4, 1 }
 0x107   : > { %v5468_v48 = vpop.f32.mrf.mxu1  ;;  %3803 = vmatmul.msk.bf16.gmra.mxu1 %vm1417_vm10, %v2001_v60  ;;  %v1855_v60 = vrot.slane %v1853_v46, 1  ;;  %v2012_v46 = vsel %vm1417_vm10, %v5527_v18, %v5432_v30 }
 0x109   : > { %v1856_v24 = vor.u32 %v1855_v60, %v1851_v25 }
 0x10a   : > { %3916 = vmatmul.msk.bf16.vlgmr.msrb.gmra.mxu3 %vm1417_vm10, %v3138_v15  ;;  %v1258_v15 = vor.u32 %v1257_v6, %v1253_v62  ;;  %v1297_v17 = vpop.permute.xlu2 %1296  ;;  %v2842_v62 = vunpack.c.l.b16 %v2714_v63 }
 0x10b   : > { %v1295_v32 = vpop.permute.xlu0 %1294  ;;  %v5488_v59 = vpop.permute.xlu1 %1886  ;;  %v1431_v50 = vsel %vm1417_vm10, %v5527_v18, %v1297_v17 }
 0x10c   : > { %v1428_v0 = vsel %vm1417_vm10, %v5033_v5, %v1295_v32  ;;  %1312 = vrot.lane.b32.xlu2 %v1251_v26, %s4422_s14  ;;  %v1262_v32 = vrot.slane %v1260_v43, 1  ;;  %v4142_v26 = vld [vmem:[#allocation2 + $0x30] sm:$0xe]  ;;  %v5542_v25 = vpack.c.b16 %v2842_v62, %v2842_v62  ;;  %v2973_v62 = vshrl.u32 %v5548_v27, 16 }
 0x10d   : > { %2213 = vmatmul.bf16.gmra.mxu0 %v2009_v53  ;;  %v5496_v5 = vpop.f32.mrf.mxu3  ;;  %2516 = vmatmul.bf16.gmra.mxu2 %v1428_v0  ;;  %v1861_v53 = vsel %vm1095_vm2, %v1856_v24, %v1860_v38  ;;  %v1863_v0 = vshrl.u32 %v5512_v47, 16  ;;  %v4143_v60 = vor.u32 %v4142_v26, %v4141_v19  ;;  %v2713_v38 = vld [vmem:[#allocation2 + $0x8c] sm:$0x1] }
 0x10e   : > { %1900 = vrot.lane.b32.xlu0 %v1849_v58, %s4422_s14  ;;  %v1263_v52 = vsel %vm1095_vm2, %v1258_v15, %v1262_v32  ;;  %v1279_v58 = vshll.u32 %v5369_v57, 16  ;;  %v5550_v15 = vld [vmem:[#allocation2 + $0x84] sm:$0xf0] }
 0x10f   : > { %v5499_v35 = vpop.f32.mrf.mxu1  ;;  %v5537_v6 = vor.u32 %v1867_v8, %v1863_v0  ;;  %v3142_v4 = vrot.slane %v4143_v60, 1  ;;  %v6274_v0 = vld [vmem:[#allocation26_spill] sm:$0xff] }
 0x110   : > { %v1281_v56 = vrot.slane %v1279_v58, 1  ;;  %v5571_v60 = vld [vmem:[#allocation2 + $0x9c] sm:$0xff]  }
 0x113   : > { %v3057_v28 = vpop.permute.xlu1 %3056 }
 0x114   : > { %v3185_v10 = vsel %vm1417_vm10, %v5410_v33, %v3057_v28  ;;  %v1870_v33 = vshll.u32 %v5442_v2, 16  ;;  %1314 = vrot.lane.b32.xlu2 %v1263_v52, %s4422_s14  ;;  %v1274_v2 = vrot.slane %v1272_v1, 1  ;;  %v1277_v28 = vshrl.u32 %v5369_v57, 16 }
 0x115   : > { %v5517_v39 = vpop.f32.mrf.mxu3  ;;  %v2841_v52 = vunpack.c.l.b16 %v2713_v38 }
 0x116   : > { %1902 = vrot.lane.b32.xlu0 %v1861_v53, %s4422_s14  ;;  %v1872_v43 = vrot.slane %v1870_v33, 1  ;;  %v1275_v40 = vsel %vm1095_vm2, %v5492_v49, %v1274_v2  ;;  %v1282_v14 = vor.u32 %v1281_v56, %v1277_v28  ;;  %v1286_v53 = vrot.slane %v1284_v12, 1  ;;  %v4263_v28 = vld [vmem:[#allocation2 + $0x3c] sm:$0xe]  ;;  %v2715_v12 = vld [vmem:[#allocation2 + $0xa4] sm:$0x1] }
 0x117   : > { %3385 = vmatmul.bf16.vlgmr.msrb.gmra.mxu1 %v3185_v10  ;;  %v5525_v9 = vpop.f32.mrf.mxu1  ;;  %v2992_v10 = vshll.u32 %v5542_v25, 16  ;;  %v5562_v63 = vpack.c.b16 %v2841_v52, %v2841_v52 }
 0x118   : > { %v1873_v32 = vsel %vm1095_vm2, %v5537_v6, %v1872_v43  ;;  %v1287_v2 = vsel %vm1095_vm2, %v1282_v14, %v1286_v53  ;;  %v2997_v53 = vshrl.u32 %v5571_v60, 16 }
 0x119   : > { %v2994_v33 = vrot.slane %v2992_v10, 1  ;;  %v1883_v26 = vpop.permute.xlu0 %1882  ;;  %v2980_v58 = vshll.u32 %v5562_v63, 16 }
 0x11a   : > { %3917 = vmatmul.msk.bf16.gmra.mxu3 %vm1417_vm10, %v3141_v44  ;;  %v6273_v44 = vld [vmem:[#allocation32_spill] sm:$0xff] }
 0x11b   : > { %v3059_v24 = vpop.permute.xlu1 %3058  ;;  %v3143_v17 = vrot.slane %v6273_v44, 1  ;;  %v2995_v56 = vsel %vm1095_vm2, %v5438_v61, %v2994_v33  ;;  %v2982_v52 = vrot.slane %v2980_v58, 1  ;;  %v6279_v58 = vld [vmem:[#allocation36_spill] sm:$0xff] }
 0x11c   : > { %1316 = vrot.lane.b32.xlu2 %v1275_v40, %s4422_s14  ;;  %v3188_v8 = vsel %vm1417_vm10, %v6274_v0, %v3059_v24  ;;  %v5573_v40 = vld [vmem:[#allocation2 + $0x9c] sm:$0xf0]  ;;  %v6276_v24 = vld [vmem:[#allocation19_spill] sm:$0xff]  ;;  %v2999_v0 = vshll.u32 %v5571_v60, 16 }
 0x11d   : > { %2218 = vmatmul.bf16.gmra.mxu0 %v2012_v46  ;;  %v5540_v30 = vpop.f32.mrf.mxu3  ;;  %2521 = vmatmul.bf16.gmra.mxu2 %v1431_v50  ;;  %v2975_v46 = vshll.u32 %v5548_v27, 16  ;;  %v3144_v19 = vsel %vm1368_vm9, %v3142_v4, %v3143_v17  ;;  %v1434_v38 = vsel %vm1417_vm10, %v6276_v24, %v5459_v55  ;;  %v2843_v4 = vunpack.c.l.b16 %v2715_v12 }
 0x11e   : > { %1904 = vrot.lane.b32.xlu0 %v1873_v32, %s4422_s14  ;;  %v6275_v32 = vld [vmem:[#allocation28_spill] sm:$0xff] }
 0x11f   : > { %v2977_v43 = vrot.slane %v2975_v46, 1  ;;  %v2015_v10 = vsel %vm1417_vm10, %v6275_v32, %v1883_v26  ;;  %v5587_v61 = vpack.c.b16 %v2843_v4, %v2843_v4  ;;  %v4241_v4 = vld [vmem:[#allocation2 + $0x48] sm:$0xff]  }
 0x121   : > { %v2978_v17 = vor.u32 %v2977_v43, %v2973_v62  ;;  %v3004_v55 = vshll.u32 %v5587_v61, 16 }
 0x123   : > { %v2983_v46 = vsel %vm1095_vm2, %v2978_v17, %v2982_v52  ;;  %v3006_v26 = vrot.slane %v3004_v55, 1 }
 0x124   : > { %v5557_v1 = vpop.f32.mrf.mxu1  ;;  %1318 = vrot.lane.b32.xlu2 %v1287_v2, %s4422_s14  ;;  %v3061_v2 = vpop.permute.xlu1 %3060 }
 0x125   : > { %v5565_v50 = vpop.f32.mrf.mxu3 }
 0x126   : > { %3076 = vrot.lane.b32.xlu0 %v2995_v56, %s4422_s14  ;;  %v3146_v56 = vrot.slane %v6279_v58, 1 }
 0x127   : > { %3390 = vmatmul.bf16.gmra.mxu1 %v3188_v8  ;;  %v6278_v8 = vld [vmem:[#allocation35_spill] sm:$0xff] }
 0x128   : > { %v4264_v33 = vor.u32 %v4263_v28, %v6278_v8 }
 0x129   : > { %v1885_v24 = vpop.permute.xlu2 %1884 }
 0x12a   : > { %3918 = vmatmul.msk.bf16.gmra.mxu3 %vm1417_vm10, %v3144_v19  ;;  %v3001_v19 = vrot.slane %v2999_v0, 1  ;;  %v3145_v43 = vrot.slane %v4264_v33, 1  ;;  %v2018_v17 = vsel %vm1417_vm10, %v4241_v4, %v1885_v24  ;;  %v4145_v0 = vld [vmem:[#allocation2 + $0x48] sm:$0xe]  ;;  %v5624_v24 = vld [vmem:[#allocation2 + $0xb4] sm:$0xf0] }
 0x12c   : > { %v5584_v44 = vpop.f32.mrf.mxu1  ;;  %v3002_v62 = vor.u32 %v3001_v19, %v2997_v53  ;;  %3074 = vrot.lane.b32.xlu2 %v2983_v46, %s4422_s14  ;;  %v4144_v53 = vld [vmem:[#allocation2 + $0x48] sm:$0xf0] }
 0x12d   : > { %2223 = vmatmul.bf16.gmra.mxu0 %v2015_v10  ;;  %v5589_v14 = vpop.f32.mrf.mxu3  ;;  %2526 = vmatmul.bf16.gmra.mxu2 %v1434_v38  ;;  %v3191_v10 = vsel %vm1417_vm10, %v5527_v18, %v3061_v2  ;;  %v3147_v38 = vsel %vm1368_vm9, %v3145_v43, %v3146_v56  ;;  %v4146_v18 = vor.u32 %v4145_v0, %v4144_v53  ;;  %v6284_v43 = vld [vmem:[#allocation34_spill] sm:$0xff]  ;;  %v6286_v53 = vld [vmem:[#allocation15_spill] sm:$0xff] }
 0x12e   : > { %6277 = vst [vmem:[#allocation30_spill] sm:$0xff] %v5589_v14  ;;  %v3007_v12 = vsel %vm1095_vm2, %v3002_v62, %v3006_v26  ;;  %v6282_v26 = vld [vmem:[#allocation39_spill] sm:$0xff]  ;;  %v2021_v0 = vsel %vm1417_vm10, %v6286_v53, %v5488_v59 }
 0x12f   : > { %3078 = vrot.lane.b32.xlu1 %v3007_v12, %s4422_s14  ;;  %v3063_v8 = vpop.permute.xlu1 %3062  ;;  %v3148_v19 = vrot.slane %v4146_v18, 1  ;;  %v3149_v2 = vrot.slane %v6282_v26, 1 }
 0x130   : > { %v3194_v58 = vsel %vm1417_vm10, %v6284_v43, %v3063_v8 }
 0x131   : > { %v3150_v12 = vsel %vm1368_vm9, %v3148_v19, %v3149_v2 }
 0x134   : > { %v5599_v32 = vpop.f32.mrf.mxu1 }
 0x135   : > { %v5604_v28 = vpop.f32.mrf.mxu3 }
 0x136   : > { %6280 = vst [vmem:[#allocation32_spill] sm:$0xff] %v5604_v28  ;;  %v6290_v28 = vld [vmem:[#allocation42_spill] sm:$0xff] }
 0x137   : > { %3395 = vmatmul.bf16.gmra.mxu1 %v3191_v10  ;;  %v5622_v10 = vld [vmem:[#allocation2 + $0xb4] sm:$0xff]  }
 0x138   : > { %v3023_v19 = vshll.u32 %v5622_v10, 16  ;;  %v3021_v2 = vshrl.u32 %v5622_v10, 16 }
 0x13a   : > { %3919 = vmatmul.msk.bf16.gmra.mxu3 %vm1417_vm10, %v3147_v38  ;;  %v4266_v38 = vld [vmem:[#allocation2 + $0x54] sm:$0xe]  ;;  %v3025_v43 = vrot.slane %v3023_v19, 1 }
 0x13c   : > { %v5609_v52 = vpop.f32.mrf.mxu1  ;;  %v3026_v53 = vor.u32 %v3025_v43, %v3021_v2 }
 0x13d   : > { %2228 = vmatmul.bf16.gmra.mxu0 %v2018_v17  ;;  %v5611_v55 = vpop.f32.mrf.mxu3  ;;  %v2717_v17 = vld [vmem:[#allocation2 + $0xbc] sm:$0x1] }
 0x13e   : > { %6281 = vst [vmem:[#allocation26_spill] sm:$0xff] %v5611_v55  ;;  %v2845_v18 = vunpack.c.l.b16 %v2717_v17 }
 0x140   : > { %v1301_v33 = vpop.permute.xlu0 %1300 }
 0x141   : > { %v1437_v46 = vsel %vm1417_vm10, %v4241_v4, %v1301_v33  ;;  %v1303_v33 = vpop.permute.xlu2 %1302 }
 0x142   : > { %2531 = vmatmul.bf16.gmra.mxu2 %v1437_v46  ;;  %v5632_v46 = vpack.c.b16 %v2845_v18, %v2845_v18  ;;  %v1440_v17 = vsel %vm1417_vm10, %v4920_v29, %v1303_v33  ;;  %v3065_v55 = vpop.permute.xlu1 %3064  ;;  %v2716_v18 = vld [vmem:[#allocation2 + $0xb0] sm:$0x1] }
 0x144   : > { %v5615_v62 = vpop.f32.mrf.mxu1 }
 0x145   : > { %6283 = vst [vmem:[#allocation28_spill] sm:$0xff] %v5615_v62  ;;  %v5619_v56 = vpop.f32.mrf.mxu3  ;;  %v2844_v62 = vunpack.c.l.b16 %v2716_v18 }
 0x146   : > { %6285 = vst [vmem:[#allocation19_spill] sm:$0xff] %v5619_v56  ;;  %v6289_v56 = vld [vmem:[#allocation41_spill] sm:$0xff] }
 0x147   : > { %3400 = vmatmul.bf16.gmra.mxu1 %v3194_v58  ;;  %v3028_v58 = vshll.u32 %v5632_v46, 16  ;;  %v4267_v59 = vor.u32 %v4266_v38, %v6289_v56  ;;  %v3197_v56 = vsel %vm1417_vm10, %v4241_v4, %v3065_v55  ;;  %v5648_v38 = vpack.c.b16 %v2844_v62, %v2844_v62 }
 0x148   : > { %v1889_v33 = vpop.permute.xlu0 %1888 }
 0x149   : > { %v1305_v14 = vpop.permute.xlu2 %1304  ;;  %v3016_v29 = vshll.u32 %v5648_v38, 16 }
 0x14a   : > { %3920 = vmatmul.msk.bf16.gmra.mxu3 %vm1417_vm10, %v3150_v12  ;;  %v3030_v12 = vrot.slane %v3028_v58, 1 }
 0x14b   : > { %v3018_v58 = vrot.slane %v3016_v29, 1 }
 0x14c   : > { %v5630_v8 = vpop.f32.mrf.mxu1 }
 0x14d   : > { %6287 = vst [vmem:[#allocation35_spill] sm:$0xff] %v5630_v8  ;;  %2233 = vmatmul.bf16.gmra.mxu0 %v2021_v0  ;;  %v5635_v26 = vpop.f32.mrf.mxu3  ;;  %v3031_v8 = vsel %vm1095_vm2, %v3026_v53, %v3030_v12  ;;  %v3151_v0 = vrot.slane %v4267_v59, 1  ;;  %v4242_v59 = vld [vmem:[#allocation2 + $0x60] sm:$0xff]   ;;  %v3019_v4 = vsel %vm1095_vm2, %v5492_v49, %v3018_v58  ;;  %v5661_v12 = vpop.f32.mrf.mxu2 }
 0x14e   : > { %6288 = vst [vmem:[#allocation36_spill] sm:$0xff] %v5635_v26  ;;  %v3152_v26 = vrot.slane %v6290_v28, 1  ;;  %3082 = vrot.lane.b32.xlu0 %v3031_v8, %s4422_s14  ;;  %v2718_v28 = vld [vmem:[#allocation2 + $0xc8] sm:$0x1]  ;;  %v2024_v8 = vsel %vm1417_vm10, %v4242_v59, %v1889_v33  ;;  %3080 = vrot.lane.b32.xlu2 %v3019_v4, %s4422_s14  ;;  %v1443_v49 = vsel %vm1417_vm10, %v4242_v59, %v1305_v14 }
 0x14f   : > { %v2846_v55 = vunpack.c.l.b16 %v2718_v28  ;;  %6291 = vst [vmem:[#allocation39_spill] sm:$0xff] %v5661_v12  ;;  %v3155_v12 = vrot.slane %v5345_v34, 1 }
 0x150   : > { %v3153_v43 = vsel %vm1368_vm9, %v3151_v0, %v3152_v26  ;;  %v4148_v26 = vld [vmem:[#allocation2 + $0x60] sm:$0xe] }
 0x151   : > { %v1307_v62 = vpop.permute.xlu2 %1306  ;;  %v5663_v18 = vpack.c.b16 %v2846_v55, %v2846_v55 }
 0x152   : > { %2536 = vmatmul.bf16.gmra.mxu2 %v1440_v17  ;;  %v4147_v17 = vld [vmem:[#allocation2 + $0x60] sm:$0xf0] }
 0x153   : > { %v4149_v29 = vor.u32 %v4148_v26, %v4147_v17 }
 0x154   : > { %v5645_v19 = vpop.f32.mrf.mxu1 }
 0x155   : > { %v5650_v2 = vpop.f32.mrf.mxu3  ;;  %v3154_v4 = vrot.slane %v4149_v29, 1  ;;  %v5679_v14 = vpop.f32.mrf.mxu2 }
 0x156   : > { %6295 = vst [vmem:[#allocation41_spill] sm:$0xff] %v5679_v14 }
 0x157   : > { %3405 = vmatmul.bf16.gmra.mxu1 %v3197_v56  ;;  %v3040_v56 = vshll.u32 %v5663_v18, 16 }
 0x158   : > { %v1891_v28 = vpop.permute.xlu0 %1890 }
 0x159   : > { %v3042_v33 = vrot.slane %v3040_v56, 1  ;;  %v1309_v26 = vpop.permute.xlu2 %1308  ;;  %v4269_v56 = vld [vmem:[#allocation2 + $0x6c] sm:$0xe]  ;;  %v2027_v34 = vsel %vm1417_vm10, %v5019_v13, %v1891_v28  ;;  %v3158_v28 = vrot.slane %v5425_v21, 1 }
 0x15a   : > { %3921 = vmatmul.msk.bf16.gmra.mxu3 %vm1417_vm10, %v3153_v43  ;;  %v3067_v43 = vpop.permute.xlu1 %3066 }
 0x15b   : > { %v3043_v58 = vsel %vm1095_vm2, %v5537_v6, %v3042_v33  ;;  %v3156_v6 = vsel %vm1368_vm9, %v3154_v4, %v3155_v12  ;;  %v1446_v12 = vsel %vm1417_vm10, %v5023_v51, %v1307_v62 }
 0x15c   : > { %v5659_v53 = vpop.f32.mrf.mxu1  ;;  %3084 = vrot.lane.b32.xlu1 %v3043_v58, %s4422_s14 }
 0x15d   : > { %2238 = vmatmul.bf16.gmra.mxu0 %v2024_v8  ;;  %v5665_v0 = vpop.f32.mrf.mxu3  ;;  %v6293_v8 = vld [vmem:[#allocation40_spill] sm:$0xff] }
 0x15e   : > { %6292 = vst [vmem:[#allocation34_spill] sm:$0xff] %v5665_v0  ;;  %v3200_v0 = vsel %vm1417_vm10, %v6293_v8, %v3067_v43 }
 0x160   : > { %v1893_v33 = vpop.permute.xlu0 %1892 }
 0x161   : > { %v5691_v58 = vpop.permute.xlu2 %1310  ;;  %v2030_v21 = vsel %vm1417_vm10, %v5353_v22, %v1893_v33  ;;  %v1449_v33 = vsel %vm1417_vm10, %v5353_v22, %v1309_v26 }
 0x162   : > { %2541 = vmatmul.bf16.gmra.mxu2 %v1443_v49  ;;  %v3069_v4 = vpop.permute.xlu1 %3068 }
 0x164   : > { %v5673_v55 = vpop.f32.mrf.mxu1 }
 0x165   : > { %v5677_v17 = vpop.f32.mrf.mxu3 }
 0x166   : > { %6294 = vst [vmem:[#allocation15_spill] sm:$0xff] %v5677_v17 }
 0x167   : > { %3410 = vmatmul.bf16.gmra.mxu1 %v3200_v0  ;;  %v4270_v0 = vor.u32 %v4269_v56, %v5397_v54 }
 0x168   : > { %v1895_v17 = vpop.permute.xlu0 %1894 }
 0x169   : > { %v3157_v13 = vrot.slane %v4270_v0, 1  ;;  %v5709_v51 = vpop.permute.xlu2 %1312 }
 0x16a   : > { %v5682_v29 = vpop.f32.mrf.mxu0  ;;  %3922 = vmatmul.msk.bf16.gmra.mxu3 %vm1417_vm10, %v3156_v6 }
 0x16b   : > { %6296 = vst [vmem:[#allocation42_spill] sm:$0xff] %v5682_v29  ;;  %v3159_v54 = vsel %vm1368_vm9, %v3157_v13, %v3158_v28  ;;  %v5720_v28 = vld [vmem:[#allocation2 + $0xcc] sm:$0xff]  }
 0x16c   : > { %v5687_v49 = vpop.f32.mrf.mxu1  ;;  %v3047_v22 = vshll.u32 %v5720_v28, 16 }
 0x16d   : > { %2243 = vmatmul.bf16.gmra.mxu0 %v2027_v34  ;;  %v5689_v43 = vpop.f32.mrf.mxu3  ;;  %v3203_v34 = vsel %vm1417_vm10, %v4242_v59, %v3069_v4  ;;  %v4150_v59 = vld [vmem:[#allocation2 + $0x78] sm:$0xf0] }
 0x16e   : > { %6297 = vst [vmem:[#allocation40_spill] sm:$0xff] %v5689_v43 }
 0x170   : > { %v5694_v8 = vpop.f32.mrf.mxu2 }
 0x171   : > { %6298 = vst [vmem:[#allocation43_spill] sm:$0xff] %v5694_v8  ;;  %v3071_v8 = vpop.permute.xlu1 %3070 }
 0x172   : > { %v5698_v14 = vpop.f32.mrf.mxu0  ;;  %2546 = vmatmul.bf16.gmra.mxu2 %v1446_v12  ;;  %v4151_v12 = vld [vmem:[#allocation2 + $0x78] sm:$0xe] }
 0x173   : > { %6299 = vst [vmem:[#allocation44_spill] sm:$0xff] %v5698_v14  ;;  %v4152_v13 = vor.u32 %v4151_v12, %v4150_v59  ;;  %v5730_v14 = vpop.permute.xlu2 %1314  ;;  %v3206_v12 = vsel %vm1417_vm10, %v5395_v7, %v3071_v8 }
 0x174   : > { %v5701_v6 = vpop.f32.mrf.mxu1 }
 0x175   : > { %6300 = vst [vmem:[#allocation45_spill] sm:$0xff] %v5701_v6  ;;  %v5704_v43 = vpop.f32.mrf.mxu3 }
 0x176   : > { %6301 = vst [vmem:[#allocation46_spill] sm:$0xff] %v5704_v43 }
 0x177   : > { %3415 = vmatmul.bf16.gmra.mxu1 %v3203_v34  ;;  %v1897_v34 = vpop.permute.xlu0 %1896 }
 0x178   : > { %v5707_v56 = vpop.f32.mrf.mxu2 }
 0x179   : > { %6302 = vst [vmem:[#allocation47_spill] sm:$0xff] %v5707_v56  ;;  %v5722_v56 = vld [vmem:[#allocation2 + $0xcc] sm:$0xf0] }
 0x17a   : > { %v5711_v62 = vpop.f32.mrf.mxu0  ;;  %3923 = vmatmul.msk.bf16.gmra.mxu3 %vm1417_vm10, %v3159_v54  ;;  %v2719_v54 = vld [vmem:[#allocation2 + $0xd4] sm:$0x1] }
 0x17b   : > { %6303 = vst [vmem:[#allocation48_spill] sm:$0xff] %v5711_v62 }
 0x17c   : > { %v5716_v0 = vpop.f32.mrf.mxu1 }
 0x17d   : > { %6304 = vst [vmem:[#allocation49_spill] sm:$0xff] %v5716_v0  ;;  %2248 = vmatmul.bf16.gmra.mxu0 %v2030_v21  ;;  %v5718_v4 = vpop.f32.mrf.mxu3  ;;  %v2847_v0 = vunpack.c.l.b16 %v2719_v54  ;;  %v3160_v21 = vrot.slane %v4152_v13, 1  ;;  %v3049_v54 = vrot.slane %v3047_v22, 1 }
 0x17e   : > { %6305 = vst [vmem:[#allocation50_spill] sm:$0xff] %v5718_v4  ;;  %v3161_v4 = vrot.slane %v5465_v45, 1 }
 0x17f   : > { %v1899_v7 = vpop.permute.xlu0 %1898 }
 0x180   : > { %v5724_v43 = vpop.f32.mrf.mxu2  ;;  %v3162_v45 = vsel %vm1368_vm9, %v3160_v21, %v3161_v4  ;;  %v5756_v21 = vpop.permute.xlu2 %1316 }
 0x181   : > { %6306 = vst [vmem:[#allocation51_spill] sm:$0xff] %v5724_v43  ;;  %v5737_v43 = vpack.c.b16 %v2847_v0, %v2847_v0  ;;  %v2033_v0 = vsel %vm1417_vm10, %v5187_v16, %v1895_v17  ;;  %v1452_v16 = vsel %vm1417_vm10, %v5189_v3, %v5691_v58  ;;  %v3073_v17 = vpop.permute.xlu1 %3072 }
 0x182   : > { %v5728_v62 = vpop.f32.mrf.mxu0  ;;  %2551 = vmatmul.bf16.gmra.mxu2 %v1449_v33  ;;  %v4272_v33 = vld [vmem:[#allocation2 + $0x84] sm:$0xe] }
 0x183   : > { %6307 = vst [vmem:[#allocation52_spill] sm:$0xff] %v5728_v62  ;;  %v3045_v62 = vshrl.u32 %v5720_v28, 16  ;;  %v3052_v6 = vshll.u32 %v5737_v43, 16 }
 0x184   : > { %v5733_v59 = vpop.f32.mrf.mxu1 }
 0x185   : > { %6308 = vst [vmem:[#allocation53_spill] sm:$0xff] %v5733_v59  ;;  %v5740_v26 = vpop.f32.mrf.mxu3  ;;  %v3050_v59 = vor.u32 %v3049_v54, %v3045_v62  ;;  %v3054_v29 = vrot.slane %v3052_v6, 1  ;;  %v4273_v6 = vor.u32 %v4272_v33, %v5550_v15 }
 0x186   : > { %6309 = vst [vmem:[#allocation54_spill] sm:$0xff] %v5740_v26 }
 0x187   : > { %3420 = vmatmul.bf16.gmra.mxu1 %v3206_v12  ;;  %v3055_v22 = vsel %vm1095_vm2, %v3050_v59, %v3054_v29  ;;  %v5766_v29 = vpop.permute.xlu0 %1900  ;;  %v3163_v59 = vrot.slane %v4273_v6, 1 }
 0x188   : > { %v5745_v13 = vpop.f32.mrf.mxu2  ;;  %3086 = vrot.lane.b32.xlu2 %v3055_v22, %s4422_s14  ;;  %v4243_v22 = vld [vmem:[#allocation2 + $0x78] sm:$0xff]  }
 0x189   : > { %6310 = vst [vmem:[#allocation55_spill] sm:$0xff] %v5745_v13  ;;  %v3209_v13 = vsel %vm1417_vm10, %v4243_v22, %v3073_v17  ;;  %v4154_v17 = vld [vmem:[#allocation2 + $0x90] sm:$0xe] }
 0x18a   : > { %v5747_v8 = vpop.f32.mrf.mxu0  ;;  %3924 = vmatmul.msk.bf16.gmra.mxu3 %vm1417_vm10, %v3162_v45  ;;  %v3164_v45 = vrot.slane %v5562_v63, 1  ;;  %v2036_v63 = vsel %vm1417_vm10, %v5414_v31, %v1897_v34 }
 0x18c   : > { %v5754_v12 = vpop.f32.mrf.mxu1  ;;  %v3165_v3 = vsel %vm1368_vm9, %v3163_v59, %v3164_v45 }
 0x18d   : > { %2253 = vmatmul.bf16.gmra.mxu0 %v2033_v0  ;;  %v3475_v4 = vpop.f32.mrf.mxu3 }
 0x190   : > { %v5759_v62 = vpop.f32.mrf.mxu2 }
 0x191   : > { %6311 = vst [vmem:[#allocation56_spill] sm:$0xff] %v5759_v62  ;;  %v5772_v62 = vpop.permute.xlu2 %1318 }
 0x192   : > { %v5764_v54 = vpop.f32.mrf.mxu0  ;;  %2556 = vmatmul.bf16.gmra.mxu2 %v1452_v16  ;;  %v4153_v16 = vld [vmem:[#allocation2 + $0x90] sm:$0xf0] }
 0x193   : > { %6312 = vst [vmem:[#allocation57_spill] sm:$0xff] %v5764_v54  ;;  %v4155_v22 = vor.u32 %v4154_v17, %v4153_v16 }
 0x194   : > { %v3386_v0 = vpop.f32.mrf.mxu1 }
 0x195   : > { %v5770_v15 = vadd.f32 %v3475_v4, %v3386_v0  ;;  %v3477_v33 = vpop.f32.mrf.mxu3  ;;  %v5784_v0 = vpop.permute.xlu0 %1902 }
 0x197   : > { %3425 = vmatmul.bf16.gmra.mxu1 %v3209_v13 }
 0x198   : > { %v5775_v58 = vpop.f32.mrf.mxu2 }
 0x199   : > { %6313 = vst [vmem:[#allocation58_spill] sm:$0xff] %v5775_v58  ;;  %v3075_v45 = vpop.permute.xlu2 %3074  ;;  %v1455_v58 = vsel %vm1417_vm10, %v5414_v31, %v5709_v51 }
 0x19a   : > { %v5777_v54 = vpop.f32.mrf.mxu0  ;;  %3925 = vmatmul.msk.bf16.gmra.mxu3 %vm1417_vm10, %v3165_v3  ;;  %v3166_v3 = vrot.slane %v4155_v22, 1 }
 0x19b   : > { %6314 = vst [vmem:[#allocation59_spill] sm:$0xff] %v5777_v54  ;;  %v3167_v54 = vrot.slane %v5542_v25, 1  ;;  %v2039_v25 = vsel %vm1417_vm10, %v5276_v20, %v1899_v7  ;;  %v3170_v20 = vrot.slane %v5587_v61, 1 }
 0x19c   : > { %v3388_v6 = vpop.f32.mrf.mxu1 }
 0x19d   : > { %v5782_v4 = vadd.f32 %v3477_v33, %v3388_v6  ;;  %2258 = vmatmul.bf16.gmra.mxu0 %v2036_v63  ;;  %v3480_v13 = vpop.f32.mrf.mxu3  ;;  %v3212_v33 = vsel %vm1417_vm10, %v5548_v27, %v3075_v45  ;;  %v5798_v16 = vpop.permute.xlu0 %1904  ;;  %v3168_v17 = vsel %vm1368_vm9, %v3166_v3, %v3167_v54  ;;  %v1458_v54 = vsel %vm1417_vm10, %v5278_v23, %v5730_v14  ;;  %v4156_v14 = vld [vmem:[#allocation2 + $0xa8] sm:$0xf0] }
 0x19e   : > { %v2042_v23 = vsel %vm1417_vm10, %v5462_v37, %v5766_v29 }
 0x1a0   : > { %v5786_v59 = vpop.f32.mrf.mxu2 }
 0x1a1   : > { %6315 = vst [vmem:[#allocation60_spill] sm:$0xff] %v5786_v59  ;;  %v4275_v59 = vld [vmem:[#allocation2 + $0x9c] sm:$0xe] }
 0x1a2   : > { %v5791_v34 = vpop.f32.mrf.mxu0  ;;  %2561 = vmatmul.bf16.gmra.mxu2 %v1455_v58 }
 0x1a3   : > { %6316 = vst [vmem:[#allocation61_spill] sm:$0xff] %v5791_v34 }
 0x1a4   : > { %v3391_v26 = vpop.f32.mrf.mxu1 }
 0x1a5   : > { %v5796_v63 = vadd.f32 %v3480_v13, %v3391_v26  ;;  %v3482_v6 = vpop.f32.mrf.mxu3  ;;  %v4276_v13 = vor.u32 %v4275_v59, %v5573_v40  ;;  %v3077_v22 = vpop.permute.xlu0 %3076 }
 0x1a7   : > { %3430 = vmatmul.bf16.gmra.mxu1 %v3212_v33  ;;  %v3169_v33 = vrot.slane %v4276_v13, 1 }
 0x1a8   : > { %v5801_v51 = vpop.f32.mrf.mxu2 }
 0x1a9   : > { %v3171_v59 = vsel %vm1368_vm9, %v3169_v33, %v3170_v20  ;;  %v3079_v33 = vpop.permute.xlu1 %3078 }
 0x1aa   : > { %v5803_v34 = vpop.f32.mrf.mxu0  ;;  %3926 = vmatmul.msk.bf16.gmra.mxu3 %vm1417_vm10, %v3168_v17 }
 0x1ac   : > { %v3393_v58 = vpop.f32.mrf.mxu1 }
 0x1ad   : > { %v5808_v27 = vadd.f32 %v3482_v6, %v3393_v58  ;;  %2263 = vmatmul.bf16.gmra.mxu0 %v2039_v25  ;;  %v3485_v26 = vpop.f32.mrf.mxu3  ;;  %v3215_v6 = vsel %vm1417_vm10, %v5414_v31, %v3077_v22  ;;  %v4157_v58 = vld [vmem:[#allocation2 + $0xa8] sm:$0xe] }
 0x1ae   : > { %v4158_v22 = vor.u32 %v4157_v58, %v4156_v14 }
 0x1b0   : > { %v5816_v3 = vpop.f32.mrf.mxu2  ;;  %v3172_v29 = vrot.slane %v4158_v22, 1 }
 0x1b1   : > { %6317 = vst [vmem:[#allocation62_spill] sm:$0xff] %v5816_v3  ;;  %v3179_v3 = vrot.slane %v5663_v18, 1 }
 0x1b2   : > { %v5814_v45 = vpop.f32.mrf.mxu0  ;;  %2566 = vmatmul.bf16.gmra.mxu2 %v1458_v54  ;;  %v1461_v54 = vsel %vm1417_vm10, %v5462_v37, %v5756_v21  ;;  %v4278_v21 = vld [vmem:[#allocation2 + $0xb4] sm:$0xe] }
 0x1b4   : > { %v3396_v7 = vpop.f32.mrf.mxu1 }
 0x1b5   : > { %v5821_v17 = vadd.f32 %v3485_v26, %v3396_v7  ;;  %v3487_v40 = vpop.f32.mrf.mxu3  ;;  %v3173_v7 = vrot.slane %v5648_v38, 1  ;;  %v2045_v38 = vsel %vm1417_vm10, %v5367_v11, %v5784_v0  ;;  %v3176_v11 = vrot.slane %v5632_v46, 1 }
 0x1b6   : > { %v2048_v46 = vsel %vm1417_vm10, %v5512_v47, %v5798_v16 }
 0x1b7   : > { %3435 = vmatmul.bf16.gmra.mxu1 %v3215_v6  ;;  %v3174_v14 = vsel %vm1368_vm9, %v3172_v29, %v3173_v7  ;;  %v1464_v29 = vsel %vm1417_vm10, %v5369_v57, %v5772_v62 }
 0x1b8   : > { %v5832_v31 = vpop.f32.mrf.mxu2 }
 0x1b9   : > { %6318 = vst [vmem:[#allocation63_spill] sm:$0xff] %v5832_v31  ;;  %v4284_v31 = vld [vmem:[#allocation2 + $0xc] sm:$0xe] }
 0x1ba   : > { %v5824_v25 = vpop.f32.mrf.mxu0  ;;  %3927 = vmatmul.msk.bf16.gmra.mxu3 %vm1417_vm10, %v3171_v59 }
 0x1bc   : > { %v3398_v61 = vpop.f32.mrf.mxu1 }
 0x1bd   : > { %v5830_v13 = vadd.f32 %v3487_v40, %v3398_v61  ;;  %2268 = vmatmul.bf16.gmra.mxu0 %v2042_v23  ;;  %v3490_v26 = vpop.f32.mrf.mxu3  ;;  %v3218_v40 = vsel %vm1417_vm10, %v5571_v60, %v3079_v33  ;;  %v4279_v33 = vor.u32 %v4278_v21, %v5624_v24  ;;  %v4076_v24 = vld [vmem:[#allocation2] sm:$0xe] }
 0x1c2   : > { %v5837_v20 = vpop.f32.mrf.mxu0  ;;  %2571 = vmatmul.bf16.gmra.mxu2 %v1461_v54 }
 0x1c3   : > { %6319 = vst [vmem:[#allocation64_spill] sm:$0xff] %v5837_v20 }
 0x1c4   : > { %v3401_v6 = vpop.f32.mrf.mxu1 }
 0x1c5   : > { %v5842_v59 = vadd.f32 %v3490_v26, %v3401_v6  ;;  %v3492_v23 = vpop.f32.mrf.mxu3  ;;  %v5844_v61 = vpop.f32.mrf.mxu2 }
 0x1c6   : > { %6320 = vst [vmem:[#allocation65_spill] sm:$0xff] %v5844_v61  ;;  %v3081_v6 = vpop.permute.xlu2 %3080 }
 0x1c7   : > { %3440 = vmatmul.bf16.gmra.mxu1 %v3218_v40  ;;  %v3175_v40 = vrot.slane %v4279_v33, 1  ;;  %v4159_v33 = vld [vmem:[#allocation2 + $0xc0] sm:$0xf0] }
 0x1c9   : > { %v3177_v57 = vsel %vm1368_vm9, %v3175_v40, %v3176_v11 }
 0x1ca   : > { %v5847_v58 = vpop.f32.mrf.mxu0  ;;  %3928 = vmatmul.msk.bf16.gmra.mxu3 %vm1417_vm10, %v3174_v14 }
 0x1cb   : > { %6321 = vst [vmem:[#allocation66_spill] sm:$0xff] %v5847_v58 }
 0x1cc   : > { %v3403_v22 = vpop.f32.mrf.mxu1 }
 0x1cd   : > { %v5853_v54 = vadd.f32 %v3492_v23, %v3403_v22  ;;  %2273 = vmatmul.bf16.gmra.mxu0 %v2045_v38  ;;  %v3495_v60 = vpop.f32.mrf.mxu3  ;;  %v5855_v26 = vpop.f32.mrf.mxu2  ;;  %v3221_v23 = vsel %vm1417_vm10, %v5462_v37, %v3081_v6  ;;  %v4075_v22 = vld [vmem:[#allocation2] sm:$0xf0]  ;;  %v4281_v37 = vld [vmem:[#allocation2 + $0xc] sm:$0xe]  ;;  %v4160_v6 = vld [vmem:[#allocation2 + $0xc0] sm:$0xe] }
 0x1ce   : > { %6322 = vst [vmem:[#allocation67_spill] sm:$0xff] %v5855_v26  ;;  %v4077_v62 = vor.u32 %v4076_v24, %v4075_v22  ;;  %v4161_v22 = vor.u32 %v4160_v6, %v4159_v33  ;;  %v3083_v24 = vpop.permute.xlu0 %3082  ;;  %v6327_v33 = vld [vmem:[#allocation12_spill] sm:$0xff] }
 0x1cf   : > { %v1955_v6 = vrot.slane %v6327_v33, 1 }
 0x1d0   : > { %v1369_v40 = vrot.slane %v4077_v62, 1  ;;  %v3178_v20 = vrot.slane %v4161_v22, 1  ;;  %v6328_v22 = vld [vmem:[#allocation11_spill] sm:$0xff] }
 0x1d1   : > { %v4285_v18 = vor.u32 %v4284_v31, %v6328_v22 }
 0x1d2   : > { %v5861_v7 = vpop.f32.mrf.mxu0  ;;  %2576 = vmatmul.bf16.gmra.mxu2 %v1464_v29  ;;  %v6324_v29 = vld [vmem:[#allocation9_spill] sm:$0xff] }
 0x1d3   : > { %6323 = vst [vmem:[#allocation68_spill] sm:$0xff] %v5861_v7 }
 0x1d4   : > { %v3406_v0 = vpop.f32.mrf.mxu1 }
 0x1d5   : > { %v5866_v14 = vadd.f32 %v3495_v60, %v3406_v0  ;;  %v3497_v38 = vpop.f32.mrf.mxu3  ;;  %v5868_v21 = vpop.f32.mrf.mxu2  ;;  %v1370_v0 = vrot.slane %v6324_v29, 1 }
 0x1d7   : > { %3445 = vmatmul.bf16.gmra.mxu1 %v3221_v23  ;;  %v1371_v61 = vsel %vm1368_vm9, %v1369_v40, %v1370_v0  ;;  %v4287_v40 = vld [vmem:[#allocation2 + $0xcc] sm:$0xe] }
 0x1d8   : > { %v4288_v31 = vor.u32 %v4287_v40, %v5722_v56  ;;  %v6331_v56 = vld [vmem:[#allocation14_spill] sm:$0xff] }
 0x1d9   : > { %v1958_v40 = vrot.slane %v6331_v56, 1 }
 0x1da   : > { %v5871_v26 = vpop.f32.mrf.mxu0  ;;  %3929 = vmatmul.msk.bf16.gmra.mxu3 %vm1417_vm10, %v3177_v57  ;;  %v6325_v57 = vld [vmem:[#allocation10_spill] sm:$0xff] }
 0x1db   : > { %v4282_v58 = vor.u32 %v4281_v37, %v6325_v57  ;;  %v3180_v37 = vsel %vm1368_vm9, %v3178_v20, %v3179_v3  ;;  %v4107_v3 = vld [vmem:[#allocation2 + $0x18] sm:$0xf0]  ;;  %v4108_v20 = vld [vmem:[#allocation2 + $0x18] sm:$0xe] }
 0x1dc   : > { %v3408_v60 = vpop.f32.mrf.mxu1 }
 0x1dd   : > { %v5878_v23 = vadd.f32 %v3497_v38, %v3408_v60  ;;  %2278 = vmatmul.bf16.gmra.mxu0 %v2048_v46  ;;  %v3500_v7 = vpop.f32.mrf.mxu3  ;;  %v5880_v11 = vpop.f32.mrf.mxu2  ;;  %v3224_v38 = vsel %vm1417_vm10, %v5622_v10, %v3083_v24  ;;  %v1954_v60 = vrot.slane %v4282_v58, 1  ;;  %v1372_v24 = vrot.slane %v4285_v18, 1 }
 0x1e2   : > { %v5883_v16 = vpop.f32.mrf.mxu0  ;;  %3852 = vmatmul.msk.bf16.vlgmr.msrb.gmra.mxu2 %vm1417_vm10, %v1371_v61  ;;  %v1956_v61 = vsel %vm1368_vm9, %v1954_v60, %v1955_v6  ;;  %v3085_v60 = vpop.permute.xlu1 %3084 }
 0x1e3   : > { %v3227_v18 = vsel %vm1417_vm10, %v5512_v47, %v3085_v60  ;;  %v2329_v60 = vadd.f32 %v5436_v42, %v5871_v26  ;;  %v6334_v42 = vld [vmem:[#allocation24_spill] sm:$0xff] }
 0x1e4   : > { %v3411_v29 = vpop.f32.mrf.mxu1 }
 0x1e5   : > { %v5890_v62 = vadd.f32 %v3500_v7, %v3411_v29  ;;  %v3502_v46 = vpop.f32.mrf.mxu3  ;;  %v5893_v0 = vpop.f32.mrf.mxu2  ;;  %v6330_v29 = vld [vmem:[#allocation13_spill] sm:$0xff] }
 0x1e7   : > { %6326 = vst [vmem:[#allocation9_spill] sm:$0xff] %v5890_v62  ;;  %3450 = vmatmul.bf16.gmra.mxu1 %v3224_v38  ;;  %v1373_v38 = vrot.slane %v6330_v29, 1 }
 0x1e9   : > { %v1374_v22 = vsel %vm1368_vm9, %v1372_v24, %v1373_v38  ;;  %v4078_v24 = vld [vmem:[#allocation2 + $0x18] sm:$0xf0]  ;;  %v4079_v38 = vld [vmem:[#allocation2 + $0x18] sm:$0xe] }
 0x1ea   : > { %v5897_v57 = vpop.f32.mrf.mxu0  ;;  %3930 = vmatmul.msk.bf16.gmra.mxu3 %vm1417_vm10, %v3180_v37  ;;  %v4109_v37 = vor.u32 %v4108_v20, %v4107_v3  ;;  %v4080_v20 = vor.u32 %v4079_v38, %v4078_v24 }
 0x1ec   : > { %v3413_v10 = vpop.f32.mrf.mxu1  ;;  %v1957_v62 = vrot.slane %v4109_v37, 1 }
 0x1ed   : > { %v5901_v7 = vadd.f32 %v3502_v46, %v3413_v10  ;;  %3788 = vmatmul.msk.bf16.vlgmr.msrb.gmra.mxu0 %vm1417_vm10, %v1956_v61  ;;  %v3505_v58 = vpop.f32.mrf.mxu3  ;;  %v5905_v33 = vpop.f32.mrf.mxu2  ;;  %v3181_v46 = vrot.slane %v4288_v31, 1  ;;  %v3182_v10 = vrot.slane %v5737_v43, 1 }
 0x1ee   : > { %v1959_v47 = vsel %vm1368_vm9, %v1957_v62, %v1958_v40  ;;  %v2538_v62 = vadd.f32 %v5868_v21, %v2329_v60  ;;  %v3087_v40 = vpop.permute.xlu2 %3086 }
 0x1ef   : > { %6329 = vst [vmem:[#allocation10_spill] sm:$0xff] %v5901_v7  ;;  %v3183_v43 = vsel %vm1368_vm9, %v3181_v46, %v3182_v10  ;;  %v1375_v46 = vrot.slane %v4080_v20, 1  ;;  %v6333_v10 = vld [vmem:[#allocation21_spill] sm:$0xff]  ;;  %v3230_v20 = vsel %vm1417_vm10, %v5720_v28, %v3087_v40 }
 0x1f0   : > { %v2627_v21 = vadd.f32 %v5440_v41, %v2538_v62 }
 0x1f2   : > { %v5909_v6 = vpop.f32.mrf.mxu0  ;;  %3853 = vmatmul.msk.bf16.gmra.mxu2 %vm1417_vm10, %v1374_v22 }
 0x1f4   : > { %v3416_v61 = vpop.f32.mrf.mxu1 }
 0x1f5   : > { %v5915_v29 = vadd.f32 %v3505_v58, %v3416_v61  ;;  %v3507_v7 = vpop.f32.mrf.mxu3  ;;  %v5918_v3 = vpop.f32.mrf.mxu2  ;;  %v4290_v58 = vld [vmem:[#allocation2 + $0x24] sm:$0xe] }
 0x1f6   : > { %v4291_v26 = vor.u32 %v4290_v58, %v6334_v42 }
 0x1f7   : > { %3455 = vmatmul.bf16.gmra.mxu1 %v3227_v18  ;;  %v1376_v18 = vrot.slane %v6333_v10, 1  ;;  %v6335_v10 = vld [vmem:[#allocation27_spill] sm:$0xff] }
 0x1f9   : > { %v1377_v24 = vsel %vm1368_vm9, %v1375_v46, %v1376_v18  ;;  %v1960_v46 = vrot.slane %v4291_v26, 1  ;;  %v1961_v18 = vrot.slane %v6335_v10, 1 }
 0x1fa   : > { %v5921_v31 = vpop.f32.mrf.mxu0  ;;  %3931 = vmatmul.msk.bf16.gmra.mxu3 %vm1417_vm10, %v3183_v43  ;;  %v2331_v43 = vadd.f32 %v5468_v48, %v5883_v16  ;;  %v6336_v16 = vld [vmem:[#allocation23_spill] sm:$0xff] }
 0x1fb   : > { %v1962_v62 = vsel %vm1368_vm9, %v1960_v46, %v1961_v18 }
 0x1fc   : > { %v3418_v22 = vpop.f32.mrf.mxu1  ;;  %v2540_v48 = vadd.f32 %v5880_v11, %v2331_v43  ;;  %v2334_v11 = vadd.f32 %v5499_v35, %v5897_v57  ;;  %v6337_v43 = vld [vmem:[#allocation25_spill] sm:$0xff]  ;;  %v2336_v57 = vadd.f32 %v5525_v9, %v5909_v6 }
 0x1fd   : > { %v5927_v37 = vadd.f32 %v3507_v7, %v3418_v22  ;;  %3789 = vmatmul.msk.bf16.gmra.mxu0 %vm1417_vm10, %v1959_v47  ;;  %v3510_v61 = vpop.f32.mrf.mxu3  ;;  %v5932_v56 = vpop.f32.mrf.mxu2  ;;  %v4293_v7 = vld [vmem:[#allocation2 + $0x24] sm:$0xe] }
 0x1fe   : > { %v4294_v41 = vor.u32 %v4293_v7, %v6336_v16  ;;  %v1379_v7 = vrot.slane %v6337_v43, 1  ;;  %v2543_v46 = vadd.f32 %v5893_v0, %v2334_v11 }
 0x1ff   : > { %6332 = vst [vmem:[#allocation12_spill] sm:$0xff] %v5927_v37 }
 0x202   : > { %v5937_v38 = vpop.f32.mrf.mxu0  ;;  %3854 = vmatmul.msk.bf16.gmra.mxu2 %vm1417_vm10, %v1377_v24  ;;  %v2629_v24 = vadd.f32 %v5470_v36, %v2540_v48  ;;  %v2632_v48 = vadd.f32 %v5496_v5, %v2543_v46  ;;  %v4296_v5 = vld [vmem:[#allocation2 + $0x3c] sm:$0xe] }
 0x204   : > { %v3421_v47 = vpop.f32.mrf.mxu1 }
 0x205   : > { %v3511_v22 = vadd.f32 %v3510_v61, %v3421_v47  ;;  %v3512_v60 = vpop.f32.mrf.mxu3  ;;  %v5947_v58 = vpop.f32.mrf.mxu2 }
 0x207   : > { %v3569_v37 = vadd.f32 %v3511_v22, %v2627_v21  ;;  %3460 = vmatmul.bf16.gmra.mxu1 %v3230_v20  ;;  %v4110_v21 = vld [vmem:[#allocation2 + $0x30] sm:$0xf0]  ;;  %v4111_v22 = vld [vmem:[#allocation2 + $0x30] sm:$0xe] }
 0x208   : > { %v4112_v35 = vor.u32 %v4111_v22, %v4110_v21  ;;  %v2339_v21 = vadd.f32 %v5557_v1, %v5921_v31  ;;  %v4299_v1 = vld [vmem:[#allocation2 + $0x3c] sm:$0xe]  ;;  %v2341_v31 = vadd.f32 %v5584_v44, %v5937_v38 }
 0x209   : > { %v3601_v28 = vpack.c.bf16 %v3569_v37, %v3569_v37  ;;  %v1378_v37 = vrot.slane %v4294_v41, 1  ;;  %v6338_v41 = vld [vmem:[#allocation17_spill] sm:$0xff] }
 0x20a   : > { %v5956_v61 = vpop.f32.mrf.mxu0  ;;  %v1963_v0 = vrot.slane %v4112_v35, 1 }
 0x20b   : > { %3633 = vst.msk [vmem:[%s5953_s28 + $0x38] sm:$0xf] %vm406_vm0, %v3601_v28  ;;  %v1380_v36 = vsel %vm1368_vm9, %v1378_v37, %v1379_v7  ;;  %v2545_v37 = vadd.f32 %v5905_v33, %v2336_v57 }
 0x20c   : > { %v3423_v40 = vpop.f32.mrf.mxu1 }
 0x20d   : > { %v3513_v42 = vadd.f32 %v3512_v60, %v3423_v40  ;;  %3790 = vmatmul.msk.bf16.gmra.mxu0 %vm1417_vm10, %v1962_v62  ;;  %v3515_v26 = vpop.f32.mrf.mxu3  ;;  %v5966_v20 = vpop.f32.mrf.mxu2  ;;  %v1964_v62 = vrot.slane %v6338_v41, 1  ;;  %v4081_v40 = vld [vmem:[#allocation2 + $0x30] sm:$0xf0] }
 0x20f   : > { %v3570_v47 = vadd.f32 %v3513_v42, %v2629_v24  ;;  %v4082_v24 = vld [vmem:[#allocation2 + $0x30] sm:$0xe]  ;;  %v1965_v7 = vsel %vm1368_vm9, %v1963_v0, %v1964_v62 }
 0x210   : > { %v4083_v9 = vor.u32 %v4082_v24, %v4081_v40 }
 0x211   : > { %v3602_v10 = vpack.c.bf16 %v3570_v47, %v3570_v47  ;;  %v2634_v47 = vadd.f32 %v5517_v39, %v2545_v37  ;;  %v6340_v39 = vld [vmem:[#allocation29_spill] sm:$0xff] }
 0x212   : > { %v5970_v18 = vpop.f32.mrf.mxu0  ;;  %3855 = vmatmul.msk.bf16.gmra.mxu2 %vm1417_vm10, %v1380_v36  ;;  %v1381_v46 = vrot.slane %v4083_v9, 1  ;;  %v4297_v41 = vor.u32 %v4296_v5, %v6340_v39 }
 0x213   : > { %3634 = vst.msk [vmem:[%s5953_s28 + $0x3c] sm:$0xf] %vm406_vm0, %v3602_v10  ;;  %v6339_v10 = vld [vmem:[#allocation33_spill] sm:$0xff] }
 0x214   : > { %v3426_v60 = vpop.f32.mrf.mxu1  ;;  %v1382_v36 = vrot.slane %v6339_v10, 1  ;;  %v1966_v24 = vrot.slane %v4297_v41, 1  ;;  %v6343_v10 = vld [vmem:[#allocation22_spill] sm:$0xff] }
 0x215   : > { %v3516_v28 = vadd.f32 %v3515_v26, %v3426_v60  ;;  %v3517_v16 = vpop.f32.mrf.mxu3  ;;  %v5979_v42 = vpop.f32.mrf.mxu2  ;;  %v2548_v60 = vadd.f32 %v5918_v3, %v2339_v21 }
 0x217   : > { %v3571_v11 = vadd.f32 %v3516_v28, %v2632_v48  ;;  %v1383_v28 = vsel %vm1368_vm9, %v1381_v46, %v1382_v36  ;;  %v2637_v62 = vadd.f32 %v5540_v30, %v2548_v60  ;;  %v1385_v36 = vrot.slane %v6343_v10, 1 }
 0x219   : > { %v3603_v43 = vpack.c.bf16 %v3571_v11, %v3571_v11  ;;  %v6341_v11 = vld [vmem:[#allocation31_spill] sm:$0xff] }
 0x21a   : > { %v5982_v6 = vpop.f32.mrf.mxu0  ;;  %v1967_v37 = vrot.slane %v6341_v11, 1 }
 0x21b   : > { %3635 = vst.msk [vmem:[%s5953_s28 + $0x40] sm:$0xf] %vm406_vm0, %v3603_v43 }
 0x21c   : > { %v3428_v26 = vpop.f32.mrf.mxu1  ;;  %v1968_v44 = vsel %vm1368_vm9, %v1966_v24, %v1967_v37  ;;  %v6345_v24 = vld [vmem:[#allocation38_spill] sm:$0xff]  ;;  %v4084_v37 = vld [vmem:[#allocation2 + $0x48] sm:$0xf0] }
 0x21d   : > { %v3518_v22 = vadd.f32 %v3517_v16, %v3428_v26  ;;  %3791 = vmatmul.msk.bf16.gmra.mxu0 %vm1417_vm10, %v1965_v7  ;;  %v3520_v33 = vpop.f32.mrf.mxu3  ;;  %v5992_v57 = vpop.f32.mrf.mxu2  ;;  %v2550_v7 = vadd.f32 %v5932_v56, %v2341_v31  ;;  %v6342_v26 = vld [vmem:[#allocation20_spill] sm:$0xff]  ;;  %v1970_v11 = vrot.slane %v6345_v24, 1 }
 0x21f   : > { %v3572_v35 = vadd.f32 %v3518_v22, %v2634_v47  ;;  %v4300_v47 = vor.u32 %v4299_v1, %v6342_v26  ;;  %v2639_v38 = vadd.f32 %v5565_v50, %v2550_v7  ;;  %v2344_v22 = vadd.f32 %v5599_v32, %v5956_v61 }
 0x220   : > { %v2346_v61 = vadd.f32 %v5609_v52, %v5970_v18 }
 0x221   : > { %v3604_v48 = vpack.c.bf16 %v3572_v35, %v3572_v35  ;;  %v1384_v46 = vrot.slane %v4300_v47, 1  ;;  %v2553_v39 = vadd.f32 %v5947_v58, %v2344_v22  ;;  %v6346_v22 = vld [vmem:[#allocation32_spill] sm:$0xff] }
 0x222   : > { %v5996_v0 = vpop.f32.mrf.mxu0  ;;  %3856 = vmatmul.msk.bf16.gmra.mxu2 %vm1417_vm10, %v1383_v28  ;;  %v4114_v28 = vld [vmem:[#allocation2 + $0x48] sm:$0xe]  ;;  %v2555_v26 = vadd.f32 %v5966_v20, %v2346_v61 }
 0x223   : > { %3636 = vst.msk [vmem:[%s5953_s28 + $0x44] sm:$0xf] %vm406_vm0, %v3604_v48  ;;  %v4113_v48 = vld [vmem:[#allocation2 + $0x48] sm:$0xf0]  ;;  %v1386_v50 = vsel %vm1368_vm9, %v1384_v46, %v1385_v36 }
 0x224   : > { %v3431_v16 = vpop.f32.mrf.mxu1  ;;  %v4115_v32 = vor.u32 %v4114_v28, %v4113_v48 }
 0x225   : > { %v3521_v3 = vadd.f32 %v3520_v33, %v3431_v16  ;;  %v3522_v40 = vpop.f32.mrf.mxu3  ;;  %v6006_v9 = vpop.f32.mrf.mxu2  ;;  %v6344_v16 = vld [vmem:[#allocation30_spill] sm:$0xff] }
 0x226   : > { %v1969_v58 = vrot.slane %v4115_v32, 1 }
 0x227   : > { %v3573_v43 = vadd.f32 %v3521_v3, %v2637_v62  ;;  %v2642_v62 = vadd.f32 %v6344_v16, %v2553_v39 }
 0x229   : > { %v3605_v5 = vpack.c.bf16 %v3573_v43, %v3573_v43  ;;  %v4085_v43 = vld [vmem:[#allocation2 + $0x48] sm:$0xe] }
 0x22a   : > { %v6010_v21 = vpop.f32.mrf.mxu0  ;;  %v4086_v52 = vor.u32 %v4085_v43, %v4084_v37  ;;  %v6352_v37 = vld [vmem:[#allocation18_spill] sm:$0xff] }
 0x22b   : > { %3637 = vst.msk [vmem:[%s5953_s28 + $0x48] sm:$0xf] %vm406_vm0, %v3605_v5  ;;  %v1973_v43 = vrot.slane %v6352_v37, 1 }
 0x22c   : > { %v3433_v30 = vpop.f32.mrf.mxu1  ;;  %v1387_v20 = vrot.slane %v4086_v52, 1 }
 0x22d   : > { %v3523_v33 = vadd.f32 %v3522_v40, %v3433_v30  ;;  %3792 = vmatmul.msk.bf16.gmra.mxu0 %vm1417_vm10, %v1968_v44  ;;  %v3525_v56 = vpop.f32.mrf.mxu3  ;;  %v6020_v60 = vpop.f32.mrf.mxu2  ;;  %v1971_v44 = vsel %vm1368_vm9, %v1969_v58, %v1970_v11  ;;  %v4302_v30 = vld [vmem:[#allocation2 + $0x54] sm:$0xe] }
 0x22f   : > { %v3574_v35 = vadd.f32 %v3523_v33, %v2639_v38  ;;  %v2644_v33 = vadd.f32 %v6346_v22, %v2555_v26  ;;  %v6353_v22 = vld [vmem:[#allocation19_spill] sm:$0xff] }
 0x231   : > { %v3606_v41 = vpack.c.bf16 %v3574_v35, %v3574_v35  ;;  %v6348_v35 = vld [vmem:[#allocation37_spill] sm:$0xff] }
 0x232   : > { %v6024_v1 = vpop.f32.mrf.mxu0  ;;  %3857 = vmatmul.msk.bf16.gmra.mxu2 %vm1417_vm10, %v1386_v50  ;;  %v1388_v48 = vrot.slane %v6348_v35, 1 }
 0x233   : > { %3638 = vst.msk [vmem:[%s5953_s28 + $0x4c] sm:$0xf] %vm406_vm0, %v3606_v41 }
 0x234   : > { %v3436_v31 = vpop.f32.mrf.mxu1  ;;  %v1389_v32 = vsel %vm1368_vm9, %v1387_v20, %v1388_v48 }
 0x235   : > { %v3526_v3 = vadd.f32 %v3525_v56, %v3436_v31  ;;  %v3527_v40 = vpop.f32.mrf.mxu3  ;;  %v6033_v5 = vpop.f32.mrf.mxu2  ;;  %v6347_v56 = vld [vmem:[#allocation28_spill] sm:$0xff] }
 0x236   : > { %v2349_v46 = vadd.f32 %v6347_v56, %v5982_v6  ;;  %v6349_v31 = vld [vmem:[#allocation16_spill] sm:$0xff] }
 0x237   : > { %v3575_v7 = vadd.f32 %v3526_v3, %v2642_v62  ;;  %v4303_v16 = vor.u32 %v4302_v30, %v6349_v31  ;;  %v6350_v62 = vld [vmem:[#allocation35_spill] sm:$0xff] }
 0x238   : > { %v2558_v41 = vadd.f32 %v5979_v42, %v2349_v46  ;;  %v2351_v3 = vadd.f32 %v6350_v62, %v5996_v0  ;;  %v2354_v0 = vadd.f32 %v5645_v19, %v6010_v21  ;;  %v2356_v19 = vadd.f32 %v5659_v53, %v6024_v1  ;;  %v6354_v21 = vld [vmem:[#allocation36_spill] sm:$0xff] }
 0x239   : > { %v3607_v47 = vpack.c.bf16 %v3575_v7, %v3575_v7  ;;  %v1972_v42 = vrot.slane %v4303_v16, 1 }
 0x23a   : > { %v2269_v18 = vpop.f32.mrf.mxu0  ;;  %v2565_v16 = vadd.f32 %v6020_v60, %v2356_v19 }
 0x23b   : > { %3639 = vst.msk [vmem:[%s5953_s28 + $0x50] sm:$0xf] %vm406_vm0, %v3607_v47  ;;  %v2560_v47 = vadd.f32 %v5992_v57, %v2351_v3  ;;  %v1974_v30 = vsel %vm1368_vm9, %v1972_v42, %v1973_v43  ;;  %v2359_v3 = vadd.f32 %v5673_v55, %v2269_v18 }
 0x23c   : > { %v3438_v38 = vpop.f32.mrf.mxu1 }
 0x23d   : > { %v3528_v10 = vadd.f32 %v3527_v40, %v3438_v38  ;;  %3793 = vmatmul.msk.bf16.gmra.mxu0 %vm1417_vm10, %v1971_v44  ;;  %v3530_v36 = vpop.f32.mrf.mxu3  ;;  %v6044_v39 = vpop.f32.mrf.mxu2  ;;  %v6351_v40 = vld [vmem:[#allocation26_spill] sm:$0xff] }
 0x23e   : > { %v2647_v58 = vadd.f32 %v6351_v40, %v2558_v41  ;;  %v2654_v40 = vadd.f32 %v5650_v2, %v2565_v16 }
 0x23f   : > { %v3576_v28 = vadd.f32 %v3528_v10, %v2644_v33  ;;  %v2649_v33 = vadd.f32 %v6353_v22, %v2560_v47 }
 0x241   : > { %v3608_v50 = vpack.c.bf16 %v3576_v28, %v3576_v28 }
 0x242   : > { %v2271_v61 = vpop.f32.mrf.mxu0  ;;  %3858 = vmatmul.msk.bf16.gmra.mxu2 %vm1417_vm10, %v1389_v32 }
 0x243   : > { %3640 = vst.msk [vmem:[%s5953_s28 + $0x54] sm:$0xf] %vm406_vm0, %v3608_v50  ;;  %v2361_v43 = vadd.f32 %v5687_v49, %v2271_v61  ;;  %v6359_v61 = vld [vmem:[#allocation15_spill] sm:$0xff] }
 0x244   : > { %v3441_v6 = vpop.f32.mrf.mxu1 }
 0x245   : > { %v3531_v24 = vadd.f32 %v3530_v36, %v3441_v6  ;;  %v3532_v11 = vpop.f32.mrf.mxu3  ;;  %v2572_v26 = vpop.f32.mrf.mxu2  ;;  %v2563_v36 = vadd.f32 %v6006_v9, %v2354_v0 }
 0x247   : > { %v3577_v7 = vadd.f32 %v3531_v24, %v2647_v58  ;;  %v2652_v28 = vadd.f32 %v6354_v21, %v2563_v36 }
 0x249   : > { %v3609_v52 = vpack.c.bf16 %v3577_v7, %v3577_v7  ;;  %v6355_v7 = vld [vmem:[#allocation34_spill] sm:$0xff] }
 0x24a   : > { %v2274_v44 = vpop.f32.mrf.mxu0 }
 0x24b   : > { %3641 = vst.msk [vmem:[%s5953_s28 + $0x58] sm:$0xf] %vm406_vm0, %v3609_v52 }
 0x24c   : > { %v3443_v38 = vpop.f32.mrf.mxu1 }
 0x24d   : > { %v3533_v56 = vadd.f32 %v3532_v11, %v3443_v38  ;;  %3794 = vmatmul.msk.bf16.gmra.mxu0 %vm1417_vm10, %v1974_v30  ;;  %v3535_v46 = vpop.f32.mrf.mxu3  ;;  %v6064_v57 = vpop.f32.mrf.mxu2  ;;  %v2568_v11 = vadd.f32 %v6033_v5, %v2359_v3  ;;  %v2570_v30 = vadd.f32 %v6044_v39, %v2361_v43  ;;  %v6356_v5 = vld [vmem:[#allocation42_spill] sm:$0xff]  ;;  %v6361_v3 = vld [vmem:[#allocation49_spill] sm:$0xff] }
 0x24f   : > { %v3578_v10 = vadd.f32 %v3533_v56, %v2649_v33  ;;  %v2657_v55 = vadd.f32 %v6355_v7, %v2568_v11  ;;  %v6357_v56 = vld [vmem:[#allocation45_spill] sm:$0xff]  ;;  %v2659_v36 = vadd.f32 %v6359_v61, %v2570_v30 }
 0x251   : > { %v3610_v20 = vpack.c.bf16 %v3578_v10, %v3578_v10  ;;  %v6358_v10 = vld [vmem:[#allocation39_spill] sm:$0xff] }
 0x252   : > { %v2276_v35 = vpop.f32.mrf.mxu0 }
 0x253   : > { %3642 = vst.msk [vmem:[%s5953_s28 + $0x5c] sm:$0xf] %vm406_vm0, %v3610_v20 }
 0x254   : > { %v3446_v48 = vpop.f32.mrf.mxu1 }
 0x255   : > { %v3536_v41 = vadd.f32 %v3535_v46, %v3446_v48  ;;  %v3537_v50 = vpop.f32.mrf.mxu3  ;;  %v6072_v31 = vpop.f32.mrf.mxu2  ;;  %v2364_v46 = vadd.f32 %v6357_v56, %v2274_v44 }
 0x257   : > { %v3579_v32 = vadd.f32 %v3536_v41, %v2652_v28  ;;  %v2573_v28 = vadd.f32 %v2572_v26, %v2364_v46 }
 0x259   : > { %v3611_v6 = vpack.c.bf16 %v3579_v32, %v3579_v32 }
 0x25a   : > { %v2279_v9 = vpop.f32.mrf.mxu0 }
 0x25b   : > { %3643 = vst.msk [vmem:[%s5953_s28 + $0x60] sm:$0xf] %vm406_vm0, %v3611_v6  ;;  %v6360_v6 = vld [vmem:[#allocation44_spill] sm:$0xff] }
 0x25c   : > { %v3448_v62 = vpop.f32.mrf.mxu1 }
 0x25d   : > { %v3538_v53 = vadd.f32 %v3537_v50, %v3448_v62  ;;  %v3540_v1 = vpop.f32.mrf.mxu3  ;;  %v6079_v24 = vpop.f32.mrf.mxu2 }
 0x25f   : > { %v3580_v58 = vadd.f32 %v3538_v53, %v2654_v40  ;;  %v2366_v40 = vadd.f32 %v6361_v3, %v2276_v35  ;;  %v6362_v53 = vld [vmem:[#allocation41_spill] sm:$0xff]  ;;  %v6364_v35 = vld [vmem:[#allocation48_spill] sm:$0xff] }
 0x261   : > { %v3612_v42 = vpack.c.bf16 %v3580_v58, %v3580_v58  ;;  %v6363_v58 = vld [vmem:[#allocation40_spill] sm:$0xff]  ;;  %v2575_v7 = vadd.f32 %v6064_v57, %v2366_v40 }
 0x262   : > { %v6082_v37 = vpop.f32.mrf.mxu0  ;;  %v2662_v26 = vadd.f32 %v6363_v58, %v2573_v28 }
 0x263   : > { %3644 = vst.msk [vmem:[%s5953_s28 + $0x64] sm:$0xf] %vm406_vm0, %v3612_v42  ;;  %v2371_v28 = vadd.f32 %v5754_v12, %v6082_v37 }
 0x264   : > { %v3451_v60 = vpop.f32.mrf.mxu1 }
 0x265   : > { %v3541_v18 = vadd.f32 %v3540_v1, %v3451_v60  ;;  %v3542_v2 = vpop.f32.mrf.mxu3  ;;  %v2591_v52 = vpop.f32.mrf.mxu2 }
 0x267   : > { %v3581_v47 = vadd.f32 %v3541_v18, %v2657_v55 }
 0x269   : > { %v3613_v38 = vpack.c.bf16 %v3581_v47, %v3581_v47 }
 0x26a   : > { %v2293_v0 = vpop.f32.mrf.mxu0 }
 0x26b   : > { %3645 = vst.msk [vmem:[%s5953_s28 + $0x68] sm:$0xf] %vm406_vm0, %v3613_v38  ;;  %v2294_v22 = vadd.f32 %v2293_v0, %v6356_v5  ;;  %v6365_v38 = vld [vmem:[#allocation53_spill] sm:$0xff]  ;;  %v6366_v5 = vld [vmem:[#allocation43_spill] sm:$0xff] }
 0x26c   : > { %v3453_v33 = vpop.f32.mrf.mxu1  ;;  %v2369_v0 = vadd.f32 %v6365_v38, %v2279_v9  ;;  %v6368_v9 = vld [vmem:[#allocation52_spill] sm:$0xff] }
 0x26d   : > { %v2503_v49 = vadd.f32 %v6358_v10, %v2294_v22  ;;  %v3543_v20 = vadd.f32 %v3542_v2, %v3453_v33  ;;  %v3545_v48 = vpop.f32.mrf.mxu3  ;;  %v2593_v39 = vpop.f32.mrf.mxu2  ;;  %v6367_v33 = vld [vmem:[#allocation46_spill] sm:$0xff] }
 0x26e   : > { %v2664_v57 = vadd.f32 %v6367_v33, %v2575_v7  ;;  %v2578_v61 = vadd.f32 %v6072_v31, %v2369_v0  ;;  %v6370_v31 = vld [vmem:[#allocation50_spill] sm:$0xff]  ;;  %v6375_v33 = vld [vmem:[#allocation59_spill] sm:$0xff] }
 0x26f   : > { %v2592_v19 = vadd.f32 %v2591_v52, %v2503_v49  ;;  %v3582_v21 = vadd.f32 %v3543_v20, %v2659_v36 }
 0x271   : > { %v3555_v41 = vadd.f32 %v5770_v15, %v2592_v19  ;;  %v3614_v50 = vpack.c.bf16 %v3582_v21, %v3582_v21 }
 0x272   : > { %v2295_v32 = vpop.f32.mrf.mxu0 }
 0x273   : > { %v3587_v16 = vpack.c.bf16 %v3555_v41, %v3555_v41  ;;  %3646 = vst.msk [vmem:[%s5953_s28 + $0x6c] sm:$0xf] %vm406_vm0, %v3614_v50  ;;  %v2296_v44 = vadd.f32 %v2295_v32, %v6360_v6  ;;  %v6369_v41 = vld [vmem:[#allocation47_spill] sm:$0xff]  ;;  %v2667_v32 = vadd.f32 %v6370_v31, %v2578_v61 }
 0x274   : > { %v3456_v62 = vpop.f32.mrf.mxu1 }
 0x275   : > { %3619 = vst.msk [vmem:[%s5953_s28] sm:$0xf] %vm406_vm0, %v3587_v16  ;;  %v2505_v1 = vadd.f32 %v6362_v53, %v2296_v44  ;;  %v3546_v11 = vadd.f32 %v3545_v48, %v3456_v62  ;;  %v3547_v15 = vpop.f32.mrf.mxu3  ;;  %v2596_v43 = vpop.f32.mrf.mxu2  ;;  %v2580_v62 = vadd.f32 %v6079_v24, %v2371_v28 }
 0x277   : > { %v2594_v42 = vadd.f32 %v2593_v39, %v2505_v1  ;;  %v3583_v60 = vadd.f32 %v3546_v11, %v2662_v26  ;;  %v6371_v26 = vld [vmem:[#allocation51_spill] sm:$0xff] }
 0x279   : > { %v3556_v55 = vadd.f32 %v5782_v4, %v2594_v42  ;;  %v3615_v18 = vpack.c.bf16 %v3583_v60, %v3583_v60 }
 0x27a   : > { %v2298_v2 = vpop.f32.mrf.mxu0 }
 0x27b   : > { %v3588_v47 = vpack.c.bf16 %v3556_v55, %v3556_v55  ;;  %3647 = vst.msk [vmem:[%s5953_s28 + $0x70] sm:$0xf] %vm406_vm0, %v3615_v18  ;;  %v2299_v52 = vadd.f32 %v2298_v2, %v6364_v35  ;;  %v6374_v35 = vld [vmem:[#allocation55_spill] sm:$0xff] }
 0x27c   : > { %v3458_v30 = vpop.f32.mrf.mxu1 }
 0x27d   : > { %3620 = vst.msk [vmem:[%s5953_s28 + $0x4] sm:$0xf] %vm406_vm0, %v3588_v47  ;;  %v2508_v22 = vadd.f32 %v6366_v5, %v2299_v52  ;;  %v3548_v56 = vadd.f32 %v3547_v15, %v3458_v30  ;;  %v2598_v10 = vpop.f32.mrf.mxu2  ;;  %v3550_v49 = vpop.f32.mrf.mxu3  ;;  %v6372_v15 = vld [vmem:[#allocation54_spill] sm:$0xff] }
 0x27e   : > { %v2669_v42 = vadd.f32 %v6372_v15, %v2580_v62 }
 0x27f   : > { %v2597_v4 = vadd.f32 %v2596_v43, %v2508_v22  ;;  %v3584_v46 = vadd.f32 %v3548_v56, %v2664_v57  ;;  %v6376_v57 = vld [vmem:[#allocation56_spill] sm:$0xff] }
 0x281   : > { %v3557_v36 = vadd.f32 %v5796_v63, %v2597_v4  ;;  %v3616_v20 = vpack.c.bf16 %v3584_v46, %v3584_v46 }
 0x282   : > { %v2300_v48 = vpop.f32.mrf.mxu0 }
 0x283   : > { %v3589_v19 = vpack.c.bf16 %v3557_v36, %v3557_v36  ;;  %3648 = vst.msk [vmem:[%s5953_s28 + $0x74] sm:$0xf] %vm406_vm0, %v3616_v20  ;;  %v2301_v21 = vadd.f32 %v2300_v48, %v6368_v9  ;;  %v6377_v36 = vld [vmem:[#allocation61_spill] sm:$0xff] }
 0x284   : > { %v3461_v39 = vpop.f32.mrf.mxu1 }
 0x285   : > { %3621 = vst.msk [vmem:[%s5953_s28 + $0x8] sm:$0xf] %vm406_vm0, %v3589_v19  ;;  %v2510_v50 = vadd.f32 %v6369_v41, %v2301_v21  ;;  %v3551_v63 = vadd.f32 %v3550_v49, %v3461_v39  ;;  %v2601_v44 = vpop.f32.mrf.mxu2  ;;  %v3552_v1 = vpop.f32.mrf.mxu3 }
 0x287   : > { %v2599_v16 = vadd.f32 %v2598_v10, %v2510_v50  ;;  %v3585_v6 = vadd.f32 %v3551_v63, %v2667_v32 }
 0x289   : > { %v3558_v3 = vadd.f32 %v5808_v27, %v2599_v16  ;;  %v3617_v40 = vpack.c.bf16 %v3585_v6, %v3585_v6 }
 0x28a   : > { %v2303_v53 = vpop.f32.mrf.mxu0 }
 0x28b   : > { %v3590_v12 = vpack.c.bf16 %v3558_v3, %v3558_v3  ;;  %3649 = vst.msk [vmem:[%s5953_s28 + $0x78] sm:$0xf] %vm406_vm0, %v3617_v40  ;;  %v2304_v37 = vadd.f32 %v2303_v53, %v5747_v8  ;;  %v6373_v8 = vld [vmem:[#allocation57_spill] sm:$0xff] }
 0x28c   : > { %v3463_v58 = vpop.f32.mrf.mxu1 }
 0x28d   : > { %3622 = vst.msk [vmem:[%s5953_s28 + $0xc] sm:$0xf] %vm406_vm0, %v3590_v12  ;;  %v2513_v11 = vadd.f32 %v6371_v26, %v2304_v37  ;;  %v3553_v24 = vadd.f32 %v3552_v1, %v3463_v58  ;;  %v2603_v43 = vpop.f32.mrf.mxu2 }
 0x28f   : > { %v2602_v60 = vadd.f32 %v2601_v44, %v2513_v11  ;;  %v3586_v27 = vadd.f32 %v3553_v24, %v2669_v42 }
 0x291   : > { %v3559_v7 = vadd.f32 %v5821_v17, %v2602_v60  ;;  %v3618_v55 = vpack.c.bf16 %v3586_v27, %v3586_v27 }
 0x292   : > { %v2305_v18 = vpop.f32.mrf.mxu0 }
 0x293   : > { %v3591_v2 = vpack.c.bf16 %v3559_v7, %v3559_v7  ;;  %3650 = vst.msk [vmem:[%s5953_s28 + $0x7c] sm:$0xf] %vm406_vm0, %v3618_v55  ;;  %v2306_v47 = vadd.f32 %v2305_v18, %v6373_v8  ;;  %v6385_v55 = vld [vmem:[#allocation66_spill] sm:$0xff]  ;;  %v6386_v8 = vld [vmem:[#allocation65_spill] sm:$0xff] }
 0x295   : > { %3623 = vst.msk [vmem:[%s5953_s28 + $0x10] sm:$0xf] %vm406_vm0, %v3591_v2  ;;  %v2515_v52 = vadd.f32 %v6374_v35, %v2306_v47  ;;  %v2606_v38 = vpop.f32.mrf.mxu2 }
 0x297   : > { %v2604_v30 = vadd.f32 %v2603_v43, %v2515_v52 }
 0x299   : > { %v3560_v0 = vadd.f32 %v5830_v13, %v2604_v30  ;;  %v6378_v13 = vld [vmem:[#allocation58_spill] sm:$0xff] }
 0x29a   : > { %v2308_v5 = vpop.f32.mrf.mxu0 }
 0x29b   : > { %v3592_v22 = vpack.c.bf16 %v3560_v0, %v3560_v0  ;;  %v2309_v17 = vadd.f32 %v2308_v5, %v6375_v33  ;;  %v6387_v0 = vld [vmem:[#allocation68_spill] sm:$0xff] }
 0x29d   : > { %3624 = vst.msk [vmem:[%s5953_s28 + $0x14] sm:$0xf] %vm406_vm0, %v3592_v22  ;;  %v2518_v56 = vadd.f32 %v6376_v57, %v2309_v17  ;;  %v2608_v46 = vpop.f32.mrf.mxu2  ;;  %v6388_v22 = vld [vmem:[#allocation67_spill] sm:$0xff] }
 0x29f   : > { %v2607_v4 = vadd.f32 %v2606_v38, %v2518_v56  ;;  %v6389_v56 = vld [vmem:[#allocation12_spill] sm:$0xff] }
 0x2a1   : > { %v3561_v10 = vadd.f32 %v5842_v59, %v2607_v4  ;;  %v6379_v59 = vld [vmem:[#allocation60_spill] sm:$0xff] }
 0x2a2   : > { %v2310_v49 = vpop.f32.mrf.mxu0 }
 0x2a3   : > { %v3593_v61 = vpack.c.bf16 %v3561_v10, %v3561_v10  ;;  %v2311_v20 = vadd.f32 %v2310_v49, %v6377_v36 }
 0x2a5   : > { %3625 = vst.msk [vmem:[%s5953_s28 + $0x18] sm:$0xf] %vm406_vm0, %v3593_v61  ;;  %v2520_v48 = vadd.f32 %v6378_v13, %v2311_v20  ;;  %v2611_v9 = vpop.f32.mrf.mxu2 }
 0x2a7   : > { %v2609_v19 = vadd.f32 %v2608_v46, %v2520_v48 }
 0x2a9   : > { %v3562_v21 = vadd.f32 %v5853_v54, %v2609_v19 }
 0x2aa   : > { %v2313_v39 = vpop.f32.mrf.mxu0 }
 0x2ab   : > { %v3594_v28 = vpack.c.bf16 %v3562_v21, %v3562_v21  ;;  %v2314_v41 = vadd.f32 %v2313_v39, %v5803_v34 }
 0x2ad   : > { %3626 = vst.msk [vmem:[%s5953_s28 + $0x1c] sm:$0xf] %vm406_vm0, %v3594_v28  ;;  %v2523_v50 = vadd.f32 %v6379_v59, %v2314_v41  ;;  %v2613_v32 = vpop.f32.mrf.mxu2 }
 0x2af   : > { %v2612_v31 = vadd.f32 %v2611_v9, %v2523_v50 }
 0x2b1   : > { %v3563_v63 = vadd.f32 %v5866_v14, %v2612_v31  ;;  %v6380_v14 = vld [vmem:[#allocation62_spill] sm:$0xff] }
 0x2b2   : > { %v2315_v16 = vpop.f32.mrf.mxu0 }
 0x2b3   : > { %v3595_v6 = vpack.c.bf16 %v3563_v63, %v3563_v63  ;;  %v2316_v44 = vadd.f32 %v2315_v16, %v5814_v45  ;;  %v6381_v45 = vld [vmem:[#allocation9_spill] sm:$0xff] }
 0x2b5   : > { %3627 = vst.msk [vmem:[%s5953_s28 + $0x20] sm:$0xf] %vm406_vm0, %v3595_v6  ;;  %v2525_v54 = vadd.f32 %v5801_v51, %v2316_v44  ;;  %v2616_v34 = vpop.f32.mrf.mxu2  ;;  %v6382_v51 = vld [vmem:[#allocation64_spill] sm:$0xff] }
 0x2b7   : > { %v2614_v62 = vadd.f32 %v2613_v32, %v2525_v54 }
 0x2b9   : > { %v3564_v3 = vadd.f32 %v5878_v23, %v2614_v62  ;;  %v6383_v23 = vld [vmem:[#allocation63_spill] sm:$0xff] }
 0x2ba   : > { %v2318_v40 = vpop.f32.mrf.mxu0 }
 0x2bb   : > { %v3596_v53 = vpack.c.bf16 %v3564_v3, %v3564_v3  ;;  %v2319_v1 = vadd.f32 %v2318_v40, %v5824_v25  ;;  %v6384_v25 = vld [vmem:[#allocation10_spill] sm:$0xff] }
 0x2bd   : > { %3628 = vst.msk [vmem:[%s5953_s28 + $0x24] sm:$0xf] %vm406_vm0, %v3596_v53  ;;  %v2528_v12 = vadd.f32 %v6380_v14, %v2319_v1  ;;  %v2618_v26 = vpop.f32.mrf.mxu2 }
 0x2bf   : > { %v2617_v37 = vadd.f32 %v2616_v34, %v2528_v12 }
 0x2c1   : > { %v3565_v58 = vadd.f32 %v6381_v45, %v2617_v37 }
 0x2c2   : > { %v2320_v11 = vpop.f32.mrf.mxu0 }
 0x2c3   : > { %v3597_v15 = vpack.c.bf16 %v3565_v58, %v3565_v58  ;;  %v2321_v42 = vadd.f32 %v2320_v11, %v6382_v51 }
 0x2c5   : > { %3629 = vst.msk [vmem:[%s5953_s28 + $0x28] sm:$0xf] %vm406_vm0, %v3597_v15  ;;  %v2530_v24 = vadd.f32 %v6383_v23, %v2321_v42  ;;  %v2621_v2 = vpop.f32.mrf.mxu2 }
 0x2c7   : > { %v2619_v60 = vadd.f32 %v2618_v26, %v2530_v24 }
 0x2c9   : > { %v3566_v27 = vadd.f32 %v6384_v25, %v2619_v60 }
 0x2ca   : > { %v2323_v43 = vpop.f32.mrf.mxu0 }
 0x2cb   : > { %v3598_v7 = vpack.c.bf16 %v3566_v27, %v3566_v27  ;;  %v2324_v18 = vadd.f32 %v2323_v43, %v6385_v55 }
 0x2cd   : > { %3630 = vst.msk [vmem:[%s5953_s28 + $0x2c] sm:$0xf] %vm406_vm0, %v3598_v7  ;;  %v2533_v47 = vadd.f32 %v6386_v8, %v2324_v18  ;;  %v2623_v17 = vpop.f32.mrf.mxu2 }
 0x2cf   : > { %v2622_v35 = vadd.f32 %v2621_v2, %v2533_v47 }
 0x2d1   : > { %v3567_v52 = vadd.f32 %v5915_v29, %v2622_v35 }
 0x2d2   : > { %v2325_v30 = vpop.f32.mrf.mxu0 }
 0x2d3   : > { %v3599_v38 = vpack.c.bf16 %v3567_v52, %v3567_v52  ;;  %v2326_v5 = vadd.f32 %v2325_v30, %v6387_v0 }
 0x2d5   : > { %3631 = vst.msk [vmem:[%s5953_s28 + $0x30] sm:$0xf] %vm406_vm0, %v3599_v38  ;;  %v2535_v33 = vadd.f32 %v6388_v22, %v2326_v5 }
 0x2d7   : > { %v2624_v57 = vadd.f32 %v2623_v17, %v2535_v33 }
 0x2d9   : > { %v3568_v4 = vadd.f32 %v6389_v56, %v2624_v57 }
 0x2db   : > { %v3600_v46 = vpack.c.bf16 %v3568_v4, %v3568_v4 }
 0x2dd   : > { %3632 = vst.msk [vmem:[%s5953_s28 + $0x34] sm:$0xf] %vm406_vm0, %v3600_v46 }
 0x2de PF: > { %p15_p4 = scmp.ge.s32.totalorder %s4491_s27, 4   ;;  %s6390_s15 = smov %s4406_s16 }
 0x2df   : > { %s6391_s16 = smov %s4410_s17  ;;  %s6392_s17 = smov %s4501_s6 }
 0x2e0   : > { %s6393_s18 = smov %s4491_s27  ;;  %17 = sbr.rel (!%p15_p4) target bundleno = 4 (0x4), region = 84 }
 0x2e5   :  { %3672 = vsyncpa [#allocation4], 1 }
 0x2e6   :  { %3674 = vsyncpa [#allocation4 + $0x1], 1 }
 0x2e7   :  { %3675 = vsyncpa [#allocation6], 1 }

// kernel: basic_block_v2.3
= control target key start
LH: loop header
LB: loop body
LE: loop exit
PB: predicated region body
PF: predicated region fallthrough
CT: control target
= control target key end

     0   :  { %10 = vsyncpa [#allocation4], 0  ;;  %s6535_s0 = inlined_call_operand.vmem [shape: bf16[2,16,16,64], index: 0, kind: input, shape index: {}]   ;;  %s6536_s1 = inlined_call_operand.hbm [shape: bf16[3,192,64], index: 1, kind: input, shape index: {}]   ;;  %s6537_s2 = inlined_call_operand.vmem [shape: f32[1,64], index: 2, kind: input, shape index: {}]   ;;  %s6538_s3 = inlined_call_operand.vmem [shape: f32[1,64], index: 3, kind: input, shape index: {}]   ;;  %s6539_s4 = inlined_call_operand.hbm [shape: f32[2,256,64], index: 4, kind: input, shape index: {}]   ;;  %s6540_s5 = inlined_call_operand.hbm [shape: f32[2,256,64], index: 5, kind: output, shape index: {}]  }
   0x1   :  { %11 = vsyncpa [#allocation7], 0 }
   0x2   :  { %13 = vsyncpa [#allocation7 + $0x1], 0 }
   0x3   :  { %14 = vsyncpa [#allocation5], 0 }
   0x4   :  { %16 = vsyncpa [#allocation5 + $0x1], 0  ;;  %s4725_s18 = smov 0   ;;  %s4727_s19 = smov 0  }
   0x5   :  { %s4729_s20 = smov 0   ;;  %s4731_s21 = smov 0  }
   0x6 LB: > { %s4746_s22 = sadd.s32 4294967295, %s4684_s21   ;;  %s3873_s23 = sadd.s32 4294967294, %s4684_s21   ;;  %s4684_s21 = sphi %s4731_s21, %s6733_s21   ;;  %s4680_s20 = sphi %s4729_s20, %s6732_s20   ;;  %s4676_s19 = sphi %s4727_s19, %s6731_s19   ;;  %s4672_s18 = sphi %s4725_s18, %s6730_s18  }
   0x7   : > { %p131_p0 = scmp.ne.s32.totalorder %s4676_s19, %s4672_s18  ;;  %p132_p1 = scmp.eq.s32.totalorder %s4746_s22, 0 }
   0x8   : > { %p155_p2 = scmp.eq.s32.totalorder %s4746_s22, 1  ;;  %p161_p3 = scmp.eq.s32.totalorder %s3873_s23, 1 }
   0x9   : > { %p4755_p4 = por %p132_p1, %p131_p0  ;;  %p3874_p5 = scmp.ge.s32.totalorder %s4684_s21, 1 }
   0xa   : > { %p4760_p6 = por %p161_p3, %p131_p0  ;;  %p168_p7 = scmp.lt.s32.totalorder %s4684_s21, 3 }
   0xb   : > { %s179_s28 = sshll.u32 %s6536_s1, 4  ;;  %s4686_s30 = smov [#allocation3]   ;;  %s180_s28 = int_to_ptr.hbm [resolvable:$true] %s179_s28 }
   0xc   : > { %p4768_p8 = pnand %p3874_p5, %p168_p7  ;;  %s181_s6 = sshll.u32 %s4686_s30, 4  ;;  %s182_s6 = int_to_ptr.vmem [resolvable:$true] %s181_s6 }
   0xd   : > { %s4778_s7 = sadd.s32 1, %s4684_s21   ;;  %s4687_s8 = smov 64  }
   0xe   : > { %p4407_p9 = pneg %p4768_p8  ;;  %s4688_s9 = smov 4  }
   0xf   : > { %s115_s10 = ssub.s32 %s4684_s21, %s4778_s7  ;;  %s118_s11 = sadd.s32 1, %s4680_s20 }
  0x10   : > { %p4408_p10 = pnand %p4407_p9, %p132_p1  ;;  %p116_p12 = scmp.eq.s32.totalorder %s115_s10, 0 }
  0x11   : > { %p125_p13 = scmp.ne.s32.totalorder %s4680_s20, %s4676_s19  ;;  %p126_p0 = scmp.eq.s32.totalorder %s4684_s21, 0 }
  0x12   : > { %4410 = dma.hbm_to_vmem [thread:$0]  (!%p4408_p10), %s180_s28, 4608, %s182_s6, [#allocation4], %s4687_s8, %s4687_s8, %s4688_s9  }
  0x13   : > { %p4420_p3 = scmp.lt.s32.totalorder %s4684_s21, 2  ;;  %p127_p5 = por %p126_p0, %p125_p13 }
  0x14   : > { %s4788_s12 = scalar_select %p116_p12, %s4680_s20, %s118_s11  }
  0x15   : > { %p4792_p7 = por %p155_p2, %p125_p13  ;;  %s209_s14 = sand.u32 1, %s4680_s20  }
  0x16   : > { %s4083_s15 = sshll.u32 %s4684_s21, 8  ;;  %s3877_s16 = sshll.u32 %s209_s14, 8 }
  0x17   : > { %s218_s26 = scalar_lea.hbm %s6539_s4, %s4083_s15  ;;  %s213_s28 = scalar_lea.vmem [#allocation6], %s3877_s16 }
  0x18   : > { %s219_s27 = sshll.u32 %s218_s26, 4  ;;  %s221_s30 = sshll.u32 %s213_s28, 4  ;;  %s220_s27 = int_to_ptr.hbm [resolvable:$true] %s219_s27  ;;  %s222_s30 = int_to_ptr.vmem [resolvable:$true] %s221_s30 }
  0x19   : > { %p4803_p9 = pnand %p4420_p3, %p127_p5  ;;  %s210_s8 = scalar_lea.sflag [#allocation7], %s209_s14 }
  0x1a   : > { %s4572_s9 = sshra.s32 %s220_s27, 4  ;;  %s4579_s16 = scalar_lea.hbm %s6539_s4, 512  ;;  %s4573_s9 = int_to_ptr.hbm [resolvable:$true] %s4572_s9 }
  0x1b   : > { %s4574_s10 = scalar_lea.hbm %s4573_s9, 256  ;;  %p4576_p10 = pneg %p4803_p9 }
  0x1c   : > { %p4575_p2 = scmp.ne.s32.totalorder %s4573_s9, %s4574_s10  ;;  %p4580_p0 = scmp.lt.s32.totalorder %s4573_s9, %s6539_s4 }
  0x1d   : > { %p4581_p3 = scmp.lt.s32.totalorder %s4579_s16, %s4574_s10 }
  0x1e   : > { %p4577_p12 = pnand %p4576_p10, %p4575_p2 }
  0x1f   : > { %p4582_p5 = por %p4581_p3, %p4580_p0 }
  0x20   : > { %p4578_p13 = pneg %p4577_p12 }
  0x22   : > { %p4583_p11 = pnand %p4582_p5, %p4578_p13 }
  0x24   : > { %4586 = shalt.err (!%p4583_p11)
}
  0x25   : > { %s4689_s14 = smov 128   ;;  %s4690_s26 = smov 8  }
  0x26   : > { %4414 = dma.hbm_to_vmem [thread:$0]  (!%p4803_p9), %s220_s27, 4096, %s222_s30, %s210_s8, %s4689_s14, %s4689_s14, %s4690_s26  }
  0x27   : > { %233 = sbr.rel (%p4768_p8) target bundleno = 741 (0x2e5), region = 40 }
  0x2c   : > { %4647 = dma.done.wait (%p132_p1), [#allocation4], 4608  }
  0x2d   : > { %4649 = vsyncadd (%p132_p1), [#allocation4], 4294962688  ;;  %s4824_s28 = sand.u32 1, %s4676_s19  }
  0x2e   : > { %s3882_s9 = sshll.u32 %s4824_s28, 8  ;;  %s241_s10 = scalar_lea.sflag [#allocation7], %s4824_s28 }
  0x2f   : > { %s4830_s27 = scalar_lea.vmem [#allocation6], %s3882_s9 }
  0x30   : > { %4651 = dma.done.wait (%p4755_p4), %s241_s10, 4096  }
  0x31   : > { %4653 = vsyncadd (%p4755_p4), %s241_s10, 4294963200  ;;  %vm483_vm0 = vcmask 519168   ;;  %vm486_vm1 = vcmask 516096   ;;  %v4691_v0 = vmov 0   ;;  %p277_p1 = scmp.lt.s32.totalorder %s4746_s22, 1  ;;  %v4096_v1 = vld [vmem:[#allocation3 + $0x58] sm:$0xff] }
  0x32   : > { %484 = vst.msk [vmem:[#allocation2] sm:$0xf] %vm483_vm0, %v4691_v0  ;;  %v4108_v2 = vld [vmem:[#allocation3 + $0xb8] sm:$0xff]  ;;  %4395 = vmatpush.bf16.msra.mxu3 %v4096_v1  ;;  %v4095_v5 = vld [vmem:[#allocation3 + $0x50] sm:$0xff]  ;;  %v4865_v8 = vld [vmem:[%s6537_s2] ss:$0 sm:$0xff] }
  0x33   : > { %485 = vst.msk [vmem:[#allocation2 + $0x4] sm:$0xf] %vm483_vm0, %v4691_v0  ;;  %s278_s29 = scalar_select %p277_p1, %s4746_s22, 1  ;;  %4391 = vmatpush.bf16.msra.mxu1 %v4108_v2  ;;  %v4876_v15 = vld [vmem:[%s6538_s3] ss:$0 sm:$0xff]  ;;  %vm1445_vm9 = vcmask 1046528  }
  0x34   : > { %487 = vst.msk [vmem:[#allocation2 + $0x8] sm:$0x1] %vm486_vm1, %v4691_v0  ;;  %v4094_v18 = vld [vmem:[#allocation3 + $0x48] sm:$0xff]  ;;  %vm1172_vm2 = vsmask.f32 7424  ;;  %s4692_s23 = smov 64  }
  0x35   : > { %488 = vst.msk [vmem:[#allocation2 + $0xc] sm:$0xf] %vm483_vm0, %v4691_v0  ;;  %s4084_s24 = sshll.u32 %s278_s29, 7  ;;  %vm539_vm3 = vsmask.f32 256  ;;  %vm1494_vm10 = vcmask 523264  }
  0x36   : > { %489 = vst.msk [vmem:[#allocation2 + $0x10] sm:$0xf] %vm483_vm0, %v4691_v0  ;;  %s4853_s8 = scalar_lea.vmem %s6535_s0, %s4084_s24  ;;  %4396 = vmatpush.bf16.msra.mxu3 %v4095_v5  ;;  %vm540_vm4 = vsmask.f32 4368  ;;  %vm864_vm5 = vsmask.f32 7938  ;;  %vm4978_vm8 = vmand %vm486_vm1, %vm539_vm3 }
  0x37   : > { %490 = vst.msk [vmem:[#allocation2 + $0x14] sm:$0x1] %vm486_vm1, %v4691_v0  ;;  %v4123_v3 = vld [vmem:[%s4853_s8] sm:$0xff]   ;;  %v4287_v25 = vld [vmem:[%s4853_s8 + $0x30] sm:$0xff]   ;;  %v4282_v26 = vld [vmem:[%s4853_s8 + $0x8] sm:$0xff]   ;;  %s6227_s24 = scalar_lea.vmem [#allocation8], %s3882_s9 }
  0x38   : > { %491 = vst.msk [vmem:[#allocation2 + $0x18] sm:$0xf] %vm483_vm0, %v4691_v0  ;;  %v4124_v6 = vunpack.c.l.bf16 %v4123_v3  ;;  %v4125_v7 = vunpack.c.h.bf16 %v4123_v3  ;;  %v4148_v29 = vunpack.c.l.bf16 %v4287_v25  ;;  %v4149_v30 = vunpack.c.h.bf16 %v4287_v25  ;;  %v4288_v49 = vld [vmem:[%s4853_s8 + $0x38] sm:$0xff]   ;;  %vm4951_vm6 = vmor %vm539_vm3, %vm540_vm4  ;;  %s4121_s9 = sshll.u32 %s4746_s22, 8  ;;  %s3773_s11 = sshll.u32 %s6227_s24, 4  ;;  %s3774_s11 = int_to_ptr.vmem [resolvable:$true] %s3773_s11 }
  0x39   : > { %492 = vst.msk [vmem:[#allocation2 + $0x1c] sm:$0xf] %vm483_vm0, %v4691_v0  ;;  %v4129_v31 = vunpack.c.h.bf16 %v4282_v26  ;;  %v4128_v37 = vunpack.c.l.bf16 %v4282_v26  ;;  %v4152_v51 = vunpack.c.l.bf16 %v4288_v49  ;;  %v4153_v58 = vunpack.c.h.bf16 %v4288_v49  ;;  %v4284_v60 = vld [vmem:[%s4853_s8 + $0x18] sm:$0xff]   ;;  %vm4961_vm7 = vmand %vm483_vm0, %vm864_vm5  ;;  %s3761_s22 = scalar_lea.sflag [#allocation5], %s4824_s28  ;;  %s4622_s26 = scalar_lea.hbm %s6540_s5, 512 }
  0x3a   : > { %v4187_v4 = vld [vmem:[#allocation2] sm:$0xff]   ;;  %493 = vst.msk [vmem:[#allocation2 + $0x20] sm:$0x1] %vm486_vm1, %v4691_v0  ;;  %v351_v13 = vmul.f32 %v4865_v8, %v4124_v6  ;;  %v352_v14 = vmul.f32 %v4865_v8, %v4125_v7  ;;  %4397 = vmatpush.bf16.msra.mxu3 %v4094_v18  ;;  %v363_v35 = vmul.f32 %v4865_v8, %v4148_v29  ;;  %v4136_v5 = vunpack.c.l.bf16 %v4284_v60 }
  0x3b   : > { %v1012_v9 = vld [vmem:[#allocation2 + $0x8] sm:$0x1]  ;;  %v1174_v10 = vshrl.u32 %v4187_v4, 16  ;;  %v1176_v11 = vshll.u32 %v4187_v4, 16  ;;  %494 = vst.msk [vmem:[#allocation2 + $0x24] sm:$0xf] %vm483_vm0, %v4691_v0  ;;  %v364_v36 = vmul.f32 %v4865_v8, %v4149_v30  ;;  %v354_v38 = vmul.f32 %v4865_v8, %v4129_v31 }
  0x3c   : > { %v1140_v12 = vunpack.c.l.b16 %v1012_v9  ;;  %495 = vst.msk [vmem:[#allocation2 + $0x28] sm:$0xf] %vm483_vm0, %v4691_v0  ;;  %v387_v19 = vadd.f32 %v4876_v15, %v351_v13  ;;  %v388_v20 = vadd.f32 %v4876_v15, %v352_v14  ;;  %v399_v39 = vadd.f32 %v4876_v15, %v363_v35 }
  0x3d   : > { %v1178_v16 = vrot.slane %v1176_v11, 1  ;;  %496 = vst.msk [vmem:[#allocation2 + $0x2c] sm:$0x1] %vm486_vm1, %v4691_v0  ;;  %v400_v40 = vadd.f32 %v4876_v15, %v364_v36  ;;  %v353_v41 = vmul.f32 %v4865_v8, %v4128_v37  ;;  %v390_v48 = vadd.f32 %v4876_v15, %v354_v38 }
  0x3e   : > { %v4880_v17 = vpack.c.b16 %v1140_v12, %v1140_v12  ;;  %497 = vst.msk [vmem:[#allocation2 + $0x30] sm:$0xf] %vm483_vm0, %v4691_v0  ;;  %v419_v23 = vmax.f32 %v387_v19, 0.0  ;;  %v420_v24 = vmax.f32 %v388_v20, 0.0  ;;  %v431_v45 = vmax.f32 %v399_v39, 0.0 }
  0x3f   : > { %498 = vst.msk [vmem:[#allocation2 + $0x34] sm:$0xf] %vm483_vm0, %v4691_v0  ;;  %v1179_v21 = vor.u32 %v1178_v16, %v1174_v10  ;;  %v432_v46 = vmax.f32 %v400_v40, 0.0  ;;  %v389_v47 = vadd.f32 %v4876_v15, %v353_v41  ;;  %v422_v55 = vmax.f32 %v390_v48, 0.0  ;;  %v4965_v20 = vld [vmem:[#allocation2 + $0xc] sm:$0xf] }
  0x40   : > { %6569 = vst [vmem:[#allocation12_spill] sm:$0xff] %v4880_v17  ;;  %v1181_v22 = vshll.u32 %v4880_v17, 16  ;;  %v451_v28 = vpack.c.bf16 %v419_v23, %v419_v23  ;;  %v452_v33 = vpack.c.bf16 %v420_v24, %v420_v24  ;;  %v463_v52 = vpack.c.bf16 %v431_v45, %v431_v45 }
  0x41   : > { %499 = vst.msk [vmem:[#allocation2 + $0x38] sm:$0x1] %vm486_vm1, %v4691_v0  ;;  %v464_v53 = vpack.c.bf16 %v432_v46, %v432_v46  ;;  %v421_v54 = vmax.f32 %v389_v47, 0.0  ;;  %v365_v59 = vmul.f32 %v4865_v8, %v4152_v51  ;;  %v4939_v1 = vpack.c.bf16 %v422_v55, %v422_v55  ;;  %v4289_v55 = vld [vmem:[%s4853_s8 + $0x40] sm:$0xff]  }
  0x42   : > { %500 = vst.msk [vmem:[#allocation2 + $0x3c] sm:$0xf] %vm483_vm0, %v4691_v0  ;;  %v1183_v27 = vrot.slane %v1181_v22, 1  ;;  %v543_v34 = vshrl.u32 %v451_v28, 16  ;;  %v546_v43 = vshll.u32 %v451_v28, 16  ;;  %v551_v44 = vshrl.u32 %v452_v33, 16 }
  0x43   : > { %501 = vst.msk [vmem:[#allocation2 + $0x40] sm:$0xf] %vm483_vm0, %v4691_v0  ;;  %v554_v50 = vshll.u32 %v452_v33, 16  ;;  %v645_v61 = vshrl.u32 %v463_v52, 16  ;;  %v653_v62 = vshrl.u32 %v464_v53, 16  ;;  %v4937_v63 = vpack.c.bf16 %v421_v54, %v421_v54 }
  0x44   : > { %502 = vst.msk [vmem:[#allocation2 + $0x44] sm:$0x1] %vm486_vm1, %v4691_v0  ;;  %v1184_v32 = vsel %vm1172_vm2, %v1179_v21, %v1183_v27  ;;  %v4917_v42 = vrot.slane %v543_v34, 7  ;;  %v553_v57 = vrot.slane %v551_v44, 7  ;;  %v656_v2 = vshll.u32 %v464_v53, 16 }
  0x45   : > { %503 = vst.msk [vmem:[#allocation2 + $0x48] sm:$0xf] %vm483_vm0, %v4691_v0  ;;  %1365 = vrot.lane.b32.xlu0 %v1184_v32, %s4692_s23  ;;  %v366_v3 = vmul.f32 %v4865_v8, %v4153_v58  ;;  %v401_v4 = vadd.f32 %v4876_v15, %v365_v59  ;;  %v647_v6 = vrot.slane %v645_v61, 7  ;;  %v648_v7 = vshll.u32 %v463_v52, 16  ;;  %v872_v28 = vld [vmem:[#allocation2 + $0x14] sm:$0x1] }
  0x46   : > { %504 = vst.msk [vmem:[#allocation2 + $0x4c] sm:$0xf] %vm483_vm0, %v4691_v0  ;;  %v4931_v56 = vor.u32 %v546_v43, %v4917_v42  ;;  %v655_v9 = vrot.slane %v653_v62, 7  ;;  %v4137_v10 = vunpack.c.h.bf16 %v4284_v60  ;;  %v549_v12 = vrot.slane %v4917_v42, 4  ;;  %v4285_v32 = vld [vmem:[%s4853_s8 + $0x20] sm:$0xff]  }
  0x47   : > { %505 = vst.msk [vmem:[#allocation2 + $0x50] sm:$0x1] %vm486_vm1, %v4691_v0  ;;  %v556_v13 = vor.u32 %v554_v50, %v553_v57  ;;  %v560_v14 = vshrl.u32 %v4937_v63, 16  ;;  %v433_v16 = vmax.f32 %v401_v4, 0.0  ;;  %v558_v18 = vrot.slane %v553_v57, 4 }
  0x48   : > { %506 = vst.msk [vmem:[#allocation2 + $0x54] sm:$0xf] %vm483_vm0, %v4691_v0  ;;  %v568_v21 = vshrl.u32 %v4939_v1, 16  ;;  %v402_v22 = vadd.f32 %v4876_v15, %v366_v3  ;;  %v651_v23 = vrot.slane %v647_v6, 4  ;;  %v658_v24 = vor.u32 %v656_v2, %v655_v9  ;;  %v4107_v2 = vld [vmem:[#allocation3 + $0xb0] sm:$0xff] }
  0x49   : > { %507 = vst.msk [vmem:[#allocation2 + $0x58] sm:$0xf] %vm483_vm0, %v4691_v0  ;;  %v4971_v25 = vpack.c.bf16 %v433_v16, %v433_v16  ;;  %v357_v26 = vmul.f32 %v4865_v8, %v4136_v5  ;;  %v4982_v29 = vor.u32 %v648_v7, %v647_v6  ;;  %v571_v30 = vshll.u32 %v4939_v1, 16  ;;  %v4093_v7 = vld [vmem:[#allocation3 + $0x40] sm:$0xff]  ;;  %4392 = vmatpush.bf16.msra.mxu1 %v4107_v2 }
  0x4a   : > { %508 = vst.msk [vmem:[#allocation2 + $0x5c] sm:$0x1] %vm486_vm1, %v4691_v0  ;;  %v358_v31 = vmul.f32 %v4865_v8, %v4137_v10  ;;  %v4991_v33 = vsel %vm4951_vm6, %v549_v12, %v556_v13  ;;  %v867_v34 = vsel %vm4961_vm7, %v4931_v56, %v4965_v20  ;;  %v660_v35 = vrot.slane %v655_v9, 4  ;;  %v5047_v9 = vld [vmem:[#allocation2 + $0x18] sm:$0xf]  ;;  %4398 = vmatpush.bf16.msra.mxu3 %v4093_v7 }
  0x4b   : > { %509 = vst.msk [vmem:[#allocation2 + $0x60] sm:$0xf] %vm483_vm0, %v4691_v0  ;;  %v562_v37 = vrot.slane %v560_v14, 7  ;;  %v434_v39 = vmax.f32 %v402_v22, 0.0  ;;  %v662_v40 = vshrl.u32 %v4971_v25, 16  ;;  %v393_v41 = vadd.f32 %v4876_v15, %v357_v26 }
  0x4c   : > { %510 = vst.msk [vmem:[#allocation2 + $0x64] sm:$0xf] %vm483_vm0, %v4691_v0  ;;  %v394_v42 = vadd.f32 %v4876_v15, %v358_v31  ;;  %v5008_v43 = vsel %vm4978_vm8, %v558_v18, %v872_v28  ;;  %v5012_v44 = vsel %vm4951_vm6, %v651_v23, %v658_v24  ;;  %v563_v45 = vshll.u32 %v4937_v63, 16  ;;  %v879_v10 = vld [vmem:[#allocation2 + $0x20] sm:$0x1]  ;;  %v4283_v31 = vld [vmem:[%s4853_s8 + $0x10] sm:$0xff]  }
  0x4d   : > { %511 = vst.msk [vmem:[#allocation2 + $0x68] sm:$0x1] %vm486_vm1, %v4691_v0  ;;  %v5015_v46 = vrot.slane %v568_v21, 7  ;;  %v466_v48 = vpack.c.bf16 %v434_v39, %v434_v39  ;;  %v425_v49 = vmax.f32 %v393_v41, 0.0  ;;  %v4140_v50 = vunpack.c.l.bf16 %v4285_v32  ;;  %v4106_v18 = vld [vmem:[#allocation3 + $0xa8] sm:$0xff] }
  0x4e   : > { %512 = vst.msk [vmem:[#allocation2 + $0x6c] sm:$0xf] %vm483_vm0, %v4691_v0  ;;  %v5029_v52 = vrot.slane %v662_v40, 7  ;;  %v426_v53 = vmax.f32 %v394_v42, 0.0  ;;  %v4141_v54 = vunpack.c.h.bf16 %v4285_v32  ;;  %v566_v57 = vrot.slane %v562_v37, 4  ;;  %4393 = vmatpush.bf16.msra.mxu1 %v4106_v18 }
  0x4f   : > { %513 = vst.msk [vmem:[#allocation2 + $0x70] sm:$0xf] %vm483_vm0, %v4691_v0  ;;  %v4997_v36 = vld [vmem:[#allocation2 + $0x54] sm:$0xf]  ;;  %v573_v58 = vor.u32 %v571_v30, %v5015_v46  ;;  %v665_v59 = vshll.u32 %v4971_v25, 16  ;;  %v670_v60 = vshrl.u32 %v466_v48, 16  ;;  %v457_v61 = vpack.c.bf16 %v425_v49, %v425_v49 }
  0x50   : > { %514 = vst.msk [vmem:[#allocation2 + $0x74] sm:$0x1] %vm486_vm1, %v4691_v0  ;;  %v911_v47 = vsel %vm4961_vm7, %v4982_v29, %v4997_v36  ;;  %v458_v62 = vpack.c.bf16 %v426_v53, %v426_v53  ;;  %v359_v63 = vmul.f32 %v4865_v8, %v4140_v50  ;;  %v360_v1 = vmul.f32 %v4865_v8, %v4141_v54  ;;  %v5138_v56 = vld [vmem:[#allocation2 + $0x3c] sm:$0xf] }
  0x51   : > { %515 = vst.msk [vmem:[#allocation2 + $0x78] sm:$0xf] %vm483_vm0, %v4691_v0  ;;  %v914_v38 = vld [vmem:[#allocation2 + $0x5c] sm:$0x1]  ;;  %v5042_v3 = vor.u32 %v563_v45, %v562_v37  ;;  %v575_v4 = vrot.slane %v5015_v46, 4  ;;  %v673_v5 = vshll.u32 %v466_v48, 16  ;;  %v4156_v6 = vunpack.c.l.bf16 %v4289_v55 }
  0x52   : > { %516 = vst.msk [vmem:[#allocation2 + $0x7c] sm:$0xf] %vm483_vm0, %v4691_v0  ;;  %v5027_v51 = vsel %vm4978_vm8, %v660_v35, %v914_v38  ;;  %v668_v12 = vrot.slane %v5029_v52, 4  ;;  %v395_v13 = vadd.f32 %v4876_v15, %v359_v63  ;;  %v396_v14 = vadd.f32 %v4876_v15, %v360_v1  ;;  %v5066_v35 = vld [vmem:[#allocation2 + $0x60] sm:$0xf] }
  0x53   : > { %517 = vst.msk [vmem:[#allocation2 + $0x80] sm:$0x1] %vm486_vm1, %v4691_v0  ;;  %v4157_v16 = vunpack.c.h.bf16 %v4289_v55  ;;  %v5056_v21 = vsel %vm4951_vm6, %v566_v57, %v573_v58  ;;  %v672_v22 = vrot.slane %v670_v60, 7  ;;  %v594_v23 = vshrl.u32 %v457_v61, 16  ;;  %v5091_v57 = vld [vmem:[#allocation2 + $0x30] sm:$0xf] }
  0x54   : > { %518 = vst.msk [vmem:[#allocation2 + $0x84] sm:$0xf] %vm483_vm0, %v4691_v0  ;;  %v597_v24 = vshll.u32 %v457_v61, 16  ;;  %v5061_v25 = vor.u32 %v665_v59, %v5029_v52  ;;  %v602_v26 = vshrl.u32 %v458_v62, 16  ;;  %v427_v28 = vmax.f32 %v395_v13, 0.0  ;;  %v4105_v59 = vld [vmem:[#allocation3 + $0xa0] sm:$0xff] }
  0x55   : > { %519 = vst.msk [vmem:[#allocation2 + $0x88] sm:$0xf] %vm483_vm0, %v4691_v0  ;;  %v428_v30 = vmax.f32 %v396_v14, 0.0  ;;  %v675_v32 = vor.u32 %v673_v5, %v672_v22  ;;  %v596_v37 = vrot.slane %v594_v23, 7  ;;  %v605_v38 = vshll.u32 %v458_v62, 16  ;;  %4394 = vmatpush.bf16.msra.mxu1 %v4105_v59 }
  0x56   : > { %520 = vst.msk [vmem:[#allocation2 + $0x8c] sm:$0x1] %vm486_vm1, %v4691_v0  ;;  %v367_v39 = vmul.f32 %v4865_v8, %v4156_v6  ;;  %v604_v40 = vrot.slane %v602_v26, 7  ;;  %v459_v41 = vpack.c.bf16 %v427_v28, %v427_v28  ;;  %v368_v45 = vmul.f32 %v4865_v8, %v4157_v16  ;;  %v921_v49 = vld [vmem:[#allocation2 + $0x68] sm:$0x1] }
  0x57   : > { %521 = vst.msk [vmem:[#allocation2 + $0x90] sm:$0xf] %vm483_vm0, %v4691_v0  ;;  %v460_v42 = vpack.c.bf16 %v428_v30, %v428_v30  ;;  %v876_v46 = vsel %vm4961_vm7, %v5042_v3, %v5047_v9  ;;  %v5080_v48 = vsel %vm4978_vm8, %v575_v4, %v879_v10  ;;  %v4132_v52 = vunpack.c.l.bf16 %v4283_v31  ;;  %v893_v6 = vld [vmem:[#allocation2 + $0x38] sm:$0x1]  ;;  %v5150_v59 = vld [vmem:[#allocation2 + $0x6c] sm:$0xf] }
  0x58   : > { %522 = vst.msk [vmem:[#allocation2 + $0x94] sm:$0xf] %vm483_vm0, %v4691_v0  ;;  %v403_v50 = vadd.f32 %v4876_v15, %v367_v39  ;;  %v677_v53 = vrot.slane %v672_v22, 4  ;;  %v918_v54 = vsel %vm4961_vm7, %v5061_v25, %v5066_v35  ;;  %v5089_v55 = vor.u32 %v597_v24, %v596_v37  ;;  %v928_v36 = vld [vmem:[#allocation2 + $0x74] sm:$0x1] }
  0x59   : > { %523 = vst.msk [vmem:[#allocation2 + $0x98] sm:$0x1] %vm486_vm1, %v4691_v0  ;;  %v611_v58 = vshrl.u32 %v459_v41, 16  ;;  %v600_v60 = vrot.slane %v596_v37, 4  ;;  %v607_v61 = vor.u32 %v605_v38, %v604_v40  ;;  %v619_v62 = vshrl.u32 %v460_v42, 16  ;;  %v4290_v37 = vld [vmem:[%s4853_s8 + $0x48] sm:$0xff]  }
  0x5a   : > { %524 = vst.msk [vmem:[#allocation2 + $0x9c] sm:$0xf] %vm483_vm0, %v4691_v0  ;;  %v404_v63 = vadd.f32 %v4876_v15, %v368_v45  ;;  %v5100_v1 = vsel %vm4951_vm6, %v668_v12, %v675_v32  ;;  %v609_v2 = vrot.slane %v604_v40, 4  ;;  %v614_v4 = vshll.u32 %v459_v41, 16 }
  0x5b   : > { %525 = vst.msk [vmem:[#allocation2 + $0xa0] sm:$0xf] %vm483_vm0, %v4691_v0  ;;  %v435_v5 = vmax.f32 %v403_v50, 0.0  ;;  %v613_v7 = vrot.slane %v611_v58, 7  ;;  %v4133_v13 = vunpack.c.h.bf16 %v4283_v31  ;;  %v355_v14 = vmul.f32 %v4865_v8, %v4132_v52  ;;  %v900_v50 = vld [vmem:[#allocation2 + $0x44] sm:$0x1] }
  0x5c   : > { %526 = vst.msk [vmem:[#allocation2 + $0xa4] sm:$0x1] %vm486_vm1, %v4691_v0  ;;  %v436_v10 = vmax.f32 %v404_v63, 0.0  ;;  %v5109_v12 = vsel %vm4978_vm8, %v677_v53, %v921_v49  ;;  %v890_v16 = vsel %vm4961_vm7, %v5089_v55, %v5091_v57  ;;  %v622_v18 = vshll.u32 %v460_v42, 16 }
  0x5d   : > { %527 = vst.msk [vmem:[#allocation2 + $0xa8] sm:$0xf] %vm483_vm0, %v4691_v0  ;;  %v467_v22 = vpack.c.bf16 %v435_v5, %v435_v5  ;;  %v5119_v23 = vsel %vm4951_vm6, %v600_v60, %v607_v61  ;;  %v621_v24 = vrot.slane %v619_v62, 7  ;;  %v356_v28 = vmul.f32 %v4865_v8, %v4133_v13 }
  0x5e   : > { %528 = vst.msk [vmem:[#allocation2 + $0xac] sm:$0xf] %vm483_vm0, %v4691_v0  ;;  %v468_v26 = vpack.c.bf16 %v436_v10, %v436_v10  ;;  %v5129_v30 = vsel %vm4978_vm8, %v609_v2, %v893_v6  ;;  %v391_v32 = vadd.f32 %v4876_v15, %v355_v14  ;;  %v5135_v38 = vor.u32 %v614_v4, %v613_v7 }
  0x5f   : > { %529 = vst.msk [vmem:[#allocation2 + $0xb0] sm:$0x1] %vm486_vm1, %v4691_v0  ;;  %v679_v31 = vshrl.u32 %v467_v22, 16  ;;  %v617_v39 = vrot.slane %v613_v7, 4  ;;  %v4160_v45 = vunpack.c.l.bf16 %v4290_v37  ;;  %v626_v49 = vrot.slane %v621_v24, 4 }
  0x60   : > { %530 = vst.msk [vmem:[#allocation2 + $0xb4] sm:$0xf] %vm483_vm0, %v4691_v0  ;;  %v687_v40 = vshrl.u32 %v468_v26, 16  ;;  %v690_v41 = vshll.u32 %v468_v26, 16  ;;  %v423_v42 = vmax.f32 %v391_v32, 0.0  ;;  %v4161_v53 = vunpack.c.h.bf16 %v4290_v37 }
  0x61   : > { %531 = vst.msk [vmem:[#allocation2 + $0xb8] sm:$0xf] %vm483_vm0, %v4691_v0  ;;  %v681_v20 = vrot.slane %v679_v31, 7  ;;  %v5174_v3 = vsel %vm4978_vm8, %v626_v49, %v900_v50 }
  0x62   : > { %532 = vst.msk [vmem:[#allocation2 + $0xbc] sm:$0x1] %vm486_vm1, %v4691_v0  ;;  %v689_v52 = vrot.slane %v687_v40, 7  ;;  %v455_v61 = vpack.c.bf16 %v423_v42, %v423_v42  ;;  %v370_v63 = vmul.f32 %v4865_v8, %v4161_v53 }
  0x63   : > { %533 = vst.msk [vmem:[#allocation2 + $0xc0] sm:$0xf] %vm483_vm0, %v4691_v0  ;;  %v685_v58 = vrot.slane %v681_v20, 4 }
  0x64   : > { %534 = vst.msk [vmem:[#allocation2 + $0xc4] sm:$0xf] %vm483_vm0, %v4691_v0  ;;  %v692_v62 = vor.u32 %v690_v41, %v689_v52  ;;  %v694_v29 = vrot.slane %v689_v52, 4  ;;  %v580_v4 = vshll.u32 %v455_v61, 16 }
  0x65   : > { %535 = vst.msk [vmem:[#allocation2 + $0xc8] sm:$0x1] %vm486_vm1, %v4691_v0 }
  0x66   : > { %536 = vst.msk [vmem:[#allocation2 + $0xcc] sm:$0xf] %vm483_vm0, %v4691_v0  ;;  %v5178_v9 = vsel %vm4951_vm6, %v685_v58, %v692_v62  ;;  %v5195_v10 = vsel %vm4978_vm8, %v694_v29, %v928_v36 }
  0x67   : > { %537 = vst.msk [vmem:[#allocation2 + $0xd0] sm:$0xf] %vm483_vm0, %v4691_v0 }
  0x68   : > { %538 = vst.msk [vmem:[#allocation2 + $0xd4] sm:$0x1] %vm486_vm1, %v4691_v0  ;;  %v682_v0 = vshll.u32 %v467_v22, 16 }
  0x69   : > { %868 = vst [vmem:[#allocation2 + $0xc] sm:$0xf] %v867_v34  ;;  %v392_v34 = vadd.f32 %v4876_v15, %v356_v28 }
  0x6a   : > { %869 = vst.msk [vmem:[#allocation2 + $0x10] sm:$0xf] %vm483_vm0, %v4991_v33  ;;  %v624_v33 = vor.u32 %v622_v18, %v621_v24  ;;  %v5203_v18 = vadd.f32 %v4876_v15, %v370_v63 }
  0x6b   : > { %874 = vst [vmem:[#allocation2 + $0x14] sm:$0x1] %v5008_v43  ;;  %v5148_v43 = vor.u32 %v682_v0, %v681_v20  ;;  %v424_v60 = vmax.f32 %v392_v34, 0.0 }
  0x6c   : > { %912 = vst [vmem:[#allocation2 + $0x54] sm:$0xf] %v911_v47  ;;  %v369_v47 = vmul.f32 %v4865_v8, %v4160_v45  ;;  %v5170_v8 = vsel %vm4951_vm6, %v617_v39, %v624_v33 }
  0x6d   : > { %913 = vst.msk [vmem:[#allocation2 + $0x58] sm:$0xf] %vm483_vm0, %v5012_v44  ;;  %v897_v44 = vsel %vm4961_vm7, %v5135_v38, %v5138_v56  ;;  %v5164_v2 = vpack.c.bf16 %v424_v60, %v424_v60 }
  0x6e   : > { %916 = vst [vmem:[#allocation2 + $0x5c] sm:$0x1] %v5027_v51  ;;  %v577_v51 = vshrl.u32 %v455_v61, 16  ;;  %v5200_v14 = vadd.f32 %v4876_v15, %v369_v47 }
  0x6f   : > { %877 = vst [vmem:[#allocation2 + $0x18] sm:$0xf] %v876_v46  ;;  %v925_v46 = vsel %vm4961_vm7, %v5148_v43, %v5150_v59  ;;  %v585_v15 = vshrl.u32 %v5164_v2, 16  ;;  %v588_v59 = vshll.u32 %v5164_v2, 16 }
  0x70   : > { %878 = vst.msk [vmem:[#allocation2 + $0x1c] sm:$0xf] %vm483_vm0, %v5056_v21  ;;  %v5197_v13 = vrot.slane %v577_v51, 7 }
  0x71   : > { %v5184_v5 = vld [vmem:[#allocation2 + $0xc] sm:$0xff]   ;;  %881 = vst [vmem:[#allocation2 + $0x20] sm:$0x1] %v5080_v48 }
  0x72   : > { %v5186_v21 = vld [vmem:[#allocation2 + $0xc] sm:$0xf0]  ;;  %v1599_v22 = vld [vmem:[#allocation2 + $0x14] sm:$0x1]  ;;  %919 = vst [vmem:[#allocation2 + $0x60] sm:$0xf] %v918_v54  ;;  %v5213_v31 = vor.u32 %v580_v4, %v5197_v13 }
  0x73   : > { %6576 = vst [vmem:[#allocation13_spill] sm:$0xff] %v5186_v21  ;;  %v5188_v6 = vld [vmem:[#allocation2 + $0xc] sm:$0xff]   ;;  %v1013_v24 = vld [vmem:[#allocation2 + $0x14] sm:$0x1]  ;;  %v1727_v48 = vunpack.c.l.b16 %v1599_v22  ;;  %v4483_v28 = vld [vmem:[#allocation2 + $0x54] sm:$0xe] }
  0x74   : > { %v5190_v7 = vld [vmem:[#allocation2 + $0xc] sm:$0xf0]  ;;  %v1141_v26 = vunpack.c.l.b16 %v1013_v24  ;;  %920 = vst.msk [vmem:[#allocation2 + $0x64] sm:$0xf] %vm483_vm0, %v5100_v1  ;;  %v5216_v0 = vld [vmem:[#allocation2 + $0x54] sm:$0xff]   ;;  %v583_v25 = vrot.slane %v5197_v13, 4 }
  0x75   : > { %6577 = vst [vmem:[#allocation14_spill] sm:$0xff] %v5190_v7  ;;  %v4482_v32 = vld [vmem:[#allocation2 + $0x54] sm:$0xf0]  ;;  %v5220_v35 = vpack.c.b16 %v1727_v48, %v1727_v48  ;;  %v1019_v37 = vld [vmem:[#allocation2 + $0x5c] sm:$0x1]  ;;  %v1760_v1 = vshrl.u32 %v5184_v5, 16 }
  0x76   : > { %6578 = vst [vmem:[#allocation15_spill] sm:$0xff] %v5216_v0  ;;  %v5222_v54 = vpack.c.b16 %v1141_v26, %v1141_v26  ;;  %v1762_v39 = vshll.u32 %v5184_v5, 16  ;;  %v1186_v40 = vshrl.u32 %v5188_v6, 16  ;;  %v1147_v34 = vunpack.c.l.b16 %v1019_v37  ;;  %v5252_v37 = vld [vmem:[#allocation2 + $0x54] sm:$0xff]   ;;  %v1605_v38 = vld [vmem:[#allocation2 + $0x5c] sm:$0x1] }
  0x77   : > { %923 = vst [vmem:[#allocation2 + $0x68] sm:$0x1] %v5109_v12  ;;  %v1188_v12 = vshll.u32 %v5188_v6, 16  ;;  %v1767_v41 = vshll.u32 %v5220_v35, 16  ;;  %v4328_v42 = vld [vmem:[#allocation2 + $0x18] sm:$0xff]   ;;  %v5243_v24 = vrot.slane %v585_v15, 7 }
  0x78   : > { %6579 = vst [vmem:[#allocation16_spill] sm:$0xff] %v5220_v35  ;;  %v1193_v20 = vshll.u32 %v5222_v54, 16  ;;  %v1764_v55 = vrot.slane %v1762_v39, 1  ;;  %v1600_v45 = vld [vmem:[#allocation2 + $0x20] sm:$0x1]  ;;  %v1772_v33 = vshrl.u32 %v4328_v42, 16  ;;  %v5238_v52 = vpack.c.b16 %v1147_v34, %v1147_v34 }
  0x79   : > { %6580 = vst [vmem:[#allocation17_spill] sm:$0xff] %v5222_v54  ;;  %v1190_v57 = vrot.slane %v1188_v12, 1  ;;  %v1769_v49 = vrot.slane %v1767_v41, 1  ;;  %v1728_v53 = vunpack.c.l.b16 %v1600_v45  ;;  %v4346_v58 = vld [vmem:[#allocation2 + $0x60] sm:$0xe]  ;;  %v1774_v29 = vshll.u32 %v4328_v42, 16 }
  0x7a   : > { %891 = vst [vmem:[#allocation2 + $0x30] sm:$0xf] %v890_v16  ;;  %v4484_v16 = vor.u32 %v4483_v28, %v4482_v32  ;;  %v1195_v50 = vrot.slane %v1193_v20, 1  ;;  %v1765_v60 = vor.u32 %v1764_v55, %v1760_v1  ;;  %v5254_v1 = vld [vmem:[#allocation2 + $0x54] sm:$0xf0]  ;;  %v590_v2 = vor.u32 %v588_v59, %v5243_v24 }
  0x7b   : > { %892 = vst.msk [vmem:[#allocation2 + $0x34] sm:$0xf] %vm483_vm0, %v5119_v23  ;;  %v4317_v23 = vld [vmem:[#allocation2 + $0x60] sm:$0xe]  ;;  %v1191_v61 = vor.u32 %v1190_v57, %v1186_v40  ;;  %v4345_v36 = vld [vmem:[#allocation2 + $0x60] sm:$0xf0]  ;;  %v5241_v63 = vpack.c.b16 %v1728_v53, %v1728_v53  ;;  %v1733_v53 = vunpack.c.l.b16 %v1605_v38 }
  0x7c   : > { %895 = vst [vmem:[#allocation2 + $0x38] sm:$0x1] %v5129_v30  ;;  %v1467_v62 = vrot.slane %v4484_v16, 1  ;;  %v4316_v47 = vld [vmem:[#allocation2 + $0x60] sm:$0xf0]  ;;  %v1468_v30 = vrot.slane %v5238_v52, 1  ;;  %v4347_v4 = vor.u32 %v4346_v58, %v4345_v36  ;;  %v1770_v48 = vsel %vm1172_vm2, %v1765_v60, %v1769_v49 }
  0x7d   : > { %6581 = vst [vmem:[#allocation18_spill] sm:$0xff] %v5241_v63  ;;  %v1196_v26 = vsel %vm1172_vm2, %v1191_v61, %v1195_v50  ;;  %v1776_v28 = vrot.slane %v1774_v29, 1  ;;  %1951 = vrot.lane.b32.xlu0 %v1770_v48, %s4692_s23  ;;  %v1779_v39 = vshll.u32 %v5241_v63, 16  ;;  %v4318_v41 = vor.u32 %v4317_v23, %v4316_v47  ;;  %v882_v58 = vld [vmem:[#allocation2 + $0x24] sm:$0xf]  ;;  %v4087_v63 = vld [vmem:[#allocation3 + $0x10] sm:$0xff] }
  0x7e   : > { %v1606_v51 = vld [vmem:[#allocation2 + $0x68] sm:$0x1]  ;;  %898 = vst [vmem:[#allocation2 + $0x3c] sm:$0xf] %v897_v44  ;;  %1367 = vrot.lane.b32.xlu1 %v1196_v26, %s4692_s23  ;;  %v1469_v15 = vsel %vm1445_vm9, %v1467_v62, %v1468_v30  ;;  %v2052_v20 = vrot.slane %v4347_v4, 1  ;;  %v5290_v60 = vpack.c.b16 %v1733_v53, %v1733_v53  ;;  %v592_v61 = vrot.slane %v5243_v24, 4 }
  0x7f   : > { %v1020_v22 = vld [vmem:[#allocation2 + $0x68] sm:$0x1]  ;;  %v1734_v32 = vunpack.c.l.b16 %v1606_v51  ;;  %6582 = vst [vmem:[#allocation19_spill] sm:$0xff] %v5252_v37  ;;  %4005 = vmatmul.msk.bf16.vlgmr.msra.gmra.mxu3 %vm1494_vm10, %v1469_v15  ;;  %v5263_v56 = vor.u32 %v1776_v28, %v1772_v33  ;;  %v1781_v55 = vrot.slane %v1779_v39, 1  ;;  %v1470_v50 = vrot.slane %v4318_v41, 1 }
  0x80   : > { %6583 = vst [vmem:[#allocation20_spill] sm:$0xff] %v5254_v1  ;;  %v1148_v12 = vunpack.c.l.b16 %v1020_v22  ;;  %v886_v62 = vld [vmem:[#allocation2 + $0x2c] sm:$0x1]  ;;  %v1832_v36 = vshrl.u32 %v5252_v37, 16  ;;  %v1834_v47 = vshll.u32 %v5252_v37, 16  ;;  %v883_v30 = vsel %vm4961_vm7, %v5213_v31, %v882_v58 }
  0x81   : > { %899 = vst.msk [vmem:[#allocation2 + $0x40] sm:$0xf] %vm483_vm0, %v5170_v8  ;;  %v5265_v44 = vpack.c.b16 %v1734_v32, %v1734_v32  ;;  %v1839_v22 = vshll.u32 %v5290_v60, 16  ;;  %v591_v32 = vsel %vm4951_vm6, %v583_v25, %v590_v2  ;;  %v887_v24 = vsel %vm4978_vm8, %v592_v61, %v886_v62 }
  0x82   : > { %v4329_v40 = vld [vmem:[#allocation2 + $0x30] sm:$0xff]   ;;  %902 = vst [vmem:[#allocation2 + $0x44] sm:$0x1] %v5174_v3  ;;  %v5268_v45 = vpack.c.b16 %v1148_v12, %v1148_v12  ;;  %v1782_v3 = vsel %vm1172_vm2, %v5263_v56, %v1781_v55  ;;  %v1836_v28 = vrot.slane %v1834_v47, 1 }
  0x83   : > { %v1602_v34 = vld [vmem:[#allocation2 + $0x38] sm:$0x1]  ;;  %v1798_v42 = vshll.u32 %v4329_v40, 16  ;;  %v1796_v16 = vshrl.u32 %v4329_v40, 16  ;;  %926 = vst [vmem:[#allocation2 + $0x6c] sm:$0xf] %v925_v46 }
  0x84   : > { %v1730_v57 = vunpack.c.l.b16 %v1602_v34  ;;  %v2053_v8 = vrot.slane %v5265_v44, 1  ;;  %927 = vst.msk [vmem:[#allocation2 + $0x70] sm:$0xf] %vm483_vm0, %v5178_v9  ;;  %v1471_v43 = vrot.slane %v5268_v45, 1  ;;  %v1841_v40 = vrot.slane %v1839_v22, 1 }
  0x85   : > { %v1800_v33 = vrot.slane %v1798_v42, 1  ;;  %930 = vst [vmem:[#allocation2 + $0x74] sm:$0x1] %v5195_v10  ;;  %v437_v22 = vmax.f32 %v5200_v14, 0.0  ;;  %v438_v14 = vmax.f32 %v5203_v18, 0.0 }
  0x86   : > { %v5280_v49 = vpack.c.b16 %v1730_v57, %v1730_v57  ;;  %v2054_v23 = vsel %vm1445_vm9, %v2052_v20, %v2053_v8  ;;  %6585 = vst [vmem:[#allocation22_spill] sm:$0xff] %v5290_v60  ;;  %1953 = vrot.lane.b32.xlu1 %v1782_v3, %s4692_s23  ;;  %v1472_v31 = vsel %vm1445_vm9, %v1470_v50, %v1471_v43 }
  0x87   : > { %3941 = vmatmul.msk.bf16.vlgmr.msra.gmra.mxu1 %vm1494_vm10, %v2054_v23  ;;  %v5287_v46 = vor.u32 %v1800_v33, %v1796_v16  ;;  %884 = vst [vmem:[#allocation2 + $0x24] sm:$0xf] %v883_v30  ;;  %v1014_v16 = vld [vmem:[#allocation2 + $0x20] sm:$0x1]  ;;  %v1837_v3 = vor.u32 %v1836_v28, %v1832_v36 }
  0x88   : > { %6584 = vst [vmem:[#allocation21_spill] sm:$0xff] %v5280_v49  ;;  %v1803_v9 = vshll.u32 %v5280_v49, 16  ;;  %v5293_v10 = vld [vmem:[#allocation2 + $0x3c] sm:$0xff]  }
  0x89   : > { %6586 = vst [vmem:[#allocation23_spill] sm:$0xff] %v5293_v10  ;;  %v5295_v29 = vld [vmem:[#allocation2 + $0x3c] sm:$0xf0]  ;;  %v1017_v4 = vld [vmem:[#allocation2 + $0x44] sm:$0x1]  ;;  %v1234_v34 = vshrl.u32 %v5293_v10, 16  ;;  %v5341_v28 = vsel %vm1172_vm2, %v1837_v3, %v1841_v40 }
  0x8a   : > { %6587 = vst [vmem:[#allocation24_spill] sm:$0xff] %v5295_v29  ;;  %v1805_v51 = vrot.slane %v1803_v9, 1  ;;  %v1145_v48 = vunpack.c.l.b16 %v1017_v4  ;;  %v4486_v26 = vld [vmem:[#allocation2 + $0x6c] sm:$0xe]  ;;  %v1236_v42 = vshll.u32 %v5293_v10, 16  ;;  %v1142_v9 = vunpack.c.l.b16 %v1014_v16 }
  0x8b   : > { %v5312_v15 = vld [vmem:[#allocation2 + $0x6c] sm:$0xff]   ;;  %885 = vst.msk [vmem:[#allocation2 + $0x28] sm:$0xf] %vm483_vm0, %v591_v32  ;;  %v2781_v23 = vld [vmem:[#allocation2 + $0x20] sm:$0x1] }
  0x8c   : > { %v4485_v39 = vld [vmem:[#allocation2 + $0x6c] sm:$0xf0]  ;;  %v1806_v13 = vsel %vm1172_vm2, %v5287_v46, %v1805_v51  ;;  %v5319_v38 = vpack.c.b16 %v1145_v48, %v1145_v48  ;;  %v1607_v25 = vld [vmem:[#allocation2 + $0x74] sm:$0x1]  ;;  %888 = vst [vmem:[#allocation2 + $0x2c] sm:$0x1] %v887_v24  ;;  %v5335_v51 = vpack.c.b16 %v1142_v9, %v1142_v9  ;;  %v2909_v4 = vunpack.c.l.b16 %v2781_v23 }
  0x8d   : > { %v5314_v12 = vld [vmem:[#allocation2 + $0x6c] sm:$0xff]   ;;  %v1021_v20 = vld [vmem:[#allocation2 + $0x74] sm:$0x1]  ;;  %v1735_v55 = vunpack.c.l.b16 %v1607_v25  ;;  %v4487_v33 = vor.u32 %v4486_v26, %v4485_v39  ;;  %v1238_v50 = vrot.slane %v1236_v42, 1 }
  0x8e   : > { %v4488_v41 = vld [vmem:[#allocation2 + $0x6c] sm:$0xf0]  ;;  %6588 = vst [vmem:[#allocation25_spill] sm:$0xff] %v5319_v38  ;;  %v4489_v57 = vld [vmem:[#allocation2 + $0x6c] sm:$0xe]  ;;  %v1241_v8 = vshll.u32 %v5319_v38, 16  ;;  %v1149_v58 = vunpack.c.l.b16 %v1021_v20  ;;  %1957 = vrot.lane.b32.xlu1 %v1806_v13, %s4692_s23  ;;  %v5349_v20 = vpack.c.b16 %v2909_v4, %v2909_v4 }
  0x8f   : > { %v5324_v53 = vpack.c.b16 %v1735_v55, %v1735_v55  ;;  %v2055_v59 = vrot.slane %v4487_v33, 1  ;;  %v1239_v61 = vor.u32 %v1238_v50, %v1234_v34  ;;  %4006 = vmatmul.msk.bf16.gmra.mxu3 %vm1494_vm10, %v1472_v31  ;;  %v4490_v2 = vor.u32 %v4489_v57, %v4488_v41  ;;  %6590 = vst [vmem:[#allocation27_spill] sm:$0xff] %v5335_v51  ;;  %v5675_v19 = vld [vmem:[#allocation2 + $0x6c] sm:$0xf0] }
  0x90   : > { %v1243_v43 = vrot.slane %v1241_v8, 1  ;;  %v5328_v47 = vpack.c.b16 %v1149_v58, %v1149_v58  ;;  %v1205_v13 = vshll.u32 %v5335_v51, 16  ;;  %v469_v34 = vpack.c.bf16 %v437_v22, %v437_v22  ;;  %v931_v22 = vld [vmem:[#allocation2 + $0x78] sm:$0xf] }
  0x91   : > { %v2056_v62 = vrot.slane %v5324_v53, 1  ;;  %v1473_v25 = vrot.slane %v4490_v2, 1  ;;  %v2949_v55 = vshll.u32 %v5349_v20, 16  ;;  %v470_v57 = vpack.c.bf16 %v438_v14, %v438_v14 }
  0x92   : > { %v5331_v30 = vld [vmem:[#allocation2 + $0x24] sm:$0xff]   ;;  %v1244_v48 = vsel %vm1172_vm2, %v1239_v61, %v1243_v43  ;;  %v1474_v39 = vrot.slane %v5328_v47, 1  ;;  %v1207_v40 = vrot.slane %v1205_v13, 1  ;;  %v696_v16 = vshrl.u32 %v469_v34, 16 }
  0x93   : > { %v5333_v36 = vld [vmem:[#allocation2 + $0x24] sm:$0xf0]  ;;  %v2057_v26 = vsel %vm1445_vm9, %v2055_v59, %v2056_v62  ;;  %v1015_v32 = vld [vmem:[#allocation2 + $0x2c] sm:$0x1]  ;;  %v699_v8 = vshll.u32 %v469_v34, 16  ;;  %v1210_v3 = vshrl.u32 %v5331_v30, 16 }
  0x94   : > { %6589 = vst [vmem:[#allocation26_spill] sm:$0xff] %v5333_v36  ;;  %v5343_v24 = vld [vmem:[#allocation2 + $0x24] sm:$0xff]   ;;  %v1143_v41 = vunpack.c.l.b16 %v1015_v32  ;;  %v1601_v33 = vld [vmem:[#allocation2 + $0x2c] sm:$0x1]  ;;  %v1212_v50 = vshll.u32 %v5331_v30, 16  ;;  %v1208_v18 = vsel %vm1172_vm2, %v5263_v56, %v1207_v40  ;;  %v1475_v23 = vsel %vm1445_vm9, %v1473_v25, %v1474_v39 }
  0x95   : > { %v5345_v31 = vld [vmem:[#allocation2 + $0x24] sm:$0xf0]  ;;  %1369 = vrot.lane.b32.xlu2 %v1208_v18, %s4692_s23  ;;  %v698_v43 = vrot.slane %v696_v16, 7  ;;  %v704_v59 = vshrl.u32 %v470_v57, 16  ;;  %v707_v9 = vshll.u32 %v470_v57, 16  ;;  %v2951_v32 = vrot.slane %v2949_v55, 1 }
  0x96   : > { %6591 = vst [vmem:[#allocation28_spill] sm:$0xff] %v5345_v31  ;;  %v5352_v42 = vpack.c.b16 %v1143_v41, %v1143_v41  ;;  %1375 = vrot.lane.b32.xlu1 %v1244_v48, %s4692_s23  ;;  %v5364_v61 = vld [vmem:[#allocation2 + $0x24] sm:$0xff]   ;;  %v1214_v2 = vrot.slane %v1212_v50, 1  ;;  %v935_v39 = vld [vmem:[#allocation2 + $0x80] sm:$0x1]  ;;  %v4291_v18 = vld [vmem:[%s4853_s8 + $0x50] sm:$0xff]  }
  0x97   : > { %3942 = vmatmul.msk.bf16.gmra.mxu1 %vm1494_vm10, %v2057_v26  ;;  %v5366_v62 = vld [vmem:[#allocation2 + $0x24] sm:$0xf0]  ;;  %v1729_v26 = vunpack.c.l.b16 %v1601_v33  ;;  %v701_v41 = vor.u32 %v699_v8, %v698_v43  ;;  %v702_v13 = vrot.slane %v698_v43, 4  ;;  %v706_v48 = vrot.slane %v704_v59, 7  ;;  %v2782_v34 = vld [vmem:[#allocation2 + $0x2c] sm:$0x1] }
  0x98   : > { %6592 = vst [vmem:[#allocation29_spill] sm:$0xff] %v5352_v42  ;;  %v1217_v58 = vshll.u32 %v5352_v42, 16  ;;  %v1215_v14 = vor.u32 %v1214_v2, %v1210_v3  ;;  %v1784_v33 = vshrl.u32 %v5343_v24, 16  ;;  %v1786_v55 = vshll.u32 %v5343_v24, 16  ;;  %v5377_v3 = vld [vmem:[#allocation2 + $0x3c] sm:$0xff]  }
  0x99   : > { %v5368_v25 = vpack.c.b16 %v1729_v26, %v1729_v26  ;;  %v709_v40 = vor.u32 %v707_v9, %v706_v48  ;;  %v711_v57 = vrot.slane %v706_v48, 4  ;;  %v932_v16 = vsel %vm4961_vm7, %v701_v41, %v931_v22  ;;  %6594 = vst [vmem:[#allocation31_spill] sm:$0xff] %v5377_v3  ;;  %v1603_v41 = vld [vmem:[#allocation2 + $0x44] sm:$0x1] }
  0x9a   : > { %v1219_v4 = vrot.slane %v1217_v58, 1  ;;  %933 = vst [vmem:[#allocation2 + $0x78] sm:$0xf] %v932_v16  ;;  %v5379_v58 = vld [vmem:[#allocation2 + $0x3c] sm:$0xf0]  ;;  %v2910_v9 = vunpack.c.l.b16 %v2782_v34  ;;  %v1788_v2 = vrot.slane %v1786_v55, 1  ;;  %v4164_v22 = vunpack.c.l.bf16 %v4291_v18 }
  0x9b   : > { %6593 = vst [vmem:[#allocation30_spill] sm:$0xff] %v5368_v25  ;;  %v1791_v8 = vshll.u32 %v5368_v25, 16  ;;  %v710_v43 = vsel %vm4951_vm6, %v702_v13, %v709_v40  ;;  %v936_v59 = vsel %vm4978_vm8, %v711_v57, %v935_v39  ;;  %v4165_v26 = vunpack.c.h.bf16 %v4291_v18  ;;  %v5397_v34 = vld [vmem:[%s6537_s2] ss:$0 sm:$0xff]  ;;  %v2783_v16 = vld [vmem:[#allocation2 + $0x38] sm:$0x1] }
  0x9c   : > { %v1220_v50 = vsel %vm1172_vm2, %v1215_v14, %v1219_v4  ;;  %6595 = vst [vmem:[#allocation32_spill] sm:$0xff] %v5379_v58  ;;  %v5389_v48 = vpack.c.b16 %v2910_v9, %v2910_v9  ;;  %v2954_v14 = vshrl.u32 %v5364_v61, 16  ;;  %v2956_v13 = vshll.u32 %v5364_v61, 16  ;;  %v4091_v9 = vld [vmem:[#allocation3 + $0x30] sm:$0xff] }
  0x9d   : > { %1371 = vrot.lane.b32.xlu0 %v1220_v50, %s4692_s23  ;;  %934 = vst.msk [vmem:[#allocation2 + $0x7c] sm:$0xf] %vm483_vm0, %v710_v43  ;;  %v1793_v4 = vrot.slane %v1791_v8, 1  ;;  %v1789_v39 = vor.u32 %v1788_v2, %v1784_v33  ;;  %v371_v40 = vmul.f32 %v5397_v34, %v4164_v22  ;;  %v372_v57 = vmul.f32 %v5397_v34, %v4165_v26 }
  0x9e   : > { %1963 = vrot.lane.b32.xlu1 %v5341_v28, %s4692_s23  ;;  %937 = vst [vmem:[#allocation2 + $0x80] sm:$0x1] %v936_v59  ;;  %v4092_v28 = vld [vmem:[#allocation3 + $0x38] sm:$0xff]  ;;  %v2958_v18 = vrot.slane %v2956_v13, 1  ;;  %v2961_v50 = vshll.u32 %v5389_v48, 16  ;;  %v1731_v55 = vunpack.c.l.b16 %v1603_v41  ;;  %v2911_v8 = vunpack.c.l.b16 %v2783_v16 }
  0x9f   : > { %4007 = vmatmul.msk.bf16.gmra.mxu3 %vm1494_vm10, %v1475_v23  ;;  %v1794_v43 = vsel %vm1172_vm2, %v1789_v39, %v1793_v4  ;;  %v5406_v23 = vld [vmem:[%s6538_s3] ss:$0 sm:$0xff]  ;;  %2570 = vmatpush.bf16.msra.mxu2 %v4092_v28  ;;  %v2952_v2 = vsel %vm1172_vm2, %v5263_v56, %v2951_v32  ;;  %v4292_v28 = vld [vmem:[%s4853_s8 + $0x58] sm:$0xff]  }
  0xa0   : > { %v407_v33 = vadd.f32 %v5406_v23, %v371_v40  ;;  %v408_v59 = vadd.f32 %v5406_v23, %v372_v57  ;;  %1955 = vrot.lane.b32.xlu2 %v1794_v43, %s4692_s23  ;;  %v2963_v4 = vrot.slane %v2961_v50, 1  ;;  %v5413_v41 = vpack.c.b16 %v1731_v55, %v1731_v55 }
  0xa1   : > { %v4349_v22 = vld [vmem:[#allocation2 + $0x78] sm:$0xe]  ;;  %v5415_v13 = vpack.c.b16 %v2911_v8, %v2911_v8  ;;  %v1808_v40 = vshrl.u32 %v5377_v3, 16  ;;  %v1810_v57 = vshll.u32 %v5377_v3, 16  ;;  %v2959_v38 = vor.u32 %v2958_v18, %v2954_v14 }
  0xa2   : > { %v4320_v26 = vld [vmem:[#allocation2 + $0x78] sm:$0xe]  ;;  %6596 = vst [vmem:[#allocation33_spill] sm:$0xff] %v5413_v41  ;;  %v439_v39 = vmax.f32 %v407_v33, 0.0  ;;  %v440_v16 = vmax.f32 %v408_v59, 0.0  ;;  %v1815_v56 = vshll.u32 %v5413_v41, 16  ;;  %v4168_v43 = vunpack.c.l.bf16 %v4292_v28 }
  0xa3   : > { %v2973_v32 = vshll.u32 %v5415_v13, 16  ;;  %2571 = vmatpush.bf16.msra.mxu2 %v4091_v9  ;;  %v1812_v42 = vrot.slane %v1810_v57, 1 }
  0xa4   : > { %v4348_v60 = vld [vmem:[#allocation2 + $0x78] sm:$0xf0]  ;;  %v471_v58 = vpack.c.bf16 %v439_v39, %v439_v39  ;;  %v472_v33 = vpack.c.bf16 %v440_v16, %v440_v16  ;;  %v1817_v36 = vrot.slane %v1815_v56, 1  ;;  %v4169_v39 = vunpack.c.h.bf16 %v4292_v28  ;;  %v1016_v56 = vld [vmem:[#allocation2 + $0x38] sm:$0x1] }
  0xa5   : > { %v4319_v1 = vld [vmem:[#allocation2 + $0x78] sm:$0xf0]  ;;  %v1608_v50 = vld [vmem:[#allocation2 + $0x80] sm:$0x1]  ;;  %v4350_v55 = vor.u32 %v4349_v22, %v4348_v60 }
  0xa6   : > { %v1022_v29 = vld [vmem:[#allocation2 + $0x80] sm:$0x1]  ;;  %v4321_v8 = vor.u32 %v4320_v26, %v4319_v1  ;;  %3133 = vrot.lane.b32.xlu1 %v2952_v2, %s4692_s23  ;;  %v1736_v59 = vunpack.c.l.b16 %v1608_v50  ;;  %v713_v18 = vshrl.u32 %v471_v58, 16  ;;  %v716_v41 = vshll.u32 %v471_v58, 16  ;;  %v938_v26 = vld [vmem:[#allocation2 + $0x84] sm:$0xf] }
  0xa7   : > { %v1150_v49 = vunpack.c.l.b16 %v1022_v29  ;;  %v2058_v25 = vrot.slane %v4350_v55, 1  ;;  %v721_v60 = vshrl.u32 %v472_v33, 16  ;;  %v724_v22 = vshll.u32 %v472_v33, 16  ;;  %v942_v55 = vld [vmem:[#allocation2 + $0x8c] sm:$0x1] }
  0xa8   : > { %v1476_v14 = vrot.slane %v4321_v8, 1  ;;  %v5423_v31 = vpack.c.b16 %v1736_v59, %v1736_v59  ;;  %v2964_v1 = vsel %vm1172_vm2, %v2959_v38, %v2963_v4  ;;  %v715_v9 = vrot.slane %v713_v18, 7  ;;  %v4286_v38 = vld [vmem:[%s4853_s8 + $0x28] sm:$0xff]   ;;  %v4090_v18 = vld [vmem:[#allocation3 + $0x28] sm:$0xff] }
  0xa9   : > { %v5425_v51 = vpack.c.b16 %v1150_v49, %v1150_v49  ;;  %v1813_v2 = vor.u32 %v1812_v42, %v1808_v40  ;;  %v723_v57 = vrot.slane %v721_v60, 7  ;;  %v373_v58 = vmul.f32 %v5397_v34, %v4168_v43  ;;  %2572 = vmatpush.bf16.msra.mxu2 %v4090_v18 }
  0xaa   : > { %v2059_v29 = vrot.slane %v5423_v31, 1  ;;  %v718_v50 = vor.u32 %v716_v41, %v715_v9  ;;  %v719_v49 = vrot.slane %v715_v9, 4  ;;  %v2975_v33 = vrot.slane %v2973_v32, 1  ;;  %v5442_v32 = vld [vmem:[%s4853_s8 + $0x60] sm:$0xff]  }
  0xab   : > { %v1477_v16 = vrot.slane %v5425_v51, 1  ;;  %v1818_v8 = vsel %vm1172_vm2, %v1813_v2, %v1817_v36  ;;  %v726_v40 = vor.u32 %v724_v22, %v723_v57  ;;  %v728_v28 = vrot.slane %v723_v57, 4 }
  0xac   : > { %v2060_v4 = vsel %vm1445_vm9, %v2058_v25, %v2059_v29  ;;  %1959 = vrot.lane.b32.xlu0 %v1818_v8, %s4692_s23  ;;  %v939_v41 = vsel %vm4961_vm7, %v718_v50, %v938_v26  ;;  %v374_v43 = vmul.f32 %v5397_v34, %v4169_v39  ;;  %v409_v59 = vadd.f32 %v5406_v23, %v373_v58  ;;  %v4120_v39 = vld [vmem:[#allocation3 + $0x118] sm:$0xff]  ;;  %v5460_v50 = vld [vmem:[#allocation2 + $0x3c] sm:$0xf0] }
  0xad   : > { %v1478_v42 = vsel %vm1445_vm9, %v1476_v14, %v1477_v16  ;;  %3943 = vmatmul.msk.bf16.gmra.mxu1 %vm1494_vm10, %v2060_v4  ;;  %v1144_v36 = vunpack.c.l.b16 %v1016_v56  ;;  %v727_v25 = vsel %vm4951_vm6, %v719_v49, %v726_v40  ;;  %940 = vst [vmem:[#allocation2 + $0x84] sm:$0xf] %v939_v41  ;;  %v943_v14 = vsel %vm4978_vm8, %v728_v28, %v942_v55  ;;  %v4104_v29 = vld [vmem:[#allocation3 + $0x98] sm:$0xff]  ;;  %v4089_v16 = vld [vmem:[#allocation3 + $0x20] sm:$0xff]  ;;  %v2784_v4 = vld [vmem:[#allocation2 + $0x44] sm:$0x1] }
  0xae   : > { %3135 = vrot.lane.b32.xlu1 %v2964_v1, %s4692_s23  ;;  %v4144_v60 = vunpack.c.l.bf16 %v4286_v38  ;;  %v4145_v22 = vunpack.c.h.bf16 %v4286_v38  ;;  %941 = vst.msk [vmem:[#allocation2 + $0x88] sm:$0xf] %vm483_vm0, %v727_v25  ;;  %v2976_v9 = vsel %vm1172_vm2, %v5287_v46, %v2975_v33  ;;  %v410_v26 = vadd.f32 %v5406_v23, %v374_v43  ;;  %v5458_v56 = vld [vmem:[#allocation2 + $0x3c] sm:$0xff]   ;;  %3547 = vmatpush.bf16.msrb.mxu3 %v4120_v39  ;;  %v4088_v25 = vld [vmem:[#allocation3 + $0x18] sm:$0xff]  ;;  %v4103_v55 = vld [vmem:[#allocation3 + $0x90] sm:$0xff] }
  0xaf   : > { %4008 = vmatmul.msk.bf16.gmra.mxu3 %vm1494_vm10, %v1478_v42  ;;  %v441_v1 = vmax.f32 %v409_v59, 0.0  ;;  %v5454_v2 = vpack.c.b16 %v1144_v36, %v1144_v36  ;;  %944 = vst [vmem:[#allocation2 + $0x8c] sm:$0x1] %v943_v14  ;;  %v4172_v49 = vunpack.c.l.bf16 %v5442_v32  ;;  %2272 = vmatpush.bf16.msra.mxu0 %v4104_v29  ;;  %v2912_v28 = vunpack.c.l.b16 %v2784_v4  ;;  %v945_v29 = vld [vmem:[#allocation2 + $0x90] sm:$0xf] }
  0xb0   : > { %v361_v57 = vmul.f32 %v5397_v34, %v4144_v60  ;;  %v362_v58 = vmul.f32 %v5397_v34, %v4145_v22  ;;  %6598 = vst [vmem:[#allocation35_spill] sm:$0xff] %v5458_v56  ;;  %v442_v8 = vmax.f32 %v410_v26, 0.0  ;;  %2573 = vmatpush.bf16.msra.mxu2 %v4089_v16 }
  0xb1   : > { %6597 = vst [vmem:[#allocation34_spill] sm:$0xff] %v5454_v2  ;;  %v473_v33 = vpack.c.bf16 %v441_v1, %v441_v1  ;;  %v1229_v38 = vshll.u32 %v5454_v2, 16  ;;  %v5467_v60 = vpack.c.b16 %v2912_v28, %v2912_v28 }
  0xb2   : > { %6599 = vst [vmem:[#allocation36_spill] sm:$0xff] %v5460_v50  ;;  %v397_v42 = vadd.f32 %v5406_v23, %v361_v57  ;;  %v398_v40 = vadd.f32 %v5406_v23, %v362_v58  ;;  %v474_v41 = vpack.c.bf16 %v442_v8, %v442_v8  ;;  %v375_v58 = vmul.f32 %v5397_v34, %v4172_v49 }
  0xb3   : > { %v730_v43 = vshrl.u32 %v473_v33, 16  ;;  %v733_v59 = vshll.u32 %v473_v33, 16  ;;  %v1231_v36 = vrot.slane %v1229_v38, 1  ;;  %6600 = vst [vmem:[#allocation37_spill] sm:$0xff] %v5467_v60  ;;  %2273 = vmatpush.bf16.msra.mxu0 %v4103_v55 }
  0xb4   : > { %v429_v14 = vmax.f32 %v397_v42, 0.0  ;;  %v430_v18 = vmax.f32 %v398_v40, 0.0  ;;  %v4492_v22 = vld [vmem:[#allocation2 + $0x84] sm:$0xe]  ;;  %v738_v39 = vshrl.u32 %v474_v41, 16  ;;  %v741_v4 = vshll.u32 %v474_v41, 16  ;;  %2574 = vmatpush.bf16.msra.mxu2 %v4088_v25 }
  0xb5   : > { %v4495_v26 = vld [vmem:[#allocation2 + $0x84] sm:$0xe]  ;;  %v732_v1 = vrot.slane %v730_v43, 7  ;;  %v1232_v57 = vsel %vm1172_vm2, %v5287_v46, %v1231_v36  ;;  %v4491_v33 = vld [vmem:[#allocation2 + $0x84] sm:$0xf0]  ;;  %v4116_v40 = vld [vmem:[#allocation3 + $0xf8] sm:$0xff] }
  0xb6   : > { %v5472_v8 = vld [vmem:[#allocation2 + $0x84] sm:$0xff]   ;;  %3137 = vrot.lane.b32.xlu1 %v2976_v9, %s4692_s23  ;;  %1373 = vrot.lane.b32.xlu2 %v1232_v57, %s4692_s23  ;;  %v461_v42 = vpack.c.bf16 %v429_v14, %v429_v14  ;;  %v1609_v28 = vld [vmem:[#allocation2 + $0x8c] sm:$0x1]  ;;  %v4493_v54 = vor.u32 %v4492_v22, %v4491_v33  ;;  %v740_v41 = vrot.slane %v738_v39, 7  ;;  %v949_v57 = vld [vmem:[#allocation2 + $0x98] sm:$0x1] }
  0xb7   : > { %v5474_v38 = vld [vmem:[#allocation2 + $0x84] sm:$0xff]   ;;  %v1023_v43 = vld [vmem:[#allocation2 + $0x8c] sm:$0x1]  ;;  %v1737_v2 = vunpack.c.l.b16 %v1609_v28  ;;  %v735_v36 = vor.u32 %v733_v59, %v732_v1  ;;  %v736_v49 = vrot.slane %v732_v1, 4  ;;  %3454 = vmatpush.bf16.msrb.mxu1 %v4116_v40  ;;  %v462_v59 = vpack.c.bf16 %v430_v18, %v430_v18 }
  0xb8   : > { %v4494_v16 = vld [vmem:[#allocation2 + $0x84] sm:$0xf0]  ;;  %v1151_v46 = vunpack.c.l.b16 %v1023_v43  ;;  %v2061_v21 = vrot.slane %v4493_v54, 1  ;;  %v628_v1 = vshrl.u32 %v461_v42, 16  ;;  %v745_v55 = vrot.slane %v740_v41, 4  ;;  %2575 = vmatpush.bf16.msra.mxu2 %v4087_v63 }
  0xb9   : > { %v4496_v7 = vor.u32 %v4495_v26, %v4494_v16  ;;  %v5478_v35 = vpack.c.b16 %v1737_v2, %v1737_v2  ;;  %v946_v14 = vsel %vm4961_vm7, %v735_v36, %v945_v29  ;;  %v743_v26 = vor.u32 %v741_v4, %v740_v41  ;;  %v903_v40 = vld [vmem:[#allocation2 + $0x48] sm:$0xf]  ;;  %v907_v43 = vld [vmem:[#allocation2 + $0x50] sm:$0x1] }
  0xba   : > { %v5480_v9 = vpack.c.b16 %v1151_v46, %v1151_v46  ;;  %947 = vst [vmem:[#allocation2 + $0x90] sm:$0xf] %v946_v14  ;;  %v630_v2 = vrot.slane %v628_v1, 7  ;;  %v631_v33 = vshll.u32 %v461_v42, 16  ;;  %v636_v39 = vshrl.u32 %v462_v59, 16  ;;  %v4294_v46 = vld [vmem:[%s4853_s8 + $0x68] sm:$0xff]  }
  0xbb   : > { %v1479_v28 = vrot.slane %v4496_v7, 1  ;;  %v2062_v25 = vrot.slane %v5478_v35, 1  ;;  %v639_v16 = vshll.u32 %v462_v59, 16  ;;  %v744_v7 = vsel %vm4951_vm6, %v736_v49, %v743_v26  ;;  %v4086_v59 = vld [vmem:[#allocation3 + $0x8] sm:$0xff] }
  0xbc   : > { %v1480_v22 = vrot.slane %v5480_v9, 1  ;;  %v950_v18 = vsel %vm4978_vm8, %v745_v55, %v949_v57  ;;  %948 = vst.msk [vmem:[#allocation2 + $0x94] sm:$0xf] %vm483_vm0, %v744_v7  ;;  %v633_v63 = vor.u32 %v631_v33, %v630_v2  ;;  %v634_v4 = vrot.slane %v630_v2, 4  ;;  %2576 = vmatpush.bf16.msra.mxu2 %v4086_v59  ;;  %v4101_v2 = vld [vmem:[#allocation3 + $0x80] sm:$0xff] }
  0xbd   : > { %v2063_v29 = vsel %vm1445_vm9, %v2061_v21, %v2062_v25  ;;  %v638_v42 = vrot.slane %v636_v39, 7  ;;  %v2978_v21 = vshrl.u32 %v5458_v56, 16  ;;  %951 = vst [vmem:[#allocation2 + $0x98] sm:$0x1] %v950_v18  ;;  %v2980_v36 = vshll.u32 %v5458_v56, 16  ;;  %v4085_v33 = vld [vmem:[#allocation3] sm:$0xff] }
  0xbe   : > { %v1481_v54 = vsel %vm1445_vm9, %v1479_v28, %v1480_v22  ;;  %3944 = vmatmul.msk.bf16.gmra.mxu1 %vm1494_vm10, %v2063_v29  ;;  %v2985_v49 = vshll.u32 %v5467_v60, 16  ;;  %v6601_v41 = vunpack.c.h.bf16 %v5442_v32  ;;  %v411_v57 = vadd.f32 %v5406_v23, %v375_v58  ;;  %v4102_v28 = vld [vmem:[#allocation3 + $0x88] sm:$0xff]  ;;  %v1366_v32 = vpop.permute.xlu0 %1365  ;;  %v4115_v18 = vld [vmem:[#allocation3 + $0xf0] sm:$0xff]  ;;  %v4476_v60 = vld [vmem:[#allocation3 + $0xa0] sm:$0xff] }
  0xbf   : > { %4009 = vmatmul.msk.bf16.gmra.mxu3 %vm1494_vm10, %v1481_v54  ;;  %v641_v1 = vor.u32 %v639_v16, %v638_v42  ;;  %v643_v25 = vrot.slane %v638_v42, 4  ;;  %v904_v22 = vsel %vm4961_vm7, %v633_v63, %v903_v40  ;;  %v4176_v26 = vunpack.c.l.bf16 %v4294_v46  ;;  %2274 = vmatpush.bf16.msra.mxu0 %v4102_v28  ;;  %v4468_v28 = vld [vmem:[#allocation2] sm:$0xff]  }
  0xc0   : > { %v376_v14 = vmul.f32 %v5397_v34, %v6601_v41  ;;  %905 = vst [vmem:[#allocation2 + $0x48] sm:$0xf] %v904_v22  ;;  %v4177_v39 = vunpack.c.h.bf16 %v4294_v46  ;;  %v2982_v54 = vrot.slane %v2980_v36, 1  ;;  %v2987_v7 = vrot.slane %v2985_v49, 1  ;;  %3455 = vmatpush.bf16.msrb.mxu1 %v4115_v18  ;;  %2577 = vmatpush.bf16.msra.mxu2 %v4085_v33  ;;  %v5521_v33 = vld [vmem:[%s4853_s8 + $0x70] sm:$0xff]  }
  0xc1   : > { %v4352_v29 = vld [vmem:[#allocation2 + $0x90] sm:$0xe]  ;;  %v642_v58 = vsel %vm4951_vm6, %v634_v4, %v641_v1  ;;  %v908_v16 = vsel %vm4978_vm8, %v643_v25, %v907_v43  ;;  %v443_v63 = vmax.f32 %v411_v57, 0.0  ;;  %v377_v41 = vmul.f32 %v5397_v34, %v4176_v26 }
  0xc2   : > { %v412_v55 = vadd.f32 %v5406_v23, %v376_v14  ;;  %v4323_v40 = vld [vmem:[#allocation2 + $0x90] sm:$0xe]  ;;  %906 = vst.msk [vmem:[#allocation2 + $0x4c] sm:$0xf] %vm483_vm0, %v642_v58  ;;  %v378_v14 = vmul.f32 %v5397_v34, %v4177_v39  ;;  %v2983_v46 = vor.u32 %v2982_v54, %v2978_v21  ;;  %v1496_v4 = vsel %vm1494_vm10, %v4468_v28, %v1366_v32 }
  0xc3   : > { %909 = vst [vmem:[#allocation2 + $0x50] sm:$0x1] %v908_v16  ;;  %v4351_v59 = vld [vmem:[#allocation2 + $0x90] sm:$0xf0]  ;;  %v475_v36 = vpack.c.bf16 %v443_v63, %v443_v63  ;;  %2275 = vmatpush.bf16.msra.mxu0 %v4101_v2  ;;  %v413_v57 = vadd.f32 %v5406_v23, %v377_v41  ;;  %2578 = vmatmul.bf16.vlgmr.msra.gmra.mxu2 %v1496_v4  ;;  %v1880_v27 = vshrl.u32 %v5472_v8, 16 }
  0xc4   : > { %v444_v42 = vmax.f32 %v412_v55, 0.0  ;;  %v4322_v43 = vld [vmem:[#allocation2 + $0x90] sm:$0xf0]  ;;  %v1610_v25 = vld [vmem:[#allocation2 + $0x98] sm:$0x1]  ;;  %v4353_v22 = vor.u32 %v4352_v29, %v4351_v59  ;;  %v2988_v21 = vsel %vm1172_vm2, %v2983_v46, %v2987_v7  ;;  %v5517_v39 = vadd.f32 %v5406_v23, %v378_v14  ;;  %v4099_v46 = vld [vmem:[#allocation3 + $0x70] sm:$0xff] }
  0xc5   : > { %v4100_v1 = vld [vmem:[#allocation3 + $0x78] sm:$0xff]  ;;  %v1024_v26 = vld [vmem:[#allocation2 + $0x98] sm:$0x1]  ;;  %v4324_v55 = vor.u32 %v4323_v40, %v4322_v43  ;;  %v1738_v58 = vunpack.c.l.b16 %v1610_v25  ;;  %3139 = vrot.lane.b32.xlu1 %v2988_v21, %s4692_s23  ;;  %v747_v2 = vshrl.u32 %v475_v36, 16  ;;  %v750_v18 = vshll.u32 %v475_v36, 16 }
  0xc6   : > { %v476_v49 = vpack.c.bf16 %v444_v42, %v444_v42  ;;  %v4469_v32 = vld [vmem:[#allocation3 + $0x58] sm:$0xff]  ;;  %v1152_v16 = vunpack.c.l.b16 %v1024_v26  ;;  %v2064_v54 = vrot.slane %v4353_v22, 1  ;;  %v952_v14 = vld [vmem:[#allocation2 + $0x9c] sm:$0xf]  ;;  %v956_v43 = vld [vmem:[#allocation2 + $0xa4] sm:$0x1] }
  0xc7   : > { %2663 = vmatpush.bf16.msrb.mxu2 %v4469_v32  ;;  %v5523_v40 = vpack.c.b16 %v1738_v58, %v1738_v58  ;;  %v1482_v42 = vrot.slane %v4324_v55, 1  ;;  %v749_v41 = vrot.slane %v747_v2, 7  ;;  %2276 = vmatpush.bf16.msra.mxu0 %v4100_v1  ;;  %v445_v25 = vmax.f32 %v413_v57, 0.0  ;;  %v4470_v22 = vld [vmem:[#allocation3 + $0x50] sm:$0xff] }
  0xc8   : > { %v755_v63 = vshrl.u32 %v476_v49, 16  ;;  %v758_v29 = vshll.u32 %v476_v49, 16  ;;  %v5525_v7 = vpack.c.b16 %v1152_v16, %v1152_v16  ;;  %v446_v26 = vmax.f32 %v5517_v39, 0.0 }
  0xc9   : > { %v4299_v28 = vld [vmem:[#allocation2 + $0x48] sm:$0xff]   ;;  %v2065_v4 = vrot.slane %v5523_v40, 1  ;;  %v752_v1 = vor.u32 %v750_v18, %v749_v41  ;;  %v753_v16 = vrot.slane %v749_v41, 4 }
  0xca   : > { %v757_v59 = vrot.slane %v755_v63, 7  ;;  %v1483_v49 = vrot.slane %v5525_v7, 1  ;;  %v1018_v21 = vld [vmem:[#allocation2 + $0x50] sm:$0x1]  ;;  %v1246_v55 = vshrl.u32 %v4299_v28, 16  ;;  %v1248_v32 = vshll.u32 %v4299_v28, 16 }
  0xcb   : > { %2664 = vmatpush.bf16.msrb.mxu2 %v4470_v22  ;;  %v1146_v58 = vunpack.c.l.b16 %v1018_v21  ;;  %v1604_v63 = vld [vmem:[#allocation2 + $0x50] sm:$0x1]  ;;  %v2066_v57 = vsel %vm1445_vm9, %v2064_v54, %v2065_v4  ;;  %2277 = vmatpush.bf16.msra.mxu0 %v4099_v46  ;;  %v4331_v28 = vld [vmem:[#allocation2 + $0x60] sm:$0xff]  }
  0xcc   : > { %v760_v2 = vor.u32 %v758_v29, %v757_v59  ;;  %v2785_v17 = vld [vmem:[#allocation2 + $0x50] sm:$0x1]  ;;  %v1484_v39 = vsel %vm1445_vm9, %v1482_v42, %v1483_v49  ;;  %v1250_v36 = vrot.slane %v1248_v32, 1  ;;  %v762_v37 = vrot.slane %v757_v59, 4  ;;  %v4098_v4 = vld [vmem:[#allocation3 + $0x68] sm:$0xff] }
  0xcd   : > { %v5535_v22 = vpack.c.b16 %v1146_v58, %v1146_v58  ;;  %v953_v29 = vsel %vm4961_vm7, %v752_v1, %v952_v14  ;;  %v1732_v41 = vunpack.c.l.b16 %v1604_v63  ;;  %v2913_v46 = vunpack.c.l.b16 %v2785_v17  ;;  %v4471_v49 = vld [vmem:[#allocation3 + $0x48] sm:$0xff]  ;;  %v4097_v1 = vld [vmem:[#allocation3 + $0x60] sm:$0xff] }
  0xce   : > { %3945 = vmatmul.msk.bf16.gmra.mxu1 %vm1494_vm10, %v2066_v57  ;;  %v761_v18 = vsel %vm4951_vm6, %v753_v16, %v760_v2  ;;  %v1251_v54 = vor.u32 %v1250_v36, %v1246_v55  ;;  %954 = vst [vmem:[#allocation2 + $0x9c] sm:$0xf] %v953_v29  ;;  %v957_v42 = vsel %vm4978_vm8, %v762_v37, %v956_v43  ;;  %v1844_v14 = vshrl.u32 %v4331_v28, 16  ;;  %v4119_v37 = vld [vmem:[#allocation3 + $0x110] sm:$0xff]  ;;  %v4472_v29 = vld [vmem:[#allocation3 + $0x40] sm:$0xff] }
  0xcf   : > { %4010 = vmatmul.msk.bf16.gmra.mxu3 %vm1494_vm10, %v1484_v39  ;;  %6602 = vst [vmem:[#allocation38_spill] sm:$0xff] %v5535_v22  ;;  %v477_v59 = vpack.c.bf16 %v445_v25, %v445_v25  ;;  %2665 = vmatpush.bf16.msrb.mxu2 %v4471_v49  ;;  %v1253_v21 = vshll.u32 %v5535_v22, 16  ;;  %v5545_v32 = vpack.c.b16 %v1732_v41, %v1732_v41  ;;  %v1846_v17 = vshll.u32 %v4331_v28, 16  ;;  %v959_v28 = vld [vmem:[#allocation2 + $0xa8] sm:$0xf] }
  0xd0   : > { %955 = vst.msk [vmem:[#allocation2 + $0xa0] sm:$0xf] %vm483_vm0, %v761_v18  ;;  %v478_v58 = vpack.c.bf16 %v446_v26, %v446_v26  ;;  %v5547_v36 = vpack.c.b16 %v2913_v46, %v2913_v46  ;;  %2278 = vmatpush.bf16.msra.mxu0 %v4098_v4  ;;  %v1851_v26 = vshll.u32 %v5265_v44, 16  ;;  %3548 = vmatpush.bf16.msrb.mxu3 %v4119_v37  ;;  %v5557_v44 = vld [vmem:[#allocation2 + $0x54] sm:$0xff]  }
  0xd1   : > { %6603 = vst [vmem:[#allocation39_spill] sm:$0xff] %v5545_v32  ;;  %v764_v55 = vshrl.u32 %v477_v59, 16  ;;  %v767_v16 = vshll.u32 %v477_v59, 16  ;;  %v1255_v43 = vrot.slane %v1253_v21, 1  ;;  %v1827_v25 = vshll.u32 %v5545_v32, 16  ;;  %v4473_v32 = vld [vmem:[#allocation3 + $0xb8] sm:$0xff] }
  0xd2   : > { %958 = vst [vmem:[#allocation2 + $0xa4] sm:$0x1] %v957_v42  ;;  %v772_v2 = vshrl.u32 %v478_v58, 16  ;;  %v775_v63 = vshll.u32 %v478_v58, 16  ;;  %v2997_v57 = vshll.u32 %v5547_v36, 16  ;;  %v1848_v18 = vrot.slane %v1846_v17, 1 }
  0xd3   : > { %6604 = vst [vmem:[#allocation40_spill] sm:$0xff] %v5547_v36  ;;  %v766_v39 = vrot.slane %v764_v55, 7  ;;  %2666 = vmatpush.bf16.msrb.mxu2 %v4472_v29  ;;  %v1256_v41 = vsel %vm1172_vm2, %v1251_v54, %v1255_v43  ;;  %v1829_v42 = vrot.slane %v1827_v25, 1  ;;  %v4181_v59 = vunpack.c.h.bf16 %v5521_v33  ;;  %v963_v58 = vld [vmem:[#allocation2 + $0xb0] sm:$0x1] }
  0xd4   : > { %v774_v46 = vrot.slane %v772_v2, 7  ;;  %1377 = vrot.lane.b32.xlu0 %v1256_v41, %s4692_s23  ;;  %v2999_v4 = vrot.slane %v2997_v57, 1  ;;  %v5555_v55 = vor.u32 %v1848_v18, %v1844_v14  ;;  %2279 = vmatpush.bf16.msra.mxu0 %v4097_v1  ;;  %6605 = vst [vmem:[#allocation41_spill] sm:$0xff] %v5557_v44  ;;  %v5559_v17 = vld [vmem:[#allocation2 + $0x54] sm:$0xf0]  ;;  %v1853_v22 = vrot.slane %v1851_v26, 1 }
  0xd5   : > { %v769_v49 = vor.u32 %v767_v16, %v766_v39  ;;  %v770_v21 = vrot.slane %v766_v39, 4  ;;  %6606 = vst [vmem:[#allocation42_spill] sm:$0xff] %v5559_v17  ;;  %v4659_v37 = vld [vmem:[#allocation2 + $0x9c] sm:$0xe]  ;;  %v1830_v25 = vsel %vm1172_vm2, %v1251_v54, %v1829_v42 }
  0xd6   : > { %v4662_v43 = vld [vmem:[#allocation2 + $0x9c] sm:$0xe]  ;;  %v777_v2 = vor.u32 %v775_v63, %v774_v46  ;;  %v779_v29 = vrot.slane %v774_v46, 4  ;;  %1961 = vrot.lane.b32.xlu2 %v1830_v25, %s4692_s23  ;;  %v3000_v1 = vsel %vm1172_vm2, %v1251_v54, %v2999_v4  ;;  %v2786_v4 = vld [vmem:[#allocation2 + $0x5c] sm:$0x1] }
  0xd7   : > { %v5562_v57 = vld [vmem:[#allocation2 + $0x9c] sm:$0xff]   ;;  %v960_v18 = vsel %vm4961_vm7, %v769_v49, %v959_v28  ;;  %3141 = vrot.lane.b32.xlu1 %v3000_v1, %s4692_s23 }
  0xd8   : > { %2365 = vmatpush.bf16.msrb.mxu0 %v4473_v32  ;;  %v4658_v16 = vld [vmem:[#allocation2 + $0x9c] sm:$0xf0]  ;;  %961 = vst [vmem:[#allocation2 + $0xa8] sm:$0xf] %v960_v18  ;;  %v6607_v32 = vunpack.c.l.bf16 %v5521_v33  ;;  %v778_v17 = vsel %vm4951_vm6, %v770_v21, %v777_v2  ;;  %v964_v54 = vsel %vm4978_vm8, %v779_v29, %v963_v58  ;;  %v1854_v33 = vsel %vm1172_vm2, %v5555_v55, %v1853_v22  ;;  %v4474_v18 = vld [vmem:[#allocation3 + $0xb0] sm:$0xff] }
  0xd9   : > { %v5564_v39 = vld [vmem:[#allocation2 + $0x9c] sm:$0xff]   ;;  %v1611_v41 = vld [vmem:[#allocation2 + $0xa4] sm:$0x1]  ;;  %v4660_v25 = vor.u32 %v4659_v37, %v4658_v16  ;;  %962 = vst.msk [vmem:[#allocation2 + $0xac] sm:$0xf] %vm483_vm0, %v778_v17  ;;  %v2914_v2 = vunpack.c.l.b16 %v2786_v4  ;;  %v380_v58 = vmul.f32 %v5397_v34, %v4181_v59  ;;  %v1258_v22 = vshrl.u32 %v5216_v0, 16 }
  0xda   : > { %v4661_v14 = vld [vmem:[#allocation2 + $0x9c] sm:$0xf0]  ;;  %v1025_v42 = vld [vmem:[#allocation2 + $0xa4] sm:$0x1]  ;;  %v379_v63 = vmul.f32 %v5397_v34, %v6607_v32  ;;  %v1739_v26 = vunpack.c.l.b16 %v1611_v41  ;;  %965 = vst [vmem:[#allocation2 + $0xb0] sm:$0x1] %v964_v54 }
  0xdb   : > { %v1153_v46 = vunpack.c.l.b16 %v1025_v42  ;;  %v4663_v28 = vor.u32 %v4662_v43, %v4661_v14  ;;  %v2067_v41 = vrot.slane %v4660_v25, 1  ;;  %v5590_v29 = vpack.c.b16 %v2914_v2, %v2914_v2 }
  0xdc   : > { %v5579_v49 = vpack.c.b16 %v1739_v26, %v1739_v26  ;;  %2366 = vmatpush.bf16.msrb.mxu0 %v4474_v18  ;;  %1965 = vrot.lane.b32.xlu0 %v1854_v33, %s4692_s23  ;;  %v415_v17 = vadd.f32 %v5406_v23, %v379_v63  ;;  %v416_v16 = vadd.f32 %v5406_v23, %v380_v58  ;;  %v1260_v14 = vshll.u32 %v5216_v0, 16  ;;  %v4475_v63 = vld [vmem:[#allocation3 + $0xa8] sm:$0xff] }
  0xdd   : > { %v5581_v1 = vpack.c.b16 %v1153_v46, %v1153_v46  ;;  %v1485_v21 = vrot.slane %v4663_v28, 1  ;;  %6608 = vst [vmem:[#allocation43_spill] sm:$0xff] %v5590_v29  ;;  %v3002_v46 = vshrl.u32 %v5557_v44, 16  ;;  %v3004_v54 = vshll.u32 %v5557_v44, 16  ;;  %v4114_v33 = vld [vmem:[#allocation3 + $0xe8] sm:$0xff] }
  0xde   : > { %v2068_v37 = vrot.slane %v5579_v49, 1  ;;  %v3009_v4 = vshll.u32 %v5590_v29, 16  ;;  %v447_v25 = vmax.f32 %v415_v17, 0.0  ;;  %v448_v28 = vmax.f32 %v416_v16, 0.0  ;;  %3456 = vmatpush.bf16.msrb.mxu1 %v4114_v33 }
  0xdf   : > { %v1486_v43 = vrot.slane %v5581_v1, 1  ;;  %v4355_v32 = vld [vmem:[#allocation2 + $0xa8] sm:$0xe]  ;;  %v1262_v18 = vrot.slane %v1260_v14, 1  ;;  %v3006_v58 = vrot.slane %v3004_v54, 1 }
  0xe0   : > { %v2069_v42 = vsel %vm1445_vm9, %v2067_v41, %v2068_v37  ;;  %v4326_v26 = vld [vmem:[#allocation2 + $0xa8] sm:$0xe]  ;;  %2367 = vmatpush.bf16.msrb.mxu0 %v4475_v63  ;;  %v4296_v41 = vld [vmem:[%s4853_s8 + $0x78] sm:$0xff]   ;;  %v4325_v2 = vld [vmem:[#allocation2 + $0xa8] sm:$0xf0]  ;;  %v1265_v37 = vshll.u32 %v5238_v52, 16  ;;  %v479_v56 = vpack.c.bf16 %v447_v25, %v447_v25  ;;  %v480_v16 = vpack.c.bf16 %v448_v28, %v448_v28  ;;  %s3772_s8 = scalar_lea.hbm %s6540_s5, %s4121_s9 }
  0xe1   : > { %v1487_v59 = vsel %vm1445_vm9, %v1485_v21, %v1486_v43  ;;  %3946 = vmatmul.msk.bf16.gmra.mxu1 %vm1494_vm10, %v2069_v42  ;;  %v4354_v21 = vld [vmem:[#allocation2 + $0xa8] sm:$0xf0]  ;;  %v1612_v43 = vld [vmem:[#allocation2 + $0xb0] sm:$0x1]  ;;  %v3011_v63 = vrot.slane %v3009_v4, 1  ;;  %v4113_v42 = vld [vmem:[#allocation3 + $0xe0] sm:$0xff]  ;;  %v3007_v17 = vor.u32 %v3006_v58, %v3002_v46  ;;  %v4327_v14 = vor.u32 %v4326_v26, %v4325_v2 }
  0xe2   : > { %4011 = vmatmul.msk.bf16.gmra.mxu3 %vm1494_vm10, %v1487_v59  ;;  %v4356_v44 = vor.u32 %v4355_v32, %v4354_v21  ;;  %v1026_v0 = vld [vmem:[#allocation2 + $0xb0] sm:$0x1]  ;;  %v4184_v59 = vunpack.c.l.bf16 %v4296_v41  ;;  %v1740_v36 = vunpack.c.l.b16 %v1612_v43  ;;  %v781_v50 = vshrl.u32 %v479_v56, 16  ;;  %3457 = vmatpush.bf16.msrb.mxu1 %v4113_v42  ;;  %v970_v2 = vld [vmem:[#allocation2 + $0xbc] sm:$0x1]  ;;  %s3775_s15 = sshll.u32 %s3772_s8, 4  ;;  %s3776_s15 = int_to_ptr.hbm [resolvable:$true] %s3775_s15 }
  0xe3   : > { %v1154_v29 = vunpack.c.l.b16 %v1026_v0  ;;  %v784_v10 = vshll.u32 %v479_v56, 16  ;;  %v4185_v54 = vunpack.c.h.bf16 %v4296_v41  ;;  %v3012_v32 = vsel %vm1172_vm2, %v3007_v17, %v3011_v63  ;;  %v966_v0 = vld [vmem:[#allocation2 + $0xb4] sm:$0xf]  ;;  %v2787_v41 = vld [vmem:[#allocation2 + $0x68] sm:$0x1]  ;;  %s4616_s16 = sshra.s32 %s3776_s15, 4  ;;  %s4617_s16 = int_to_ptr.hbm [resolvable:$true] %s4616_s16 }
  0xe4   : > { %2368 = vmatpush.bf16.msrb.mxu0 %v4476_v60  ;;  %v5604_v3 = vpack.c.b16 %v1740_v36, %v1740_v36  ;;  %v789_v4 = vshrl.u32 %v480_v16, 16  ;;  %3143 = vrot.lane.b32.xlu1 %v3012_v32, %s4692_s23  ;;  %v783_v25 = vrot.slane %v781_v50, 7  ;;  %v792_v33 = vshll.u32 %v480_v16, 16  ;;  %s4618_s17 = scalar_lea.hbm %s4617_s16, 256  ;;  %p4623_p9 = scmp.lt.s32.totalorder %s4617_s16, %s6540_s5 }
  0xe5   : > { %v5606_v52 = vpack.c.b16 %v1154_v29, %v1154_v29  ;;  %v1263_v46 = vor.u32 %v1262_v18, %v1258_v22  ;;  %v1267_v28 = vrot.slane %v1265_v37, 1  ;;  %v2070_v60 = vrot.slane %v4356_v44, 1  ;;  %p4619_p4 = scmp.ne.s32.totalorder %s4617_s16, %s4618_s17  ;;  %p4624_p2 = scmp.lt.s32.totalorder %s4622_s26, %s4618_s17 }
  0xe6   : > { %v2071_v26 = vrot.slane %v5604_v3, 1  ;;  %v791_v56 = vrot.slane %v789_v4, 7  ;;  %v1856_v36 = vshrl.u32 %v5312_v15, 16  ;;  %v786_v29 = vor.u32 %v784_v10, %v783_v25 }
  0xe7   : > { %v787_v21 = vrot.slane %v783_v25, 4  ;;  %v1268_v58 = vsel %vm1172_vm2, %v1263_v46, %v1267_v28  ;;  %v1858_v43 = vshll.u32 %v5312_v15, 16  ;;  %v1488_v50 = vrot.slane %v4327_v14, 1  ;;  %p4620_p8 = pnand %p4619_p4, %p4792_p7  ;;  %p4625_p10 = por %p4624_p2, %p4623_p9 }
  0xe8   : > { %v1489_v63 = vrot.slane %v5606_v52, 1  ;;  %v794_v22 = vor.u32 %v792_v33, %v791_v56  ;;  %v796_v18 = vrot.slane %v791_v56, 4  ;;  %1379 = vrot.lane.b32.xlu2 %v1268_v58, %s4692_s23  ;;  %v967_v44 = vsel %vm4961_vm7, %v786_v29, %v966_v0 }
  0xe9   : > { %v1860_v37 = vrot.slane %v1858_v43, 1  ;;  %v1863_v42 = vshll.u32 %v5324_v53, 16  ;;  %v2915_v10 = vunpack.c.l.b16 %v2787_v41  ;;  %968 = vst [vmem:[#allocation2 + $0xb4] sm:$0xf] %v967_v44  ;;  %v381_v14 = vmul.f32 %v5397_v34, %v4184_v59  ;;  %v5629_v53 = vld [vmem:[#allocation2 + $0x78] sm:$0xff]   ;;  %v4118_v43 = vld [vmem:[#allocation3 + $0x108] sm:$0xff]  ;;  %p4621_p11 = pneg %p4620_p8 }
  0xea   : > { %v795_v17 = vsel %vm4951_vm6, %v787_v21, %v794_v22  ;;  %v971_v16 = vsel %vm4978_vm8, %v796_v18, %v970_v2  ;;  %v382_v32 = vmul.f32 %v5397_v34, %v4185_v54  ;;  %v2072_v4 = vsel %vm1445_vm9, %v2070_v60, %v2071_v26  ;;  %v4112_v21 = vld [vmem:[#allocation3 + $0xd8] sm:$0xff]  ;;  %3549 = vmatpush.bf16.msrb.mxu3 %v4118_v43 }
  0xeb   : > { %969 = vst.msk [vmem:[#allocation2 + $0xb8] sm:$0xf] %vm483_vm0, %v795_v17  ;;  %v1861_v25 = vor.u32 %v1860_v37, %v1856_v36  ;;  %v1865_v33 = vrot.slane %v1863_v42, 1  ;;  %v5627_v0 = vpack.c.b16 %v2915_v10, %v2915_v10  ;;  %v1490_v46 = vsel %vm1445_vm9, %v1488_v50, %v1489_v63  ;;  %3458 = vmatpush.bf16.msrb.mxu1 %v4112_v21  ;;  %v4111_v42 = vld [vmem:[#allocation3 + $0xd0] sm:$0xff]  ;;  %p4626_p12 = pnand %p4625_p10, %p4621_p11 }
  0xec   : > { %972 = vst [vmem:[#allocation2 + $0xbc] sm:$0x1] %v971_v16  ;;  %v417_v28 = vadd.f32 %v5406_v23, %v381_v14  ;;  %v418_v56 = vadd.f32 %v5406_v23, %v382_v32  ;;  %v1277_v59 = vshll.u32 %v5268_v45, 16  ;;  %v1870_v60 = vshll.u32 %v5629_v53, 16 }
  0xed   : > { %v1866_v34 = vsel %vm1172_vm2, %v1861_v25, %v1865_v33  ;;  %v3021_v54 = vshll.u32 %v5627_v0, 16  ;;  %v1868_v22 = vshrl.u32 %v5629_v53, 16  ;;  %v4117_v25 = vld [vmem:[#allocation3 + $0x100] sm:$0xff] }
  0xee   : > { %1967 = vrot.lane.b32.xlu0 %v1866_v34, %s4692_s23  ;;  %v449_v41 = vmax.f32 %v417_v28, 0.0  ;;  %v450_v29 = vmax.f32 %v418_v56, 0.0  ;;  %v1279_v2 = vrot.slane %v1277_v59, 1  ;;  %3550 = vmatpush.bf16.msrb.mxu3 %v4117_v25  ;;  %v1282_v25 = vshrl.u32 %v5314_v12, 16 }
  0xef   : > { %v1952_v26 = vpop.permute.xlu0 %1951  ;;  %v3023_v58 = vrot.slane %v3021_v54, 1  ;;  %3459 = vmatpush.bf16.msrb.mxu1 %v4111_v42  ;;  %v977_v42 = vld [vmem:[#allocation2 + $0xc8] sm:$0x1] }
  0xf0   : > { %v1368_v36 = vpop.permute.xlu1 %1367  ;;  %v2080_v23 = vsel %vm1494_vm10, %v5184_v5, %v1952_v26  ;;  %v481_v50 = vpack.c.bf16 %v449_v41, %v449_v41  ;;  %v482_v63 = vpack.c.bf16 %v450_v29, %v450_v29  ;;  %v4665_v18 = vld [vmem:[#allocation2 + $0xb4] sm:$0xe]  ;;  %v1280_v5 = vsel %vm1172_vm2, %v5555_v55, %v1279_v2 }
  0xf1   : > { %3947 = vmatmul.msk.bf16.gmra.mxu1 %vm1494_vm10, %v2072_v4  ;;  %v1499_v45 = vsel %vm1494_vm10, %v5188_v6, %v1368_v36  ;;  %2280 = vmatmul.bf16.vlgmr.msra.gmra.mxu0 %v2080_v23  ;;  %v4668_v44 = vld [vmem:[#allocation2 + $0xb4] sm:$0xe]  ;;  %v3024_v37 = vsel %vm1172_vm2, %v5555_v55, %v3023_v58  ;;  %v1872_v6 = vrot.slane %v1870_v60, 1  ;;  %v973_v60 = vld [vmem:[#allocation2 + $0xc0] sm:$0xf]  ;;  %v1875_v26 = vshll.u32 %v5423_v31, 16  ;;  %v1370_v58 = vpop.permute.xlu2 %1369 }
  0xf2   : > { %4012 = vmatmul.msk.bf16.gmra.mxu3 %vm1494_vm10, %v1490_v46  ;;  %2583 = vmatmul.bf16.gmra.mxu2 %v1499_v45  ;;  %v5650_v10 = vld [vmem:[#allocation2 + $0xb4] sm:$0xff]   ;;  %v798_v32 = vshrl.u32 %v481_v50, 16  ;;  %v801_v4 = vshll.u32 %v481_v50, 16  ;;  %v806_v59 = vshrl.u32 %v482_v63, 16  ;;  %v4110_v36 = vld [vmem:[#allocation3 + $0xc8] sm:$0xff] }
  0xf3   : > { %v4664_v17 = vld [vmem:[#allocation2 + $0xb4] sm:$0xf0]  ;;  %3145 = vrot.lane.b32.xlu1 %v3024_v37, %s4692_s23  ;;  %1381 = vrot.lane.b32.xlu2 %v1280_v5, %s4692_s23  ;;  %v1613_v33 = vld [vmem:[#allocation2 + $0xbc] sm:$0x1]  ;;  %v5661_v23 = vor.u32 %v1872_v6, %v1868_v22  ;;  %v809_v37 = vshll.u32 %v482_v63, 16  ;;  %v5673_v63 = vld [vmem:[#allocation2 + $0x6c] sm:$0xff]  }
  0xf4   : > { %v5652_v16 = vld [vmem:[#allocation2 + $0xb4] sm:$0xff]   ;;  %v1027_v46 = vld [vmem:[#allocation2 + $0xbc] sm:$0x1]  ;;  %v1741_v28 = vunpack.c.l.b16 %v1613_v33  ;;  %v800_v56 = vrot.slane %v798_v32, 7  ;;  %v4666_v34 = vor.u32 %v4665_v18, %v4664_v17  ;;  %v808_v18 = vrot.slane %v806_v59, 7  ;;  %3460 = vmatpush.bf16.msrb.mxu1 %v4110_v36 }
  0xf5   : > { %v4667_v14 = vld [vmem:[#allocation2 + $0xb4] sm:$0xf0]  ;;  %v1155_v55 = vunpack.c.l.b16 %v1027_v46  ;;  %v1284_v33 = vshll.u32 %v5314_v12, 16  ;;  %v2788_v59 = vld [vmem:[#allocation2 + $0x74] sm:$0x1]  ;;  %v1882_v36 = vshll.u32 %v5472_v8, 16 }
  0xf6   : > { %v4669_v54 = vor.u32 %v4668_v44, %v4667_v14  ;;  %v5657_v29 = vpack.c.b16 %v1741_v28, %v1741_v28  ;;  %v803_v2 = vor.u32 %v801_v4, %v800_v56  ;;  %v2073_v45 = vrot.slane %v4666_v34, 1  ;;  %v4109_v22 = vld [vmem:[#allocation3 + $0xc0] sm:$0xff] }
  0xf7   : > { %v5659_v21 = vpack.c.b16 %v1155_v55, %v1155_v55  ;;  %v804_v50 = vrot.slane %v800_v56, 4  ;;  %v813_v17 = vrot.slane %v808_v18, 4  ;;  %v1877_v14 = vrot.slane %v1875_v26, 1  ;;  %v5667_v6 = vld [vmem:[#allocation2 + $0x18] sm:$0xff]  }
  0xf8   : > { %v1954_v41 = vpop.permute.xlu1 %1953  ;;  %v1491_v43 = vrot.slane %v4669_v54, 1  ;;  %v2074_v44 = vrot.slane %v5657_v29, 1  ;;  %v974_v5 = vsel %vm4961_vm7, %v803_v2, %v973_v60  ;;  %v1502_v32 = vsel %vm1494_vm10, %v5667_v6, %v1370_v58  ;;  %3461 = vmatpush.bf16.msrb.mxu1 %v4109_v22  ;;  %v5693_v2 = vld [vmem:[#allocation2 + $0x90] sm:$0xff]  }
  0xf9   : > { %v1492_v31 = vrot.slane %v5659_v21, 1  ;;  %975 = vst [vmem:[#allocation2 + $0xc0] sm:$0xf] %v974_v5  ;;  %v811_v4 = vor.u32 %v809_v37, %v808_v18  ;;  %v2083_v28 = vsel %vm1494_vm10, %v5667_v6, %v1954_v41  ;;  %v978_v55 = vsel %vm4978_vm8, %v813_v17, %v977_v42  ;;  %v4368_v37 = vld [vmem:[#allocation2 + $0x18] sm:$0xe] }
  0xfa   : > { %v2075_v46 = vsel %vm1445_vm9, %v2073_v45, %v2074_v44  ;;  %v1878_v56 = vsel %vm1172_vm2, %v5661_v23, %v1877_v14  ;;  %979 = vst [vmem:[#allocation2 + $0xc8] sm:$0x1] %v978_v55  ;;  %v1286_v60 = vrot.slane %v1284_v33, 1  ;;  %v1289_v26 = vshll.u32 %v5328_v47, 16 }
  0xfb   : > { %v1493_v34 = vsel %vm1445_vm9, %v1491_v43, %v1492_v31  ;;  %v812_v54 = vsel %vm4951_vm6, %v804_v50, %v811_v4  ;;  %1969 = vrot.lane.b32.xlu0 %v1878_v56, %s4692_s23  ;;  %v1887_v41 = vshll.u32 %v5478_v35, 16  ;;  %v2916_v43 = vunpack.c.l.b16 %v2788_v59  ;;  %v4367_v31 = vld [vmem:[#allocation2 + $0x18] sm:$0xf0] }
  0xfc   : > { %976 = vst.msk [vmem:[#allocation2 + $0xc4] sm:$0xf] %vm483_vm0, %v812_v54  ;;  %v1287_v11 = vor.u32 %v1286_v60, %v1282_v25  ;;  %v1291_v58 = vrot.slane %v1289_v26, 1  ;;  %v1884_v47 = vrot.slane %v1882_v36, 1  ;;  %v1301_v18 = vshll.u32 %v5425_v51, 16 }
  0xfd   : > { %v1889_v50 = vrot.slane %v1887_v41, 1  ;;  %v5705_v42 = vpack.c.b16 %v2916_v43, %v2916_v43  ;;  %v1894_v17 = vshll.u32 %v5693_v2, 16  ;;  %v1892_v51 = vshrl.u32 %v5693_v2, 16 }
  0xfe   : > { %v1292_v5 = vsel %vm1172_vm2, %v1287_v11, %v1291_v58  ;;  %v1885_v14 = vor.u32 %v1884_v47, %v1880_v27  ;;  %v1303_v22 = vrot.slane %v1301_v18, 1  ;;  %v3026_v25 = vshrl.u32 %v5673_v63, 16  ;;  %v2789_v18 = vld [vmem:[#allocation2 + $0x80] sm:$0x1] }
  0xff   : > { %1383 = vrot.lane.b32.xlu2 %v1292_v5, %s4692_s23  ;;  %v3028_v33 = vshll.u32 %v5673_v63, 16  ;;  %v4369_v56 = vor.u32 %v4368_v37, %v4367_v31  ;;  %v3214_v60 = vrot.slane %v5349_v20, 1  ;;  %v1308_v20 = vshll.u32 %v5474_v38, 16 }
 0x100   : > { %v5695_v45 = vpop.permute.xlu1 %1957  ;;  %v4358_v4 = vld [vmem:[#allocation2 + $0xc0] sm:$0xe]  ;;  %v1890_v59 = vsel %vm1172_vm2, %v1885_v14, %v1889_v50  ;;  %v1304_v36 = vsel %vm1172_vm2, %v5661_v23, %v1303_v22  ;;  %v1306_v50 = vshrl.u32 %v5474_v38, 16  ;;  %v1313_v5 = vshll.u32 %v5480_v9, 16 }
 0x101   : > { %3948 = vmatmul.msk.bf16.gmra.mxu1 %vm1494_vm10, %v2075_v46  ;;  %2285 = vmatmul.bf16.gmra.mxu0 %v2083_v28  ;;  %v3033_v46 = vshll.u32 %v5705_v42, 16  ;;  %v1896_v28 = vrot.slane %v1894_v17, 1  ;;  %v1614_v55 = vld [vmem:[#allocation2 + $0xc8] sm:$0x1]  ;;  %v3030_v26 = vrot.slane %v3028_v33, 1  ;;  %v3213_v37 = vrot.slane %v4369_v56, 1 }
 0x102   : > { %4013 = vmatmul.msk.bf16.gmra.mxu3 %vm1494_vm10, %v1493_v34  ;;  %2588 = vmatmul.bf16.gmra.mxu2 %v1502_v32  ;;  %v5702_v35 = vpop.f32.mrf.mxu3  ;;  %v1899_v32 = vshll.u32 %v5523_v40, 16  ;;  %v1742_v54 = vunpack.c.l.b16 %v1614_v55  ;;  %v1904_v17 = vshrl.u32 %v5562_v57, 16  ;;  %v1911_v9 = vshll.u32 %v5579_v49, 16 }
 0x103   : > { %v4357_v34 = vld [vmem:[#allocation2 + $0xc0] sm:$0xf0]  ;;  %1971 = vrot.lane.b32.xlu0 %v1890_v59, %s4692_s23  ;;  %v3035_v40 = vrot.slane %v3033_v46, 1  ;;  %v5719_v41 = vor.u32 %v1896_v28, %v1892_v51  ;;  %v3031_v47 = vor.u32 %v3030_v26, %v3026_v25  ;;  %v2917_v33 = vunpack.c.l.b16 %v2789_v18  ;;  %v1956_v28 = vpop.permute.xlu2 %1955 }
 0x104   : > { %v5700_v44 = vpop.f32.mrf.mxu1  ;;  %v4359_v27 = vor.u32 %v4358_v4, %v4357_v34  ;;  %v1901_v11 = vrot.slane %v1899_v32, 1  ;;  %v5723_v43 = vpack.c.b16 %v1742_v54, %v1742_v54  ;;  %v1310_v32 = vrot.slane %v1308_v20, 1  ;;  %v5743_v54 = vld [vmem:[#allocation2 + $0xa8] sm:$0xff]  }
 0x105   : > { %v3036_v51 = vsel %vm1172_vm2, %v3031_v47, %v3035_v40  ;;  %v1906_v4 = vshll.u32 %v5562_v57, 16  ;;  %v1315_v56 = vrot.slane %v1313_v5, 1  ;;  %v5741_v34 = vpack.c.b16 %v2917_v33, %v2917_v33 }
 0x106   : > { %v2076_v31 = vrot.slane %v4359_v27, 1  ;;  %v2077_v14 = vrot.slane %v5723_v43, 1  ;;  %3147 = vrot.lane.b32.xlu1 %v3036_v51, %s4692_s23  ;;  %v1902_v25 = vsel %vm1172_vm2, %v5719_v41, %v1901_v11  ;;  %v1311_v55 = vor.u32 %v1310_v32, %v1306_v50  ;;  %v4498_v50 = vld [vmem:[#allocation2 + $0x24] sm:$0xe] }
 0x107   : > { %1385 = vrot.lane.b32.xlu2 %v1304_v36, %s4692_s23  ;;  %v1908_v59 = vrot.slane %v1906_v4, 1  ;;  %v3215_v40 = vsel %vm1445_vm9, %v3213_v37, %v3214_v60  ;;  %v1913_v49 = vrot.slane %v1911_v9, 1  ;;  %v2086_v11 = vsel %vm1494_vm10, %v5343_v24, %v1956_v28 }
 0x108   : > { %v5721_v58 = vpop.permute.xlu1 %1375  ;;  %v2078_v26 = vsel %vm1445_vm9, %v2076_v31, %v2077_v14  ;;  %v3045_v20 = vshll.u32 %v5741_v34, 16  ;;  %v1918_v18 = vshll.u32 %v5743_v54, 16  ;;  %v1316_v31 = vsel %vm1172_vm2, %v1311_v55, %v1315_v56 }
 0x109   : > { %v1909_v36 = vor.u32 %v1908_v59, %v1904_v17  ;;  %v1325_v60 = vshll.u32 %v5525_v7, 16  ;;  %v1916_v7 = vshrl.u32 %v5743_v54, 16  ;;  %v1923_v51 = vshll.u32 %v5604_v3, 16 }
 0x10a   : > { %v5730_v22 = vpop.f32.mrf.mxu3  ;;  %v3047_v5 = vrot.slane %v3045_v20, 1  ;;  %v1920_v14 = vrot.slane %v1918_v18, 1  ;;  %v1332_v4 = vshll.u32 %v5564_v39, 16  ;;  %v4499_v9 = vor.u32 %v4498_v50, %v5366_v62 }
 0x10b   : > { %1973 = vrot.lane.b32.xlu0 %v1902_v25, %s4692_s23  ;;  %v1327_v32 = vrot.slane %v1325_v60, 1  ;;  %v1925_v28 = vrot.slane %v1923_v51, 1  ;;  %v1330_v3 = vshrl.u32 %v5564_v39, 16  ;;  %v1337_v59 = vshll.u32 %v5581_v1, 16  ;;  %v5789_v1 = vld [vmem:[#allocation2 + $0xc0] sm:$0xff]  }
 0x10c   : > { %v5739_v46 = vpop.f32.mrf.mxu1  ;;  %v3048_v17 = vsel %vm1172_vm2, %v5661_v23, %v3047_v5  ;;  %v5774_v33 = vor.u32 %v1920_v14, %v1916_v7  ;;  %v1930_v23 = vshll.u32 %v5650_v10, 16  ;;  %v1334_v56 = vrot.slane %v1332_v4, 1  ;;  %v4371_v4 = vld [vmem:[#allocation2 + $0x30] sm:$0xe] }
 0x10d   : > { %v1328_v55 = vsel %vm1172_vm2, %v5719_v41, %v1327_v32  ;;  %v3217_v62 = vrot.slane %v5389_v48, 1  ;;  %v1339_v18 = vrot.slane %v1337_v59, 1  ;;  %v5793_v48 = vld [vmem:[#allocation2 + $0x30] sm:$0xff]   ;;  %v1942_v7 = vshll.u32 %v5789_v1, 16 }
 0x10e   : > { %3149 = vrot.lane.b32.xlu1 %v3048_v17, %s4692_s23  ;;  %v1335_v20 = vor.u32 %v1334_v56, %v1330_v3  ;;  %v2089_v60 = vsel %vm1494_vm10, %v5793_v48, %v5695_v45  ;;  %v1349_v51 = vshll.u32 %v5606_v52, 16  ;;  %v4370_v32 = vld [vmem:[#allocation2 + $0x30] sm:$0xf0]  ;;  %v2791_v3 = vld [vmem:[#allocation2 + $0x98] sm:$0x1]  ;;  %v1356_v56 = vshll.u32 %v5652_v16, 16 }
 0x10f   : > { %v1372_v27 = vpop.permute.xlu0 %1371  ;;  %1387 = vrot.lane.b32.xlu2 %v1316_v31, %s4692_s23  ;;  %v2919_v59 = vunpack.c.l.b16 %v2791_v3  ;;  %v6610_v3 = vld [vmem:[#allocation23_spill] sm:$0xff] }
 0x110   : > { %v1505_v47 = vsel %vm1494_vm10, %v5331_v30, %v1372_v27  ;;  %v5757_v37 = vpop.permute.xlu1 %1963  ;;  %v1914_v30 = vsel %vm1172_vm2, %v1909_v36, %v1913_v49  ;;  %v1926_v36 = vsel %vm1172_vm2, %v5774_v33, %v1925_v28  ;;  %v1928_v49 = vshrl.u32 %v5650_v10, 16  ;;  %v1374_v50 = vpop.permute.xlu2 %1373 }
 0x111   : > { %3949 = vmatmul.msk.bf16.gmra.mxu1 %vm1494_vm10, %v2078_v26  ;;  %2290 = vmatmul.bf16.gmra.mxu0 %v2086_v11  ;;  %v1932_v11 = vrot.slane %v1930_v23, 1  ;;  %v1940_v28 = vshrl.u32 %v5789_v1, 16  ;;  %v1944_v23 = vrot.slane %v1942_v7, 1  ;;  %v1351_v52 = vrot.slane %v1349_v51, 1 }
 0x112   : > { %4062 = vmatmul.msk.bf16.vlgmr.msrb.gmra.mxu3 %vm1494_vm10, %v3215_v40  ;;  %v5760_v24 = vpop.f32.mrf.mxu3  ;;  %2593 = vmatmul.bf16.gmra.mxu2 %v1505_v47  ;;  %v3216_v40 = vrot.slane %v4499_v9, 1  ;;  %v1935_v47 = vshll.u32 %v5657_v29, 16  ;;  %v1508_v29 = vsel %vm1494_vm10, %v5793_v48, %v1374_v50  ;;  %v5824_v50 = vld [vmem:[#allocation2 + $0x84] sm:$0xff]  }
 0x113   : > { %1975 = vrot.lane.b32.xlu0 %v1914_v30, %s4692_s23  ;;  %v1933_v30 = vor.u32 %v1932_v11, %v1928_v49  ;;  %v1352_v49 = vsel %vm1172_vm2, %v5774_v33, %v1351_v52  ;;  %v1354_v11 = vshrl.u32 %v5652_v16, 16  ;;  %v1511_v52 = vsel %vm1494_vm10, %v6610_v3, %v5721_v58 }
 0x114   : > { %v5770_v25 = vpop.f32.mrf.mxu1  ;;  %v3218_v5 = vsel %vm1445_vm9, %v3216_v40, %v3217_v62  ;;  %v1937_v17 = vrot.slane %v1935_v47, 1  ;;  %v4372_v40 = vor.u32 %v4371_v4, %v4370_v32  ;;  %v5816_v62 = vor.u32 %v1944_v23, %v1940_v28  ;;  %v6609_v23 = vld [vmem:[#allocation31_spill] sm:$0xff] }
 0x115   : > { %v1358_v47 = vrot.slane %v1356_v56, 1  ;;  %v3052_v28 = vshll.u32 %v5824_v50, 16  ;;  %v4501_v56 = vld [vmem:[#allocation2 + $0x3c] sm:$0xe] }
 0x116   : > { %v1938_v9 = vsel %vm1172_vm2, %v1933_v30, %v1937_v17 }
 0x117   : > { %1389 = vrot.lane.b32.xlu2 %v1328_v55, %s4692_s23  ;;  %v1947_v55 = vshll.u32 %v5723_v43, 16  ;;  %v1361_v43 = vshll.u32 %v5659_v21, 16  ;;  %v2790_v21 = vld [vmem:[#allocation2 + $0x8c] sm:$0x1] }
 0x118   : > { %v3134_v27 = vpop.permute.xlu1 %3133  ;;  %v2918_v32 = vunpack.c.l.b16 %v2790_v21  ;;  %v6612_v21 = vld [vmem:[#allocation36_spill] sm:$0xff] }
 0x119   : > { %v3262_v31 = vsel %vm1494_vm10, %v5667_v6, %v3134_v27  ;;  %v1340_v6 = vsel %vm1172_vm2, %v1335_v20, %v1339_v18  ;;  %v1949_v27 = vrot.slane %v1947_v55, 1  ;;  %v5826_v20 = vld [vmem:[#allocation2 + $0x84] sm:$0xf0]  ;;  %v1363_v51 = vrot.slane %v1361_v43, 1 }
 0x11a   : > { %v5781_v26 = vpop.f32.mrf.mxu3 }
 0x11b   : > { %1977 = vrot.lane.b32.xlu0 %v1926_v36, %s4692_s23  ;;  %v5818_v36 = vpack.c.b16 %v2919_v59, %v2919_v59  ;;  %v1950_v30 = vsel %vm1172_vm2, %v5816_v62, %v1949_v27  ;;  %v3054_v27 = vrot.slane %v3052_v28, 1 }
 0x11c   : > { %v5803_v14 = vpop.f32.mrf.mxu1 }
 0x11d   : > { %v3069_v17 = vshll.u32 %v5818_v36, 16 }
 0x11e   : > { %v1960_v7 = vpop.permute.xlu0 %1959 }
 0x11f   : > { %1391 = vrot.lane.b32.xlu2 %v1340_v6, %s4692_s23  ;;  %v1359_v6 = vor.u32 %v1358_v47, %v1354_v11  ;;  %v2092_v55 = vsel %vm1494_vm10, %v6609_v23, %v1960_v7  ;;  %v3071_v59 = vrot.slane %v3069_v17, 1  ;;  %v5853_v11 = vld [vmem:[#allocation2 + $0x9c] sm:$0xff]   ;;  %v4502_v7 = vor.u32 %v4501_v56, %v6612_v21  ;;  %v4374_v21 = vld [vmem:[#allocation2 + $0x48] sm:$0xe] }
 0x120   : > { %v5855_v47 = vld [vmem:[#allocation2 + $0x9c] sm:$0xf0] }
 0x121   : > { %3462 = vmatmul.bf16.vlgmr.msrb.gmra.mxu1 %v3262_v31  ;;  %2295 = vmatmul.bf16.gmra.mxu0 %v2089_v60  ;;  %v3219_v60 = vrot.slane %v4372_v40, 1  ;;  %v1364_v40 = vsel %vm1172_vm2, %v1359_v6, %v1363_v51  ;;  %v3074_v51 = vshrl.u32 %v5853_v11, 16  ;;  %v3222_v23 = vrot.slane %v4502_v7, 1 }
 0x122   : > { %4063 = vmatmul.msk.bf16.gmra.mxu3 %vm1494_vm10, %v3218_v5  ;;  %v5808_v45 = vpop.f32.mrf.mxu3  ;;  %2598 = vmatmul.bf16.gmra.mxu2 %v1508_v29  ;;  %v3220_v5 = vrot.slane %v5415_v13, 1  ;;  %v3136_v29 = vpop.permute.xlu1 %3135  ;;  %v5841_v13 = vpack.c.b16 %v2918_v32, %v2918_v32  ;;  %v3076_v32 = vshll.u32 %v5853_v11, 16 }
 0x123   : > { %1979 = vrot.lane.b32.xlu0 %v1938_v9, %s4692_s23  ;;  %v3265_v4 = vsel %vm1494_vm10, %v5364_v61, %v3136_v29  ;;  %v3050_v61 = vshrl.u32 %v5824_v50, 16 }
 0x124   : > { %v3221_v9 = vsel %vm1445_vm9, %v3219_v60, %v3220_v5  ;;  %v3072_v60 = vsel %vm1172_vm2, %v5719_v41, %v3071_v59  ;;  %v2792_v5 = vld [vmem:[#allocation2 + $0xa4] sm:$0x1] }
 0x125   : > { %v3055_v29 = vor.u32 %v3054_v27, %v3050_v61  ;;  %v2920_v17 = vunpack.c.l.b16 %v2792_v5  ;;  %v4479_v5 = vld [vmem:[#allocation2 + $0x48] sm:$0xff]  }
 0x127   : > { %1393 = vrot.lane.b32.xlu2 %v1352_v49, %s4692_s23  ;;  %v3057_v49 = vshll.u32 %v5841_v13, 16  ;;  %v5866_v6 = vpack.c.b16 %v2920_v17, %v2920_v17  ;;  %v4373_v17 = vld [vmem:[#allocation2 + $0x48] sm:$0xf0] }
 0x129   : > { %v3081_v28 = vshll.u32 %v5866_v6, 16 }
 0x12a   : > { %v5828_v18 = vpop.f32.mrf.mxu1  ;;  %v5830_v31 = vpop.f32.mrf.mxu3 }
 0x12b   : > { %1981 = vrot.lane.b32.xlu0 %v1950_v30, %s4692_s23  ;;  %v3059_v30 = vrot.slane %v3057_v49, 1  ;;  %v3083_v59 = vrot.slane %v3081_v28, 1  ;;  %v6617_v28 = vld [vmem:[#allocation40_spill] sm:$0xff] }
 0x12f   : > { %1395 = vrot.lane.b32.xlu2 %v1364_v40, %s4692_s23 }
 0x130   : > { %v1962_v61 = vpop.permute.xlu2 %1961 }
 0x131   : > { %3467 = vmatmul.bf16.gmra.mxu1 %v3265_v4  ;;  %2300 = vmatmul.bf16.gmra.mxu0 %v2092_v55  ;;  %v3060_v4 = vsel %vm1172_vm2, %v3055_v29, %v3059_v30  ;;  %v6614_v55 = vld [vmem:[#allocation37_spill] sm:$0xff]  ;;  %v2095_v29 = vsel %vm1494_vm10, %v4479_v5, %v1962_v61  ;;  %v6620_v61 = vld [vmem:[#allocation19_spill] sm:$0xff] }
 0x132   : > { %4064 = vmatmul.msk.bf16.gmra.mxu3 %vm1494_vm10, %v3221_v9  ;;  %v5857_v43 = vpop.f32.mrf.mxu1  ;;  %v5859_v58 = vpop.f32.mrf.mxu3  ;;  %2603 = vmatmul.bf16.gmra.mxu2 %v1511_v52  ;;  %v3078_v9 = vrot.slane %v3076_v32, 1  ;;  %v3223_v3 = vrot.slane %v6614_v55, 1 }
 0x133   : > { %6611 = vst [vmem:[#allocation31_spill] sm:$0xff] %v5859_v58  ;;  %3153 = vrot.lane.b32.xlu0 %v3072_v60, %s4692_s23  ;;  %v3138_v52 = vpop.permute.xlu1 %3137 }
 0x134   : > { %v3079_v56 = vor.u32 %v3078_v9, %v3074_v51  ;;  %v3268_v49 = vsel %vm1494_vm10, %v5793_v48, %v3138_v52  ;;  %v3224_v60 = vsel %vm1445_vm9, %v3222_v23, %v3223_v3  ;;  %v4375_v51 = vor.u32 %v4374_v21, %v4373_v17  ;;  %v6619_v52 = vld [vmem:[#allocation35_spill] sm:$0xff]  ;;  %v2794_v21 = vld [vmem:[#allocation2 + $0xbc] sm:$0x1] }
 0x135   : > { %v3226_v23 = vrot.slane %v6617_v28, 1 }
 0x136   : > { %v3084_v27 = vsel %vm1172_vm2, %v3079_v56, %v3083_v59  ;;  %v3225_v9 = vrot.slane %v4375_v51, 1 }
 0x137   : > { %3151 = vrot.lane.b32.xlu2 %v3060_v4, %s4692_s23  ;;  %3155 = vrot.lane.b32.xlu1 %v3084_v27, %s4692_s23  ;;  %v2098_v27 = vsel %vm1494_vm10, %v6620_v61, %v5757_v37  ;;  %v6624_v37 = vld [vmem:[#allocation15_spill] sm:$0xff] }
 0x138   : > { %v3227_v59 = vsel %vm1445_vm9, %v3225_v9, %v3226_v23  ;;  %v6623_v9 = vld [vmem:[#allocation42_spill] sm:$0xff] }
 0x13a   : > { %v5872_v41 = vpop.f32.mrf.mxu3 }
 0x13b   : > { %6613 = vst [vmem:[#allocation23_spill] sm:$0xff] %v5872_v41  ;;  %v5876_v40 = vpop.f32.mrf.mxu1  ;;  %v3140_v55 = vpop.permute.xlu1 %3139 }
 0x13c   : > { %v3271_v56 = vsel %vm1494_vm10, %v6619_v52, %v3140_v55 }
 0x141   : > { %3472 = vmatmul.bf16.gmra.mxu1 %v3268_v49  ;;  %2305 = vmatmul.bf16.gmra.mxu0 %v2095_v29  ;;  %v4504_v49 = vld [vmem:[#allocation2 + $0x54] sm:$0xe]  ;;  %v5904_v29 = vld [vmem:[#allocation2 + $0xb4] sm:$0xf0] }
 0x142   : > { %4065 = vmatmul.msk.bf16.gmra.mxu3 %vm1494_vm10, %v3224_v60  ;;  %v5885_v30 = vpop.f32.mrf.mxu3  ;;  %v5902_v60 = vld [vmem:[#allocation2 + $0xb4] sm:$0xff]   ;;  %v4505_v28 = vor.u32 %v4504_v49, %v6623_v9  ;;  %v2793_v9 = vld [vmem:[#allocation2 + $0xb0] sm:$0x1] }
 0x143   : > { %6615 = vst [vmem:[#allocation36_spill] sm:$0xff] %v5885_v30  ;;  %v5887_v7 = vpop.f32.mrf.mxu1  ;;  %v3098_v52 = vshrl.u32 %v5902_v60, 16 }
 0x146   : > { %v1378_v32 = vpop.permute.xlu0 %1377 }
 0x147   : > { %v1514_v48 = vsel %vm1494_vm10, %v4479_v5, %v1378_v32  ;;  %v1380_v32 = vpop.permute.xlu2 %1379 }
 0x148   : > { %2608 = vmatmul.bf16.gmra.mxu2 %v1514_v48  ;;  %v2922_v48 = vunpack.c.l.b16 %v2794_v21  ;;  %v1517_v55 = vsel %vm1494_vm10, %v6624_v37, %v1380_v32 }
 0x149   : > { %v3142_v49 = vpop.permute.xlu1 %3141 }
 0x14a   : > { %v5890_v4 = vpop.f32.mrf.mxu3  ;;  %v5911_v23 = vpack.c.b16 %v2922_v48, %v2922_v48  ;;  %v3274_v58 = vsel %vm1494_vm10, %v4479_v5, %v3142_v49  ;;  %v4377_v5 = vld [vmem:[#allocation2 + $0x60] sm:$0xe]  ;;  %v2795_v49 = vld [vmem:[#allocation2 + $0xc8] sm:$0x1] }
 0x14b   : > { %6616 = vst [vmem:[#allocation37_spill] sm:$0xff] %v5890_v4  ;;  %v5893_v3 = vpop.f32.mrf.mxu1  ;;  %v6625_v4 = vld [vmem:[#allocation43_spill] sm:$0xff] }
 0x14c   : > { %6618 = vst [vmem:[#allocation40_spill] sm:$0xff] %v5893_v3  ;;  %v3229_v21 = vrot.slane %v6625_v4, 1  ;;  %v2921_v3 = vunpack.c.l.b16 %v2793_v9  ;;  %v4480_v4 = vld [vmem:[#allocation2 + $0x60] sm:$0xff]  }
 0x14f   : > { %v1382_v32 = vpop.permute.xlu2 %1381 }
 0x151   : > { %3477 = vmatmul.bf16.gmra.mxu1 %v3271_v56  ;;  %2310 = vmatmul.bf16.gmra.mxu0 %v2098_v27  ;;  %v3100_v56 = vshll.u32 %v5902_v60, 16 }
 0x152   : > { %4066 = vmatmul.msk.bf16.gmra.mxu3 %vm1494_vm10, %v3227_v59  ;;  %v5906_v17 = vpop.f32.mrf.mxu3  ;;  %v3105_v59 = vshll.u32 %v5911_v23, 16 }
 0x153   : > { %6621 = vst [vmem:[#allocation35_spill] sm:$0xff] %v5906_v17  ;;  %v5908_v51 = vpop.f32.mrf.mxu1  ;;  %v3102_v61 = vrot.slane %v3100_v56, 1  ;;  %v3228_v17 = vrot.slane %v4505_v28, 1  ;;  %v5927_v28 = vpack.c.b16 %v2921_v3, %v2921_v3 }
 0x154   : > { %6622 = vst [vmem:[#allocation19_spill] sm:$0xff] %v5908_v51  ;;  %v3107_v30 = vrot.slane %v3105_v59, 1  ;;  %v1966_v51 = vpop.permute.xlu0 %1965  ;;  %v5932_v59 = vpop.f32.mrf.mxu2 }
 0x155   : > { %v3103_v48 = vor.u32 %v3102_v61, %v3098_v52  ;;  %v2101_v56 = vsel %vm1494_vm10, %v4480_v4, %v1966_v51  ;;  %v3093_v52 = vshll.u32 %v5927_v28, 16  ;;  %6626 = vst [vmem:[#allocation42_spill] sm:$0xff] %v5932_v59  ;;  %v4376_v61 = vld [vmem:[#allocation2 + $0x60] sm:$0xf0] }
 0x157   : > { %v3108_v37 = vsel %vm1172_vm2, %v3103_v48, %v3107_v30  ;;  %v3095_v30 = vrot.slane %v3093_v52, 1  ;;  %v3232_v52 = vrot.slane %v5627_v0, 1 }
 0x158   : > { %2613 = vmatmul.bf16.gmra.mxu2 %v1517_v55  ;;  %v3230_v55 = vsel %vm1445_vm9, %v3228_v17, %v3229_v21  ;;  %3159 = vrot.lane.b32.xlu0 %v3108_v37, %s4692_s23  ;;  %v2923_v21 = vunpack.c.l.b16 %v2795_v49  ;;  %v1520_v37 = vsel %vm1494_vm10, %v4480_v4, %v1382_v32  ;;  %v6630_v32 = vld [vmem:[#allocation41_spill] sm:$0xff] }
 0x159   : > { %v3096_v3 = vsel %vm1172_vm2, %v5774_v33, %v3095_v30  ;;  %v1384_v48 = vpop.permute.xlu2 %1383 }
 0x15a   : > { %v5918_v27 = vpop.f32.mrf.mxu3  ;;  %3157 = vrot.lane.b32.xlu2 %v3096_v3, %s4692_s23  ;;  %v5941_v9 = vpack.c.b16 %v2923_v21, %v2923_v21 }
 0x15c   : > { %v5946_v33 = vpop.f32.mrf.mxu2 }
 0x15d   : > { %6628 = vst [vmem:[#allocation43_spill] sm:$0xff] %v5946_v33 }
 0x15e   : > { %v5922_v41 = vpop.f32.mrf.mxu1 }
 0x160   : > { %v1968_v49 = vpop.permute.xlu0 %1967 }
 0x161   : > { %3482 = vmatmul.bf16.gmra.mxu1 %v3274_v58  ;;  %2315 = vmatmul.bf16.gmra.mxu0 %v2101_v56  ;;  %v4378_v58 = vor.u32 %v4377_v5, %v4376_v61 }
 0x162   : > { %4067 = vmatmul.msk.bf16.gmra.mxu3 %vm1494_vm10, %v3230_v55  ;;  %v3117_v55 = vshll.u32 %v5941_v9, 16 }
 0x163   : > { %v3231_v56 = vrot.slane %v4378_v58, 1  ;;  %v2104_v58 = vsel %vm1494_vm10, %v5312_v15, %v1968_v49  ;;  %v1523_v15 = vsel %vm1494_vm10, %v5314_v12, %v1384_v48 }
 0x164   : > { %v3119_v59 = vrot.slane %v3117_v55, 1  ;;  %v4507_v55 = vld [vmem:[#allocation2 + $0x6c] sm:$0xe] }
 0x165   : > { %v5934_v17 = vpop.f32.mrf.mxu3  ;;  %v3233_v21 = vsel %vm1445_vm9, %v3231_v56, %v3232_v52 }
 0x166   : > { %6627 = vst [vmem:[#allocation15_spill] sm:$0xff] %v5934_v17  ;;  %v5939_v51 = vpop.f32.mrf.mxu1  ;;  %v3144_v17 = vpop.permute.xlu1 %3143  ;;  %v3120_v61 = vsel %vm1172_vm2, %v5816_v62, %v3119_v59 }
 0x167   : > { %3161 = vrot.lane.b32.xlu1 %v3120_v61, %s4692_s23  ;;  %v3277_v3 = vsel %vm1494_vm10, %v6630_v32, %v3144_v17  ;;  %v4508_v17 = vor.u32 %v4507_v55, %v5675_v19  ;;  %v3235_v32 = vrot.slane %v5705_v42, 1 }
 0x168   : > { %2618 = vmatmul.bf16.gmra.mxu2 %v1520_v37  ;;  %v1386_v37 = vpop.permute.xlu2 %1385 }
 0x169   : > { %v3234_v49 = vrot.slane %v4508_v17, 1  ;;  %v4379_v17 = vld [vmem:[#allocation2 + $0x78] sm:$0xf0] }
 0x16b   : > { %v3236_v55 = vsel %vm1445_vm9, %v3234_v49, %v3235_v32 }
 0x16d   : > { %v5948_v30 = vpop.f32.mrf.mxu3  ;;  %v1970_v61 = vpop.permute.xlu0 %1969 }
 0x16e   : > { %6629 = vst [vmem:[#allocation44_spill] sm:$0xff] %v5948_v30  ;;  %v5953_v5 = vpop.f32.mrf.mxu1  ;;  %v5958_v0 = vpop.f32.mrf.mxu0  ;;  %v2107_v12 = vsel %vm1494_vm10, %v5629_v53, %v1970_v61  ;;  %v1526_v61 = vsel %vm1494_vm10, %v5629_v53, %v1386_v37 }
 0x170   : > { %v5974_v52 = vpop.permute.xlu2 %1387 }
 0x171   : > { %3487 = vmatmul.bf16.gmra.mxu1 %v3277_v3  ;;  %2320 = vmatmul.bf16.gmra.mxu0 %v2104_v58  ;;  %v3146_v3 = vpop.permute.xlu1 %3145 }
 0x172   : > { %4068 = vmatmul.msk.bf16.gmra.mxu3 %vm1494_vm10, %v3233_v21  ;;  %v3280_v19 = vsel %vm1494_vm10, %v4480_v4, %v3146_v3 }
 0x175   : > { %v5963_v62 = vpop.f32.mrf.mxu3  ;;  %v5965_v59 = vpop.f32.mrf.mxu2 }
 0x176   : > { %6631 = vst [vmem:[#allocation41_spill] sm:$0xff] %v5963_v62  ;;  %v5967_v33 = vpop.f32.mrf.mxu1  ;;  %v5970_v56 = vpop.f32.mrf.mxu0 }
 0x177   : > { %6632 = vst [vmem:[#allocation45_spill] sm:$0xff] %v5965_v59  ;;  %v1972_v48 = vpop.permute.xlu0 %1971 }
 0x178   : > { %6633 = vst [vmem:[#allocation46_spill] sm:$0xff] %v5970_v56  ;;  %2623 = vmatmul.bf16.gmra.mxu2 %v1523_v15  ;;  %v5990_v42 = vpop.permute.xlu2 %1389  ;;  %v4380_v15 = vld [vmem:[#allocation2 + $0x78] sm:$0xe]  ;;  %v2796_v56 = vld [vmem:[#allocation2 + $0xd4] sm:$0x1] }
 0x179   : > { %v4381_v49 = vor.u32 %v4380_v15, %v4379_v17 }
 0x17d   : > { %v5977_v21 = vpop.f32.mrf.mxu3  ;;  %v5979_v58 = vpop.f32.mrf.mxu2 }
 0x17e   : > { %6634 = vst [vmem:[#allocation47_spill] sm:$0xff] %v5977_v21  ;;  %v5981_v59 = vpop.f32.mrf.mxu1  ;;  %v5985_v62 = vpop.f32.mrf.mxu0 }
 0x17f   : > { %6635 = vst [vmem:[#allocation48_spill] sm:$0xff] %v5979_v58  ;;  %v1974_v3 = vpop.permute.xlu0 %1973 }
 0x180   : > { %6636 = vst [vmem:[#allocation49_spill] sm:$0xff] %v5985_v62  ;;  %v3238_v62 = vrot.slane %v5741_v34, 1  ;;  %v6011_v15 = vpop.permute.xlu2 %1391 }
 0x181   : > { %3492 = vmatmul.bf16.gmra.mxu1 %v3280_v19  ;;  %2325 = vmatmul.bf16.gmra.mxu0 %v2107_v12  ;;  %v6002_v19 = vld [vmem:[#allocation2 + $0xcc] sm:$0xff]   ;;  %v3237_v12 = vrot.slane %v4381_v49, 1 }
 0x182   : > { %4069 = vmatmul.msk.bf16.gmra.mxu3 %vm1494_vm10, %v3236_v55  ;;  %v6004_v55 = vld [vmem:[#allocation2 + $0xcc] sm:$0xf0]  ;;  %v3124_v34 = vshll.u32 %v6002_v19, 16 }
 0x183   : > { %v3239_v37 = vsel %vm1445_vm9, %v3237_v12, %v3238_v62 }
 0x184   : > { %v3126_v30 = vrot.slane %v3124_v34, 1 }
 0x185   : > { %v5992_v58 = vpop.f32.mrf.mxu3  ;;  %v5994_v21 = vpop.f32.mrf.mxu2 }
 0x186   : > { %6637 = vst [vmem:[#allocation50_spill] sm:$0xff] %v5992_v58  ;;  %v5996_v4 = vpop.f32.mrf.mxu1  ;;  %v5998_v32 = vpop.f32.mrf.mxu0 }
 0x187   : > { %6638 = vst [vmem:[#allocation51_spill] sm:$0xff] %v5994_v21  ;;  %v3148_v58 = vpop.permute.xlu1 %3147 }
 0x188   : > { %6639 = vst [vmem:[#allocation52_spill] sm:$0xff] %v5996_v4  ;;  %2628 = vmatmul.bf16.gmra.mxu2 %v1526_v61  ;;  %v2924_v4 = vunpack.c.l.b16 %v2796_v56  ;;  %v3283_v53 = vsel %vm1494_vm10, %v5673_v63, %v3148_v58  ;;  %v2110_v56 = vsel %vm1494_vm10, %v5472_v8, %v1972_v48  ;;  %v1976_v58 = vpop.permute.xlu0 %1975 }
 0x189   : > { %6640 = vst [vmem:[#allocation53_spill] sm:$0xff] %v5998_v32 }
 0x18a   : > { %v6018_v61 = vpack.c.b16 %v2924_v4, %v2924_v4 }
 0x18d   : > { %v6007_v21 = vpop.f32.mrf.mxu3  ;;  %v6009_v17 = vpop.f32.mrf.mxu2 }
 0x18e   : > { %6641 = vst [vmem:[#allocation54_spill] sm:$0xff] %v6007_v21  ;;  %v6013_v32 = vpop.f32.mrf.mxu1  ;;  %v6021_v49 = vpop.f32.mrf.mxu0  ;;  %v4510_v21 = vld [vmem:[#allocation2 + $0x84] sm:$0xe] }
 0x18f   : > { %6642 = vst [vmem:[#allocation55_spill] sm:$0xff] %v6009_v17  ;;  %v3122_v17 = vshrl.u32 %v6002_v19, 16  ;;  %v4511_v48 = vor.u32 %v4510_v21, %v5826_v20 }
 0x190   : > { %6643 = vst [vmem:[#allocation56_spill] sm:$0xff] %v6013_v32  ;;  %v3129_v32 = vshll.u32 %v6018_v61, 16 }
 0x191   : > { %6644 = vst [vmem:[#allocation57_spill] sm:$0xff] %v6021_v49  ;;  %3497 = vmatmul.bf16.gmra.mxu1 %v3283_v53  ;;  %2330 = vmatmul.bf16.gmra.mxu0 %v2110_v56  ;;  %v3127_v63 = vor.u32 %v3126_v30, %v3122_v17  ;;  %v6037_v53 = vpop.permute.xlu2 %1393  ;;  %v1529_v30 = vsel %vm1494_vm10, %v5474_v38, %v5974_v52  ;;  %v3241_v17 = vrot.slane %v5841_v13, 1  ;;  %v4382_v52 = vld [vmem:[#allocation2 + $0x90] sm:$0xf0] }
 0x192   : > { %4070 = vmatmul.msk.bf16.gmra.mxu3 %vm1494_vm10, %v3239_v37  ;;  %v3131_v62 = vrot.slane %v3129_v32, 1  ;;  %v3240_v32 = vrot.slane %v4511_v48, 1  ;;  %v3150_v37 = vpop.permute.xlu1 %3149  ;;  %v2113_v38 = vsel %vm1494_vm10, %v5693_v2, %v1974_v3  ;;  %v4383_v48 = vld [vmem:[#allocation2 + $0x90] sm:$0xe]  ;;  %v1532_v3 = vsel %vm1494_vm10, %v5693_v2, %v5990_v42 }
 0x194   : > { %v3132_v12 = vsel %vm1172_vm2, %v3127_v63, %v3131_v62  ;;  %v1978_v63 = vpop.permute.xlu0 %1977  ;;  %v3242_v21 = vsel %vm1445_vm9, %v3240_v32, %v3241_v17  ;;  %v4384_v32 = vor.u32 %v4383_v48, %v4382_v52 }
 0x195   : > { %v3552_v4 = vpop.f32.mrf.mxu3  ;;  %v6029_v49 = vpop.f32.mrf.mxu2  ;;  %3163 = vrot.lane.b32.xlu2 %v3132_v12, %s4692_s23 }
 0x196   : > { %6645 = vst [vmem:[#allocation58_spill] sm:$0xff] %v6029_v49  ;;  %v6032_v8 = vpop.f32.mrf.mxu1  ;;  %v6035_v34 = vpop.f32.mrf.mxu0  ;;  %v4481_v49 = vld [vmem:[#allocation2 + $0x78] sm:$0xff]  }
 0x197   : > { %6646 = vst [vmem:[#allocation59_spill] sm:$0xff] %v6032_v8  ;;  %v3286_v20 = vsel %vm1494_vm10, %v4481_v49, %v3150_v37 }
 0x198   : > { %6647 = vst [vmem:[#allocation60_spill] sm:$0xff] %v6035_v34  ;;  %2633 = vmatmul.bf16.gmra.mxu2 %v1529_v30 }
 0x199   : > { %v6053_v13 = vpop.permute.xlu2 %1395 }
 0x19c   : > { %v1980_v37 = vpop.permute.xlu0 %1979 }
 0x19d   : > { %v3554_v56 = vpop.f32.mrf.mxu3  ;;  %v6043_v62 = vpop.f32.mrf.mxu2 }
 0x19e   : > { %6648 = vst [vmem:[#allocation61_spill] sm:$0xff] %v6043_v62  ;;  %v3463_v12 = vpop.f32.mrf.mxu1  ;;  %v6049_v8 = vpop.f32.mrf.mxu0 }
 0x19f   : > { %v6047_v34 = vadd.f32 %v3552_v4, %v3463_v12  ;;  %6649 = vst [vmem:[#allocation62_spill] sm:$0xff] %v6049_v8  ;;  %v3243_v12 = vrot.slane %v4384_v32, 1  ;;  %v4513_v32 = vld [vmem:[#allocation2 + $0x9c] sm:$0xe] }
 0x1a1   : > { %3502 = vmatmul.bf16.gmra.mxu1 %v3286_v20  ;;  %2335 = vmatmul.bf16.gmra.mxu0 %v2113_v38  ;;  %v3244_v20 = vrot.slane %v5818_v36, 1 }
 0x1a2   : > { %4071 = vmatmul.msk.bf16.gmra.mxu3 %vm1494_vm10, %v3242_v21  ;;  %v3152_v21 = vpop.permute.xlu2 %3151 }
 0x1a4   : > { %v6077_v36 = vpop.permute.xlu0 %1981 }
 0x1a5   : > { %v3557_v30 = vpop.f32.mrf.mxu3  ;;  %v6056_v62 = vpop.f32.mrf.mxu2 }
 0x1a6   : > { %6650 = vst [vmem:[#allocation63_spill] sm:$0xff] %v6056_v62  ;;  %v3465_v49 = vpop.f32.mrf.mxu1  ;;  %v6060_v17 = vpop.f32.mrf.mxu0  ;;  %v3289_v62 = vsel %vm1494_vm10, %v5824_v50, %v3152_v21 }
 0x1a7   : > { %v6058_v4 = vadd.f32 %v3554_v56, %v3465_v49  ;;  %v3245_v56 = vsel %vm1445_vm9, %v3243_v12, %v3244_v20  ;;  %v2116_v49 = vsel %vm1494_vm10, %v5562_v57, %v1976_v58  ;;  %v4514_v12 = vor.u32 %v4513_v32, %v5855_v47 }
 0x1a8   : > { %2638 = vmatmul.bf16.gmra.mxu2 %v1532_v3  ;;  %v1535_v57 = vsel %vm1494_vm10, %v5564_v39, %v6011_v15  ;;  %v3247_v20 = vrot.slane %v5866_v6, 1  ;;  %v2119_v39 = vsel %vm1494_vm10, %v5743_v54, %v1978_v63  ;;  %v4385_v15 = vld [vmem:[#allocation2 + $0xa8] sm:$0xf0] }
 0x1ac   : > { %v3154_v21 = vpop.permute.xlu0 %3153 }
 0x1ad   : > { %v3559_v38 = vpop.f32.mrf.mxu3  ;;  %v6075_v42 = vpop.f32.mrf.mxu2  ;;  %v3292_v47 = vsel %vm1494_vm10, %v5693_v2, %v3154_v21 }
 0x1ae   : > { %v3468_v8 = vpop.f32.mrf.mxu1  ;;  %v6071_v48 = vpop.f32.mrf.mxu0  ;;  %6651 = vst [vmem:[#allocation64_spill] sm:$0xff] %v6075_v42 }
 0x1af   : > { %v6069_v52 = vadd.f32 %v3557_v30, %v3468_v8 }
 0x1b1   : > { %3507 = vmatmul.bf16.gmra.mxu1 %v3289_v62  ;;  %2340 = vmatmul.bf16.gmra.mxu0 %v2116_v49  ;;  %v3246_v62 = vrot.slane %v4514_v12, 1  ;;  %v4386_v12 = vld [vmem:[#allocation2 + $0xa8] sm:$0xe] }
 0x1b2   : > { %4072 = vmatmul.msk.bf16.gmra.mxu3 %vm1494_vm10, %v3245_v56  ;;  %v4387_v2 = vor.u32 %v4386_v12, %v4385_v15 }
 0x1b4   : > { %v3249_v63 = vrot.slane %v4387_v2, 1  ;;  %v4516_v2 = vld [vmem:[#allocation2 + $0xb4] sm:$0xe] }
 0x1b5   : > { %v3562_v3 = vpop.f32.mrf.mxu3  ;;  %v6088_v58 = vpop.f32.mrf.mxu2 }
 0x1b6   : > { %v3470_v50 = vpop.f32.mrf.mxu1  ;;  %v6083_v30 = vpop.f32.mrf.mxu0  ;;  %6653 = vst [vmem:[#allocation66_spill] sm:$0xff] %v6088_v58 }
 0x1b7   : > { %v6081_v8 = vadd.f32 %v3559_v38, %v3470_v50  ;;  %6652 = vst [vmem:[#allocation65_spill] sm:$0xff] %v6083_v30  ;;  %v3248_v38 = vsel %vm1445_vm9, %v3246_v62, %v3247_v20  ;;  %v1538_v62 = vsel %vm1494_vm10, %v5743_v54, %v6037_v53  ;;  %v3250_v20 = vrot.slane %v5927_v28, 1  ;;  %v4307_v30 = vld [vmem:[#allocation2 + $0x18] sm:$0xf0] }
 0x1b8   : > { %2643 = vmatmul.bf16.gmra.mxu2 %v1535_v57  ;;  %v2122_v53 = vsel %vm1494_vm10, %v5650_v10, %v1980_v37  ;;  %v3253_v37 = vrot.slane %v5911_v23, 1 }
 0x1bd   : > { %v3564_v56 = vpop.f32.mrf.mxu3  ;;  %v6101_v6 = vpop.f32.mrf.mxu2 }
 0x1be   : > { %v3473_v49 = vpop.f32.mrf.mxu1  ;;  %v6096_v50 = vpop.f32.mrf.mxu0  ;;  %6655 = vst [vmem:[#allocation68_spill] sm:$0xff] %v6101_v6 }
 0x1bf   : > { %v6094_v32 = vadd.f32 %v3562_v3, %v3473_v49  ;;  %6654 = vst [vmem:[#allocation67_spill] sm:$0xff] %v6096_v50  ;;  %v3156_v49 = vpop.permute.xlu1 %3155 }
 0x1c0   : > { %v3295_v15 = vsel %vm1494_vm10, %v5853_v11, %v3156_v49  ;;  %v4517_v11 = vor.u32 %v4516_v2, %v5904_v29 }
 0x1c1   : > { %3512 = vmatmul.bf16.gmra.mxu1 %v3292_v47  ;;  %2345 = vmatmul.bf16.gmra.mxu0 %v2119_v39 }
 0x1c2   : > { %4073 = vmatmul.msk.bf16.gmra.mxu3 %vm1494_vm10, %v3248_v38  ;;  %v3252_v10 = vrot.slane %v4517_v11, 1  ;;  %v6662_v11 = vld [vmem:[#allocation12_spill] sm:$0xff] }
 0x1c5   : > { %v3567_v57 = vpop.f32.mrf.mxu3 }
 0x1c6   : > { %v3475_v58 = vpop.f32.mrf.mxu1  ;;  %v6105_v3 = vpop.f32.mrf.mxu0 }
 0x1c7   : > { %v6103_v21 = vadd.f32 %v3564_v56, %v3475_v58  ;;  %6656 = vst [vmem:[#allocation69_spill] sm:$0xff] %v6105_v3  ;;  %v3251_v58 = vsel %vm1445_vm9, %v3249_v63, %v3250_v20  ;;  %v1541_v63 = vsel %vm1494_vm10, %v5652_v16, %v6053_v13  ;;  %v3158_v20 = vpop.permute.xlu2 %3157  ;;  %v2125_v16 = vsel %vm1494_vm10, %v5789_v1, %v6077_v36  ;;  %v4519_v13 = vld [vmem:[#allocation2 + $0xc] sm:$0xe]  ;;  %v6665_v3 = vld [vmem:[#allocation16_spill] sm:$0xff] }
 0x1c8   : > { %2648 = vmatmul.bf16.gmra.mxu2 %v1538_v62  ;;  %v3298_v29 = vsel %vm1494_vm10, %v5743_v54, %v3158_v20  ;;  %v4388_v54 = vld [vmem:[#allocation2 + $0xc0] sm:$0xf0]  ;;  %v4389_v20 = vld [vmem:[#allocation2 + $0xc0] sm:$0xe]  ;;  %v2032_v50 = vrot.slane %v6665_v3, 1 }
 0x1cb   : > { %v6111_v38 = vpop.f32.mrf.mxu2 }
 0x1cc   : > { %6657 = vst [vmem:[#allocation70_spill] sm:$0xff] %v6111_v38 }
 0x1cd   : > { %v3569_v47 = vpop.f32.mrf.mxu3 }
 0x1ce   : > { %v3478_v39 = vpop.f32.mrf.mxu1  ;;  %v6118_v12 = vpop.f32.mrf.mxu0 }
 0x1cf   : > { %v6116_v56 = vadd.f32 %v3567_v57, %v3478_v39  ;;  %6658 = vst [vmem:[#allocation71_spill] sm:$0xff] %v6118_v12 }
 0x1d1   : > { %3517 = vmatmul.bf16.gmra.mxu1 %v3295_v15  ;;  %2350 = vmatmul.bf16.gmra.mxu0 %v2122_v53  ;;  %v4304_v15 = vld [vmem:[#allocation2] sm:$0xf0] }
 0x1d2   : > { %4074 = vmatmul.msk.bf16.gmra.mxu3 %vm1494_vm10, %v3251_v58  ;;  %v4305_v58 = vld [vmem:[#allocation2] sm:$0xe] }
 0x1d3   : > { %v6123_v62 = vpop.f32.mrf.mxu2  ;;  %v4306_v23 = vor.u32 %v4305_v58, %v4304_v15  ;;  %v6664_v15 = vld [vmem:[#allocation13_spill] sm:$0xff] }
 0x1d4   : > { %6659 = vst [vmem:[#allocation72_spill] sm:$0xff] %v6123_v62  ;;  %v4520_v58 = vor.u32 %v4519_v13, %v6664_v15  ;;  %v6668_v15 = vld [vmem:[#allocation17_spill] sm:$0xff] }
 0x1d5   : > { %v3572_v28 = vpop.f32.mrf.mxu3 }
 0x1d6   : > { %v3480_v38 = vpop.f32.mrf.mxu1  ;;  %v6128_v57 = vpop.f32.mrf.mxu0 }
 0x1d7   : > { %v6126_v49 = vadd.f32 %v3569_v47, %v3480_v38  ;;  %6660 = vst [vmem:[#allocation73_spill] sm:$0xff] %v6128_v57  ;;  %v3254_v47 = vsel %vm1445_vm9, %v3252_v10, %v3253_v37  ;;  %v1446_v57 = vrot.slane %v4306_v23, 1  ;;  %v4390_v37 = vor.u32 %v4389_v20, %v4388_v54  ;;  %v3160_v23 = vpop.permute.xlu0 %3159 }
 0x1d8   : > { %2653 = vmatmul.bf16.gmra.mxu2 %v1541_v63  ;;  %v1447_v63 = vrot.slane %v6662_v11, 1  ;;  %v2031_v11 = vrot.slane %v4520_v58, 1  ;;  %v3301_v20 = vsel %vm1494_vm10, %v5902_v60, %v3160_v23  ;;  %v1450_v58 = vrot.slane %v6668_v15, 1  ;;  %v4336_v23 = vld [vmem:[#allocation2 + $0x18] sm:$0xf0]  ;;  %v6669_v15 = vld [vmem:[#allocation18_spill] sm:$0xff] }
 0x1da   : > { %v1448_v36 = vsel %vm1445_vm9, %v1446_v57, %v1447_v63 }
 0x1db   : > { %v6134_v53 = vpop.f32.mrf.mxu2 }
 0x1dd   : > { %v3574_v39 = vpop.f32.mrf.mxu3 }
 0x1de   : > { %v3483_v62 = vpop.f32.mrf.mxu1  ;;  %v6141_v2 = vpop.f32.mrf.mxu0 }
 0x1df   : > { %v6139_v38 = vadd.f32 %v3572_v28, %v3483_v62 }
 0x1e1   : > { %6661 = vst [vmem:[#allocation74_spill] sm:$0xff] %v6139_v38  ;;  %3522 = vmatmul.bf16.gmra.mxu1 %v3298_v29  ;;  %2355 = vmatmul.bf16.gmra.mxu0 %v2125_v16  ;;  %v4522_v29 = vld [vmem:[#allocation2 + $0xc] sm:$0xe]  ;;  %v3256_v16 = vrot.slane %v5941_v9, 1  ;;  %v4308_v38 = vld [vmem:[#allocation2 + $0x18] sm:$0xe] }
 0x1e2   : > { %4075 = vmatmul.msk.bf16.gmra.mxu3 %vm1494_vm10, %v3254_v47  ;;  %v3255_v47 = vrot.slane %v4390_v37, 1  ;;  %v6667_v9 = vld [vmem:[#allocation14_spill] sm:$0xff] }
 0x1e3   : > { %v6148_v28 = vpop.f32.mrf.mxu2  ;;  %v4523_v37 = vor.u32 %v4522_v29, %v6667_v9  ;;  %v3162_v9 = vpop.permute.xlu1 %3161 }
 0x1e4   : > { %v3257_v57 = vsel %vm1445_vm9, %v3255_v47, %v3256_v16  ;;  %v4337_v47 = vld [vmem:[#allocation2 + $0x18] sm:$0xe] }
 0x1e5   : > { %v3577_v10 = vpop.f32.mrf.mxu3  ;;  %v1449_v3 = vrot.slane %v4523_v37, 1 }
 0x1e6   : > { %v3485_v62 = vpop.f32.mrf.mxu1  ;;  %v6152_v6 = vpop.f32.mrf.mxu0 }
 0x1e7   : > { %v6150_v12 = vadd.f32 %v3574_v39, %v3485_v62  ;;  %v2033_v62 = vsel %vm1445_vm9, %v2031_v11, %v2032_v50  ;;  %v1451_v11 = vsel %vm1445_vm9, %v1449_v3, %v1450_v58 }
 0x1e8   : > { %3998 = vmatmul.msk.bf16.vlgmr.msrb.gmra.mxu2 %vm1494_vm10, %v1448_v36  ;;  %v4525_v36 = vld [vmem:[#allocation2 + $0xcc] sm:$0xe] }
 0x1e9   : > { %6663 = vst [vmem:[#allocation12_spill] sm:$0xff] %v6150_v12 }
 0x1eb   : > { %v6159_v54 = vpop.f32.mrf.mxu2 }
 0x1ed   : > { %v3579_v42 = vpop.f32.mrf.mxu3 }
 0x1ee   : > { %v3488_v39 = vpop.f32.mrf.mxu1  ;;  %v6166_v63 = vpop.f32.mrf.mxu0 }
 0x1ef   : > { %v6164_v13 = vadd.f32 %v3577_v10, %v3488_v39  ;;  %v4526_v39 = vor.u32 %v4525_v36, %v6004_v55  ;;  %v3304_v36 = vsel %vm1494_vm10, %v5789_v1, %v3162_v9 }
 0x1f1   : > { %6666 = vst [vmem:[#allocation13_spill] sm:$0xff] %v6164_v13  ;;  %3527 = vmatmul.bf16.gmra.mxu1 %v3301_v20  ;;  %3934 = vmatmul.msk.bf16.vlgmr.msrb.gmra.mxu0 %vm1494_vm10, %v2033_v62  ;;  %v4338_v20 = vor.u32 %v4337_v47, %v4336_v23  ;;  %v3259_v62 = vrot.slane %v6018_v61, 1  ;;  %v2035_v13 = vrot.slane %v6669_v15, 1  ;;  %v4309_v47 = vor.u32 %v4308_v38, %v4307_v30  ;;  %v6671_v38 = vld [vmem:[#allocation28_spill] sm:$0xff] }
 0x1f2   : > { %4076 = vmatmul.msk.bf16.gmra.mxu3 %vm1494_vm10, %v3257_v57  ;;  %v3258_v57 = vrot.slane %v4526_v39, 1 }
 0x1f3   : > { %v6173_v10 = vpop.f32.mrf.mxu2  ;;  %v2034_v37 = vrot.slane %v4338_v20, 1  ;;  %v1452_v39 = vrot.slane %v4309_v47, 1 }
 0x1f4   : > { %v3260_v3 = vsel %vm1445_vm9, %v3258_v57, %v3259_v62 }
 0x1f5   : > { %v3582_v60 = vpop.f32.mrf.mxu3  ;;  %v2036_v61 = vsel %vm1445_vm9, %v2034_v37, %v2035_v13  ;;  %v4531_v37 = vld [vmem:[#allocation2 + $0x24] sm:$0xe] }
 0x1f6   : > { %v3490_v16 = vpop.f32.mrf.mxu1  ;;  %v6178_v29 = vpop.f32.mrf.mxu0 }
 0x1f7   : > { %v6176_v50 = vadd.f32 %v3579_v42, %v3490_v16  ;;  %v4528_v16 = vld [vmem:[#allocation2 + $0x24] sm:$0xe] }
 0x1f8   : > { %3999 = vmatmul.msk.bf16.gmra.mxu2 %vm1494_vm10, %v1451_v11  ;;  %v6670_v11 = vld [vmem:[#allocation27_spill] sm:$0xff]  ;;  %v4529_v9 = vor.u32 %v4528_v16, %v6671_v38  ;;  %v3678_v38 = vld [vmem:[%s4830_s27 + $0x70] sm:$0xff] }
 0x1f9   : > { %v1453_v20 = vrot.slane %v6670_v11, 1 }
 0x1fb   : > { %v6184_v55 = vpop.f32.mrf.mxu2  ;;  %v1454_v30 = vsel %vm1445_vm9, %v1452_v39, %v1453_v20 }
 0x1fd   : > { %v3584_v12 = vpop.f32.mrf.mxu3 }
 0x1fe   : > { %v3493_v42 = vpop.f32.mrf.mxu1  ;;  %v6191_v23 = vpop.f32.mrf.mxu0 }
 0x1ff   : > { %v6189_v58 = vadd.f32 %v3582_v60, %v3493_v42  ;;  %v2406_v60 = vadd.f32 %v5700_v44, %v6141_v2 }
 0x201   : > { %3532 = vmatmul.bf16.gmra.mxu1 %v3304_v36  ;;  %3935 = vmatmul.msk.bf16.gmra.mxu0 %vm1494_vm10, %v2036_v61  ;;  %v2615_v42 = vadd.f32 %v6134_v53, %v2406_v60  ;;  %v3164_v36 = vpop.permute.xlu2 %3163  ;;  %v6672_v61 = vld [vmem:[#allocation30_spill] sm:$0xff] }
 0x202   : > { %4077 = vmatmul.msk.bf16.gmra.mxu3 %vm1494_vm10, %v3260_v3  ;;  %v2037_v3 = vrot.slane %v4529_v9, 1  ;;  %v2038_v47 = vrot.slane %v6672_v61, 1  ;;  %v3307_v16 = vsel %vm1494_vm10, %v6002_v19, %v3164_v36  ;;  %v6673_v60 = vld [vmem:[#allocation26_spill] sm:$0xff]  ;;  %v4340_v36 = vld [vmem:[#allocation2 + $0x30] sm:$0xe] }
 0x203   : > { %v6197_v1 = vpop.f32.mrf.mxu2  ;;  %v2704_v39 = vadd.f32 %v5702_v35, %v2615_v42 }
 0x204   : > { %v2039_v53 = vsel %vm1445_vm9, %v2037_v3, %v2038_v47  ;;  %v2411_v47 = vadd.f32 %v5770_v25, %v6166_v63  ;;  %v4311_v25 = vld [vmem:[#allocation2 + $0x30] sm:$0xe] }
 0x205   : > { %v3587_v15 = vpop.f32.mrf.mxu3 }
 0x206   : > { %v3495_v57 = vpop.f32.mrf.mxu1  ;;  %v6203_v13 = vpop.f32.mrf.mxu0 }
 0x207   : > { %v6201_v62 = vadd.f32 %v3584_v12, %v3495_v57  ;;  %v2408_v12 = vadd.f32 %v5739_v46, %v6152_v6  ;;  %v6674_v6 = vld [vmem:[#allocation29_spill] sm:$0xff] }
 0x208   : > { %4000 = vmatmul.msk.bf16.gmra.mxu2 %vm1494_vm10, %v1454_v30  ;;  %v4532_v30 = vor.u32 %v4531_v37, %v6673_v60  ;;  %v1456_v35 = vrot.slane %v6674_v6, 1  ;;  %v2620_v60 = vadd.f32 %v6159_v54, %v2411_v47 }
 0x209   : > { %v2617_v61 = vadd.f32 %v6148_v28, %v2408_v12 }
 0x20a   : > { %v1455_v19 = vrot.slane %v4532_v30, 1  ;;  %v2709_v6 = vadd.f32 %v5760_v24, %v2620_v60 }
 0x20b   : > { %v6210_v44 = vpop.f32.mrf.mxu2  ;;  %v2706_v28 = vadd.f32 %v5730_v22, %v2617_v61  ;;  %v6675_v22 = vld [vmem:[#allocation21_spill] sm:$0xff] }
 0x20d   : > { %v3589_v11 = vpop.f32.mrf.mxu3 }
 0x20e   : > { %v3498_v2 = vpop.f32.mrf.mxu1  ;;  %v6217_v57 = vpop.f32.mrf.mxu0 }
 0x20f   : > { %v3588_v20 = vadd.f32 %v3587_v15, %v3498_v2  ;;  %v4339_v15 = vld [vmem:[#allocation2 + $0x30] sm:$0xf0] }
 0x211   : > { %v3646_v9 = vadd.f32 %v3588_v20, %v2704_v39  ;;  %3537 = vmatmul.bf16.gmra.mxu1 %v3307_v16  ;;  %3936 = vmatmul.msk.bf16.gmra.mxu0 %vm1494_vm10, %v2039_v53  ;;  %v1457_v16 = vsel %vm1445_vm9, %v1455_v19, %v1456_v35  ;;  %v4341_v39 = vor.u32 %v4340_v36, %v4339_v15  ;;  %v3679_v20 = vld [vmem:[%s4830_s27 + $0x78] sm:$0xff] }
 0x213   : > { %v3710_v46 = vadd.f32 %v3678_v38, %v3646_v9  ;;  %v6231_v37 = vpop.f32.mrf.mxu2  ;;  %v2040_v38 = vrot.slane %v4341_v39, 1  ;;  %v2041_v9 = vrot.slane %v6675_v22, 1  ;;  %v6677_v22 = vld [vmem:[#allocation32_spill] sm:$0xff] }
 0x215   : > { %v3592_v42 = vpop.f32.mrf.mxu3  ;;  %3742 = vst.msk [vmem:[%s6227_s24 + $0x70] sm:$0xff] %vm1494_vm10, %v3710_v46  ;;  %v4310_v46 = vld [vmem:[#allocation2 + $0x30] sm:$0xf0]  ;;  %v2042_v15 = vsel %vm1445_vm9, %v2040_v38, %v2041_v9 }
 0x216   : > { %v3500_v3 = vpop.f32.mrf.mxu1  ;;  %v6236_v2 = vpop.f32.mrf.mxu0  ;;  %v4312_v36 = vor.u32 %v4311_v25, %v4310_v46  ;;  %v3681_v46 = vld [vmem:[%s4830_s27 + $0x88] sm:$0xff]  ;;  %v4537_v25 = vld [vmem:[#allocation2 + $0x3c] sm:$0xe] }
 0x217   : > { %v3590_v12 = vadd.f32 %v3589_v11, %v3500_v3  ;;  %v2413_v11 = vadd.f32 %v5803_v14, %v6178_v29  ;;  %v3680_v3 = vld [vmem:[%s4830_s27 + $0x80] sm:$0xff]  ;;  %v6676_v29 = vld [vmem:[#allocation34_spill] sm:$0xff] }
 0x218   : > { %4001 = vmatmul.msk.bf16.gmra.mxu2 %vm1494_vm10, %v1457_v16  ;;  %v1458_v14 = vrot.slane %v4312_v36, 1  ;;  %v1459_v39 = vrot.slane %v6676_v29, 1 }
 0x219   : > { %v3647_v53 = vadd.f32 %v3590_v12, %v2706_v28  ;;  %v4534_v28 = vld [vmem:[#allocation2 + $0x3c] sm:$0xe]  ;;  %v2622_v12 = vadd.f32 %v6173_v10, %v2413_v11 }
 0x21a   : > { %v1460_v38 = vsel %vm1445_vm9, %v1458_v14, %v1459_v39  ;;  %v4535_v9 = vor.u32 %v4534_v28, %v6677_v22  ;;  %v3682_v14 = vld [vmem:[%s4830_s27 + $0x90] sm:$0xff] }
 0x21b   : > { %v3711_v30 = vadd.f32 %v3679_v20, %v3647_v53  ;;  %v6245_v63 = vpop.f32.mrf.mxu2  ;;  %v2711_v60 = vadd.f32 %v5781_v26, %v2622_v12  ;;  %v6679_v12 = vld [vmem:[#allocation24_spill] sm:$0xff] }
 0x21d   : > { %v3594_v61 = vpop.f32.mrf.mxu3  ;;  %3743 = vst.msk [vmem:[%s6227_s24 + $0x78] sm:$0xff] %vm1494_vm10, %v3711_v30 }
 0x21e   : > { %v3503_v19 = vpop.f32.mrf.mxu1  ;;  %v6250_v35 = vpop.f32.mrf.mxu0 }
 0x21f   : > { %v3593_v54 = vadd.f32 %v3592_v42, %v3503_v19  ;;  %v2416_v42 = vadd.f32 %v5828_v18, %v6191_v23  ;;  %v2043_v23 = vrot.slane %v4535_v9, 1 }
 0x221   : > { %v3648_v47 = vadd.f32 %v3593_v54, %v2709_v6  ;;  %3937 = vmatmul.msk.bf16.gmra.mxu0 %vm1494_vm10, %v2042_v15  ;;  %v2625_v19 = vadd.f32 %v6184_v55, %v2416_v42  ;;  %v6678_v6 = vld [vmem:[#allocation33_spill] sm:$0xff]  ;;  %v2418_v15 = vadd.f32 %v5857_v43, %v6203_v13 }
 0x222   : > { %v2044_v54 = vrot.slane %v6678_v6, 1  ;;  %v6680_v13 = vld [vmem:[#allocation25_spill] sm:$0xff] }
 0x223   : > { %v3712_v16 = vadd.f32 %v3680_v3, %v3648_v47  ;;  %v6259_v24 = vpop.f32.mrf.mxu2  ;;  %v2714_v3 = vadd.f32 %v5808_v45, %v2625_v19  ;;  %v2627_v39 = vadd.f32 %v6197_v1, %v2418_v15  ;;  %v4342_v45 = vld [vmem:[#allocation2 + $0x48] sm:$0xf0]  ;;  %v2421_v1 = vadd.f32 %v5876_v40, %v6217_v57  ;;  %v3683_v19 = vld [vmem:[%s4830_s27 + $0x98] sm:$0xff]  ;;  %v4314_v40 = vld [vmem:[#allocation2 + $0x48] sm:$0xe] }
 0x224   : > { %v2045_v47 = vsel %vm1445_vm9, %v2043_v23, %v2044_v54 }
 0x225   : > { %v3597_v20 = vpop.f32.mrf.mxu3  ;;  %3744 = vst.msk [vmem:[%s6227_s24 + $0x80] sm:$0xff] %vm1494_vm10, %v3712_v16  ;;  %v4538_v16 = vor.u32 %v4537_v25, %v6679_v12  ;;  %v2716_v22 = vadd.f32 %v5830_v31, %v2627_v39  ;;  %v2630_v23 = vadd.f32 %v6210_v44, %v2421_v1  ;;  %v6681_v31 = vld [vmem:[#allocation39_spill] sm:$0xff]  ;;  %v3684_v39 = vld [vmem:[%s4830_s27 + $0xa0] sm:$0xff] }
 0x226   : > { %v3505_v53 = vpop.f32.mrf.mxu1  ;;  %v6264_v10 = vpop.f32.mrf.mxu0  ;;  %v2047_v15 = vrot.slane %v6681_v31, 1 }
 0x227   : > { %v3595_v30 = vadd.f32 %v3594_v61, %v3505_v53  ;;  %v1461_v43 = vrot.slane %v4538_v16, 1  ;;  %v1462_v53 = vrot.slane %v6680_v13, 1 }
 0x228   : > { %4002 = vmatmul.msk.bf16.gmra.mxu2 %vm1494_vm10, %v1460_v38 }
 0x229   : > { %v3649_v11 = vadd.f32 %v3595_v30, %v2711_v60  ;;  %v1463_v25 = vsel %vm1445_vm9, %v1461_v43, %v1462_v53 }
 0x22b   : > { %v3713_v18 = vadd.f32 %v3681_v46, %v3649_v11  ;;  %v6274_v61 = vpop.f32.mrf.mxu2 }
 0x22d   : > { %v3599_v26 = vpop.f32.mrf.mxu3  ;;  %3745 = vst.msk [vmem:[%s6227_s24 + $0x88] sm:$0xff] %vm1494_vm10, %v3713_v18 }
 0x22e   : > { %v3508_v36 = vpop.f32.mrf.mxu1  ;;  %v6279_v55 = vpop.f32.mrf.mxu0 }
 0x22f   : > { %v3598_v28 = vadd.f32 %v3597_v20, %v3508_v36  ;;  %v4343_v20 = vld [vmem:[#allocation2 + $0x48] sm:$0xe] }
 0x230   : > { %v4344_v11 = vor.u32 %v4343_v20, %v4342_v45 }
 0x231   : > { %v3650_v29 = vadd.f32 %v3598_v28, %v2714_v3  ;;  %3938 = vmatmul.msk.bf16.gmra.mxu0 %vm1494_vm10, %v2045_v47  ;;  %v4313_v3 = vld [vmem:[#allocation2 + $0x48] sm:$0xf0]  ;;  %v6682_v47 = vld [vmem:[#allocation31_spill] sm:$0xff] }
 0x232   : > { %v2046_v54 = vrot.slane %v4344_v11, 1  ;;  %v2719_v12 = vadd.f32 %v6682_v47, %v2630_v23  ;;  %v6688_v47 = vld [vmem:[#allocation19_spill] sm:$0xff] }
 0x233   : > { %v3714_v42 = vadd.f32 %v3682_v14, %v3650_v29  ;;  %v6289_v30 = vpop.f32.mrf.mxu2  ;;  %v4315_v29 = vor.u32 %v4314_v40, %v4313_v3  ;;  %v6687_v40 = vld [vmem:[#allocation22_spill] sm:$0xff] }
 0x234   : > { %v2048_v14 = vsel %vm1445_vm9, %v2046_v54, %v2047_v15 }
 0x235   : > { %v3602_v60 = vpop.f32.mrf.mxu3  ;;  %3746 = vst.msk [vmem:[%s6227_s24 + $0x90] sm:$0xff] %vm1494_vm10, %v3714_v42  ;;  %v4540_v42 = vld [vmem:[#allocation2 + $0x54] sm:$0xe] }
 0x236   : > { %v3510_v38 = vpop.f32.mrf.mxu1  ;;  %v6294_v46 = vpop.f32.mrf.mxu0 }
 0x237   : > { %v3600_v9 = vadd.f32 %v3599_v26, %v3510_v38  ;;  %v2423_v26 = vadd.f32 %v5887_v7, %v6236_v2  ;;  %v1464_v7 = vrot.slane %v4315_v29, 1  ;;  %v6683_v2 = vld [vmem:[#allocation38_spill] sm:$0xff] }
 0x238   : > { %4003 = vmatmul.msk.bf16.gmra.mxu2 %vm1494_vm10, %v1463_v25  ;;  %v1465_v45 = vrot.slane %v6683_v2, 1 }
 0x239   : > { %v3651_v18 = vadd.f32 %v3600_v9, %v2716_v22  ;;  %v2632_v13 = vadd.f32 %v6231_v37, %v2423_v26  ;;  %v6684_v22 = vld [vmem:[#allocation23_spill] sm:$0xff]  ;;  %v6685_v9 = vld [vmem:[#allocation40_spill] sm:$0xff]  ;;  %v2050_v26 = vrot.slane %v6687_v40, 1 }
 0x23a   : > { %v2426_v25 = vadd.f32 %v6685_v9, %v6250_v35  ;;  %v3687_v9 = vld [vmem:[%s4830_s27 + $0xb8] sm:$0xff] }
 0x23b   : > { %v3715_v6 = vadd.f32 %v3683_v19, %v3651_v18  ;;  %v6303_v57 = vpop.f32.mrf.mxu2  ;;  %v2721_v1 = vadd.f32 %v6684_v22, %v2632_v13  ;;  %v1466_v19 = vsel %vm1445_vm9, %v1464_v7, %v1465_v45  ;;  %v6686_v18 = vld [vmem:[#allocation20_spill] sm:$0xff]  ;;  %v2431_v45 = vadd.f32 %v5922_v41, %v6279_v55  ;;  %v6691_v55 = vld [vmem:[#allocation35_spill] sm:$0xff] }
 0x23c   : > { %v4541_v23 = vor.u32 %v4540_v42, %v6686_v18  ;;  %v2635_v31 = vadd.f32 %v6245_v63, %v2426_v25  ;;  %v3686_v42 = vld [vmem:[%s4830_s27 + $0xb0] sm:$0xff]  ;;  %v2433_v41 = vadd.f32 %v5939_v51, %v6294_v46 }
 0x23d   : > { %v3604_v36 = vpop.f32.mrf.mxu3  ;;  %3747 = vst.msk [vmem:[%s6227_s24 + $0x98] sm:$0xff] %vm1494_vm10, %v3715_v6  ;;  %v3685_v6 = vld [vmem:[%s4830_s27 + $0xa8] sm:$0xff] }
 0x23e   : > { %v3513_v28 = vpop.f32.mrf.mxu1  ;;  %v6308_v16 = vpop.f32.mrf.mxu0  ;;  %v2049_v3 = vrot.slane %v4541_v23, 1 }
 0x23f   : > { %v3603_v44 = vadd.f32 %v3602_v60, %v3513_v28  ;;  %v2436_v51 = vadd.f32 %v5953_v5, %v6308_v16  ;;  %v6692_v16 = vld [vmem:[#allocation15_spill] sm:$0xff] }
 0x240   : > { %v2051_v63 = vsel %vm1445_vm9, %v2049_v3, %v2050_v26 }
 0x241   : > { %v3652_v43 = vadd.f32 %v3603_v44, %v2719_v12  ;;  %3939 = vmatmul.msk.bf16.gmra.mxu0 %vm1494_vm10, %v2048_v14  ;;  %v2428_v12 = vadd.f32 %v6688_v47, %v6264_v10  ;;  %v6689_v44 = vld [vmem:[#allocation36_spill] sm:$0xff] }
 0x242   : > { %v2724_v14 = vadd.f32 %v6689_v44, %v2635_v31  ;;  %v3689_v44 = vld [vmem:[%s4830_s27 + $0xc8] sm:$0xff] }
 0x243   : > { %v3716_v53 = vadd.f32 %v3684_v39, %v3652_v43  ;;  %v6317_v60 = vpop.f32.mrf.mxu2  ;;  %v2637_v13 = vadd.f32 %v6259_v24, %v2428_v12  ;;  %v2640_v24 = vadd.f32 %v6274_v61, %v2431_v45  ;;  %v2642_v61 = vadd.f32 %v6289_v30, %v2433_v41 }
 0x244   : > { %v2645_v30 = vadd.f32 %v6303_v57, %v2436_v51  ;;  %v6693_v57 = vld [vmem:[#allocation42_spill] sm:$0xff] }
 0x245   : > { %v3607_v20 = vpop.f32.mrf.mxu3  ;;  %3748 = vst.msk [vmem:[%s6227_s24 + $0xa0] sm:$0xff] %vm1494_vm10, %v3716_v53  ;;  %v2731_v46 = vadd.f32 %v5918_v27, %v2642_v61 }
 0x246   : > { %v3515_v38 = vpop.f32.mrf.mxu1  ;;  %v6322_v37 = vpop.f32.mrf.mxu0  ;;  %v2734_v27 = vadd.f32 %v6692_v16, %v2645_v30 }
 0x247   : > { %v3605_v11 = vadd.f32 %v3604_v36, %v3515_v38  ;;  %v2438_v5 = vadd.f32 %v5967_v33, %v6322_v37 }
 0x248   : > { %4004 = vmatmul.msk.bf16.gmra.mxu2 %vm1494_vm10, %v1466_v19 }
 0x249   : > { %v3653_v54 = vadd.f32 %v3605_v11, %v2721_v1 }
 0x24b   : > { %v3717_v15 = vadd.f32 %v3685_v6, %v3653_v54  ;;  %v6332_v36 = vpop.f32.mrf.mxu2  ;;  %v2729_v6 = vadd.f32 %v6691_v55, %v2640_v24 }
 0x24d   : > { %v3609_v35 = vpop.f32.mrf.mxu3  ;;  %3749 = vst.msk [vmem:[%s6227_s24 + $0xa8] sm:$0xff] %vm1494_vm10, %v3717_v15  ;;  %v3688_v15 = vld [vmem:[%s4830_s27 + $0xc0] sm:$0xff] }
 0x24e   : > { %v3518_v28 = vpop.f32.mrf.mxu1  ;;  %v6337_v39 = vpop.f32.mrf.mxu0 }
 0x24f   : > { %v3608_v29 = vadd.f32 %v3607_v20, %v3518_v28  ;;  %v6690_v20 = vld [vmem:[#allocation37_spill] sm:$0xff] }
 0x250   : > { %v2726_v38 = vadd.f32 %v6690_v20, %v2637_v13 }
 0x251   : > { %v3654_v43 = vadd.f32 %v3608_v29, %v2724_v14  ;;  %3940 = vmatmul.msk.bf16.gmra.mxu0 %vm1494_vm10, %v2051_v63 }
 0x253   : > { %v3718_v53 = vadd.f32 %v3686_v42, %v3654_v43  ;;  %v6345_v10 = vpop.f32.mrf.mxu2 }
 0x255   : > { %v3612_v7 = vpop.f32.mrf.mxu3  ;;  %3750 = vst.msk [vmem:[%s6227_s24 + $0xb0] sm:$0xff] %vm1494_vm10, %v3718_v53 }
 0x256   : > { %v3520_v2 = vpop.f32.mrf.mxu1  ;;  %v6350_v1 = vpop.f32.mrf.mxu0 }
 0x257   : > { %v3610_v22 = vadd.f32 %v3609_v35, %v3520_v2 }
 0x259   : > { %v3655_v25 = vadd.f32 %v3610_v22, %v2726_v38  ;;  %v2647_v38 = vadd.f32 %v6317_v60, %v2438_v5 }
 0x25b   : > { %v3719_v11 = vadd.f32 %v3687_v9, %v3655_v25  ;;  %v6356_v18 = vpop.f32.mrf.mxu2  ;;  %v3664_v25 = vld [vmem:[%s4830_s27] sm:$0xff] }
 0x25d   : > { %v3614_v19 = vpop.f32.mrf.mxu3  ;;  %3751 = vst.msk [vmem:[%s6227_s24 + $0xb8] sm:$0xff] %vm1494_vm10, %v3719_v11 }
 0x25e   : > { %v3523_v23 = vpop.f32.mrf.mxu1  ;;  %v6361_v31 = vpop.f32.mrf.mxu0 }
 0x25f   : > { %v3613_v54 = vadd.f32 %v3612_v7, %v3523_v23  ;;  %v3690_v7 = vld [vmem:[%s4830_s27 + $0xd0] sm:$0xff] }
 0x261   : > { %v3656_v3 = vadd.f32 %v3613_v54, %v2729_v6  ;;  %v3691_v6 = vld [vmem:[%s4830_s27 + $0xd8] sm:$0xff]  ;;  %v6695_v54 = vld [vmem:[#allocation46_spill] sm:$0xff] }
 0x263   : > { %v3720_v40 = vadd.f32 %v3688_v15, %v3656_v3  ;;  %v6367_v35 = vpop.f32.mrf.mxu2 }
 0x265   : > { %v3617_v26 = vpop.f32.mrf.mxu3  ;;  %3752 = vst.msk [vmem:[%s6227_s24 + $0xc0] sm:$0xff] %vm1494_vm10, %v3720_v40 }
 0x266   : > { %v3525_v28 = vpop.f32.mrf.mxu1  ;;  %v6372_v12 = vpop.f32.mrf.mxu0 }
 0x267   : > { %v3615_v47 = vadd.f32 %v3614_v19, %v3525_v28  ;;  %v6694_v19 = vld [vmem:[#allocation44_spill] sm:$0xff] }
 0x268   : > { %v2736_v23 = vadd.f32 %v6694_v19, %v2647_v38  ;;  %v6701_v38 = vld [vmem:[#allocation56_spill] sm:$0xff] }
 0x269   : > { %v3657_v14 = vadd.f32 %v3615_v47, %v2731_v46  ;;  %v6697_v47 = vld [vmem:[#allocation52_spill] sm:$0xff] }
 0x26b   : > { %v3721_v29 = vadd.f32 %v3689_v44, %v3657_v14  ;;  %v2668_v42 = vpop.f32.mrf.mxu2  ;;  %v2443_v44 = vadd.f32 %v6697_v47, %v6350_v1  ;;  %v6698_v14 = vld [vmem:[#allocation41_spill] sm:$0xff] }
 0x26d   : > { %v3619_v63 = vpop.f32.mrf.mxu3  ;;  %3753 = vst.msk [vmem:[%s6227_s24 + $0xc8] sm:$0xff] %vm1494_vm10, %v3721_v29 }
 0x26e   : > { %v3528_v43 = vpop.f32.mrf.mxu1  ;;  %v2370_v53 = vpop.f32.mrf.mxu0 }
 0x26f   : > { %v3618_v13 = vadd.f32 %v3617_v26, %v3528_v43  ;;  %v2371_v2 = vadd.f32 %v2370_v53, %v5958_v0  ;;  %v2441_v0 = vadd.f32 %v5981_v59, %v6337_v39  ;;  %v3665_v59 = vld [vmem:[%s4830_s27 + $0x8] sm:$0xff]  ;;  %v2652_v53 = vadd.f32 %v6345_v10, %v2443_v44  ;;  %v6708_v44 = vld [vmem:[#allocation51_spill] sm:$0xff] }
 0x270   : > { %v6699_v43 = vld [vmem:[#allocation49_spill] sm:$0xff] }
 0x271   : > { %v3658_v45 = vadd.f32 %v3618_v13, %v2734_v27  ;;  %v2580_v20 = vadd.f32 %v6693_v57, %v2371_v2  ;;  %v2650_v40 = vadd.f32 %v6332_v36, %v2441_v0  ;;  %v3666_v2 = vld [vmem:[%s4830_s27 + $0x10] sm:$0xff] }
 0x273   : > { %v3722_v22 = vadd.f32 %v3690_v7, %v3658_v45  ;;  %v2669_v9 = vadd.f32 %v2668_v42, %v2580_v20  ;;  %v2670_v33 = vpop.f32.mrf.mxu2  ;;  %v2739_v30 = vadd.f32 %v6698_v14, %v2650_v40  ;;  %v3692_v42 = vld [vmem:[%s4830_s27 + $0xe0] sm:$0xff]  ;;  %v6706_v40 = vld [vmem:[#allocation50_spill] sm:$0xff] }
 0x275   : > { %3754 = vst.msk [vmem:[%s6227_s24 + $0xd0] sm:$0xff] %vm1494_vm10, %v3722_v22  ;;  %v3632_v37 = vadd.f32 %v6047_v34, %v2669_v9  ;;  %v3622_v11 = vpop.f32.mrf.mxu3  ;;  %v6696_v34 = vld [vmem:[#allocation43_spill] sm:$0xff]  ;;  %v2446_v22 = vadd.f32 %v6701_v38, %v6361_v31 }
 0x276   : > { %v3530_v24 = vpop.f32.mrf.mxu1  ;;  %v2372_v60 = vpop.f32.mrf.mxu0  ;;  %v6702_v9 = vld [vmem:[#allocation47_spill] sm:$0xff] }
 0x277   : > { %v3620_v41 = vadd.f32 %v3619_v63, %v3530_v24  ;;  %v3696_v55 = vadd.f32 %v3664_v25, %v3632_v37  ;;  %v2373_v15 = vadd.f32 %v2372_v60, %v6695_v54  ;;  %v2741_v25 = vadd.f32 %v6702_v9, %v2652_v53  ;;  %v3693_v24 = vld [vmem:[%s4830_s27 + $0xe8] sm:$0xff]  ;;  %v6710_v53 = vld [vmem:[#allocation60_spill] sm:$0xff] }
 0x278   : > { %v2655_v60 = vadd.f32 %v6356_v18, %v2446_v22 }
 0x279   : > { %v3659_v3 = vadd.f32 %v3620_v41, %v2736_v23  ;;  %3728 = vst.msk [vmem:[%s6227_s24] sm:$0xff] %vm1494_vm10, %v3696_v55  ;;  %v2582_v61 = vadd.f32 %v6696_v34, %v2373_v15  ;;  %v6704_v23 = vld [vmem:[#allocation48_spill] sm:$0xff]  ;;  %v6705_v34 = vld [vmem:[#allocation59_spill] sm:$0xff] }
 0x27b   : > { %v3723_v26 = vadd.f32 %v3691_v6, %v3659_v3  ;;  %v2671_v28 = vadd.f32 %v2670_v33, %v2582_v61  ;;  %v2673_v39 = vpop.f32.mrf.mxu2  ;;  %v3667_v6 = vld [vmem:[%s4830_s27 + $0x18] sm:$0xff]  ;;  %v2448_v61 = vadd.f32 %v6705_v34, %v6372_v12 }
 0x27d   : > { %3755 = vst.msk [vmem:[%s6227_s24 + $0xd8] sm:$0xff] %vm1494_vm10, %v3723_v26  ;;  %v3633_v51 = vadd.f32 %v6058_v4, %v2671_v28  ;;  %v3624_v16 = vpop.f32.mrf.mxu3  ;;  %v6700_v4 = vld [vmem:[#allocation45_spill] sm:$0xff]  ;;  %v2744_v26 = vadd.f32 %v6706_v40, %v2655_v60  ;;  %v2657_v14 = vadd.f32 %v6367_v35, %v2448_v61  ;;  %v3695_v35 = vld [vmem:[%s4830_s27 + $0xf8] sm:$0xff] }
 0x27e   : > { %v3533_v46 = vpop.f32.mrf.mxu1  ;;  %v2375_v63 = vpop.f32.mrf.mxu0  ;;  %v6714_v60 = vld [vmem:[#allocation61_spill] sm:$0xff]  ;;  %v6715_v61 = vld [vmem:[#allocation63_spill] sm:$0xff] }
 0x27f   : > { %v3623_v29 = vadd.f32 %v3622_v11, %v3533_v46  ;;  %v3697_v36 = vadd.f32 %v3665_v59, %v3633_v51  ;;  %v2376_v5 = vadd.f32 %v2375_v63, %v6699_v43  ;;  %v6703_v11 = vld [vmem:[#allocation53_spill] sm:$0xff]  ;;  %v3668_v63 = vld [vmem:[%s4830_s27 + $0x20] sm:$0xff] }
 0x280   : > { %v6707_v51 = vld [vmem:[#allocation57_spill] sm:$0xff] }
 0x281   : > { %v3660_v27 = vadd.f32 %v3623_v29, %v2739_v30  ;;  %3729 = vst.msk [vmem:[%s6227_s24 + $0x8] sm:$0xff] %vm1494_vm10, %v3697_v36  ;;  %v2585_v13 = vadd.f32 %v6700_v4, %v2376_v5  ;;  %v6709_v5 = vld [vmem:[#allocation54_spill] sm:$0xff] }
 0x283   : > { %v3724_v7 = vadd.f32 %v3692_v42, %v3660_v27  ;;  %v2674_v1 = vadd.f32 %v2673_v39, %v2585_v13  ;;  %v2675_v45 = vpop.f32.mrf.mxu2  ;;  %v3694_v39 = vld [vmem:[%s4830_s27 + $0xf0] sm:$0xff] }
 0x285   : > { %3756 = vst.msk [vmem:[%s6227_s24 + $0xe0] sm:$0xff] %vm1494_vm10, %v3724_v7  ;;  %v3634_v57 = vadd.f32 %v6069_v52, %v2674_v1  ;;  %v3627_v41 = vpop.f32.mrf.mxu3 }
 0x286   : > { %v3535_v20 = vpop.f32.mrf.mxu1  ;;  %v2377_v37 = vpop.f32.mrf.mxu0 }
 0x287   : > { %v3625_v33 = vadd.f32 %v3624_v16, %v3535_v20  ;;  %v3698_v10 = vadd.f32 %v3666_v2, %v3634_v57  ;;  %v2378_v0 = vadd.f32 %v2377_v37, %v6703_v11  ;;  %v2746_v16 = vadd.f32 %v6709_v5, %v2657_v14  ;;  %v6711_v2 = vld [vmem:[#allocation55_spill] sm:$0xff] }
 0x289   : > { %v3661_v19 = vadd.f32 %v3625_v33, %v2741_v25  ;;  %3730 = vst.msk [vmem:[%s6227_s24 + $0x10] sm:$0xff] %vm1494_vm10, %v3698_v10  ;;  %v2587_v52 = vadd.f32 %v6704_v23, %v2378_v0  ;;  %v6712_v33 = vld [vmem:[#allocation62_spill] sm:$0xff] }
 0x28a   : > { %v6713_v10 = vld [vmem:[#allocation58_spill] sm:$0xff] }
 0x28b   : > { %v3725_v55 = vadd.f32 %v3693_v24, %v3661_v19  ;;  %v2676_v31 = vadd.f32 %v2675_v45, %v2587_v52  ;;  %v2678_v54 = vpop.f32.mrf.mxu2  ;;  %v3670_v0 = vld [vmem:[%s4830_s27 + $0x30] sm:$0xff] }
 0x28d   : > { %3757 = vst.msk [vmem:[%s6227_s24 + $0xe8] sm:$0xff] %vm1494_vm10, %v3725_v55  ;;  %v3635_v15 = vadd.f32 %v6081_v8, %v2676_v31  ;;  %v3629_v12 = vpop.f32.mrf.mxu3 }
 0x28e   : > { %v3538_v3 = vpop.f32.mrf.mxu1  ;;  %v2380_v59 = vpop.f32.mrf.mxu0 }
 0x28f   : > { %v3628_v28 = vadd.f32 %v3627_v41, %v3538_v3  ;;  %v3699_v18 = vadd.f32 %v3667_v6, %v3635_v15  ;;  %v2381_v46 = vadd.f32 %v2380_v59, %v6707_v51  ;;  %v3671_v6 = vld [vmem:[%s4830_s27 + $0x38] sm:$0xff]  ;;  %v6716_v59 = vld [vmem:[#allocation74_spill] sm:$0xff] }
 0x291   : > { %v3662_v47 = vadd.f32 %v3628_v28, %v2744_v26  ;;  %3731 = vst.msk [vmem:[%s6227_s24 + $0x18] sm:$0xff] %vm1494_vm10, %v3699_v18  ;;  %v2590_v8 = vadd.f32 %v6708_v44, %v2381_v46  ;;  %v3672_v26 = vld [vmem:[%s4830_s27 + $0x40] sm:$0xff]  ;;  %v6717_v46 = vld [vmem:[#allocation65_spill] sm:$0xff] }
 0x293   : > { %v3726_v30 = vadd.f32 %v3694_v39, %v3662_v47  ;;  %v2679_v29 = vadd.f32 %v2678_v54, %v2590_v8  ;;  %v2680_v36 = vpop.f32.mrf.mxu2  ;;  %v6718_v47 = vld [vmem:[#allocation64_spill] sm:$0xff]  ;;  %v3673_v8 = vld [vmem:[%s4830_s27 + $0x48] sm:$0xff] }
 0x295   : > { %3758 = vst.msk [vmem:[%s6227_s24 + $0xf0] sm:$0xff] %vm1494_vm10, %v3726_v30  ;;  %v3636_v42 = vadd.f32 %v6094_v32, %v2679_v29  ;;  %v3669_v32 = vld [vmem:[%s4830_s27 + $0x28] sm:$0xff]  ;;  %v6719_v30 = vld [vmem:[#allocation12_spill] sm:$0xff] }
 0x296   : > { %v3540_v43 = vpop.f32.mrf.mxu1  ;;  %v2382_v4 = vpop.f32.mrf.mxu0 }
 0x297   : > { %v3630_v27 = vadd.f32 %v3629_v12, %v3540_v43  ;;  %v3700_v13 = vadd.f32 %v3668_v63, %v3636_v42  ;;  %v2383_v7 = vadd.f32 %v2382_v4, %v6710_v53  ;;  %v6721_v43 = vld [vmem:[#allocation66_spill] sm:$0xff]  ;;  %v6722_v4 = vld [vmem:[#allocation13_spill] sm:$0xff] }
 0x299   : > { %v3663_v1 = vadd.f32 %v3630_v27, %v2746_v16  ;;  %3732 = vst.msk [vmem:[%s6227_s24 + $0x20] sm:$0xff] %vm1494_vm10, %v3700_v13  ;;  %v2592_v45 = vadd.f32 %v6711_v2, %v2383_v7  ;;  %v3674_v27 = vld [vmem:[%s4830_s27 + $0x50] sm:$0xff] }
 0x29b   : > { %v3727_v57 = vadd.f32 %v3695_v35, %v3663_v1  ;;  %v2681_v20 = vadd.f32 %v2680_v36, %v2592_v45  ;;  %v2683_v38 = vpop.f32.mrf.mxu2  ;;  %v6720_v36 = vld [vmem:[#allocation67_spill] sm:$0xff]  ;;  %v6723_v1 = vld [vmem:[#allocation69_spill] sm:$0xff]  ;;  %v6724_v45 = vld [vmem:[#allocation68_spill] sm:$0xff] }
 0x29d   : > { %3759 = vst.msk [vmem:[%s6227_s24 + $0xf8] sm:$0xff] %vm1494_vm10, %v3727_v57  ;;  %v3637_v22 = vadd.f32 %v6103_v21, %v2681_v20 }
 0x29e   : > { %v2385_v9 = vpop.f32.mrf.mxu0 }
 0x29f   : > { %v3701_v25 = vadd.f32 %v3669_v32, %v3637_v22  ;;  %v2386_v37 = vadd.f32 %v2385_v9, %v6712_v33  ;;  %v3675_v32 = vld [vmem:[%s4830_s27 + $0x58] sm:$0xff] }
 0x2a1   : > { %3733 = vst.msk [vmem:[%s6227_s24 + $0x28] sm:$0xff] %vm1494_vm10, %v3701_v25  ;;  %v2595_v24 = vadd.f32 %v6713_v10, %v2386_v37  ;;  %v6725_v25 = vld [vmem:[#allocation71_spill] sm:$0xff]  ;;  %v6726_v10 = vld [vmem:[#allocation70_spill] sm:$0xff] }
 0x2a3   : > { %v2684_v11 = vadd.f32 %v2683_v38, %v2595_v24  ;;  %v2685_v19 = vpop.f32.mrf.mxu2 }
 0x2a5   : > { %v3638_v23 = vadd.f32 %v6116_v56, %v2684_v11 }
 0x2a6   : > { %v2387_v52 = vpop.f32.mrf.mxu0 }
 0x2a7   : > { %v3702_v41 = vadd.f32 %v3670_v0, %v3638_v23  ;;  %v2388_v21 = vadd.f32 %v2387_v52, %v6060_v17  ;;  %v3676_v0 = vld [vmem:[%s4830_s27 + $0x60] sm:$0xff]  ;;  %v6727_v52 = vld [vmem:[#allocation73_spill] sm:$0xff] }
 0x2a9   : > { %3734 = vst.msk [vmem:[%s6227_s24 + $0x30] sm:$0xff] %vm1494_vm10, %v3702_v41  ;;  %v2597_v55 = vadd.f32 %v6714_v60, %v2388_v21  ;;  %v6728_v21 = vld [vmem:[#allocation72_spill] sm:$0xff] }
 0x2ab   : > { %v2686_v31 = vadd.f32 %v2685_v19, %v2597_v55  ;;  %v2688_v54 = vpop.f32.mrf.mxu2 }
 0x2ad   : > { %v3639_v15 = vadd.f32 %v6126_v49, %v2686_v31 }
 0x2ae   : > { %v2390_v3 = vpop.f32.mrf.mxu0 }
 0x2af   : > { %v3703_v34 = vadd.f32 %v3671_v6, %v3639_v15  ;;  %v2391_v56 = vadd.f32 %v2390_v3, %v6071_v48 }
 0x2b1   : > { %3735 = vst.msk [vmem:[%s6227_s24 + $0x38] sm:$0xff] %vm1494_vm10, %v3703_v34  ;;  %v2600_v40 = vadd.f32 %v6715_v61, %v2391_v56 }
 0x2b3   : > { %v2689_v17 = vadd.f32 %v2688_v54, %v2600_v40  ;;  %v2690_v28 = vpop.f32.mrf.mxu2 }
 0x2b5   : > { %v3640_v18 = vadd.f32 %v6716_v59, %v2689_v17 }
 0x2b6   : > { %v2392_v39 = vpop.f32.mrf.mxu0 }
 0x2b7   : > { %v3704_v51 = vadd.f32 %v3672_v26, %v3640_v18  ;;  %v2393_v49 = vadd.f32 %v2392_v39, %v6717_v46 }
 0x2b9   : > { %3736 = vst.msk [vmem:[%s6227_s24 + $0x40] sm:$0xff] %vm1494_vm10, %v3704_v51  ;;  %v2602_v44 = vadd.f32 %v6718_v47, %v2393_v49 }
 0x2bb   : > { %v2691_v48 = vadd.f32 %v2690_v28, %v2602_v44  ;;  %v2693_v14 = vpop.f32.mrf.mxu2 }
 0x2bd   : > { %v3641_v29 = vadd.f32 %v6719_v30, %v2691_v48 }
 0x2be   : > { %v2395_v12 = vpop.f32.mrf.mxu0 }
 0x2bf   : > { %v3705_v63 = vadd.f32 %v3673_v8, %v3641_v29  ;;  %v2396_v42 = vadd.f32 %v2395_v12, %v6720_v36 }
 0x2c1   : > { %3737 = vst.msk [vmem:[%s6227_s24 + $0x48] sm:$0xff] %vm1494_vm10, %v3705_v63  ;;  %v2605_v5 = vadd.f32 %v6721_v43, %v2396_v42 }
 0x2c3   : > { %v2694_v16 = vadd.f32 %v2693_v14, %v2605_v5  ;;  %v2695_v35 = vpop.f32.mrf.mxu2 }
 0x2c5   : > { %v3642_v13 = vadd.f32 %v6722_v4, %v2694_v16 }
 0x2c6   : > { %v2397_v53 = vpop.f32.mrf.mxu0 }
 0x2c7   : > { %v3706_v7 = vadd.f32 %v3674_v27, %v3642_v13  ;;  %v2398_v2 = vadd.f32 %v2397_v53, %v6723_v1 }
 0x2c9   : > { %3738 = vst.msk [vmem:[%s6227_s24 + $0x50] sm:$0xff] %vm1494_vm10, %v3706_v7  ;;  %v2607_v57 = vadd.f32 %v6724_v45, %v2398_v2 }
 0x2cb   : > { %v2696_v20 = vadd.f32 %v2695_v35, %v2607_v57  ;;  %v2698_v37 = vpop.f32.mrf.mxu2 }
 0x2cd   : > { %v3643_v38 = vadd.f32 %v6176_v50, %v2696_v20 }
 0x2ce   : > { %v2400_v22 = vpop.f32.mrf.mxu0 }
 0x2cf   : > { %v3707_v9 = vadd.f32 %v3675_v32, %v3643_v38  ;;  %v2401_v33 = vadd.f32 %v2400_v22, %v6725_v25 }
 0x2d1   : > { %3739 = vst.msk [vmem:[%s6227_s24 + $0x58] sm:$0xff] %vm1494_vm10, %v3707_v9  ;;  %v2610_v24 = vadd.f32 %v6726_v10, %v2401_v33 }
 0x2d3   : > { %v2699_v11 = vadd.f32 %v2698_v37, %v2610_v24  ;;  %v2700_v55 = vpop.f32.mrf.mxu2 }
 0x2d5   : > { %v3644_v19 = vadd.f32 %v6189_v58, %v2699_v11  ;;  %v3677_v58 = vld [vmem:[%s4830_s27 + $0x68] sm:$0xff] }
 0x2d6   : > { %v2402_v23 = vpop.f32.mrf.mxu0 }
 0x2d7   : > { %v3708_v50 = vadd.f32 %v3676_v0, %v3644_v19  ;;  %v2403_v41 = vadd.f32 %v2402_v23, %v6727_v52 }
 0x2d9   : > { %3740 = vst.msk [vmem:[%s6227_s24 + $0x60] sm:$0xff] %vm1494_vm10, %v3708_v50  ;;  %v2612_v60 = vadd.f32 %v6728_v21, %v2403_v41 }
 0x2db   : > { %v2701_v31 = vadd.f32 %v2700_v55, %v2612_v60 }
 0x2dd   : > { %v3645_v6 = vadd.f32 %v6201_v62, %v2701_v31 }
 0x2df   : > { %v3709_v54 = vadd.f32 %v3677_v58, %v3645_v6 }
 0x2e1   : > { %3741 = vst.msk [vmem:[%s6227_s24 + $0x68] sm:$0xff] %vm1494_vm10, %v3709_v54 }
 0x2e2   : > { %4629 = shalt.err (!%p4626_p12)
}
 0x2e3   : > { %s4693_s28 = smov 128   ;;  %s4694_s29 = smov 8  }
 0x2e4   : > { %4405 = dma.vmem_to_hbm [thread:$0]  (%p4792_p7), %s3774_s11, 4096, %s3776_s15, %s3761_s22, %s4693_s28, %s4693_s28, %s4694_s29  }
 0x2e5 PF: > { %s3790_s24 = sand.u32 1, %s4672_s18   ;;  %p6729_p13 = scmp.ge.s32.totalorder %s4684_s21, 2 }
 0x2e6   : > { %s3791_s9 = scalar_lea.sflag [#allocation5], %s3790_s24 }
 0x2e7   : > { %p4416_p0 = pnand %p6729_p13, %p4760_p6 }
 0x2e9   : > { %p4417_p3 = pneg %p4416_p0 }
 0x2eb   : > { %4655 = dma.done.wait (%p4417_p3), %s3791_s9, 4096  }
 0x2ec   : > { %4657 = vsyncadd (%p4417_p3), %s3791_s9, 4294963200  ;;  %p19_p5 = scmp.ge.s32.totalorder %s4778_s7, 4   ;;  %s6730_s18 = smov %s4676_s19 }
 0x2ed   : > { %s6731_s19 = smov %s4680_s20  ;;  %s6732_s20 = smov %s4788_s12 }
 0x2ee   : > { %s6733_s21 = smov %s4778_s7  ;;  %21 = sbr.rel (!%p19_p5) target bundleno = 6 (0x6), region = 97 }
 0x2f3   :  { %3797 = vsyncpa [#allocation4], 1 }
 0x2f4   :  { %3799 = vsyncpa [#allocation4 + $0x1], 1 }
 0x2f5   :  { %3800 = vsyncpa [#allocation7], 1 }
 0x2f6   :  { %3802 = vsyncpa [#allocation7 + $0x1], 1 }
 0x2f7   :  { %3803 = vsyncpa [#allocation5], 1 }
 0x2f8   :  { %3805 = vsyncpa [#allocation5 + $0x1], 1 }

</bundles_post_ra>
